<compile_context>
chip_gen: v7x
topology: tpu7x:2x2x1
jax: 0.10.0
libtpu: 0.0.40
codegen_flags: <defaults>
</compile_context>

<pallas_src>
import jax
import jax.numpy as jnp
import numpy as np
from jax import lax
from jax.experimental import pallas as pl
from jax.experimental.pallas import tpu as pltpu

EPS = 1e-5
_VMEM_LIMIT = 48 * 1024 * 1024     # < 64 MiB physical on v7x, plenty on v5e/v6e


def _pick_tile(n, target):
    """Largest divisor of n <= target (prefer multiples of 16, then 8)."""
    if n <= target:
        return n
    best = {16: 0, 8: 0, 1: 1}
    for d in range(1, target + 1):
        if n % d == 0:
            best[1] = d
            if d % 8 == 0:
                best[8] = d
            if d % 16 == 0:
                best[16] = d
    return best[16] or best[8] or best[1]


def _pick_row_tile(Ho, Wo, target_rows):
    """Divisor TH of Ho with TH*Wo ~ target_rows and TH*Wo sublane-aligned."""
    target_th = max(1, min(Ho, target_rows // max(Wo, 1)))
    for align in (16, 8, 1):
        divs = [d for d in range(1, Ho + 1)
                if Ho % d == 0 and (d * Wo) % align == 0]
        if divs:
            le = [d for d in divs if d <= target_th]
            return max(le) if le else min(divs)
    return Ho


# ---------------------------------------------------------------------------
# Stage 1: ConvTranspose2d(Cin, Cout, k=2, s=2) as a tiled matmul.
# Output is "tap-packed" (M, 4*Cout); the 2x2 spatial interleave is a cheap
# XLA rearrange outside the kernel.
# ---------------------------------------------------------------------------
def _deconv_kernel(x_ref, w_ref, b_ref, o_ref):
    y = jnp.dot(x_ref[...], w_ref[...], preferred_element_type=jnp.float32)
    o_ref[...] = (y + b_ref[...]).astype(o_ref.dtype)


def _deconv(x_flat, w, b):
    M, Cin = x_flat.shape
    Kout = w.shape[1]
    row_target = max(256, min(4096, (1 << 19) // max(Kout, 1)))
    TM = _pick_tile(M, row_target)
    return pl.pallas_call(
        _deconv_kernel,
        out_shape=jax.ShapeDtypeStruct((M, Kout), jnp.bfloat16),
        grid=(M // TM,),
        in_specs=[pl.BlockSpec((TM, Cin), lambda i: (i, 0)),
                  pl.BlockSpec((Cin, Kout), lambda i: (0, 0)),
                  pl.BlockSpec((1, Kout), lambda i: (0, 0))],
        out_specs=pl.BlockSpec((TM, Kout), lambda i: (i, 0)),
        compiler_params=pltpu.CompilerParams(
            dimension_semantics=("parallel",),
            vmem_limit_bytes=_VMEM_LIMIT),
    )(x_flat, w, b)


# ---------------------------------------------------------------------------
# Pass A: 3x3 conv (pad=1, no bias) over concat(srcs) channels, with the
# zero-padded halo tile assembled in a VMEM scratch (no HBM padding, minimal
# halo fetch), optional fused input affine+ReLU (previous layer's BN), bf16
# output and per-tile BN sum/sumsq partials.
# ---------------------------------------------------------------------------
def _make_conv_stats_kernel(n_src, TH, Wo, Co, hb, fuse_affine):
    nargs = 6 if fuse_affine else 4

    def kernel(*refs):
        ins = refs[:n_src * nargs]
        y_ref = refs[n_src * nargs]
        ps_ref = refs[n_src * nargs + 1]
        pads = refs[n_src * nargs + 2:]
        i = pl.program_id(1)

        acc = None
        for s in range(n_src):
            base = s * nargs
            m_ref = ins[base]            # (1, TH, Wo, cs)   this tile's rows
            t_ref = ins[base + 1]        # (1, 1,  Wo, cs)   row above (clamped)
            b_ref = ins[base + 2]        # (1, 1,  Wo, cs)   row below (clamped)
            w_ref = ins[base + 3]        # (9, cs, Co)       resident weights
            xp = pads[s]                 # (TH+2, Wo+2, cs)  f32 scratch
            cs = m_ref.shape[-1]

            if fuse_affine:
                sc = ins[base + 4][...]  # (1, 1, cs) f32
                sh = ins[base + 5][...]

                def act(v, sc=sc, sh=sh):
                    return jnp.maximum(v.astype(jnp.float32) * sc + sh, 0.0)
            else:
                def act(v):
                    return v.astype(jnp.float32)

            # Assemble the zero-padded tile in VMEM.  Borders (1-px conv halo
            # and image edges) stay exactly zero because the (fused-BN)
            # activation is applied before data is placed inside.
            xp[...] = jnp.zeros((TH + 2, Wo + 2, cs), jnp.float32)
            xp[1:TH + 1, 1:Wo + 1, :] = act(m_ref[0])

            @pl.when(i > 0)
            def _():
                xp[0:1, 1:Wo + 1, :] = act(t_ref[0])

            @pl.when(i < hb - 1)
            def _():
                xp[TH + 1:TH + 2, 1:Wo + 1, :] = act(b_ref[0])

            # TODO(synk): merge the 9 taps into one K=9*cs im2col dot for better
            # MXU fill on v6e/v7x (needs a lane-offset im2col scratch build).
            for kh in range(3):
                for kw in range(3):
                    patch = xp[kh:kh + TH, kw:kw + Wo, :]
                    patch = patch.reshape(TH * Wo, cs).astype(jnp.bfloat16)
                    c = jnp.dot(patch, w_ref[kh * 3 + kw],
                                preferred_element_type=jnp.float32)
                    acc = c if acc is None else acc + c

        y_ref[...] = acc.astype(y_ref.dtype)                   # bf16 writeback
        s1 = jnp.sum(acc, axis=0, keepdims=True)               # (1, Co) f32
        s2 = jnp.sum(acc * acc, axis=0, keepdims=True)
        ps_ref[...] = jnp.concatenate([s1, s2], axis=0).reshape(1, 2, Co)

    return kernel


def _conv3x3_stats(srcs, wts, affines=None):
    """3x3 conv over concat(srcs) channels; returns pre-BN output + BN partials.

    If `affines` is given (one (scale, shift) pair per source, each (1,1,Cs)
    f32), y*scale+shift followed by ReLU is applied to each loaded tile in VMEM
    first — i.e. the previous layer's BatchNorm+ReLU is fused into this conv.
    """
    N, Ho, Wo, _ = srcs[0].shape
    Co = wts[0].shape[-1]
    row_target = max(256, min(4096, (1 << 18) // max(Co, 1)))
    TH = _pick_row_tile(Ho, Wo, row_target)
    HB = Ho // TH
    M = N * Ho * Wo
    fuse = affines is not None

    in_specs, args = [], []
    for idx, (src, w) in enumerate(zip(srcs, wts)):
        Cs = src.shape[-1]
        in_specs += [
            # this tile's rows
            pl.BlockSpec((1, TH, Wo, Cs), lambda n, i: (n, i, 0, 0)),
            # single-row halos above / below (clamped at the image edges; the
            # kernel masks them out there, so no over-fetch and no OOB)
            pl.BlockSpec((1, 1, Wo, Cs),
                         lambda n, i: (n, jnp.maximum(i * TH - 1, 0), 0, 0)),
            pl.BlockSpec((1, 1, Wo, Cs),
                         lambda n, i: (n, jnp.minimum(i * TH + TH, Ho - 1), 0, 0)),
            # resident weights
            pl.BlockSpec((9, Cs, Co), lambda n, i: (0, 0, 0)),
        ]
        args += [src, src, src, w]
        if fuse:
            sc, sh = affines[idx]
            in_specs += [pl.BlockSpec((1, 1, Cs), lambda n, i: (0, 0, 0)),
                         pl.BlockSpec((1, 1, Cs), lambda n, i: (0, 0, 0))]
            args += [sc, sh]

    flops = 2 * M * Co * sum(9 * s.shape[-1] for s in srcs)
    bytes_accessed = int(sum(s.size * s.dtype.itemsize for s in srcs)
                         + sum(w.size * w.dtype.itemsize for w in wts)
                         + M * Co * 2 + N * HB * 2 * Co * 4)

    y, ps = pl.pallas_call(
        _make_conv_stats_kernel(len(srcs), TH, Wo, Co, HB, fuse),
        out_shape=(jax.ShapeDtypeStruct((M, Co), jnp.bfloat16),
                   jax.ShapeDtypeStruct((N * HB, 2, Co), jnp.float32)),
        grid=(N, HB),
        in_specs=in_specs,
        out_specs=(pl.BlockSpec((TH * Wo, Co), lambda n, i: (n * HB + i, 0)),
                   pl.BlockSpec((1, 2, Co), lambda n, i: (n * HB + i, 0, 0))),
        scratch_shapes=[pltpu.VMEM((TH + 2, Wo + 2, s.shape[-1]), jnp.float32)
                        for s in srcs],
        compiler_params=pltpu.CompilerParams(
            dimension_semantics=("parallel", "parallel"),
            vmem_limit_bytes=_VMEM_LIMIT),
        cost_estimate=pl.CostEstimate(flops=flops, transcendentals=0,
                                      bytes_accessed=bytes_accessed),
    )(*args)
    return y, ps, M


def _bn_scale_shift(ps, M, gamma, beta):
    """Finalize training-mode BatchNorm stats (tiny reduction, plain JAX)."""
    ssum = jnp.sum(ps[:, 0, :], axis=0)
    ssq = jnp.sum(ps[:, 1, :], axis=0)
    mean = ssum / M
    var = jnp.maximum(ssq / M - mean * mean, 0.0)   # biased var, one-pass form
    inv = lax.rsqrt(var + EPS)
    scale = (gamma * inv).astype(jnp.float32)
    shift = (beta - mean * gamma * inv).astype(jnp.float32)
    return scale, shift


# ---------------------------------------------------------------------------
# Pass B (final layer only): y * scale + shift, ReLU (elementwise, tiled)
# ---------------------------------------------------------------------------
def _bn_relu_kernel(y_ref, sc_ref, sh_ref, o_ref):
    y = y_ref[...].astype(jnp.float32) * sc_ref[...] + sh_ref[...]
    o_ref[...] = jnp.maximum(y, 0.0).astype(o_ref.dtype)


def _bn_relu(y, scale, shift, out_dtype):
    M, Co = y.shape
    row_target = max(512, min(16384, (1 << 20) // max(Co, 1)))
    TMB = _pick_tile(M, row_target)
    return pl.pallas_call(
        _bn_relu_kernel,
        out_shape=jax.ShapeDtypeStruct((M, Co), out_dtype),
        grid=(M // TMB,),
        in_specs=[pl.BlockSpec((TMB, Co), lambda i: (i, 0)),
                  pl.BlockSpec((1, Co), lambda i: (0, 0)),
                  pl.BlockSpec((1, Co), lambda i: (0, 0))],
        out_specs=pl.BlockSpec((TMB, Co), lambda i: (i, 0)),
        compiler_params=pltpu.CompilerParams(
            dimension_semantics=("parallel",),
            vmem_limit_bytes=_VMEM_LIMIT),
    )(y, scale.reshape(1, Co), shift.reshape(1, Co))


# ---------------------------------------------------------------------------
# Full forward of `Up` (RA=False).  Inputs / output are NCHW float32.
# ---------------------------------------------------------------------------
def up_forward(x1_nchw, x2_nchw, params):
    N, Cin, H, W = x1_nchw.shape
    Cout = Cin // 2
    Ho, Wo = 2 * H, 2 * W
    bf16 = jnp.bfloat16

    x1 = jnp.transpose(x1_nchw, (0, 2, 3, 1)).reshape(N * H * W, Cin).astype(bf16)
    x2 = jnp.transpose(x2_nchw, (0, 2, 3, 1)).astype(bf16)         # (N, Ho, Wo, Cout)

    # ConvTranspose2d(Cin, Cout, 2, 2): weight (Cin, Cout, 2, 2) -> (Cin, 4*Cout)
    w_up = jnp.transpose(params["up_w"], (0, 2, 3, 1)).reshape(Cin, 4 * Cout).astype(bf16)
    b_up = jnp.tile(params["up_b"], 4).reshape(1, 4 * Cout).astype(jnp.float32)

    up_flat = _deconv(x1, w_up, b_up)                               # (N*H*W, 4*Cout) bf16
    # TODO(synk): fold this 2x2 tap->spatial interleave into conv1's read path
    # (sub-pixel decomposition of the 3x3 conv) to save this HBM round trip.
    up = (up_flat.reshape(N, H, W, 2, 2, Cout)
                 .transpose(0, 1, 3, 2, 4, 5)
                 .reshape(N, Ho, Wo, Cout))

    def conv_w(w):  # (Co, Ci, 3, 3) -> (9, Ci, Co), tap-major (kh*3+kw)
        return (jnp.transpose(w, (2, 3, 1, 0))
                   .reshape(9, w.shape[1], w.shape[0]).astype(bf16))

    # ConvBlock layer 1: torch.cat([up, x2], dim=1) fused as two conv sources;
    # zero-padding is handled in-kernel (no jnp.pad / padded copies in HBM).
    y1, ps1, M = _conv3x3_stats(
        [up, x2],
        [conv_w(params["c1_w"][:, :Cout]), conv_w(params["c1_w"][:, Cout:])])
    sc1, sh1 = _bn_scale_shift(ps1, M, params["bn1_g"], params["bn1_b"])

    # ConvBlock layer 2: layer-1's BatchNorm+ReLU fused into this conv's input
    # path (no standalone elementwise pass / extra HBM round trip for h1).
    y2, ps2, _ = _conv3x3_stats(
        [y1.reshape(N, Ho, Wo, Cout)],
        [conv_w(params["c2_w"])],
        affines=[(sc1.reshape(1, 1, Cout), sh1.reshape(1, 1, Cout))])
    sc2, sh2 = _bn_scale_shift(ps2, M, params["bn2_g"], params["bn2_b"])

    out = _bn_relu(y2, sc2, sh2, jnp.float32)                       # (M, Cout) f32
    # TODO(synk): fold this NHWC->NCHW transpose into pass B's out_spec.
    return jnp.transpose(out.reshape(N, Ho, Wo, Cout), (0, 3, 1, 2))


# ---------------------------------------------------------------------------
# Deterministic parameter init (shapes per the module's __init__, RA=False)
# ---------------------------------------------------------------------------
def init_params(key, in_channels):
    Cout = in_channels // 2
    ks = jax.random.split(key, 4)

    def rn(k, shape, scale=0.1):
        return scale * jax.random.normal(k, shape, dtype=jnp.float32)

    return dict(
        up_w=rn(ks[0], (in_channels, Cout, 2, 2)),   # ConvTranspose2d weight
        up_b=rn(ks[1], (Cout,)),                     # ConvTranspose2d bias
        c1_w=rn(ks[2], (Cout, in_channels, 3, 3)),   # Conv2d (bias=False)
        bn1_g=jnp.ones((Cout,), jnp.float32),
        bn1_b=jnp.zeros((Cout,), jnp.float32),
        c2_w=rn(ks[3], (Cout, Cout, 3, 3)),
        bn2_g=jnp.ones((Cout,), jnp.float32),
        bn2_b=jnp.zeros((Cout,), jnp.float32),
    )


# ---------------------------------------------------------------------------
# Pure-JAX reference (independent path) mirroring the kernel's bf16 storage
# points so the comparison isolates structural correctness.
# ---------------------------------------------------------------------------
def ref_forward(x1, x2, p):
    f32 = jnp.float32
    bq = lambda t: t.astype(jnp.bfloat16).astype(f32)
    N, Cin, H, W = x1.shape
    Cout = Cin // 2

    up = jnp.einsum("nihw,iojk->nohjwk", bq(x1), bq(p["up_w"]),
                    precision=lax.Precision.HIGHEST)
    up = up.reshape(N, Cout, 2 * H, 2 * W) + p["up_b"].reshape(1, Cout, 1, 1)
    x = jnp.concatenate([bq(up), bq(x2)], axis=1)

    def cbr(x, w, g, b, quant_out):
        y = lax.conv_general_dilated(
            x, bq(w), (1, 1), ((1, 1), (1, 1)),
            dimension_numbers=("NCHW", "OIHW", "NCHW"),
            precision=lax.Precision.HIGHEST)
        mean = y.mean(axis=(0, 2, 3), keepdims=True)
        var = jnp.square(y - mean).mean(axis=(0, 2, 3), keepdims=True)
        # mirror the kernel: stats from the f32 accumulator, affine applied to
        # the bf16-rounded stored conv output.
        ya = bq(y)
        z = (ya - mean) * lax.rsqrt(var + EPS) * g.reshape(1, -1, 1, 1) \
            + b.reshape(1, -1, 1, 1)
        z = jnp.maximum(z, 0.0)
        return bq(z) if quant_out else z

    h = cbr(x, p["c1_w"], p["bn1_g"], p["bn1_b"], True)
    h = cbr(h, p["c2_w"], p["bn2_g"], p["bn2_b"], False)
    return h


if __name__ == "__main__":
    key = jax.random.PRNGKey(0)
    k1, k2, kp = jax.random.split(key, 3)

    in_channels = 4
    N, H, W = 2, 8, 8
    x1 = jax.random.normal(k1, (N, in_channels, H, W), dtype=jnp.float32)
    x2 = jax.random.normal(k2, (N, in_channels // 2, 2 * H, 2 * W), dtype=jnp.float32)
    params = init_params(kp, in_channels)

    out = jax.jit(up_forward)(x1, x2, params)
    out = jax.block_until_ready(out)

    assert out.shape == (N, in_channels // 2, 2 * H, 2 * W), out.shape
    ref = ref_forward(x1, x2, params)
    np.testing.assert_allclose(np.asarray(out), np.asarray(ref),
                               rtol=2e-2, atol=2e-2)

    print("KERNEL_OK")
</pallas_src>

<mosaic_0001>
module attributes {stable_mosaic.version = 11 : i64} {
  func.func @_deconv_kernel(%arg0: i32, %arg1: memref<128x4xbf16, #tpu.memory_space<vmem>>, %arg2: memref<4x8xbf16, #tpu.memory_space<vmem>>, %arg3: memref<1x8xf32, #tpu.memory_space<vmem>>, %arg4: memref<128x8xbf16, #tpu.memory_space<vmem>>) attributes {dimension_semantics = [#tpu.dimension_semantics<parallel>], iteration_bounds = array<i64: 1>, scalar_prefetch = 0 : i64, scratch_operands = 0 : i64, tpu.core_type = #tpu.core_type<tc>, window_params = [{transform_indices = @transform_0, window_bounds = array<i64: 128, 4>}, {pipeline_mode = #tpu.pipeline_mode<synchronous>, transform_indices = @transform_1, window_bounds = array<i64: 4, 8>}, {pipeline_mode = #tpu.pipeline_mode<synchronous>, transform_indices = @transform_2, window_bounds = array<i64: 1, 8>}, {transform_indices = @transform_3, window_bounds = array<i64: 128, 8>}]} {
    %c0 = arith.constant 0 : index
    %c0_0 = arith.constant 0 : index
    %0 = vector.load %arg1[%c0, %c0_0] : memref<128x4xbf16, #tpu.memory_space<vmem>>, vector<128x4xbf16>
    %c0_1 = arith.constant 0 : index
    %c0_2 = arith.constant 0 : index
    %1 = vector.load %arg2[%c0_1, %c0_2] : memref<4x8xbf16, #tpu.memory_space<vmem>>, vector<4x8xbf16>
    %cst = arith.constant dense<0.000000e+00> : vector<128x8xf32>
    %2 = tpu.matmul %0, %1, %cst {dimension_numbers = #tpu.dot_dimension_numbers<[1], [0], [0], [1], [0, 0, 1, 1], [], []>} : vector<128x4xbf16>, vector<4x8xbf16>, vector<128x8xf32> -> vector<128x8xf32>
    %c0_3 = arith.constant 0 : index
    %c0_4 = arith.constant 0 : index
    %3 = vector.load %arg3[%c0_3, %c0_4] : memref<1x8xf32, #tpu.memory_space<vmem>>, vector<1x8xf32>
    %4 = vector.broadcast %3 : vector<1x8xf32> to vector<128x8xf32>
    %5 = arith.addf %2, %4 : vector<128x8xf32>
    %6 = arith.truncf %5 : vector<128x8xf32> to vector<128x8xbf16>
    %c0_5 = arith.constant 0 : index
    %c0_6 = arith.constant 0 : index
    %7 = vector.load %arg4[%c0_5, %c0_6] : memref<128x8xbf16, #tpu.memory_space<vmem>>, vector<128x8xbf16>
    tpu.vector_store %arg4[%c0_5, %c0_6], %6 {strides = array<i32>} : memref<128x8xbf16, #tpu.memory_space<vmem>>, vector<128x8xbf16>,
    return
  }
  func.func @transform_0(%arg0: i32) -> (i32, i32) {
    %c0_i32 = arith.constant 0 : i32
    %c0_i32_0 = arith.constant 0 : i32
    return %arg0, %c0_i32 : i32, i32
  }
  func.func @transform_1(%arg0: i32) -> (i32, i32) {
    %c0_i32 = arith.constant 0 : i32
    %c0_i32_0 = arith.constant 0 : i32
    %c0_i32_1 = arith.constant 0 : i32
    return %c0_i32, %c0_i32_0 : i32, i32
  }
  func.func @transform_2(%arg0: i32) -> (i32, i32) {
    %c0_i32 = arith.constant 0 : i32
    %c0_i32_0 = arith.constant 0 : i32
    %c0_i32_1 = arith.constant 0 : i32
    return %c0_i32, %c0_i32_0 : i32, i32
  }
  func.func @transform_3(%arg0: i32) -> (i32, i32) {
    %c0_i32 = arith.constant 0 : i32
    %c0_i32_0 = arith.constant 0 : i32
    return %arg0, %c0_i32 : i32, i32
  }
}

module attributes {stable_mosaic.version = 11 : i64} {
  func.func @kernel(%arg0: i32, %arg1: i32, %arg2: memref<1x16x16x2xbf16, #tpu.memory_space<vmem>>, %arg3: memref<1x1x16x2xbf16, #tpu.memory_space<vmem>>, %arg4: memref<1x1x16x2xbf16, #tpu.memory_space<vmem>>, %arg5: memref<9x2x2xbf16, #tpu.memory_space<vmem>>, %arg6: memref<1x16x16x2xbf16, #tpu.memory_space<vmem>>, %arg7: memref<1x1x16x2xbf16, #tpu.memory_space<vmem>>, %arg8: memref<1x1x16x2xbf16, #tpu.memory_space<vmem>>, %arg9: memref<9x2x2xbf16, #tpu.memory_space<vmem>>, %arg10: memref<256x2xbf16, #tpu.memory_space<vmem>>, %arg11: memref<1x2x2xf32, #tpu.memory_space<vmem>>, %arg12: memref<18x18x2xf32, #tpu.memory_space<vmem>>, %arg13: memref<18x18x2xf32, #tpu.memory_space<vmem>>) attributes {dimension_semantics = [#tpu.dimension_semantics<parallel>, #tpu.dimension_semantics<parallel>], iteration_bounds = array<i64: 2, 1>, scalar_prefetch = 0 : i64, scratch_operands = 2 : i64, tpu.core_type = #tpu.core_type<tc>, window_params = [{transform_indices = @transform_0, window_bounds = array<i64: 1, 16, 16, 2>}, {transform_indices = @transform_1, window_bounds = array<i64: 1, 1, 16, 2>}, {transform_indices = @transform_2, window_bounds = array<i64: 1, 1, 16, 2>}, {pipeline_mode = #tpu.pipeline_mode<synchronous>, transform_indices = @transform_3, window_bounds = array<i64: 9, 2, 2>}, {transform_indices = @transform_4, window_bounds = array<i64: 1, 16, 16, 2>}, {transform_indices = @transform_5, window_bounds = array<i64: 1, 1, 16, 2>}, {transform_indices = @transform_6, window_bounds = array<i64: 1, 1, 16, 2>}, {pipeline_mode = #tpu.pipeline_mode<synchronous>, transform_indices = @transform_7, window_bounds = array<i64: 9, 2, 2>}, {transform_indices = @transform_8, window_bounds = array<i64: 256, 2>}, {transform_indices = @transform_9, window_bounds = array<i64: 1, 2, 2>}]} {
    %cst = arith.constant 0.000000e+00 : f32
    %0 = vector.broadcast %cst : f32 to vector<18x18x2xf32>
    %c0 = arith.constant 0 : index
    %c0_0 = arith.constant 0 : index
    %c0_1 = arith.constant 0 : index
    %1 = vector.load %arg12[%c0, %c0_0, %c0_1] : memref<18x18x2xf32, #tpu.memory_space<vmem>>, vector<18x18x2xf32>
    tpu.vector_store %arg12[%c0, %c0_0, %c0_1], %0 {strides = array<i32>} : memref<18x18x2xf32, #tpu.memory_space<vmem>>, vector<18x18x2xf32>,
    %c0_2 = arith.constant 0 : index
    %c0_3 = arith.constant 0 : index
    %c0_4 = arith.constant 0 : index
    %c0_5 = arith.constant 0 : index
    %2 = vector.load %arg2[%c0_2, %c0_3, %c0_4, %c0_5] : memref<1x16x16x2xbf16, #tpu.memory_space<vmem>>, vector<1x16x16x2xbf16>
    %3 = vector.shape_cast %2 : vector<1x16x16x2xbf16> to vector<16x16x2xbf16>
    %4 = arith.extf %3 : vector<16x16x2xbf16> to vector<16x16x2xf32>
    %c1 = arith.constant 1 : index
    %c1_6 = arith.constant 1 : index
    %c0_7 = arith.constant 0 : index
    %5 = vector.load %arg12[%c1, %c1_6, %c0_7] : memref<18x18x2xf32, #tpu.memory_space<vmem>>, vector<16x16x2xf32>
    tpu.vector_store %arg12[%c1, %c1_6, %c0_7], %4 {strides = array<i32>} : memref<18x18x2xf32, #tpu.memory_space<vmem>>, vector<16x16x2xf32>,
    %c0_i32 = arith.constant 0 : i32
    %6 = arith.cmpi sgt, %arg1, %c0_i32 : i32
    %7 = arith.extui %6 : i1 to i32
    %c0_i32_8 = arith.constant 0 : i32
    %8 = arith.cmpi ne, %7, %c0_i32_8 : i32
    scf.if %8 {
      %c0_152 = arith.constant 0 : index
      %c0_153 = arith.constant 0 : index
      %c0_154 = arith.constant 0 : index
      %c0_155 = arith.constant 0 : index
      %159 = vector.load %arg3[%c0_152, %c0_153, %c0_154, %c0_155] : memref<1x1x16x2xbf16, #tpu.memory_space<vmem>>, vector<1x1x16x2xbf16>
      %160 = vector.shape_cast %159 : vector<1x1x16x2xbf16> to vector<1x16x2xbf16>
      %161 = arith.extf %160 : vector<1x16x2xbf16> to vector<1x16x2xf32>
      %c0_156 = arith.constant 0 : index
      %c1_157 = arith.constant 1 : index
      %c0_158 = arith.constant 0 : index
      %162 = vector.load %arg12[%c0_156, %c1_157, %c0_158] : memref<18x18x2xf32, #tpu.memory_space<vmem>>, vector<1x16x2xf32>
      tpu.vector_store %arg12[%c0_156, %c1_157, %c0_158], %161 {strides = array<i32>} : memref<18x18x2xf32, #tpu.memory_space<vmem>>, vector<1x16x2xf32>,
    } else {
    }
    %c0_i32_9 = arith.constant 0 : i32
    %9 = arith.cmpi slt, %arg1, %c0_i32_9 : i32
    %10 = arith.extui %9 : i1 to i32
    %c0_i32_10 = arith.constant 0 : i32
    %11 = arith.cmpi ne, %10, %c0_i32_10 : i32
    scf.if %11 {
      %c0_152 = arith.constant 0 : index
      %c0_153 = arith.constant 0 : index
      %c0_154 = arith.constant 0 : index
      %c0_155 = arith.constant 0 : index
      %159 = vector.load %arg4[%c0_152, %c0_153, %c0_154, %c0_155] : memref<1x1x16x2xbf16, #tpu.memory_space<vmem>>, vector<1x1x16x2xbf16>
      %160 = vector.shape_cast %159 : vector<1x1x16x2xbf16> to vector<1x16x2xbf16>
      %161 = arith.extf %160 : vector<1x16x2xbf16> to vector<1x16x2xf32>
      %c17 = arith.constant 17 : index
      %c1_156 = arith.constant 1 : index
      %c0_157 = arith.constant 0 : index
      %162 = vector.load %arg12[%c17, %c1_156, %c0_157] : memref<18x18x2xf32, #tpu.memory_space<vmem>>, vector<1x16x2xf32>
      tpu.vector_store %arg12[%c17, %c1_156, %c0_157], %161 {strides = array<i32>} : memref<18x18x2xf32, #tpu.memory_space<vmem>>, vector<1x16x2xf32>,
    } else {
    }
    %c0_11 = arith.constant 0 : index
    %c0_12 = arith.constant 0 : index
    %c0_13 = arith.constant 0 : index
    %12 = vector.load %arg12[%c0_11, %c0_12, %c0_13] : memref<18x18x2xf32, #tpu.memory_space<vmem>>, vector<16x16x2xf32>
    %13 = vector.shape_cast %12 : vector<16x16x2xf32> to vector<256x2xf32>
    %14 = arith.truncf %13 : vector<256x2xf32> to vector<256x2xbf16>
    %c0_14 = arith.constant 0 : index
    %c0_15 = arith.constant 0 : index
    %c0_16 = arith.constant 0 : index
    %15 = vector.load %arg5[%c0_14, %c0_15, %c0_16] : memref<9x2x2xbf16, #tpu.memory_space<vmem>>, vector<1x2x2xbf16>
    %16 = vector.shape_cast %15 : vector<1x2x2xbf16> to vector<2x2xbf16>
    %cst_17 = arith.constant dense<0.000000e+00> : vector<256x2xf32>
    %17 = tpu.matmul %14, %16, %cst_17 {dimension_numbers = #tpu.dot_dimension_numbers<[1], [0], [0], [1], [0, 0, 1, 1], [], []>} : vector<256x2xbf16>, vector<2x2xbf16>, vector<256x2xf32> -> vector<256x2xf32>
    %c0_18 = arith.constant 0 : index
    %c1_19 = arith.constant 1 : index
    %c0_20 = arith.constant 0 : index
    %18 = vector.load %arg12[%c0_18, %c1_19, %c0_20] : memref<18x18x2xf32, #tpu.memory_space<vmem>>, vector<16x16x2xf32>
    %19 = vector.shape_cast %18 : vector<16x16x2xf32> to vector<256x2xf32>
    %20 = arith.truncf %19 : vector<256x2xf32> to vector<256x2xbf16>
    %c1_21 = arith.constant 1 : index
    %c0_22 = arith.constant 0 : index
    %c0_23 = arith.constant 0 : index
    %21 = vector.load %arg5[%c1_21, %c0_22, %c0_23] : memref<9x2x2xbf16, #tpu.memory_space<vmem>>, vector<1x2x2xbf16>
    %22 = vector.shape_cast %21 : vector<1x2x2xbf16> to vector<2x2xbf16>
    %cst_24 = arith.constant dense<0.000000e+00> : vector<256x2xf32>
    %23 = tpu.matmul %20, %22, %cst_24 {dimension_numbers = #tpu.dot_dimension_numbers<[1], [0], [0], [1], [0, 0, 1, 1], [], []>} : vector<256x2xbf16>, vector<2x2xbf16>, vector<256x2xf32> -> vector<256x2xf32>
    %24 = arith.addf %17, %23 : vector<256x2xf32>
    %c0_25 = arith.constant 0 : index
    %c2 = arith.constant 2 : index
    %c0_26 = arith.constant 0 : index
    %25 = vector.load %arg12[%c0_25, %c2, %c0_26] : memref<18x18x2xf32, #tpu.memory_space<vmem>>, vector<16x16x2xf32>
    %26 = vector.shape_cast %25 : vector<16x16x2xf32> to vector<256x2xf32>
    %27 = arith.truncf %26 : vector<256x2xf32> to vector<256x2xbf16>
    %c2_27 = arith.constant 2 : index
    %c0_28 = arith.constant 0 : index
    %c0_29 = arith.constant 0 : index
    %28 = vector.load %arg5[%c2_27, %c0_28, %c0_29] : memref<9x2x2xbf16, #tpu.memory_space<vmem>>, vector<1x2x2xbf16>
    %29 = vector.shape_cast %28 : vector<1x2x2xbf16> to vector<2x2xbf16>
    %cst_30 = arith.constant dense<0.000000e+00> : vector<256x2xf32>
    %30 = tpu.matmul %27, %29, %cst_30 {dimension_numbers = #tpu.dot_dimension_numbers<[1], [0], [0], [1], [0, 0, 1, 1], [], []>} : vector<256x2xbf16>, vector<2x2xbf16>, vector<256x2xf32> -> vector<256x2xf32>
    %31 = arith.addf %24, %30 : vector<256x2xf32>
    %c1_31 = arith.constant 1 : index
    %c0_32 = arith.constant 0 : index
    %c0_33 = arith.constant 0 : index
    %32 = vector.load %arg12[%c1_31, %c0_32, %c0_33] : memref<18x18x2xf32, #tpu.memory_space<vmem>>, vector<16x16x2xf32>
    %33 = vector.shape_cast %32 : vector<16x16x2xf32> to vector<256x2xf32>
    %34 = arith.truncf %33 : vector<256x2xf32> to vector<256x2xbf16>
    %c3 = arith.constant 3 : index
    %c0_34 = arith.constant 0 : index
    %c0_35 = arith.constant 0 : index
    %35 = vector.load %arg5[%c3, %c0_34, %c0_35] : memref<9x2x2xbf16, #tpu.memory_space<vmem>>, vector<1x2x2xbf16>
    %36 = vector.shape_cast %35 : vector<1x2x2xbf16> to vector<2x2xbf16>
    %cst_36 = arith.constant dense<0.000000e+00> : vector<256x2xf32>
    %37 = tpu.matmul %34, %36, %cst_36 {dimension_numbers = #tpu.dot_dimension_numbers<[1], [0], [0], [1], [0, 0, 1, 1], [], []>} : vector<256x2xbf16>, vector<2x2xbf16>, vector<256x2xf32> -> vector<256x2xf32>
    %38 = arith.addf %31, %37 : vector<256x2xf32>
    %c1_37 = arith.constant 1 : index
    %c1_38 = arith.constant 1 : index
    %c0_39 = arith.constant 0 : index
    %39 = vector.load %arg12[%c1_37, %c1_38, %c0_39] : memref<18x18x2xf32, #tpu.memory_space<vmem>>, vector<16x16x2xf32>
    %40 = vector.shape_cast %39 : vector<16x16x2xf32> to vector<256x2xf32>
    %41 = arith.truncf %40 : vector<256x2xf32> to vector<256x2xbf16>
    %c4 = arith.constant 4 : index
    %c0_40 = arith.constant 0 : index
    %c0_41 = arith.constant 0 : index
    %42 = vector.load %arg5[%c4, %c0_40, %c0_41] : memref<9x2x2xbf16, #tpu.memory_space<vmem>>, vector<1x2x2xbf16>
    %43 = vector.shape_cast %42 : vector<1x2x2xbf16> to vector<2x2xbf16>
    %cst_42 = arith.constant dense<0.000000e+00> : vector<256x2xf32>
    %44 = tpu.matmul %41, %43, %cst_42 {dimension_numbers = #tpu.dot_dimension_numbers<[1], [0], [0], [1], [0, 0, 1, 1], [], []>} : vector<256x2xbf16>, vector<2x2xbf16>, vector<256x2xf32> -> vector<256x2xf32>
    %45 = arith.addf %38, %44 : vector<256x2xf32>
    %c1_43 = arith.constant 1 : index
    %c2_44 = arith.constant 2 : index
    %c0_45 = arith.constant 0 : index
    %46 = vector.load %arg12[%c1_43, %c2_44, %c0_45] : memref<18x18x2xf32, #tpu.memory_space<vmem>>, vector<16x16x2xf32>
    %47 = vector.shape_cast %46 : vector<16x16x2xf32> to vector<256x2xf32>
    %48 = arith.truncf %47 : vector<256x2xf32> to vector<256x2xbf16>
    %c5 = arith.constant 5 : index
    %c0_46 = arith.constant 0 : index
    %c0_47 = arith.constant 0 : index
    %49 = vector.load %arg5[%c5, %c0_46, %c0_47] : memref<9x2x2xbf16, #tpu.memory_space<vmem>>, vector<1x2x2xbf16>
    %50 = vector.shape_cast %49 : vector<1x2x2xbf16> to vector<2x2xbf16>
    %cst_48 = arith.constant dense<0.000000e+00> : vector<256x2xf32>
    %51 = tpu.matmul %48, %50, %cst_48 {dimension_numbers = #tpu.dot_dimension_numbers<[1], [0], [0], [1], [0, 0, 1, 1], [], []>} : vector<256x2xbf16>, vector<2x2xbf16>, vector<256x2xf32> -> vector<256x2xf32>
    %52 = arith.addf %45, %51 : vector<256x2xf32>
    %c2_49 = arith.constant 2 : index
    %c0_50 = arith.constant 0 : index
    %c0_51 = arith.constant 0 : index
    %53 = vector.load %arg12[%c2_49, %c0_50, %c0_51] : memref<18x18x2xf32, #tpu.memory_space<vmem>>, vector<16x16x2xf32>
    %54 = vector.shape_cast %53 : vector<16x16x2xf32> to vector<256x2xf32>
    %55 = arith.truncf %54 : vector<256x2xf32> to vector<256x2xbf16>
    %c6 = arith.constant 6 : index
    %c0_52 = arith.constant 0 : index
    %c0_53 = arith.constant 0 : index
    %56 = vector.load %arg5[%c6, %c0_52, %c0_53] : memref<9x2x2xbf16, #tpu.memory_space<vmem>>, vector<1x2x2xbf16>
    %57 = vector.shape_cast %56 : vector<1x2x2xbf16> to vector<2x2xbf16>
    %cst_54 = arith.constant dense<0.000000e+00> : vector<256x2xf32>
    %58 = tpu.matmul %55, %57, %cst_54 {dimension_numbers = #tpu.dot_dimension_numbers<[1], [0], [0], [1], [0, 0, 1, 1], [], []>} : vector<256x2xbf16>, vector<2x2xbf16>, vector<256x2xf32> -> vector<256x2xf32>
    %59 = arith.addf %52, %58 : vector<256x2xf32>
    %c2_55 = arith.constant 2 : index
    %c1_56 = arith.constant 1 : index
    %c0_57 = arith.constant 0 : index
    %60 = vector.load %arg12[%c2_55, %c1_56, %c0_57] : memref<18x18x2xf32, #tpu.memory_space<vmem>>, vector<16x16x2xf32>
    %61 = vector.shape_cast %60 : vector<16x16x2xf32> to vector<256x2xf32>
    %62 = arith.truncf %61 : vector<256x2xf32> to vector<256x2xbf16>
    %c7 = arith.constant 7 : index
    %c0_58 = arith.constant 0 : index
    %c0_59 = arith.constant 0 : index
    %63 = vector.load %arg5[%c7, %c0_58, %c0_59] : memref<9x2x2xbf16, #tpu.memory_space<vmem>>, vector<1x2x2xbf16>
    %64 = vector.shape_cast %63 : vector<1x2x2xbf16> to vector<2x2xbf16>
    %cst_60 = arith.constant dense<0.000000e+00> : vector<256x2xf32>
    %65 = tpu.matmul %62, %64, %cst_60 {dimension_numbers = #tpu.dot_dimension_numbers<[1], [0], [0], [1], [0, 0, 1, 1], [], []>} : vector<256x2xbf16>, vector<2x2xbf16>, vector<256x2xf32> -> vector<256x2xf32>
    %66 = arith.addf %59, %65 : vector<256x2xf32>
    %c2_61 = arith.constant 2 : index
    %c2_62 = arith.constant 2 : index
    %c0_63 = arith.constant 0 : index
    %67 = vector.load %arg12[%c2_61, %c2_62, %c0_63] : memref<18x18x2xf32, #tpu.memory_space<vmem>>, vector<16x16x2xf32>
    %68 = vector.shape_cast %67 : vector<16x16x2xf32> to vector<256x2xf32>
    %69 = arith.truncf %68 : vector<256x2xf32> to vector<256x2xbf16>
    %c8 = arith.constant 8 : index
    %c0_64 = arith.constant 0 : index
    %c0_65 = arith.constant 0 : index
    %70 = vector.load %arg5[%c8, %c0_64, %c0_65] : memref<9x2x2xbf16, #tpu.memory_space<vmem>>, vector<1x2x2xbf16>
    %71 = vector.shape_cast %70 : vector<1x2x2xbf16> to vector<2x2xbf16>
    %cst_66 = arith.constant dense<0.000000e+00> : vector<256x2xf32>
    %72 = tpu.matmul %69, %71, %cst_66 {dimension_numbers = #tpu.dot_dimension_numbers<[1], [0], [0], [1], [0, 0, 1, 1], [], []>} : vector<256x2xbf16>, vector<2x2xbf16>, vector<256x2xf32> -> vector<256x2xf32>
    %73 = arith.addf %66, %72 : vector<256x2xf32>
    %cst_67 = arith.constant 0.000000e+00 : f32
    %74 = vector.broadcast %cst_67 : f32 to vector<18x18x2xf32>
    %c0_68 = arith.constant 0 : index
    %c0_69 = arith.constant 0 : index
    %c0_70 = arith.constant 0 : index
    %75 = vector.load %arg13[%c0_68, %c0_69, %c0_70] : memref<18x18x2xf32, #tpu.memory_space<vmem>>, vector<18x18x2xf32>
    tpu.vector_store %arg13[%c0_68, %c0_69, %c0_70], %74 {strides = array<i32>} : memref<18x18x2xf32, #tpu.memory_space<vmem>>, vector<18x18x2xf32>,
    %c0_71 = arith.constant 0 : index
    %c0_72 = arith.constant 0 : index
    %c0_73 = arith.constant 0 : index
    %c0_74 = arith.constant 0 : index
    %76 = vector.load %arg6[%c0_71, %c0_72, %c0_73, %c0_74] : memref<1x16x16x2xbf16, #tpu.memory_space<vmem>>, vector<1x16x16x2xbf16>
    %77 = vector.shape_cast %76 : vector<1x16x16x2xbf16> to vector<16x16x2xbf16>
    %78 = arith.extf %77 : vector<16x16x2xbf16> to vector<16x16x2xf32>
    %c1_75 = arith.constant 1 : index
    %c1_76 = arith.constant 1 : index
    %c0_77 = arith.constant 0 : index
    %79 = vector.load %arg13[%c1_75, %c1_76, %c0_77] : memref<18x18x2xf32, #tpu.memory_space<vmem>>, vector<16x16x2xf32>
    tpu.vector_store %arg13[%c1_75, %c1_76, %c0_77], %78 {strides = array<i32>} : memref<18x18x2xf32, #tpu.memory_space<vmem>>, vector<16x16x2xf32>,
    %c0_i32_78 = arith.constant 0 : i32
    %80 = arith.cmpi sgt, %arg1, %c0_i32_78 : i32
    %81 = arith.extui %80 : i1 to i32
    %c0_i32_79 = arith.constant 0 : i32
    %82 = arith.cmpi ne, %81, %c0_i32_79 : i32
    scf.if %82 {
      %c0_152 = arith.constant 0 : index
      %c0_153 = arith.constant 0 : index
      %c0_154 = arith.constant 0 : index
      %c0_155 = arith.constant 0 : index
      %159 = vector.load %arg7[%c0_152, %c0_153, %c0_154, %c0_155] : memref<1x1x16x2xbf16, #tpu.memory_space<vmem>>, vector<1x1x16x2xbf16>
      %160 = vector.shape_cast %159 : vector<1x1x16x2xbf16> to vector<1x16x2xbf16>
      %161 = arith.extf %160 : vector<1x16x2xbf16> to vector<1x16x2xf32>
      %c0_156 = arith.constant 0 : index
      %c1_157 = arith.constant 1 : index
      %c0_158 = arith.constant 0 : index
      %162 = vector.load %arg13[%c0_156, %c1_157, %c0_158] : memref<18x18x2xf32, #tpu.memory_space<vmem>>, vector<1x16x2xf32>
      tpu.vector_store %arg13[%c0_156, %c1_157, %c0_158], %161 {strides = array<i32>} : memref<18x18x2xf32, #tpu.memory_space<vmem>>, vector<1x16x2xf32>,
    } else {
    }
    %c0_i32_80 = arith.constant 0 : i32
    %83 = arith.cmpi slt, %arg1, %c0_i32_80 : i32
    %84 = arith.extui %83 : i1 to i32
    %c0_i32_81 = arith.constant 0 : i32
    %85 = arith.cmpi ne, %84, %c0_i32_81 : i32
    scf.if %85 {
      %c0_152 = arith.constant 0 : index
      %c0_153 = arith.constant 0 : index
      %c0_154 = arith.constant 0 : index
      %c0_155 = arith.constant 0 : index
      %159 = vector.load %arg8[%c0_152, %c0_153, %c0_154, %c0_155] : memref<1x1x16x2xbf16, #tpu.memory_space<vmem>>, vector<1x1x16x2xbf16>
      %160 = vector.shape_cast %159 : vector<1x1x16x2xbf16> to vector<1x16x2xbf16>
      %161 = arith.extf %160 : vector<1x16x2xbf16> to vector<1x16x2xf32>
      %c17 = arith.constant 17 : index
      %c1_156 = arith.constant 1 : index
      %c0_157 = arith.constant 0 : index
      %162 = vector.load %arg13[%c17, %c1_156, %c0_157] : memref<18x18x2xf32, #tpu.memory_space<vmem>>, vector<1x16x2xf32>
      tpu.vector_store %arg13[%c17, %c1_156, %c0_157], %161 {strides = array<i32>} : memref<18x18x2xf32, #tpu.memory_space<vmem>>, vector<1x16x2xf32>,
    } else {
    }
    %c0_82 = arith.constant 0 : index
    %c0_83 = arith.constant 0 : index
    %c0_84 = arith.constant 0 : index
    %86 = vector.load %arg13[%c0_82, %c0_83, %c0_84] : memref<18x18x2xf32, #tpu.memory_space<vmem>>, vector<16x16x2xf32>
    %87 = vector.shape_cast %86 : vector<16x16x2xf32> to vector<256x2xf32>
    %88 = arith.truncf %87 : vector<256x2xf32> to vector<256x2xbf16>
    %c0_85 = arith.constant 0 : index
    %c0_86 = arith.constant 0 : index
    %c0_87 = arith.constant 0 : index
    %89 = vector.load %arg9[%c0_85, %c0_86, %c0_87] : memref<9x2x2xbf16, #tpu.memory_space<vmem>>, vector<1x2x2xbf16>
    %90 = vector.shape_cast %89 : vector<1x2x2xbf16> to vector<2x2xbf16>
    %cst_88 = arith.constant dense<0.000000e+00> : vector<256x2xf32>
    %91 = tpu.matmul %88, %90, %cst_88 {dimension_numbers = #tpu.dot_dimension_numbers<[1], [0], [0], [1], [0, 0, 1, 1], [], []>} : vector<256x2xbf16>, vector<2x2xbf16>, vector<256x2xf32> -> vector<256x2xf32>
    %92 = arith.addf %73, %91 : vector<256x2xf32>
    %c0_89 = arith.constant 0 : index
    %c1_90 = arith.constant 1 : index
    %c0_91 = arith.constant 0 : index
    %93 = vector.load %arg13[%c0_89, %c1_90, %c0_91] : memref<18x18x2xf32, #tpu.memory_space<vmem>>, vector<16x16x2xf32>
    %94 = vector.shape_cast %93 : vector<16x16x2xf32> to vector<256x2xf32>
    %95 = arith.truncf %94 : vector<256x2xf32> to vector<256x2xbf16>
    %c1_92 = arith.constant 1 : index
    %c0_93 = arith.constant 0 : index
    %c0_94 = arith.constant 0 : index
    %96 = vector.load %arg9[%c1_92, %c0_93, %c0_94] : memref<9x2x2xbf16, #tpu.memory_space<vmem>>, vector<1x2x2xbf16>
    %97 = vector.shape_cast %96 : vector<1x2x2xbf16> to vector<2x2xbf16>
    %cst_95 = arith.constant dense<0.000000e+00> : vector<256x2xf32>
    %98 = tpu.matmul %95, %97, %cst_95 {dimension_numbers = #tpu.dot_dimension_numbers<[1], [0], [0], [1], [0, 0, 1, 1], [], []>} : vector<256x2xbf16>, vector<2x2xbf16>, vector<256x2xf32> -> vector<256x2xf32>
    %99 = arith.addf %92, %98 : vector<256x2xf32>
    %c0_96 = arith.constant 0 : index
    %c2_97 = arith.constant 2 : index
    %c0_98 = arith.constant 0 : index
    %100 = vector.load %arg13[%c0_96, %c2_97, %c0_98] : memref<18x18x2xf32, #tpu.memory_space<vmem>>, vector<16x16x2xf32>
    %101 = vector.shape_cast %100 : vector<16x16x2xf32> to vector<256x2xf32>
    %102 = arith.truncf %101 : vector<256x2xf32> to vector<256x2xbf16>
    %c2_99 = arith.constant 2 : index
    %c0_100 = arith.constant 0 : index
    %c0_101 = arith.constant 0 : index
    %103 = vector.load %arg9[%c2_99, %c0_100, %c0_101] : memref<9x2x2xbf16, #tpu.memory_space<vmem>>, vector<1x2x2xbf16>
    %104 = vector.shape_cast %103 : vector<1x2x2xbf16> to vector<2x2xbf16>
    %cst_102 = arith.constant dense<0.000000e+00> : vector<256x2xf32>
    %105 = tpu.matmul %102, %104, %cst_102 {dimension_numbers = #tpu.dot_dimension_numbers<[1], [0], [0], [1], [0, 0, 1, 1], [], []>} : vector<256x2xbf16>, vector<2x2xbf16>, vector<256x2xf32> -> vector<256x2xf32>
    %106 = arith.addf %99, %105 : vector<256x2xf32>
    %c1_103 = arith.constant 1 : index
    %c0_104 = arith.constant 0 : index
    %c0_105 = arith.constant 0 : index
    %107 = vector.load %arg13[%c1_103, %c0_104, %c0_105] : memref<18x18x2xf32, #tpu.memory_space<vmem>>, vector<16x16x2xf32>
    %108 = vector.shape_cast %107 : vector<16x16x2xf32> to vector<256x2xf32>
    %109 = arith.truncf %108 : vector<256x2xf32> to vector<256x2xbf16>
    %c3_106 = arith.constant 3 : index
    %c0_107 = arith.constant 0 : index
    %c0_108 = arith.constant 0 : index
    %110 = vector.load %arg9[%c3_106, %c0_107, %c0_108] : memref<9x2x2xbf16, #tpu.memory_space<vmem>>, vector<1x2x2xbf16>
    %111 = vector.shape_cast %110 : vector<1x2x2xbf16> to vector<2x2xbf16>
    %cst_109 = arith.constant dense<0.000000e+00> : vector<256x2xf32>
    %112 = tpu.matmul %109, %111, %cst_109 {dimension_numbers = #tpu.dot_dimension_numbers<[1], [0], [0], [1], [0, 0, 1, 1], [], []>} : vector<256x2xbf16>, vector<2x2xbf16>, vector<256x2xf32> -> vector<256x2xf32>
    %113 = arith.addf %106, %112 : vector<256x2xf32>
    %c1_110 = arith.constant 1 : index
    %c1_111 = arith.constant 1 : index
    %c0_112 = arith.constant 0 : index
    %114 = vector.load %arg13[%c1_110, %c1_111, %c0_112] : memref<18x18x2xf32, #tpu.memory_space<vmem>>, vector<16x16x2xf32>
    %115 = vector.shape_cast %114 : vector<16x16x2xf32> to vector<256x2xf32>
    %116 = arith.truncf %115 : vector<256x2xf32> to vector<256x2xbf16>
    %c4_113 = arith.constant 4 : index
    %c0_114 = arith.constant 0 : index
    %c0_115 = arith.constant 0 : index
    %117 = vector.load %arg9[%c4_113, %c0_114, %c0_115] : memref<9x2x2xbf16, #tpu.memory_space<vmem>>, vector<1x2x2xbf16>
    %118 = vector.shape_cast %117 : vector<1x2x2xbf16> to vector<2x2xbf16>
    %cst_116 = arith.constant dense<0.000000e+00> : vector<256x2xf32>
    %119 = tpu.matmul %116, %118, %cst_116 {dimension_numbers = #tpu.dot_dimension_numbers<[1], [0], [0], [1], [0, 0, 1, 1], [], []>} : vector<256x2xbf16>, vector<2x2xbf16>, vector<256x2xf32> -> vector<256x2xf32>
    %120 = arith.addf %113, %119 : vector<256x2xf32>
    %c1_117 = arith.constant 1 : index
    %c2_118 = arith.constant 2 : index
    %c0_119 = arith.constant 0 : index
    %121 = vector.load %arg13[%c1_117, %c2_118, %c0_119] : memref<18x18x2xf32, #tpu.memory_space<vmem>>, vector<16x16x2xf32>
    %122 = vector.shape_cast %121 : vector<16x16x2xf32> to vector<256x2xf32>
    %123 = arith.truncf %122 : vector<256x2xf32> to vector<256x2xbf16>
    %c5_120 = arith.constant 5 : index
    %c0_121 = arith.constant 0 : index
    %c0_122 = arith.constant 0 : index
    %124 = vector.load %arg9[%c5_120, %c0_121, %c0_122] : memref<9x2x2xbf16, #tpu.memory_space<vmem>>, vector<1x2x2xbf16>
    %125 = vector.shape_cast %124 : vector<1x2x2xbf16> to vector<2x2xbf16>
    %cst_123 = arith.constant dense<0.000000e+00> : vector<256x2xf32>
    %126 = tpu.matmul %123, %125, %cst_123 {dimension_numbers = #tpu.dot_dimension_numbers<[1], [0], [0], [1], [0, 0, 1, 1], [], []>} : vector<256x2xbf16>, vector<2x2xbf16>, vector<256x2xf32> -> vector<256x2xf32>
    %127 = arith.addf %120, %126 : vector<256x2xf32>
    %c2_124 = arith.constant 2 : index
    %c0_125 = arith.constant 0 : index
    %c0_126 = arith.constant 0 : index
    %128 = vector.load %arg13[%c2_124, %c0_125, %c0_126] : memref<18x18x2xf32, #tpu.memory_space<vmem>>, vector<16x16x2xf32>
    %129 = vector.shape_cast %128 : vector<16x16x2xf32> to vector<256x2xf32>
    %130 = arith.truncf %129 : vector<256x2xf32> to vector<256x2xbf16>
    %c6_127 = arith.constant 6 : index
    %c0_128 = arith.constant 0 : index
    %c0_129 = arith.constant 0 : index
    %131 = vector.load %arg9[%c6_127, %c0_128, %c0_129] : memref<9x2x2xbf16, #tpu.memory_space<vmem>>, vector<1x2x2xbf16>
    %132 = vector.shape_cast %131 : vector<1x2x2xbf16> to vector<2x2xbf16>
    %cst_130 = arith.constant dense<0.000000e+00> : vector<256x2xf32>
    %133 = tpu.matmul %130, %132, %cst_130 {dimension_numbers = #tpu.dot_dimension_numbers<[1], [0], [0], [1], [0, 0, 1, 1], [], []>} : vector<256x2xbf16>, vector<2x2xbf16>, vector<256x2xf32> -> vector<256x2xf32>
    %134 = arith.addf %127, %133 : vector<256x2xf32>
    %c2_131 = arith.constant 2 : index
    %c1_132 = arith.constant 1 : index
    %c0_133 = arith.constant 0 : index
    %135 = vector.load %arg13[%c2_131, %c1_132, %c0_133] : memref<18x18x2xf32, #tpu.memory_space<vmem>>, vector<16x16x2xf32>
    %136 = vector.shape_cast %135 : vector<16x16x2xf32> to vector<256x2xf32>
    %137 = arith.truncf %136 : vector<256x2xf32> to vector<256x2xbf16>
    %c7_134 = arith.constant 7 : index
    %c0_135 = arith.constant 0 : index
    %c0_136 = arith.constant 0 : index
    %138 = vector.load %arg9[%c7_134, %c0_135, %c0_136] : memref<9x2x2xbf16, #tpu.memory_space<vmem>>, vector<1x2x2xbf16>
    %139 = vector.shape_cast %138 : vector<1x2x2xbf16> to vector<2x2xbf16>
    %cst_137 = arith.constant dense<0.000000e+00> : vector<256x2xf32>
    %140 = tpu.matmul %137, %139, %cst_137 {dimension_numbers = #tpu.dot_dimension_numbers<[1], [0], [0], [1], [0, 0, 1, 1], [], []>} : vector<256x2xbf16>, vector<2x2xbf16>, vector<256x2xf32> -> vector<256x2xf32>
    %141 = arith.addf %134, %140 : vector<256x2xf32>
    %c2_138 = arith.constant 2 : index
    %c2_139 = arith.constant 2 : index
    %c0_140 = arith.constant 0 : index
    %142 = vector.load %arg13[%c2_138, %c2_139, %c0_140] : memref<18x18x2xf32, #tpu.memory_space<vmem>>, vector<16x16x2xf32>
    %143 = vector.shape_cast %142 : vector<16x16x2xf32> to vector<256x2xf32>
    %144 = arith.truncf %143 : vector<256x2xf32> to vector<256x2xbf16>
    %c8_141 = arith.constant 8 : index
    %c0_142 = arith.constant 0 : index
    %c0_143 = arith.constant 0 : index
    %145 = vector.load %arg9[%c8_141, %c0_142, %c0_143] : memref<9x2x2xbf16, #tpu.memory_space<vmem>>, vector<1x2x2xbf16>
    %146 = vector.shape_cast %145 : vector<1x2x2xbf16> to vector<2x2xbf16>
    %cst_144 = arith.constant dense<0.000000e+00> : vector<256x2xf32>
    %147 = tpu.matmul %144, %146, %cst_144 {dimension_numbers = #tpu.dot_dimension_numbers<[1], [0], [0], [1], [0, 0, 1, 1], [], []>} : vector<256x2xbf16>, vector<2x2xbf16>, vector<256x2xf32> -> vector<256x2xf32>
    %148 = arith.addf %141, %147 : vector<256x2xf32>
    %149 = arith.truncf %148 : vector<256x2xf32> to vector<256x2xbf16>
    %c0_145 = arith.constant 0 : index
    %c0_146 = arith.constant 0 : index
    %150 = vector.load %arg10[%c0_145, %c0_146] : memref<256x2xbf16, #tpu.memory_space<vmem>>, vector<256x2xbf16>
    tpu.vector_store %arg10[%c0_145, %c0_146], %149 {strides = array<i32>} : memref<256x2xbf16, #tpu.memory_space<vmem>>, vector<256x2xbf16>,
    %cst_147 = arith.constant dense<0.000000e+00> : vector<2xf32>
    %151 = vector.multi_reduction <add>, %148, %cst_147 [0] : vector<256x2xf32> to vector<2xf32>
    %152 = vector.shape_cast %151 : vector<2xf32> to vector<1x2xf32>
    %153 = arith.mulf %148, %148 : vector<256x2xf32>
    %cst_148 = arith.constant dense<0.000000e+00> : vector<2xf32>
    %154 = vector.multi_reduction <add>, %153, %cst_148 [0] : vector<256x2xf32> to vector<2xf32>
    %155 = vector.shape_cast %154 : vector<2xf32> to vector<1x2xf32>
    %156 = tpu.concatenate %152, %155 in 0 : vector<1x2xf32>, vector<1x2xf32> -> vector<2x2xf32>
    %157 = vector.shape_cast %156 : vector<2x2xf32> to vector<1x2x2xf32>
    %c0_149 = arith.constant 0 : index
    %c0_150 = arith.constant 0 : index
    %c0_151 = arith.constant 0 : index
    %158 = vector.load %arg11[%c0_149, %c0_150, %c0_151] : memref<1x2x2xf32, #tpu.memory_space<vmem>>, vector<1x2x2xf32>
    tpu.vector_store %arg11[%c0_149, %c0_150, %c0_151], %157 {strides = array<i32>} : memref<1x2x2xf32, #tpu.memory_space<vmem>>, vector<1x2x2xf32>,
    return
  }
  func.func @transform_0(%arg0: i32, %arg1: i32) -> (i32, i32, i32, i32) {
    %c0_i32 = arith.constant 0 : i32
    %c0_i32_0 = arith.constant 0 : i32
    %c0_i32_1 = arith.constant 0 : i32
    return %arg0, %arg1, %c0_i32, %c0_i32_0 : i32, i32, i32, i32
  }
  func.func @transform_1(%arg0: i32, %arg1: i32) -> (i32, i32, i32, i32) {
    %c16_i32 = arith.constant 16 : i32
    %0 = arith.muli %arg1, %c16_i32 : i32
    %c1_i32 = arith.constant 1 : i32
    %1 = arith.subi %0, %c1_i32 : i32
    %c0_i32 = arith.constant 0 : i32
    %2 = arith.maxsi %1, %c0_i32 : i32
    %c0_i32_0 = arith.constant 0 : i32
    %c0_i32_1 = arith.constant 0 : i32
    %c0_i32_2 = arith.constant 0 : i32
    return %arg0, %2, %c0_i32_0, %c0_i32_1 : i32, i32, i32, i32
  }
  func.func @transform_2(%arg0: i32, %arg1: i32) -> (i32, i32, i32, i32) {
    %c16_i32 = arith.constant 16 : i32
    %0 = arith.muli %arg1, %c16_i32 : i32
    %c16_i32_0 = arith.constant 16 : i32
    %1 = arith.addi %0, %c16_i32_0 : i32
    %c15_i32 = arith.constant 15 : i32
    %2 = arith.minsi %1, %c15_i32 : i32
    %c0_i32 = arith.constant 0 : i32
    %c0_i32_1 = arith.constant 0 : i32
    %c0_i32_2 = arith.constant 0 : i32
    return %arg0, %2, %c0_i32, %c0_i32_1 : i32, i32, i32, i32
  }
  func.func @transform_3(%arg0: i32, %arg1: i32) -> (i32, i32, i32) {
    %c0_i32 = arith.constant 0 : i32
    %c0_i32_0 = arith.constant 0 : i32
    %c0_i32_1 = arith.constant 0 : i32
    %c0_i32_2 = arith.constant 0 : i32
    return %c0_i32, %c0_i32_0, %c0_i32_1 : i32, i32, i32
  }
  func.func @transform_4(%arg0: i32, %arg1: i32) -> (i32, i32, i32, i32) {
    %c0_i32 = arith.constant 0 : i32
    %c0_i32_0 = arith.constant 0 : i32
    %c0_i32_1 = arith.constant 0 : i32
    return %arg0, %arg1, %c0_i32, %c0_i32_0 : i32, i32, i32, i32
  }
  func.func @transform_5(%arg0: i32, %arg1: i32) -> (i32, i32, i32, i32) {
    %c16_i32 = arith.constant 16 : i32
    %0 = arith.muli %arg1, %c16_i32 : i32
    %c1_i32 = arith.constant 1 : i32
    %1 = arith.subi %0, %c1_i32 : i32
    %c0_i32 = arith.constant 0 : i32
    %2 = arith.maxsi %1, %c0_i32 : i32
    %c0_i32_0 = arith.constant 0 : i32
    %c0_i32_1 = arith.constant 0 : i32
    %c0_i32_2 = arith.constant 0 : i32
    return %arg0, %2, %c0_i32_0, %c0_i32_1 : i32, i32, i32, i32
  }
  func.func @transform_6(%arg0: i32, %arg1: i32) -> (i32, i32, i32, i32) {
    %c16_i32 = arith.constant 16 : i32
    %0 = arith.muli %arg1, %c16_i32 : i32
    %c16_i32_0 = arith.constant 16 : i32
    %1 = arith.addi %0, %c16_i32_0 : i32
    %c15_i32 = arith.constant 15 : i32
    %2 = arith.minsi %1, %c15_i32 : i32
    %c0_i32 = arith.constant 0 : i32
    %c0_i32_1 = arith.constant 0 : i32
    %c0_i32_2 = arith.constant 0 : i32
    return %arg0, %2, %c0_i32, %c0_i32_1 : i32, i32, i32, i32
  }
  func.func @transform_7(%arg0: i32, %arg1: i32) -> (i32, i32, i32) {
    %c0_i32 = arith.constant 0 : i32
    %c0_i32_0 = arith.constant 0 : i32
    %c0_i32_1 = arith.constant 0 : i32
    %c0_i32_2 = arith.constant 0 : i32
    return %c0_i32, %c0_i32_0, %c0_i32_1 : i32, i32, i32
  }
  func.func @transform_8(%arg0: i32, %arg1: i32) -> (i32, i32) {
    %c1_i32 = arith.constant 1 : i32
    %0 = arith.muli %arg0, %c1_i32 : i32
    %1 = arith.addi %0, %arg1 : i32
    %c0_i32 = arith.constant 0 : i32
    %c0_i32_0 = arith.constant 0 : i32
    return %1, %c0_i32 : i32, i32
  }
  func.func @transform_9(%arg0: i32, %arg1: i32) -> (i32, i32, i32) {
    %c1_i32 = arith.constant 1 : i32
    %0 = arith.muli %arg0, %c1_i32 : i32
    %1 = arith.addi %0, %arg1 : i32
    %c0_i32 = arith.constant 0 : i32
    %c0_i32_0 = arith.constant 0 : i32
    %c0_i32_1 = arith.constant 0 : i32
    return %1, %c0_i32, %c0_i32_0 : i32, i32, i32
  }
}

module attributes {stable_mosaic.version = 11 : i64} {
  func.func @_bn_relu_kernel(%arg0: i32, %arg1: memref<512x2xbf16, #tpu.memory_space<vmem>>, %arg2: memref<1x2xf32, #tpu.memory_space<vmem>>, %arg3: memref<1x2xf32, #tpu.memory_space<vmem>>, %arg4: memref<512x2xf32, #tpu.memory_space<vmem>>) attributes {dimension_semantics = [#tpu.dimension_semantics<parallel>], iteration_bounds = array<i64: 1>, scalar_prefetch = 0 : i64, scratch_operands = 0 : i64, tpu.core_type = #tpu.core_type<tc>, window_params = [{transform_indices = @transform_0, window_bounds = array<i64: 512, 2>}, {pipeline_mode = #tpu.pipeline_mode<synchronous>, transform_indices = @transform_1, window_bounds = array<i64: 1, 2>}, {pipeline_mode = #tpu.pipeline_mode<synchronous>, transform_indices = @transform_2, window_bounds = array<i64: 1, 2>}, {transform_indices = @transform_3, window_bounds = array<i64: 512, 2>}]} {
    %c0 = arith.constant 0 : index
    %c0_0 = arith.constant 0 : index
    %0 = vector.load %arg1[%c0, %c0_0] : memref<512x2xbf16, #tpu.memory_space<vmem>>, vector<512x2xbf16>
    %1 = arith.extf %0 : vector<512x2xbf16> to vector<512x2xf32>
    %c0_1 = arith.constant 0 : index
    %c0_2 = arith.constant 0 : index
    %2 = vector.load %arg2[%c0_1, %c0_2] : memref<1x2xf32, #tpu.memory_space<vmem>>, vector<1x2xf32>
    %3 = vector.broadcast %2 : vector<1x2xf32> to vector<512x2xf32>
    %4 = arith.mulf %1, %3 : vector<512x2xf32>
    %c0_3 = arith.constant 0 : index
    %c0_4 = arith.constant 0 : index
    %5 = vector.load %arg3[%c0_3, %c0_4] : memref<1x2xf32, #tpu.memory_space<vmem>>, vector<1x2xf32>
    %6 = vector.broadcast %5 : vector<1x2xf32> to vector<512x2xf32>
    %7 = arith.addf %4, %6 : vector<512x2xf32>
    %cst = arith.constant 0.000000e+00 : f32
    %8 = vector.broadcast %cst : f32 to vector<512x2xf32>
    %9 = arith.maximumf %7, %8 : vector<512x2xf32>
    %c0_5 = arith.constant 0 : index
    %c0_6 = arith.constant 0 : index
    %10 = vector.load %arg4[%c0_5, %c0_6] : memref<512x2xf32, #tpu.memory_space<vmem>>, vector<512x2xf32>
    tpu.vector_store %arg4[%c0_5, %c0_6], %9 {strides = array<i32>} : memref<512x2xf32, #tpu.memory_space<vmem>>, vector<512x2xf32>,
    return
  }
  func.func @transform_0(%arg0: i32) -> (i32, i32) {
    %c0_i32 = arith.constant 0 : i32
    %c0_i32_0 = arith.constant 0 : i32
    return %arg0, %c0_i32 : i32, i32
  }
  func.func @transform_1(%arg0: i32) -> (i32, i32) {
    %c0_i32 = arith.constant 0 : i32
    %c0_i32_0 = arith.constant 0 : i32
    %c0_i32_1 = arith.constant 0 : i32
    return %c0_i32, %c0_i32_0 : i32, i32
  }
  func.func @transform_2(%arg0: i32) -> (i32, i32) {
    %c0_i32 = arith.constant 0 : i32
    %c0_i32_0 = arith.constant 0 : i32
    %c0_i32_1 = arith.constant 0 : i32
    return %c0_i32, %c0_i32_0 : i32, i32
  }
  func.func @transform_3(%arg0: i32) -> (i32, i32) {
    %c0_i32 = arith.constant 0 : i32
    %c0_i32_0 = arith.constant 0 : i32
    return %arg0, %c0_i32 : i32, i32
  }
}

module attributes {stable_mosaic.version = 11 : i64} {
  func.func @kernel(%arg0: i32, %arg1: i32, %arg2: memref<1x16x16x2xbf16, #tpu.memory_space<vmem>>, %arg3: memref<1x1x16x2xbf16, #tpu.memory_space<vmem>>, %arg4: memref<1x1x16x2xbf16, #tpu.memory_space<vmem>>, %arg5: memref<9x2x2xbf16, #tpu.memory_space<vmem>>, %arg6: memref<1x1x2xf32, #tpu.memory_space<vmem>>, %arg7: memref<1x1x2xf32, #tpu.memory_space<vmem>>, %arg8: memref<256x2xbf16, #tpu.memory_space<vmem>>, %arg9: memref<1x2x2xf32, #tpu.memory_space<vmem>>, %arg10: memref<18x18x2xf32, #tpu.memory_space<vmem>>) attributes {dimension_semantics = [#tpu.dimension_semantics<parallel>, #tpu.dimension_semantics<parallel>], iteration_bounds = array<i64: 2, 1>, scalar_prefetch = 0 : i64, scratch_operands = 1 : i64, tpu.core_type = #tpu.core_type<tc>, window_params = [{transform_indices = @transform_0, window_bounds = array<i64: 1, 16, 16, 2>}, {transform_indices = @transform_1, window_bounds = array<i64: 1, 1, 16, 2>}, {transform_indices = @transform_2, window_bounds = array<i64: 1, 1, 16, 2>}, {pipeline_mode = #tpu.pipeline_mode<synchronous>, transform_indices = @transform_3, window_bounds = array<i64: 9, 2, 2>}, {pipeline_mode = #tpu.pipeline_mode<synchronous>, transform_indices = @transform_4, window_bounds = array<i64: 1, 1, 2>}, {pipeline_mode = #tpu.pipeline_mode<synchronous>, transform_indices = @transform_5, window_bounds = array<i64: 1, 1, 2>}, {transform_indices = @transform_6, window_bounds = array<i64: 256, 2>}, {transform_indices = @transform_7, window_bounds = array<i64: 1, 2, 2>}]} {
    %c0 = arith.constant 0 : index
    %c0_0 = arith.constant 0 : index
    %c0_1 = arith.constant 0 : index
    %0 = vector.load %arg6[%c0, %c0_0, %c0_1] : memref<1x1x2xf32, #tpu.memory_space<vmem>>, vector<1x1x2xf32>
    %c0_2 = arith.constant 0 : index
    %c0_3 = arith.constant 0 : index
    %c0_4 = arith.constant 0 : index
    %1 = vector.load %arg7[%c0_2, %c0_3, %c0_4] : memref<1x1x2xf32, #tpu.memory_space<vmem>>, vector<1x1x2xf32>
    %cst = arith.constant 0.000000e+00 : f32
    %2 = vector.broadcast %cst : f32 to vector<18x18x2xf32>
    %c0_5 = arith.constant 0 : index
    %c0_6 = arith.constant 0 : index
    %c0_7 = arith.constant 0 : index
    %3 = vector.load %arg10[%c0_5, %c0_6, %c0_7] : memref<18x18x2xf32, #tpu.memory_space<vmem>>, vector<18x18x2xf32>
    tpu.vector_store %arg10[%c0_5, %c0_6, %c0_7], %2 {strides = array<i32>} : memref<18x18x2xf32, #tpu.memory_space<vmem>>, vector<18x18x2xf32>,
    %c0_8 = arith.constant 0 : index
    %c0_9 = arith.constant 0 : index
    %c0_10 = arith.constant 0 : index
    %c0_11 = arith.constant 0 : index
    %4 = vector.load %arg2[%c0_8, %c0_9, %c0_10, %c0_11] : memref<1x16x16x2xbf16, #tpu.memory_space<vmem>>, vector<1x16x16x2xbf16>
    %5 = vector.shape_cast %4 : vector<1x16x16x2xbf16> to vector<16x16x2xbf16>
    %6 = arith.extf %5 : vector<16x16x2xbf16> to vector<16x16x2xf32>
    %7 = vector.broadcast %0 : vector<1x1x2xf32> to vector<16x16x2xf32>
    %8 = arith.mulf %6, %7 : vector<16x16x2xf32>
    %9 = vector.broadcast %1 : vector<1x1x2xf32> to vector<16x16x2xf32>
    %10 = arith.addf %8, %9 : vector<16x16x2xf32>
    %cst_12 = arith.constant 0.000000e+00 : f32
    %11 = vector.broadcast %cst_12 : f32 to vector<16x16x2xf32>
    %12 = arith.maximumf %10, %11 : vector<16x16x2xf32>
    %c1 = arith.constant 1 : index
    %c1_13 = arith.constant 1 : index
    %c0_14 = arith.constant 0 : index
    %13 = vector.load %arg10[%c1, %c1_13, %c0_14] : memref<18x18x2xf32, #tpu.memory_space<vmem>>, vector<16x16x2xf32>
    tpu.vector_store %arg10[%c1, %c1_13, %c0_14], %12 {strides = array<i32>} : memref<18x18x2xf32, #tpu.memory_space<vmem>>, vector<16x16x2xf32>,
    %c0_i32 = arith.constant 0 : i32
    %14 = arith.cmpi sgt, %arg1, %c0_i32 : i32
    %15 = arith.extui %14 : i1 to i32
    %c0_i32_15 = arith.constant 0 : i32
    %16 = arith.cmpi ne, %15, %c0_i32_15 : i32
    scf.if %16 {
      %c0_81 = arith.constant 0 : index
      %c0_82 = arith.constant 0 : index
      %c0_83 = arith.constant 0 : index
      %c0_84 = arith.constant 0 : index
      %92 = vector.load %arg3[%c0_81, %c0_82, %c0_83, %c0_84] : memref<1x1x16x2xbf16, #tpu.memory_space<vmem>>, vector<1x1x16x2xbf16>
      %93 = vector.shape_cast %92 : vector<1x1x16x2xbf16> to vector<1x16x2xbf16>
      %94 = arith.extf %93 : vector<1x16x2xbf16> to vector<1x16x2xf32>
      %95 = vector.broadcast %0 : vector<1x1x2xf32> to vector<1x16x2xf32>
      %96 = arith.mulf %94, %95 : vector<1x16x2xf32>
      %97 = vector.broadcast %1 : vector<1x1x2xf32> to vector<1x16x2xf32>
      %98 = arith.addf %96, %97 : vector<1x16x2xf32>
      %cst_85 = arith.constant 0.000000e+00 : f32
      %99 = vector.broadcast %cst_85 : f32 to vector<1x16x2xf32>
      %100 = arith.maximumf %98, %99 : vector<1x16x2xf32>
      %c0_86 = arith.constant 0 : index
      %c1_87 = arith.constant 1 : index
      %c0_88 = arith.constant 0 : index
      %101 = vector.load %arg10[%c0_86, %c1_87, %c0_88] : memref<18x18x2xf32, #tpu.memory_space<vmem>>, vector<1x16x2xf32>
      tpu.vector_store %arg10[%c0_86, %c1_87, %c0_88], %100 {strides = array<i32>} : memref<18x18x2xf32, #tpu.memory_space<vmem>>, vector<1x16x2xf32>,
    } else {
    }
    %c0_i32_16 = arith.constant 0 : i32
    %17 = arith.cmpi slt, %arg1, %c0_i32_16 : i32
    %18 = arith.extui %17 : i1 to i32
    %c0_i32_17 = arith.constant 0 : i32
    %19 = arith.cmpi ne, %18, %c0_i32_17 : i32
    scf.if %19 {
      %c0_81 = arith.constant 0 : index
      %c0_82 = arith.constant 0 : index
      %c0_83 = arith.constant 0 : index
      %c0_84 = arith.constant 0 : index
      %92 = vector.load %arg4[%c0_81, %c0_82, %c0_83, %c0_84] : memref<1x1x16x2xbf16, #tpu.memory_space<vmem>>, vector<1x1x16x2xbf16>
      %93 = vector.shape_cast %92 : vector<1x1x16x2xbf16> to vector<1x16x2xbf16>
      %94 = arith.extf %93 : vector<1x16x2xbf16> to vector<1x16x2xf32>
      %95 = vector.broadcast %0 : vector<1x1x2xf32> to vector<1x16x2xf32>
      %96 = arith.mulf %94, %95 : vector<1x16x2xf32>
      %97 = vector.broadcast %1 : vector<1x1x2xf32> to vector<1x16x2xf32>
      %98 = arith.addf %96, %97 : vector<1x16x2xf32>
      %cst_85 = arith.constant 0.000000e+00 : f32
      %99 = vector.broadcast %cst_85 : f32 to vector<1x16x2xf32>
      %100 = arith.maximumf %98, %99 : vector<1x16x2xf32>
      %c17 = arith.constant 17 : index
      %c1_86 = arith.constant 1 : index
      %c0_87 = arith.constant 0 : index
      %101 = vector.load %arg10[%c17, %c1_86, %c0_87] : memref<18x18x2xf32, #tpu.memory_space<vmem>>, vector<1x16x2xf32>
      tpu.vector_store %arg10[%c17, %c1_86, %c0_87], %100 {strides = array<i32>} : memref<18x18x2xf32, #tpu.memory_space<vmem>>, vector<1x16x2xf32>,
    } else {
    }
    %c0_18 = arith.constant 0 : index
    %c0_19 = arith.constant 0 : index
    %c0_20 = arith.constant 0 : index
    %20 = vector.load %arg10[%c0_18, %c0_19, %c0_20] : memref<18x18x2xf32, #tpu.memory_space<vmem>>, vector<16x16x2xf32>
    %21 = vector.shape_cast %20 : vector<16x16x2xf32> to vector<256x2xf32>
    %22 = arith.truncf %21 : vector<256x2xf32> to vector<256x2xbf16>
    %c0_21 = arith.constant 0 : index
    %c0_22 = arith.constant 0 : index
    %c0_23 = arith.constant 0 : index
    %23 = vector.load %arg5[%c0_21, %c0_22, %c0_23] : memref<9x2x2xbf16, #tpu.memory_space<vmem>>, vector<1x2x2xbf16>
    %24 = vector.shape_cast %23 : vector<1x2x2xbf16> to vector<2x2xbf16>
    %cst_24 = arith.constant dense<0.000000e+00> : vector<256x2xf32>
    %25 = tpu.matmul %22, %24, %cst_24 {dimension_numbers = #tpu.dot_dimension_numbers<[1], [0], [0], [1], [0, 0, 1, 1], [], []>} : vector<256x2xbf16>, vector<2x2xbf16>, vector<256x2xf32> -> vector<256x2xf32>
    %c0_25 = arith.constant 0 : index
    %c1_26 = arith.constant 1 : index
    %c0_27 = arith.constant 0 : index
    %26 = vector.load %arg10[%c0_25, %c1_26, %c0_27] : memref<18x18x2xf32, #tpu.memory_space<vmem>>, vector<16x16x2xf32>
    %27 = vector.shape_cast %26 : vector<16x16x2xf32> to vector<256x2xf32>
    %28 = arith.truncf %27 : vector<256x2xf32> to vector<256x2xbf16>
    %c1_28 = arith.constant 1 : index
    %c0_29 = arith.constant 0 : index
    %c0_30 = arith.constant 0 : index
    %29 = vector.load %arg5[%c1_28, %c0_29, %c0_30] : memref<9x2x2xbf16, #tpu.memory_space<vmem>>, vector<1x2x2xbf16>
    %30 = vector.shape_cast %29 : vector<1x2x2xbf16> to vector<2x2xbf16>
    %cst_31 = arith.constant dense<0.000000e+00> : vector<256x2xf32>
    %31 = tpu.matmul %28, %30, %cst_31 {dimension_numbers = #tpu.dot_dimension_numbers<[1], [0], [0], [1], [0, 0, 1, 1], [], []>} : vector<256x2xbf16>, vector<2x2xbf16>, vector<256x2xf32> -> vector<256x2xf32>
    %32 = arith.addf %25, %31 : vector<256x2xf32>
    %c0_32 = arith.constant 0 : index
    %c2 = arith.constant 2 : index
    %c0_33 = arith.constant 0 : index
    %33 = vector.load %arg10[%c0_32, %c2, %c0_33] : memref<18x18x2xf32, #tpu.memory_space<vmem>>, vector<16x16x2xf32>
    %34 = vector.shape_cast %33 : vector<16x16x2xf32> to vector<256x2xf32>
    %35 = arith.truncf %34 : vector<256x2xf32> to vector<256x2xbf16>
    %c2_34 = arith.constant 2 : index
    %c0_35 = arith.constant 0 : index
    %c0_36 = arith.constant 0 : index
    %36 = vector.load %arg5[%c2_34, %c0_35, %c0_36] : memref<9x2x2xbf16, #tpu.memory_space<vmem>>, vector<1x2x2xbf16>
    %37 = vector.shape_cast %36 : vector<1x2x2xbf16> to vector<2x2xbf16>
    %cst_37 = arith.constant dense<0.000000e+00> : vector<256x2xf32>
    %38 = tpu.matmul %35, %37, %cst_37 {dimension_numbers = #tpu.dot_dimension_numbers<[1], [0], [0], [1], [0, 0, 1, 1], [], []>} : vector<256x2xbf16>, vector<2x2xbf16>, vector<256x2xf32> -> vector<256x2xf32>
    %39 = arith.addf %32, %38 : vector<256x2xf32>
    %c1_38 = arith.constant 1 : index
    %c0_39 = arith.constant 0 : index
    %c0_40 = arith.constant 0 : index
    %40 = vector.load %arg10[%c1_38, %c0_39, %c0_40] : memref<18x18x2xf32, #tpu.memory_space<vmem>>, vector<16x16x2xf32>
    %41 = vector.shape_cast %40 : vector<16x16x2xf32> to vector<256x2xf32>
    %42 = arith.truncf %41 : vector<256x2xf32> to vector<256x2xbf16>
    %c3 = arith.constant 3 : index
    %c0_41 = arith.constant 0 : index
    %c0_42 = arith.constant 0 : index
    %43 = vector.load %arg5[%c3, %c0_41, %c0_42] : memref<9x2x2xbf16, #tpu.memory_space<vmem>>, vector<1x2x2xbf16>
    %44 = vector.shape_cast %43 : vector<1x2x2xbf16> to vector<2x2xbf16>
    %cst_43 = arith.constant dense<0.000000e+00> : vector<256x2xf32>
    %45 = tpu.matmul %42, %44, %cst_43 {dimension_numbers = #tpu.dot_dimension_numbers<[1], [0], [0], [1], [0, 0, 1, 1], [], []>} : vector<256x2xbf16>, vector<2x2xbf16>, vector<256x2xf32> -> vector<256x2xf32>
    %46 = arith.addf %39, %45 : vector<256x2xf32>
    %c1_44 = arith.constant 1 : index
    %c1_45 = arith.constant 1 : index
    %c0_46 = arith.constant 0 : index
    %47 = vector.load %arg10[%c1_44, %c1_45, %c0_46] : memref<18x18x2xf32, #tpu.memory_space<vmem>>, vector<16x16x2xf32>
    %48 = vector.shape_cast %47 : vector<16x16x2xf32> to vector<256x2xf32>
    %49 = arith.truncf %48 : vector<256x2xf32> to vector<256x2xbf16>
    %c4 = arith.constant 4 : index
    %c0_47 = arith.constant 0 : index
    %c0_48 = arith.constant 0 : index
    %50 = vector.load %arg5[%c4, %c0_47, %c0_48] : memref<9x2x2xbf16, #tpu.memory_space<vmem>>, vector<1x2x2xbf16>
    %51 = vector.shape_cast %50 : vector<1x2x2xbf16> to vector<2x2xbf16>
    %cst_49 = arith.constant dense<0.000000e+00> : vector<256x2xf32>
    %52 = tpu.matmul %49, %51, %cst_49 {dimension_numbers = #tpu.dot_dimension_numbers<[1], [0], [0], [1], [0, 0, 1, 1], [], []>} : vector<256x2xbf16>, vector<2x2xbf16>, vector<256x2xf32> -> vector<256x2xf32>
    %53 = arith.addf %46, %52 : vector<256x2xf32>
    %c1_50 = arith.constant 1 : index
    %c2_51 = arith.constant 2 : index
    %c0_52 = arith.constant 0 : index
    %54 = vector.load %arg10[%c1_50, %c2_51, %c0_52] : memref<18x18x2xf32, #tpu.memory_space<vmem>>, vector<16x16x2xf32>
    %55 = vector.shape_cast %54 : vector<16x16x2xf32> to vector<256x2xf32>
    %56 = arith.truncf %55 : vector<256x2xf32> to vector<256x2xbf16>
    %c5 = arith.constant 5 : index
    %c0_53 = arith.constant 0 : index
    %c0_54 = arith.constant 0 : index
    %57 = vector.load %arg5[%c5, %c0_53, %c0_54] : memref<9x2x2xbf16, #tpu.memory_space<vmem>>, vector<1x2x2xbf16>
    %58 = vector.shape_cast %57 : vector<1x2x2xbf16> to vector<2x2xbf16>
    %cst_55 = arith.constant dense<0.000000e+00> : vector<256x2xf32>
    %59 = tpu.matmul %56, %58, %cst_55 {dimension_numbers = #tpu.dot_dimension_numbers<[1], [0], [0], [1], [0, 0, 1, 1], [], []>} : vector<256x2xbf16>, vector<2x2xbf16>, vector<256x2xf32> -> vector<256x2xf32>
    %60 = arith.addf %53, %59 : vector<256x2xf32>
    %c2_56 = arith.constant 2 : index
    %c0_57 = arith.constant 0 : index
    %c0_58 = arith.constant 0 : index
    %61 = vector.load %arg10[%c2_56, %c0_57, %c0_58] : memref<18x18x2xf32, #tpu.memory_space<vmem>>, vector<16x16x2xf32>
    %62 = vector.shape_cast %61 : vector<16x16x2xf32> to vector<256x2xf32>
    %63 = arith.truncf %62 : vector<256x2xf32> to vector<256x2xbf16>
    %c6 = arith.constant 6 : index
    %c0_59 = arith.constant 0 : index
    %c0_60 = arith.constant 0 : index
    %64 = vector.load %arg5[%c6, %c0_59, %c0_60] : memref<9x2x2xbf16, #tpu.memory_space<vmem>>, vector<1x2x2xbf16>
    %65 = vector.shape_cast %64 : vector<1x2x2xbf16> to vector<2x2xbf16>
    %cst_61 = arith.constant dense<0.000000e+00> : vector<256x2xf32>
    %66 = tpu.matmul %63, %65, %cst_61 {dimension_numbers = #tpu.dot_dimension_numbers<[1], [0], [0], [1], [0, 0, 1, 1], [], []>} : vector<256x2xbf16>, vector<2x2xbf16>, vector<256x2xf32> -> vector<256x2xf32>
    %67 = arith.addf %60, %66 : vector<256x2xf32>
    %c2_62 = arith.constant 2 : index
    %c1_63 = arith.constant 1 : index
    %c0_64 = arith.constant 0 : index
    %68 = vector.load %arg10[%c2_62, %c1_63, %c0_64] : memref<18x18x2xf32, #tpu.memory_space<vmem>>, vector<16x16x2xf32>
    %69 = vector.shape_cast %68 : vector<16x16x2xf32> to vector<256x2xf32>
    %70 = arith.truncf %69 : vector<256x2xf32> to vector<256x2xbf16>
    %c7 = arith.constant 7 : index
    %c0_65 = arith.constant 0 : index
    %c0_66 = arith.constant 0 : index
    %71 = vector.load %arg5[%c7, %c0_65, %c0_66] : memref<9x2x2xbf16, #tpu.memory_space<vmem>>, vector<1x2x2xbf16>
    %72 = vector.shape_cast %71 : vector<1x2x2xbf16> to vector<2x2xbf16>
    %cst_67 = arith.constant dense<0.000000e+00> : vector<256x2xf32>
    %73 = tpu.matmul %70, %72, %cst_67 {dimension_numbers = #tpu.dot_dimension_numbers<[1], [0], [0], [1], [0, 0, 1, 1], [], []>} : vector<256x2xbf16>, vector<2x2xbf16>, vector<256x2xf32> -> vector<256x2xf32>
    %74 = arith.addf %67, %73 : vector<256x2xf32>
    %c2_68 = arith.constant 2 : index
    %c2_69 = arith.constant 2 : index
    %c0_70 = arith.constant 0 : index
    %75 = vector.load %arg10[%c2_68, %c2_69, %c0_70] : memref<18x18x2xf32, #tpu.memory_space<vmem>>, vector<16x16x2xf32>
    %76 = vector.shape_cast %75 : vector<16x16x2xf32> to vector<256x2xf32>
    %77 = arith.truncf %76 : vector<256x2xf32> to vector<256x2xbf16>
    %c8 = arith.constant 8 : index
    %c0_71 = arith.constant 0 : index
    %c0_72 = arith.constant 0 : index
    %78 = vector.load %arg5[%c8, %c0_71, %c0_72] : memref<9x2x2xbf16, #tpu.memory_space<vmem>>, vector<1x2x2xbf16>
    %79 = vector.shape_cast %78 : vector<1x2x2xbf16> to vector<2x2xbf16>
    %cst_73 = arith.constant dense<0.000000e+00> : vector<256x2xf32>
    %80 = tpu.matmul %77, %79, %cst_73 {dimension_numbers = #tpu.dot_dimension_numbers<[1], [0], [0], [1], [0, 0, 1, 1], [], []>} : vector<256x2xbf16>, vector<2x2xbf16>, vector<256x2xf32> -> vector<256x2xf32>
    %81 = arith.addf %74, %80 : vector<256x2xf32>
    %82 = arith.truncf %81 : vector<256x2xf32> to vector<256x2xbf16>
    %c0_74 = arith.constant 0 : index
    %c0_75 = arith.constant 0 : index
    %83 = vector.load %arg8[%c0_74, %c0_75] : memref<256x2xbf16, #tpu.memory_space<vmem>>, vector<256x2xbf16>
    tpu.vector_store %arg8[%c0_74, %c0_75], %82 {strides = array<i32>} : memref<256x2xbf16, #tpu.memory_space<vmem>>, vector<256x2xbf16>,
    %cst_76 = arith.constant dense<0.000000e+00> : vector<2xf32>
    %84 = vector.multi_reduction <add>, %81, %cst_76 [0] : vector<256x2xf32> to vector<2xf32>
    %85 = vector.shape_cast %84 : vector<2xf32> to vector<1x2xf32>
    %86 = arith.mulf %81, %81 : vector<256x2xf32>
    %cst_77 = arith.constant dense<0.000000e+00> : vector<2xf32>
    %87 = vector.multi_reduction <add>, %86, %cst_77 [0] : vector<256x2xf32> to vector<2xf32>
    %88 = vector.shape_cast %87 : vector<2xf32> to vector<1x2xf32>
    %89 = tpu.concatenate %85, %88 in 0 : vector<1x2xf32>, vector<1x2xf32> -> vector<2x2xf32>
    %90 = vector.shape_cast %89 : vector<2x2xf32> to vector<1x2x2xf32>
    %c0_78 = arith.constant 0 : index
    %c0_79 = arith.constant 0 : index
    %c0_80 = arith.constant 0 : index
    %91 = vector.load %arg9[%c0_78, %c0_79, %c0_80] : memref<1x2x2xf32, #tpu.memory_space<vmem>>, vector<1x2x2xf32>
    tpu.vector_store %arg9[%c0_78, %c0_79, %c0_80], %90 {strides = array<i32>} : memref<1x2x2xf32, #tpu.memory_space<vmem>>, vector<1x2x2xf32>,
    return
  }
  func.func @transform_0(%arg0: i32, %arg1: i32) -> (i32, i32, i32, i32) {
    %c0_i32 = arith.constant 0 : i32
    %c0_i32_0 = arith.constant 0 : i32
    %c0_i32_1 = arith.constant 0 : i32
    return %arg0, %arg1, %c0_i32, %c0_i32_0 : i32, i32, i32, i32
  }
  func.func @transform_1(%arg0: i32, %arg1: i32) -> (i32, i32, i32, i32) {
    %c16_i32 = arith.constant 16 : i32
    %0 = arith.muli %arg1, %c16_i32 : i32
    %c1_i32 = arith.constant 1 : i32
    %1 = arith.subi %0, %c1_i32 : i32
    %c0_i32 = arith.constant 0 : i32
    %2 = arith.maxsi %1, %c0_i32 : i32
    %c0_i32_0 = arith.constant 0 : i32
    %c0_i32_1 = arith.constant 0 : i32
    %c0_i32_2 = arith.constant 0 : i32
    return %arg0, %2, %c0_i32_0, %c0_i32_1 : i32, i32, i32, i32
  }
  func.func @transform_2(%arg0: i32, %arg1: i32) -> (i32, i32, i32, i32) {
    %c16_i32 = arith.constant 16 : i32
    %0 = arith.muli %arg1, %c16_i32 : i32
    %c16_i32_0 = arith.constant 16 : i32
    %1 = arith.addi %0, %c16_i32_0 : i32
    %c15_i32 = arith.constant 15 : i32
    %2 = arith.minsi %1, %c15_i32 : i32
    %c0_i32 = arith.constant 0 : i32
    %c0_i32_1 = arith.constant 0 : i32
    %c0_i32_2 = arith.constant 0 : i32
    return %arg0, %2, %c0_i32, %c0_i32_1 : i32, i32, i32, i32
  }
  func.func @transform_3(%arg0: i32, %arg1: i32) -> (i32, i32, i32) {
    %c0_i32 = arith.constant 0 : i32
    %c0_i32_0 = arith.constant 0 : i32
    %c0_i32_1 = arith.constant 0 : i32
    %c0_i32_2 = arith.constant 0 : i32
    return %c0_i32, %c0_i32_0, %c0_i32_1 : i32, i32, i32
  }
  func.func @transform_4(%arg0: i32, %arg1: i32) -> (i32, i32, i32) {
    %c0_i32 = arith.constant 0 : i32
    %c0_i32_0 = arith.constant 0 : i32
    %c0_i32_1 = arith.constant 0 : i32
    %c0_i32_2 = arith.constant 0 : i32
    return %c0_i32, %c0_i32_0, %c0_i32_1 : i32, i32, i32
  }
  func.func @transform_5(%arg0: i32, %arg1: i32) -> (i32, i32, i32) {
    %c0_i32 = arith.constant 0 : i32
    %c0_i32_0 = arith.constant 0 : i32
    %c0_i32_1 = arith.constant 0 : i32
    %c0_i32_2 = arith.constant 0 : i32
    return %c0_i32, %c0_i32_0, %c0_i32_1 : i32, i32, i32
  }
  func.func @transform_6(%arg0: i32, %arg1: i32) -> (i32, i32) {
    %c1_i32 = arith.constant 1 : i32
    %0 = arith.muli %arg0, %c1_i32 : i32
    %1 = arith.addi %0, %arg1 : i32
    %c0_i32 = arith.constant 0 : i32
    %c0_i32_0 = arith.constant 0 : i32
    return %1, %c0_i32 : i32, i32
  }
  func.func @transform_7(%arg0: i32, %arg1: i32) -> (i32, i32, i32) {
    %c1_i32 = arith.constant 1 : i32
    %0 = arith.muli %arg0, %c1_i32 : i32
    %1 = arith.addi %0, %arg1 : i32
    %c0_i32 = arith.constant 0 : i32
    %c0_i32_0 = arith.constant 0 : i32
    %c0_i32_1 = arith.constant 0 : i32
    return %1, %c0_i32, %c0_i32_0 : i32, i32, i32
  }
}

</mosaic_0001>

<bundles_post_ra>
// kernel: tile.9
= control target key start
LH: loop header
LB: loop body
LE: loop exit
PB: predicated region body
PF: predicated region fallthrough
CT: control target
= control target key end

     0   :  { %vm7_vm0 = vcmask 15360   ;;  %s37_s8 = smov 2   ;;  %s38_s9 = smov 4   ;;  %vm13_vm1 = vcmask 64560   ;;  %vm19_vm2 = vcmask 48160   ;;  %vm25_vm3 = vcmask 31760   ;;  %s55_s0 = inlined_call_operand.vmem [shape: f32[4,2], index: 0, kind: input, shape index: {}]   ;;  %s56_s1 = inlined_call_operand.vmem [shape: f32[1,8], index: 1, kind: output, shape index: {}]  }
   0x1   :  { %v4_v0 = vld [vmem:[%s55_s0] sm:$0xf]  ;;  %s36_s0 = smov 6  }
   0x2   :  { %5 = vst [vmem:[#allocation1] sm:$0xf] %v4_v0 }
   0x9   :  { %v10_v1 = vld [vmem:[#allocation1 + $0x3] sm:$0x1]   ;;  %v22_v2 = vld [vmem:[#allocation1 + $0x1] sm:$0x1]   ;;  %v6_v3 = vld [vmem:[#allocation1] sm:$0x1]  }
   0xa   :  { %11 = vrot.lane.b32.xlu0 %v10_v1, %s36_s0  ;;  %23 = vrot.lane.b32.xlu1 %v22_v2, %s37_s8  ;;  %v16_v4 = vld [vmem:[#allocation1 + $0x2] sm:$0x1]   ;;  %8 = vst.msk [vmem:[#allocation0] sm:$0x1] %vm7_vm0, %v6_v3  }
   0xe   :  { %17 = vrot.lane.b32.xlu0 %v16_v4, %s38_s9 }
  0x7c   :  { %v12_v5 = vpop.permute.xlu0 %11   ;;  %v24_v6 = vpop.permute.xlu1 %23  }
  0x7d   :  { %14 = vst.msk [vmem:[#allocation0] sm:$0x1] %vm13_vm1, %v12_v5  }
  0x80   :  { %v18_v7 = vpop.permute.xlu0 %17  }
  0x81   :  { %20 = vst.msk [vmem:[#allocation0] sm:$0x1] %vm19_vm2, %v18_v7  }
  0x82   :  { %26 = vst.msk [vmem:[#allocation0] sm:$0x1] %vm25_vm3, %v24_v6  }
  0x89   :  { %v30_v8 = vld [vmem:[#allocation0] sm:$0x1] }
  0x8a   :  { %32 = vst [vmem:[%s56_s1] sm:$0x1] %v30_v8 }

// kernel: tile.8
= control target key start
LH: loop header
LB: loop body
LE: loop exit
PB: predicated region body
PF: predicated region fallthrough
CT: control target
= control target key end

     0   :  { %s22_s0 = inlined_call_operand.vmem [shape: f32[2], index: 0, kind: input, shape index: {}]   ;;  %s23_s1 = inlined_call_operand.vmem [shape: f32[4,2], index: 1, kind: output, shape index: {}]  }
   0x1   :  { %v4_v0 = vld [vmem:[%s22_s0] ss:$0 sm:$0xff] }
   0x2   :  { %5 = vst [vmem:[%s23_s1] sm:$0xf] %v4_v0 }

// kernel: up_forward.4
= control target key start
LH: loop header
LB: loop body
LE: loop exit
PB: predicated region body
PF: predicated region fallthrough
CT: control target
= control target key end

     0   :  { %vm104_vm0 = vcmask 1041408   ;;  %vm79_vm1 = vcmask 31744   ;;  %vm269_vm2 = vcmask 60416   ;;  %s500_s1 = inlined_call_operand.vmem [shape: bf16[4,8], index: 1, kind: input, shape index: {}]   ;;  %s501_s0 = inlined_call_operand.vmem [shape: bf16[128,4], index: 0, kind: input, shape index: {}]   ;;  %s502_s2 = inlined_call_operand.vmem [shape: f32[1,8], index: 2, kind: input, shape index: {}]   ;;  %s503_s3 = inlined_call_operand.vmem [shape: bf16[128,8], index: 3, kind: output, shape index: {}]  }
   0x1   :  { %v31_v0 = vld [vmem:[%s500_s1] sm:$0x3]  ;;  %v372_v4 = vld [vmem:[%s501_s0 + $0x8] sm:$0xff]   ;;  %v374_v6 = vld [vmem:[%s501_s0 + $0x10] sm:$0xff]  }
   0x2   :  { %368 = vmatprep.subr.msk.bf16.mxu0 %vm104_vm0, %v31_v0  ;;  %369 = vmatprep.subr.msk.bf16.mxu1 %vm104_vm0, %v31_v0  ;;  %v106_v1 = vsel %vm104_vm0, %v31_v0, 0  ;;  %v370_v2 = vld [vmem:[%s501_s0] sm:$0xff]   ;;  %v373_v5 = vld [vmem:[%s501_s0 + $0x28] sm:$0xff]   ;;  %v375_v7 = vld [vmem:[%s501_s0 + $0x30] sm:$0xff]  }
   0x3   :  { %349 = vmatpush3.bf16.msra.mxu0 %v106_v1  ;;  %367 = vmatpush3.bf16.msra.mxu1 %v106_v1  ;;  %v371_v3 = vld [vmem:[%s501_s0 + $0x20] sm:$0xff]   ;;  %v376_v8 = vld [vmem:[%s501_s0 + $0x18] sm:$0xff]  }
   0x4   :  { %350 = vmatprep.mubr.msk.bf16.mxu0 %vm79_vm1, %v370_v2  ;;  %358 = vmatprep.mubr.msk.bf16.mxu1 %vm79_vm1, %v371_v3  ;;  %v377_v9 = vld [vmem:[%s501_s0 + $0x38] sm:$0xff]   ;;  %v290_v10 = vld [vmem:[%s502_s2] ss:$0 sm:$0xff] }
   0x6   :  { %351 = vmatmul.mubr.msk.bf16.vlgmr.msra.gmra.mrb[0].mxu0 %vm79_vm1, %v372_v4  ;;  %359 = vmatmul.mubr.msk.bf16.vlgmr.msra.gmra.mrb[0].mxu1 %vm79_vm1, %v373_v5 }
   0x7   :  { %354 = vmatprep.mubr.msk.bf16.mxu0 %vm79_vm1, %v374_v6  ;;  %362 = vmatprep.mubr.msk.bf16.mxu1 %vm79_vm1, %v375_v7 }
   0xe   :  { %355 = vmatmul.mubr.msk.bf16.gmra.mrb[4].mxu0 %vm79_vm1, %v376_v8  ;;  %363 = vmatmul.mubr.msk.bf16.gmra.mrb[4].mxu1 %vm79_vm1, %v377_v9 }
  0xd9   :  { %v352_v11 = vpop.f32.mrb[0].mxu0  ;;  %v360_v13 = vpop.f32.mrb[0].mxu1 }
  0xda   :  { %v151_v12 = vadd.f32 %v352_v11, %v290_v10  ;;  %v142_v14 = vpop.f32.mrb[1].mxu0  ;;  %v183_v15 = vadd.f32 %v360_v13, %v290_v10  ;;  %v174_v17 = vpop.f32.mrb[1].mxu1 }
  0xdb   :  { %v143_v16 = vadd.f32 %v290_v10, %v142_v14  ;;  %v353_v18 = vpop.f32.mrb[2].mxu0  ;;  %v175_v20 = vadd.f32 %v290_v10, %v174_v17  ;;  %v361_v22 = vpop.f32.mrb[2].mxu1 }
  0xdc   :  { %v325_v19 = vpack.c.bf16 %v151_v12, %v151_v12  ;;  %v154_v21 = vadd.f32 %v353_v18, %v290_v10  ;;  %v145_v23 = vpop.f32.mrb[3].mxu0  ;;  %v333_v24 = vpack.c.bf16 %v183_v15, %v183_v15  ;;  %v186_v26 = vadd.f32 %v361_v22, %v290_v10  ;;  %v177_v28 = vpop.f32.mrb[3].mxu1 }
  0xdd   :  { %v323_v25 = vpack.c.bf16 %v143_v16, %v143_v16  ;;  %v146_v27 = vadd.f32 %v290_v10, %v145_v23  ;;  %v331_v29 = vpack.c.bf16 %v175_v20, %v175_v20  ;;  %v178_v31 = vadd.f32 %v290_v10, %v177_v28 }
  0xde   :  { %272 = vst.msk [vmem:[%s503_s3 + $0x8] sm:$0xf] %vm269_vm2, %v325_v19  ;;  %v326_v30 = vpack.c.bf16 %v154_v21, %v154_v21  ;;  %280 = vst.msk [vmem:[%s503_s3 + $0x28] sm:$0xf] %vm269_vm2, %v333_v24  ;;  %v334_v32 = vpack.c.bf16 %v186_v26, %v186_v26 }
  0xdf   :  { %270 = vst.msk [vmem:[%s503_s3] sm:$0xf] %vm269_vm2, %v323_v25  ;;  %v324_v33 = vpack.c.bf16 %v146_v27, %v146_v27  ;;  %278 = vst.msk [vmem:[%s503_s3 + $0x20] sm:$0xf] %vm269_vm2, %v331_v29  ;;  %v332_v34 = vpack.c.bf16 %v178_v31, %v178_v31 }
  0xe0   :  { %273 = vst.msk [vmem:[%s503_s3 + $0xc] sm:$0xf] %vm269_vm2, %v326_v30  ;;  %281 = vst.msk [vmem:[%s503_s3 + $0x2c] sm:$0xf] %vm269_vm2, %v334_v32 }
  0xe1   :  { %271 = vst.msk [vmem:[%s503_s3 + $0x4] sm:$0xf] %vm269_vm2, %v324_v33  ;;  %v356_v35 = vpop.f32.mrb[4].mxu0  ;;  %279 = vst.msk [vmem:[%s503_s3 + $0x24] sm:$0xf] %vm269_vm2, %v332_v34  ;;  %v364_v37 = vpop.f32.mrb[4].mxu1 }
  0xe2   :  { %v167_v36 = vadd.f32 %v356_v35, %v290_v10  ;;  %v158_v38 = vpop.f32.mrb[5].mxu0  ;;  %v199_v39 = vadd.f32 %v364_v37, %v290_v10  ;;  %v190_v41 = vpop.f32.mrb[5].mxu1 }
  0xe3   :  { %v159_v40 = vadd.f32 %v290_v10, %v158_v38  ;;  %v357_v42 = vpop.f32.mrb[6].mxu0  ;;  %v191_v44 = vadd.f32 %v290_v10, %v190_v41  ;;  %v365_v46 = vpop.f32.mrb[6].mxu1 }
  0xe4   :  { %v329_v43 = vpack.c.bf16 %v167_v36, %v167_v36  ;;  %v170_v45 = vadd.f32 %v357_v42, %v290_v10  ;;  %v161_v47 = vpop.f32.mrb[7].mxu0  ;;  %v337_v48 = vpack.c.bf16 %v199_v39, %v199_v39  ;;  %v202_v50 = vadd.f32 %v365_v46, %v290_v10  ;;  %v193_v52 = vpop.f32.mrb[7].mxu1 }
  0xe5   :  { %v327_v49 = vpack.c.bf16 %v159_v40, %v159_v40  ;;  %v162_v51 = vadd.f32 %v290_v10, %v161_v47  ;;  %v335_v53 = vpack.c.bf16 %v191_v44, %v191_v44  ;;  %v194_v55 = vadd.f32 %v290_v10, %v193_v52 }
  0xe6   :  { %276 = vst.msk [vmem:[%s503_s3 + $0x18] sm:$0xf] %vm269_vm2, %v329_v43  ;;  %v330_v54 = vpack.c.bf16 %v170_v45, %v170_v45  ;;  %284 = vst.msk [vmem:[%s503_s3 + $0x38] sm:$0xf] %vm269_vm2, %v337_v48  ;;  %v338_v56 = vpack.c.bf16 %v202_v50, %v202_v50 }
  0xe7   :  { %274 = vst.msk [vmem:[%s503_s3 + $0x10] sm:$0xf] %vm269_vm2, %v327_v49  ;;  %v328_v57 = vpack.c.bf16 %v162_v51, %v162_v51  ;;  %282 = vst.msk [vmem:[%s503_s3 + $0x30] sm:$0xf] %vm269_vm2, %v335_v53  ;;  %v336_v58 = vpack.c.bf16 %v194_v55, %v194_v55 }
  0xe8   :  { %277 = vst.msk [vmem:[%s503_s3 + $0x1c] sm:$0xf] %vm269_vm2, %v330_v54  ;;  %285 = vst.msk [vmem:[%s503_s3 + $0x3c] sm:$0xf] %vm269_vm2, %v338_v56 }
  0xe9   :  { %275 = vst.msk [vmem:[%s503_s3 + $0x14] sm:$0xf] %vm269_vm2, %v328_v57  ;;  %283 = vst.msk [vmem:[%s503_s3 + $0x34] sm:$0xf] %vm269_vm2, %v336_v58 }

// kernel: up_forward.7
= control target key start
LH: loop header
LB: loop body
LE: loop exit
PB: predicated region body
PF: predicated region fallthrough
CT: control target
= control target key end

     0   :  { %vm348_vm0 = vcmask 15360   ;;  %s1088_s0 = inlined_call_operand.vmem [shape: bf16[512,2], index: 0, kind: input, shape index: {}]   ;;  %s1089_s1 = inlined_call_operand.vmem [shape: f32[1,2], index: 1, kind: input, shape index: {}]   ;;  %s1090_s2 = inlined_call_operand.vmem [shape: f32[1,2], index: 2, kind: input, shape index: {}]   ;;  %s1091_s3 = inlined_call_operand.vmem [shape: f32[512,2], index: 3, kind: output, shape index: {}]  }
   0x1   :  { %v420_v0 = vld [vmem:[%s1088_s0] sm:$0xff]   ;;  %v547_v4 = vld [vmem:[%s1088_s0 + $0x8] sm:$0xff]   ;;  %v548_v5 = vld [vmem:[%s1088_s0 + $0x10] sm:$0xff]  }
   0x2   :  { %v604_v1 = vld [vmem:[%s1089_s1] ss:$0 sm:$0xff]  ;;  %v421_v2 = vunpack.c.l.bf16 %v420_v0  ;;  %v422_v3 = vunpack.c.h.bf16 %v420_v0  ;;  %v549_v6 = vld [vmem:[%s1088_s0 + $0x18] sm:$0xff]   ;;  %v425_v8 = vunpack.c.l.bf16 %v547_v4  ;;  %v426_v9 = vunpack.c.h.bf16 %v547_v4  ;;  %v551_v33 = vld [vmem:[%s1088_s0 + $0x28] sm:$0xff]  }
   0x3   :  { %v618_v7 = vld [vmem:[%s1090_s2] ss:$0 sm:$0xff]  ;;  %v429_v10 = vunpack.c.l.bf16 %v548_v5  ;;  %v430_v11 = vunpack.c.h.bf16 %v548_v5  ;;  %v433_v14 = vunpack.c.l.bf16 %v549_v6  ;;  %v434_v15 = vunpack.c.h.bf16 %v549_v6  ;;  %v552_v34 = vld [vmem:[%s1088_s0 + $0x30] sm:$0xff]   ;;  %v553_v39 = vld [vmem:[%s1088_s0 + $0x38] sm:$0xff]  }
   0x4   :  { %v149_v12 = vmul.f32 %v421_v2, %v604_v1  ;;  %v150_v13 = vmul.f32 %v422_v3, %v604_v1  ;;  %v151_v16 = vmul.f32 %v425_v8, %v604_v1  ;;  %v152_v17 = vmul.f32 %v426_v9, %v604_v1  ;;  %v550_v28 = vld [vmem:[%s1088_s0 + $0x20] sm:$0xff]   ;;  %v555_v6 = vld [vmem:[%s1088_s0 + $0x48] sm:$0xff]   ;;  %v556_v8 = vld [vmem:[%s1088_s0 + $0x50] sm:$0xff]  }
   0x5   :  { %v153_v18 = vmul.f32 %v429_v10, %v604_v1  ;;  %v154_v19 = vmul.f32 %v430_v11, %v604_v1  ;;  %v155_v22 = vmul.f32 %v433_v14, %v604_v1  ;;  %v156_v23 = vmul.f32 %v434_v15, %v604_v1  ;;  %v554_v0 = vld [vmem:[%s1088_s0 + $0x40] sm:$0xff]  }
   0x6   :  { %v220_v20 = vadd.f32 %v618_v7, %v149_v12  ;;  %v221_v21 = vadd.f32 %v618_v7, %v150_v13  ;;  %v222_v24 = vadd.f32 %v618_v7, %v151_v16  ;;  %v223_v25 = vadd.f32 %v618_v7, %v152_v17  ;;  %v557_v13 = vld [vmem:[%s1088_s0 + $0x58] sm:$0xff]  }
   0x7   :  { %v224_v26 = vadd.f32 %v618_v7, %v153_v18  ;;  %v225_v27 = vadd.f32 %v618_v7, %v154_v19  ;;  %v226_v31 = vadd.f32 %v618_v7, %v155_v22  ;;  %v227_v32 = vadd.f32 %v618_v7, %v156_v23 }
   0x8   :  { %v284_v29 = vmax.f32 %v220_v20, 0.0  ;;  %v285_v30 = vmax.f32 %v221_v21, 0.0  ;;  %v286_v35 = vmax.f32 %v222_v24, 0.0  ;;  %v287_v36 = vmax.f32 %v223_v25, 0.0 }
   0x9   :  { %v288_v37 = vmax.f32 %v224_v26, 0.0  ;;  %v289_v38 = vmax.f32 %v225_v27, 0.0  ;;  %v290_v40 = vmax.f32 %v226_v31, 0.0  ;;  %v291_v41 = vmax.f32 %v227_v32, 0.0 }
   0xa   :  { %349 = vst.msk [vmem:[%s1091_s3] sm:$0xff] %vm348_vm0, %v284_v29  ;;  %350 = vst.msk [vmem:[%s1091_s3 + $0x8] sm:$0xff] %vm348_vm0, %v285_v30  ;;  %v437_v42 = vunpack.c.l.bf16 %v550_v28  ;;  %v438_v43 = vunpack.c.h.bf16 %v550_v28  ;;  %v441_v44 = vunpack.c.l.bf16 %v551_v33  ;;  %v442_v45 = vunpack.c.h.bf16 %v551_v33 }
   0xb   :  { %351 = vst.msk [vmem:[%s1091_s3 + $0x10] sm:$0xff] %vm348_vm0, %v286_v35  ;;  %352 = vst.msk [vmem:[%s1091_s3 + $0x18] sm:$0xff] %vm348_vm0, %v287_v36  ;;  %v445_v46 = vunpack.c.l.bf16 %v552_v34  ;;  %v446_v47 = vunpack.c.h.bf16 %v552_v34  ;;  %v449_v50 = vunpack.c.l.bf16 %v553_v39  ;;  %v450_v51 = vunpack.c.h.bf16 %v553_v39 }
   0xc   :  { %353 = vst.msk [vmem:[%s1091_s3 + $0x20] sm:$0xff] %vm348_vm0, %v288_v37  ;;  %354 = vst.msk [vmem:[%s1091_s3 + $0x28] sm:$0xff] %vm348_vm0, %v289_v38  ;;  %v157_v48 = vmul.f32 %v437_v42, %v604_v1  ;;  %v158_v49 = vmul.f32 %v438_v43, %v604_v1  ;;  %v159_v52 = vmul.f32 %v441_v44, %v604_v1  ;;  %v453_v16 = vunpack.c.l.bf16 %v554_v0  ;;  %v558_v38 = vld [vmem:[%s1088_s0 + $0x60] sm:$0xff]   ;;  %v559_v43 = vld [vmem:[%s1088_s0 + $0x68] sm:$0xff]  }
   0xd   :  { %355 = vst.msk [vmem:[%s1091_s3 + $0x30] sm:$0xff] %vm348_vm0, %v290_v40  ;;  %356 = vst.msk [vmem:[%s1091_s3 + $0x38] sm:$0xff] %vm348_vm0, %v291_v41  ;;  %v160_v53 = vmul.f32 %v442_v45, %v604_v1  ;;  %v161_v54 = vmul.f32 %v445_v46, %v604_v1  ;;  %v162_v55 = vmul.f32 %v446_v47, %v604_v1  ;;  %v454_v17 = vunpack.c.h.bf16 %v554_v0  ;;  %v560_v44 = vld [vmem:[%s1088_s0 + $0x70] sm:$0xff]  }
   0xe   :  { %v228_v56 = vadd.f32 %v618_v7, %v157_v48  ;;  %v229_v57 = vadd.f32 %v618_v7, %v158_v49  ;;  %v163_v58 = vmul.f32 %v449_v50, %v604_v1  ;;  %v164_v59 = vmul.f32 %v450_v51, %v604_v1  ;;  %v561_v49 = vld [vmem:[%s1088_s0 + $0x78] sm:$0xff]  }
   0xf   :  { %v230_v60 = vadd.f32 %v618_v7, %v159_v52  ;;  %v231_v61 = vadd.f32 %v618_v7, %v160_v53  ;;  %v232_v62 = vadd.f32 %v618_v7, %v161_v54  ;;  %v233_v63 = vadd.f32 %v618_v7, %v162_v55 }
  0x10   :  { %v292_v2 = vmax.f32 %v228_v56, 0.0  ;;  %v293_v3 = vmax.f32 %v229_v57, 0.0  ;;  %v234_v4 = vadd.f32 %v618_v7, %v163_v58  ;;  %v235_v5 = vadd.f32 %v618_v7, %v164_v59 }
  0x11   :  { %v294_v9 = vmax.f32 %v230_v60, 0.0  ;;  %v295_v10 = vmax.f32 %v231_v61, 0.0  ;;  %v296_v11 = vmax.f32 %v232_v62, 0.0  ;;  %v297_v12 = vmax.f32 %v233_v63, 0.0 }
  0x12   :  { %357 = vst.msk [vmem:[%s1091_s3 + $0x40] sm:$0xff] %vm348_vm0, %v292_v2  ;;  %358 = vst.msk [vmem:[%s1091_s3 + $0x48] sm:$0xff] %vm348_vm0, %v293_v3  ;;  %v298_v14 = vmax.f32 %v234_v4, 0.0  ;;  %v299_v15 = vmax.f32 %v235_v5, 0.0  ;;  %v457_v18 = vunpack.c.l.bf16 %v555_v6  ;;  %v458_v19 = vunpack.c.h.bf16 %v555_v6 }
  0x13   :  { %359 = vst.msk [vmem:[%s1091_s3 + $0x50] sm:$0xff] %vm348_vm0, %v294_v9  ;;  %360 = vst.msk [vmem:[%s1091_s3 + $0x58] sm:$0xff] %vm348_vm0, %v295_v10  ;;  %v461_v20 = vunpack.c.l.bf16 %v556_v8  ;;  %v462_v21 = vunpack.c.h.bf16 %v556_v8  ;;  %v165_v22 = vmul.f32 %v453_v16, %v604_v1  ;;  %v166_v23 = vmul.f32 %v454_v17, %v604_v1  ;;  %v563_v17 = vld [vmem:[%s1088_s0 + $0x88] sm:$0xff]  }
  0x14   :  { %361 = vst.msk [vmem:[%s1091_s3 + $0x60] sm:$0xff] %vm348_vm0, %v296_v11  ;;  %362 = vst.msk [vmem:[%s1091_s3 + $0x68] sm:$0xff] %vm348_vm0, %v297_v12  ;;  %v465_v24 = vunpack.c.l.bf16 %v557_v13  ;;  %v466_v25 = vunpack.c.h.bf16 %v557_v13  ;;  %v167_v26 = vmul.f32 %v457_v18, %v604_v1  ;;  %v168_v27 = vmul.f32 %v458_v19, %v604_v1  ;;  %v562_v12 = vld [vmem:[%s1088_s0 + $0x80] sm:$0xff]   ;;  %v564_v18 = vld [vmem:[%s1088_s0 + $0x90] sm:$0xff]  }
  0x15   :  { %363 = vst.msk [vmem:[%s1091_s3 + $0x70] sm:$0xff] %vm348_vm0, %v298_v14  ;;  %364 = vst.msk [vmem:[%s1091_s3 + $0x78] sm:$0xff] %vm348_vm0, %v299_v15  ;;  %v169_v28 = vmul.f32 %v461_v20, %v604_v1  ;;  %v170_v29 = vmul.f32 %v462_v21, %v604_v1  ;;  %v236_v30 = vadd.f32 %v618_v7, %v165_v22  ;;  %v469_v52 = vunpack.c.l.bf16 %v558_v38 }
  0x16   :  { %v237_v31 = vadd.f32 %v618_v7, %v166_v23  ;;  %v171_v32 = vmul.f32 %v465_v24, %v604_v1  ;;  %v172_v33 = vmul.f32 %v466_v25, %v604_v1  ;;  %v238_v34 = vadd.f32 %v618_v7, %v167_v26  ;;  %v565_v23 = vld [vmem:[%s1088_s0 + $0x98] sm:$0xff]  }
  0x17   :  { %v239_v35 = vadd.f32 %v618_v7, %v168_v27  ;;  %v240_v36 = vadd.f32 %v618_v7, %v169_v28  ;;  %v241_v37 = vadd.f32 %v618_v7, %v170_v29  ;;  %v300_v39 = vmax.f32 %v236_v30, 0.0 }
  0x18   :  { %v301_v40 = vmax.f32 %v237_v31, 0.0  ;;  %v242_v41 = vadd.f32 %v618_v7, %v171_v32  ;;  %v243_v42 = vadd.f32 %v618_v7, %v172_v33  ;;  %v302_v45 = vmax.f32 %v238_v34, 0.0 }
  0x19   :  { %v303_v46 = vmax.f32 %v239_v35, 0.0  ;;  %v304_v47 = vmax.f32 %v240_v36, 0.0  ;;  %v305_v48 = vmax.f32 %v241_v37, 0.0  ;;  %365 = vst.msk [vmem:[%s1091_s3 + $0x80] sm:$0xff] %vm348_vm0, %v300_v39  ;;  %v470_v53 = vunpack.c.h.bf16 %v558_v38 }
  0x1a   :  { %366 = vst.msk [vmem:[%s1091_s3 + $0x88] sm:$0xff] %vm348_vm0, %v301_v40  ;;  %v306_v50 = vmax.f32 %v242_v41, 0.0  ;;  %v307_v51 = vmax.f32 %v243_v42, 0.0  ;;  %367 = vst.msk [vmem:[%s1091_s3 + $0x90] sm:$0xff] %vm348_vm0, %v302_v45  ;;  %v473_v54 = vunpack.c.l.bf16 %v559_v43  ;;  %v474_v55 = vunpack.c.h.bf16 %v559_v43 }
  0x1b   :  { %368 = vst.msk [vmem:[%s1091_s3 + $0x98] sm:$0xff] %vm348_vm0, %v303_v46  ;;  %369 = vst.msk [vmem:[%s1091_s3 + $0xa0] sm:$0xff] %vm348_vm0, %v304_v47  ;;  %v477_v56 = vunpack.c.l.bf16 %v560_v44  ;;  %v478_v57 = vunpack.c.h.bf16 %v560_v44  ;;  %v173_v58 = vmul.f32 %v469_v52, %v604_v1  ;;  %v174_v59 = vmul.f32 %v470_v53, %v604_v1  ;;  %v567_v53 = vld [vmem:[%s1088_s0 + $0xa8] sm:$0xff]  }
  0x1c   :  { %370 = vst.msk [vmem:[%s1091_s3 + $0xa8] sm:$0xff] %vm348_vm0, %v305_v48  ;;  %371 = vst.msk [vmem:[%s1091_s3 + $0xb0] sm:$0xff] %vm348_vm0, %v306_v50  ;;  %v481_v60 = vunpack.c.l.bf16 %v561_v49  ;;  %v482_v61 = vunpack.c.h.bf16 %v561_v49  ;;  %v175_v62 = vmul.f32 %v473_v54, %v604_v1  ;;  %v176_v63 = vmul.f32 %v474_v55, %v604_v1  ;;  %v566_v48 = vld [vmem:[%s1088_s0 + $0xa0] sm:$0xff]   ;;  %v568_v54 = vld [vmem:[%s1088_s0 + $0xb0] sm:$0xff]  }
  0x1d   :  { %372 = vst.msk [vmem:[%s1091_s3 + $0xb8] sm:$0xff] %vm348_vm0, %v307_v51  ;;  %v177_v0 = vmul.f32 %v477_v56, %v604_v1  ;;  %v178_v2 = vmul.f32 %v478_v57, %v604_v1  ;;  %v244_v3 = vadd.f32 %v618_v7, %v173_v58  ;;  %v245_v4 = vadd.f32 %v618_v7, %v174_v59  ;;  %v569_v59 = vld [vmem:[%s1088_s0 + $0xb8] sm:$0xff]  }
  0x1e   :  { %v179_v5 = vmul.f32 %v481_v60, %v604_v1  ;;  %v180_v6 = vmul.f32 %v482_v61, %v604_v1  ;;  %v246_v8 = vadd.f32 %v618_v7, %v175_v62  ;;  %v247_v9 = vadd.f32 %v618_v7, %v176_v63 }
  0x1f   :  { %v248_v10 = vadd.f32 %v618_v7, %v177_v0  ;;  %v249_v11 = vadd.f32 %v618_v7, %v178_v2  ;;  %v308_v13 = vmax.f32 %v244_v3, 0.0  ;;  %v309_v14 = vmax.f32 %v245_v4, 0.0 }
  0x20   :  { %v250_v15 = vadd.f32 %v618_v7, %v179_v5  ;;  %v251_v16 = vadd.f32 %v618_v7, %v180_v6  ;;  %v310_v19 = vmax.f32 %v246_v8, 0.0  ;;  %v311_v20 = vmax.f32 %v247_v9, 0.0 }
  0x21   :  { %v312_v21 = vmax.f32 %v248_v10, 0.0  ;;  %v313_v22 = vmax.f32 %v249_v11, 0.0  ;;  %373 = vst.msk [vmem:[%s1091_s3 + $0xc0] sm:$0xff] %vm348_vm0, %v308_v13  ;;  %374 = vst.msk [vmem:[%s1091_s3 + $0xc8] sm:$0xff] %vm348_vm0, %v309_v14  ;;  %v485_v26 = vunpack.c.l.bf16 %v562_v12  ;;  %v486_v27 = vunpack.c.h.bf16 %v562_v12 }
  0x22   :  { %v314_v24 = vmax.f32 %v250_v15, 0.0  ;;  %v315_v25 = vmax.f32 %v251_v16, 0.0  ;;  %375 = vst.msk [vmem:[%s1091_s3 + $0xd0] sm:$0xff] %vm348_vm0, %v310_v19  ;;  %376 = vst.msk [vmem:[%s1091_s3 + $0xd8] sm:$0xff] %vm348_vm0, %v311_v20  ;;  %v489_v28 = vunpack.c.l.bf16 %v563_v17  ;;  %v490_v29 = vunpack.c.h.bf16 %v563_v17 }
  0x23   :  { %377 = vst.msk [vmem:[%s1091_s3 + $0xe0] sm:$0xff] %vm348_vm0, %v312_v21  ;;  %378 = vst.msk [vmem:[%s1091_s3 + $0xe8] sm:$0xff] %vm348_vm0, %v313_v22  ;;  %v493_v30 = vunpack.c.l.bf16 %v564_v18  ;;  %v494_v31 = vunpack.c.h.bf16 %v564_v18  ;;  %v181_v32 = vmul.f32 %v485_v26, %v604_v1  ;;  %v182_v33 = vmul.f32 %v486_v27, %v604_v1  ;;  %v570_v22 = vld [vmem:[%s1088_s0 + $0xc0] sm:$0xff]   ;;  %v571_v27 = vld [vmem:[%s1088_s0 + $0xc8] sm:$0xff]  }
  0x24   :  { %379 = vst.msk [vmem:[%s1091_s3 + $0xf0] sm:$0xff] %vm348_vm0, %v314_v24  ;;  %380 = vst.msk [vmem:[%s1091_s3 + $0xf8] sm:$0xff] %vm348_vm0, %v315_v25  ;;  %v497_v34 = vunpack.c.l.bf16 %v565_v23  ;;  %v498_v35 = vunpack.c.h.bf16 %v565_v23  ;;  %v183_v36 = vmul.f32 %v489_v28, %v604_v1  ;;  %v184_v37 = vmul.f32 %v490_v29, %v604_v1  ;;  %v572_v28 = vld [vmem:[%s1088_s0 + $0xd0] sm:$0xff]  }
  0x25   :  { %v185_v38 = vmul.f32 %v493_v30, %v604_v1  ;;  %v186_v39 = vmul.f32 %v494_v31, %v604_v1  ;;  %v252_v40 = vadd.f32 %v618_v7, %v181_v32  ;;  %v253_v41 = vadd.f32 %v618_v7, %v182_v33  ;;  %v573_v33 = vld [vmem:[%s1088_s0 + $0xd8] sm:$0xff]  }
  0x26   :  { %v187_v42 = vmul.f32 %v497_v34, %v604_v1  ;;  %v188_v43 = vmul.f32 %v498_v35, %v604_v1  ;;  %v254_v44 = vadd.f32 %v618_v7, %v183_v36  ;;  %v255_v45 = vadd.f32 %v618_v7, %v184_v37 }
  0x27   :  { %v256_v46 = vadd.f32 %v618_v7, %v185_v38  ;;  %v257_v47 = vadd.f32 %v618_v7, %v186_v39  ;;  %v316_v49 = vmax.f32 %v252_v40, 0.0  ;;  %v317_v50 = vmax.f32 %v253_v41, 0.0 }
  0x28   :  { %v258_v51 = vadd.f32 %v618_v7, %v187_v42  ;;  %v259_v52 = vadd.f32 %v618_v7, %v188_v43  ;;  %v318_v55 = vmax.f32 %v254_v44, 0.0  ;;  %v319_v56 = vmax.f32 %v255_v45, 0.0 }
  0x29   :  { %v320_v57 = vmax.f32 %v256_v46, 0.0  ;;  %v321_v58 = vmax.f32 %v257_v47, 0.0  ;;  %381 = vst.msk [vmem:[%s1091_s3 + $0x100] sm:$0xff] %vm348_vm0, %v316_v49  ;;  %382 = vst.msk [vmem:[%s1091_s3 + $0x108] sm:$0xff] %vm348_vm0, %v317_v50  ;;  %v501_v62 = vunpack.c.l.bf16 %v566_v48  ;;  %v502_v63 = vunpack.c.h.bf16 %v566_v48 }
  0x2a   :  { %v322_v60 = vmax.f32 %v258_v51, 0.0  ;;  %v323_v61 = vmax.f32 %v259_v52, 0.0  ;;  %383 = vst.msk [vmem:[%s1091_s3 + $0x110] sm:$0xff] %vm348_vm0, %v318_v55  ;;  %384 = vst.msk [vmem:[%s1091_s3 + $0x118] sm:$0xff] %vm348_vm0, %v319_v56  ;;  %v505_v0 = vunpack.c.l.bf16 %v567_v53  ;;  %v506_v2 = vunpack.c.h.bf16 %v567_v53 }
  0x2b   :  { %385 = vst.msk [vmem:[%s1091_s3 + $0x120] sm:$0xff] %vm348_vm0, %v320_v57  ;;  %386 = vst.msk [vmem:[%s1091_s3 + $0x128] sm:$0xff] %vm348_vm0, %v321_v58  ;;  %v509_v3 = vunpack.c.l.bf16 %v568_v54  ;;  %v510_v4 = vunpack.c.h.bf16 %v568_v54  ;;  %v189_v5 = vmul.f32 %v501_v62, %v604_v1  ;;  %v190_v6 = vmul.f32 %v502_v63, %v604_v1  ;;  %v574_v58 = vld [vmem:[%s1088_s0 + $0xe0] sm:$0xff]   ;;  %v575_v63 = vld [vmem:[%s1088_s0 + $0xe8] sm:$0xff]  }
  0x2c   :  { %387 = vst.msk [vmem:[%s1091_s3 + $0x130] sm:$0xff] %vm348_vm0, %v322_v60  ;;  %388 = vst.msk [vmem:[%s1091_s3 + $0x138] sm:$0xff] %vm348_vm0, %v323_v61  ;;  %v513_v8 = vunpack.c.l.bf16 %v569_v59  ;;  %v514_v9 = vunpack.c.h.bf16 %v569_v59  ;;  %v191_v10 = vmul.f32 %v505_v0, %v604_v1  ;;  %v192_v11 = vmul.f32 %v506_v2, %v604_v1  ;;  %v576_v0 = vld [vmem:[%s1088_s0 + $0xf0] sm:$0xff]  }
  0x2d   :  { %v193_v12 = vmul.f32 %v509_v3, %v604_v1  ;;  %v194_v13 = vmul.f32 %v510_v4, %v604_v1  ;;  %v260_v14 = vadd.f32 %v618_v7, %v189_v5  ;;  %v261_v15 = vadd.f32 %v618_v7, %v190_v6  ;;  %v577_v6 = vld [vmem:[%s1088_s0 + $0xf8] sm:$0xff]  }
  0x2e   :  { %v195_v16 = vmul.f32 %v513_v8, %v604_v1  ;;  %v196_v17 = vmul.f32 %v514_v9, %v604_v1  ;;  %v262_v18 = vadd.f32 %v618_v7, %v191_v10  ;;  %v263_v19 = vadd.f32 %v618_v7, %v192_v11 }
  0x2f   :  { %v264_v20 = vadd.f32 %v618_v7, %v193_v12  ;;  %v265_v21 = vadd.f32 %v618_v7, %v194_v13  ;;  %v324_v23 = vmax.f32 %v260_v14, 0.0  ;;  %v325_v24 = vmax.f32 %v261_v15, 0.0 }
  0x30   :  { %v266_v25 = vadd.f32 %v618_v7, %v195_v16  ;;  %v267_v26 = vadd.f32 %v618_v7, %v196_v17  ;;  %v326_v29 = vmax.f32 %v262_v18, 0.0  ;;  %v327_v30 = vmax.f32 %v263_v19, 0.0 }
  0x31   :  { %v328_v31 = vmax.f32 %v264_v20, 0.0  ;;  %v329_v32 = vmax.f32 %v265_v21, 0.0  ;;  %389 = vst.msk [vmem:[%s1091_s3 + $0x140] sm:$0xff] %vm348_vm0, %v324_v23  ;;  %390 = vst.msk [vmem:[%s1091_s3 + $0x148] sm:$0xff] %vm348_vm0, %v325_v24  ;;  %v517_v36 = vunpack.c.l.bf16 %v570_v22  ;;  %v518_v37 = vunpack.c.h.bf16 %v570_v22 }
  0x32   :  { %v330_v34 = vmax.f32 %v266_v25, 0.0  ;;  %v331_v35 = vmax.f32 %v267_v26, 0.0  ;;  %391 = vst.msk [vmem:[%s1091_s3 + $0x150] sm:$0xff] %vm348_vm0, %v326_v29  ;;  %392 = vst.msk [vmem:[%s1091_s3 + $0x158] sm:$0xff] %vm348_vm0, %v327_v30  ;;  %v521_v38 = vunpack.c.l.bf16 %v571_v27  ;;  %v522_v39 = vunpack.c.h.bf16 %v571_v27 }
  0x33   :  { %393 = vst.msk [vmem:[%s1091_s3 + $0x160] sm:$0xff] %vm348_vm0, %v328_v31  ;;  %394 = vst.msk [vmem:[%s1091_s3 + $0x168] sm:$0xff] %vm348_vm0, %v329_v32  ;;  %v525_v40 = vunpack.c.l.bf16 %v572_v28  ;;  %v526_v41 = vunpack.c.h.bf16 %v572_v28  ;;  %v197_v42 = vmul.f32 %v517_v36, %v604_v1  ;;  %v198_v43 = vmul.f32 %v518_v37, %v604_v1 }
  0x34   :  { %395 = vst.msk [vmem:[%s1091_s3 + $0x170] sm:$0xff] %vm348_vm0, %v330_v34  ;;  %396 = vst.msk [vmem:[%s1091_s3 + $0x178] sm:$0xff] %vm348_vm0, %v331_v35  ;;  %v529_v44 = vunpack.c.l.bf16 %v573_v33  ;;  %v530_v45 = vunpack.c.h.bf16 %v573_v33  ;;  %v199_v46 = vmul.f32 %v521_v38, %v604_v1  ;;  %v200_v47 = vmul.f32 %v522_v39, %v604_v1 }
  0x35   :  { %v201_v48 = vmul.f32 %v525_v40, %v604_v1  ;;  %v202_v49 = vmul.f32 %v526_v41, %v604_v1  ;;  %v268_v50 = vadd.f32 %v618_v7, %v197_v42  ;;  %v269_v51 = vadd.f32 %v618_v7, %v198_v43 }
  0x36   :  { %v203_v52 = vmul.f32 %v529_v44, %v604_v1  ;;  %v204_v53 = vmul.f32 %v530_v45, %v604_v1  ;;  %v270_v54 = vadd.f32 %v618_v7, %v199_v46  ;;  %v271_v55 = vadd.f32 %v618_v7, %v200_v47 }
  0x37   :  { %v272_v56 = vadd.f32 %v618_v7, %v201_v48  ;;  %v273_v57 = vadd.f32 %v618_v7, %v202_v49  ;;  %v332_v59 = vmax.f32 %v268_v50, 0.0  ;;  %v333_v60 = vmax.f32 %v269_v51, 0.0 }
  0x38   :  { %v274_v61 = vadd.f32 %v618_v7, %v203_v52  ;;  %v275_v62 = vadd.f32 %v618_v7, %v204_v53  ;;  %v334_v2 = vmax.f32 %v270_v54, 0.0  ;;  %v335_v3 = vmax.f32 %v271_v55, 0.0 }
  0x39   :  { %v336_v4 = vmax.f32 %v272_v56, 0.0  ;;  %v337_v5 = vmax.f32 %v273_v57, 0.0  ;;  %397 = vst.msk [vmem:[%s1091_s3 + $0x180] sm:$0xff] %vm348_vm0, %v332_v59  ;;  %398 = vst.msk [vmem:[%s1091_s3 + $0x188] sm:$0xff] %vm348_vm0, %v333_v60  ;;  %v533_v10 = vunpack.c.l.bf16 %v574_v58  ;;  %v534_v11 = vunpack.c.h.bf16 %v574_v58 }
  0x3a   :  { %v338_v8 = vmax.f32 %v274_v61, 0.0  ;;  %v339_v9 = vmax.f32 %v275_v62, 0.0  ;;  %399 = vst.msk [vmem:[%s1091_s3 + $0x190] sm:$0xff] %vm348_vm0, %v334_v2  ;;  %400 = vst.msk [vmem:[%s1091_s3 + $0x198] sm:$0xff] %vm348_vm0, %v335_v3  ;;  %v537_v12 = vunpack.c.l.bf16 %v575_v63  ;;  %v538_v13 = vunpack.c.h.bf16 %v575_v63 }
  0x3b   :  { %401 = vst.msk [vmem:[%s1091_s3 + $0x1a0] sm:$0xff] %vm348_vm0, %v336_v4  ;;  %402 = vst.msk [vmem:[%s1091_s3 + $0x1a8] sm:$0xff] %vm348_vm0, %v337_v5  ;;  %v541_v14 = vunpack.c.l.bf16 %v576_v0  ;;  %v542_v15 = vunpack.c.h.bf16 %v576_v0  ;;  %v205_v16 = vmul.f32 %v533_v10, %v604_v1  ;;  %v206_v17 = vmul.f32 %v534_v11, %v604_v1 }
  0x3c   :  { %403 = vst.msk [vmem:[%s1091_s3 + $0x1b0] sm:$0xff] %vm348_vm0, %v338_v8  ;;  %404 = vst.msk [vmem:[%s1091_s3 + $0x1b8] sm:$0xff] %vm348_vm0, %v339_v9  ;;  %v545_v18 = vunpack.c.l.bf16 %v577_v6  ;;  %v546_v19 = vunpack.c.h.bf16 %v577_v6  ;;  %v207_v20 = vmul.f32 %v537_v12, %v604_v1  ;;  %v208_v21 = vmul.f32 %v538_v13, %v604_v1 }
  0x3d   :  { %v209_v22 = vmul.f32 %v541_v14, %v604_v1  ;;  %v210_v23 = vmul.f32 %v542_v15, %v604_v1  ;;  %v276_v24 = vadd.f32 %v618_v7, %v205_v16  ;;  %v277_v25 = vadd.f32 %v618_v7, %v206_v17 }
  0x3e   :  { %v211_v26 = vmul.f32 %v545_v18, %v604_v1  ;;  %v212_v27 = vmul.f32 %v546_v19, %v604_v1  ;;  %v278_v28 = vadd.f32 %v618_v7, %v207_v20  ;;  %v279_v29 = vadd.f32 %v618_v7, %v208_v21 }
  0x3f   :  { %v280_v30 = vadd.f32 %v618_v7, %v209_v22  ;;  %v281_v31 = vadd.f32 %v618_v7, %v210_v23  ;;  %v340_v32 = vmax.f32 %v276_v24, 0.0  ;;  %v341_v33 = vmax.f32 %v277_v25, 0.0 }
  0x40   :  { %v282_v34 = vadd.f32 %v618_v7, %v211_v26  ;;  %v283_v35 = vadd.f32 %v618_v7, %v212_v27  ;;  %v342_v36 = vmax.f32 %v278_v28, 0.0  ;;  %v343_v37 = vmax.f32 %v279_v29, 0.0 }
  0x41   :  { %v344_v38 = vmax.f32 %v280_v30, 0.0  ;;  %v345_v39 = vmax.f32 %v281_v31, 0.0  ;;  %405 = vst.msk [vmem:[%s1091_s3 + $0x1c0] sm:$0xff] %vm348_vm0, %v340_v32  ;;  %406 = vst.msk [vmem:[%s1091_s3 + $0x1c8] sm:$0xff] %vm348_vm0, %v341_v33 }
  0x42   :  { %v346_v1 = vmax.f32 %v282_v34, 0.0  ;;  %v347_v40 = vmax.f32 %v283_v35, 0.0  ;;  %407 = vst.msk [vmem:[%s1091_s3 + $0x1d0] sm:$0xff] %vm348_vm0, %v342_v36  ;;  %408 = vst.msk [vmem:[%s1091_s3 + $0x1d8] sm:$0xff] %vm348_vm0, %v343_v37 }
  0x43   :  { %409 = vst.msk [vmem:[%s1091_s3 + $0x1e0] sm:$0xff] %vm348_vm0, %v344_v38  ;;  %410 = vst.msk [vmem:[%s1091_s3 + $0x1e8] sm:$0xff] %vm348_vm0, %v345_v39 }
  0x44   :  { %411 = vst.msk [vmem:[%s1091_s3 + $0x1f0] sm:$0xff] %vm348_vm0, %v346_v1  ;;  %412 = vst.msk [vmem:[%s1091_s3 + $0x1f8] sm:$0xff] %vm348_vm0, %v347_v40 }

// kernel: up_forward.6
= control target key start
LH: loop header
LB: loop body
LE: loop exit
PB: predicated region body
PF: predicated region fallthrough
CT: control target
= control target key end

     0   :  { %s4956_s24 = smov 0   ;;  %s4958_s1 = smov 0   ;;  %s5781_s0 = inlined_call_operand.vmem [shape: bf16[2,16,16,2], index: 0, kind: input, shape index: {}, may-alias: {0,1,2}]   ;;  %s5782_s1 = inlined_call_operand.vmem [shape: bf16[2,16,16,2], index: 1, kind: input, shape index: {}, may-alias: {0,1,2}]   ;;  %s5783_s2 = inlined_call_operand.vmem [shape: bf16[2,16,16,2], index: 2, kind: input, shape index: {}, may-alias: {0,1,2}]   ;;  %s5784_s3 = inlined_call_operand.vmem [shape: bf16[9,2,2], index: 3, kind: input, shape index: {}]   ;;  %s5785_s4 = inlined_call_operand.vmem [shape: f32[1,1,2], index: 4, kind: input, shape index: {}]   ;;  %s5786_s5 = inlined_call_operand.vmem [shape: f32[1,1,2], index: 5, kind: input, shape index: {}]   ;;  %s5787_s6 = inlined_call_operand.vmem [shape: bf16[512,2], index: 6, kind: output, shape index: {0}]   ;;  %s5788_s7 = inlined_call_operand.vmem [shape: f32[2,2,2], index: 7, kind: output, shape index: {1}]  }
   0x1   :  { %s4960_s2 = smov 0  }
   0x2 LB: > { %s30_s25 = sadd.s32 1, %s4909_s1  ;;  %p3826_p0 = scmp.ge.s32.totalorder %s4913_s2, 1  ;;  %s4913_s2 = sphi %s4960_s2, %s18_s2   ;;  %s4909_s1 = sphi %s4958_s1, %s5790_s1   ;;  %s4905_s24 = sphi %s4956_s24, %s5789_s24  }
   0x3   : > { %p32_p1 = scmp.ge.s32.totalorder %s30_s25, 2  ;;  %p328_p2 = scmp.lt.s32.totalorder %s4913_s2, 3 }
   0x5   : > { %s5792_s25 = smov (%p32_p1, %s30_s25), 0  ;;  %p329_p3 = pnand %p3826_p0, %p328_p2 }
   0x6   : > { %v3838_v0 = vld [vmem:[%s5784_s3 + $0x1] sm:$0x1] (!%p329_p3)  ;;  %vm900_vm0 = vcmask (!%p329_p3), 1040384   ;;  %v4982_v1 = vld [vmem:[%s5784_s3 + $0x4] sm:$0x1] (!%p329_p3)  ;;  %vm459_vm1 = vcmask (!%p329_p3), 15360  }
   0x7   : > { %332 = sbr.rel (%p329_p3) target bundleno = 566 (0x236), region = 44  ;;  %4856 = vmatprep.subr.msk.bf16.mxu1 (!%p329_p3), %vm900_vm0, %v3838_v0  ;;  %4860 = vmatprep.subr.msk.bf16.mxu0 (!%p329_p3), %vm900_vm0, %v4982_v1  ;;  %v902_v2 = vsel (!%p329_p3), %vm900_vm0, %v3838_v0, 0  ;;  %v4990_v3 = vsel (!%p329_p3), %vm900_vm0, %v4982_v1, 0  ;;  %vm462_vm2 = vcmask (!%p329_p3), 9216   ;;  %p398_p4 = scmp.lt.s32.totalorder (!%p329_p3), %s4905_s24, 1  ;;  %v4915_v4 = vmov (!%p329_p3), 0.0  }
   0x8   : > { %4293 = vmatpush3.bf16.msra.mxu1 (!%p329_p3), %v902_v2  ;;  %4429 = vmatpush3.bf16.msra.mxu0 (!%p329_p3), %v4990_v3  ;;  %460 = vst.msk [vmem:[#allocation2] sm:$0xff] (!%p329_p3), %vm459_vm1, %v4915_v4  ;;  %461 = vst.msk [vmem:[#allocation2 + $0x8] sm:$0xff] (!%p329_p3), %vm459_vm1, %v4915_v4  ;;  %v801_v5 = vld [vmem:[%s5784_s3] sm:$0x1] (!%p329_p3)  ;;  %v3922_v6 = vld [vmem:[%s5784_s3 + $0x5] sm:$0x1] (!%p329_p3) }
   0x9   : > { %463 = vst.msk [vmem:[#allocation2 + $0x10] sm:$0x3] (!%p329_p3), %vm462_vm2, %v4915_v4  ;;  %466 = vst.msk [vmem:[#allocation2 + $0x28] sm:$0x3] (!%p329_p3), %vm462_vm2, %v4915_v4  ;;  %4857 = vmatprep.subr.msk.bf16.mxu1 (!%p329_p3), %vm900_vm0, %v801_v5  ;;  %4862 = vmatprep.subr.msk.bf16.mxu0 (!%p329_p3), %vm900_vm0, %v3922_v6  ;;  %v5070_v7 = vld [vmem:[%s5785_s4] ss:$0 sm:$0xff] (!%p329_p3) }
   0xa   : > { %464 = vst.msk [vmem:[#allocation2 + $0x18] sm:$0xff] (!%p329_p3), %vm459_vm1, %v4915_v4  ;;  %465 = vst.msk [vmem:[#allocation2 + $0x20] sm:$0xff] (!%p329_p3), %vm459_vm1, %v4915_v4  ;;  %v5074_v9 = vsel (!%p329_p3), %vm900_vm0, %v801_v5, 0  ;;  %v5078_v11 = vsel (!%p329_p3), %vm900_vm0, %v3922_v6, 0  ;;  %v5085_v20 = vld [vmem:[%s5786_s5] ss:$0 sm:$0xff] (!%p329_p3) }
   0xb   : > { %467 = vst.msk [vmem:[#allocation2 + $0x30] sm:$0xff] (!%p329_p3), %vm459_vm1, %v4915_v4  ;;  %468 = vst.msk [vmem:[#allocation2 + $0x38] sm:$0xff] (!%p329_p3), %vm459_vm1, %v4915_v4  ;;  %s3833_s10 = sshll.u32 (!%p329_p3), %s4905_s24, 5  ;;  %vm3464_vm3 = vcmask (!%p329_p3), 11264  }
   0xc   : > { %469 = vst.msk [vmem:[#allocation2 + $0x40] sm:$0x3] (!%p329_p3), %vm462_vm2, %v4915_v4  ;;  %472 = vst.msk [vmem:[#allocation2 + $0x58] sm:$0x3] (!%p329_p3), %vm462_vm2, %v4915_v4  ;;  %p444_p5 = scmp.lt.s32.totalorder (!%p329_p3), %s3833_s10, 63 }
   0xd   : > { %470 = vst.msk [vmem:[#allocation2 + $0x48] sm:$0xff] (!%p329_p3), %vm459_vm1, %v4915_v4  ;;  %471 = vst.msk [vmem:[#allocation2 + $0x50] sm:$0xff] (!%p329_p3), %vm459_vm1, %v4915_v4 }
   0xe   : > { %473 = vst.msk [vmem:[#allocation2 + $0x60] sm:$0xff] %vm459_vm1, %v4915_v4  ;;  %474 = vst.msk [vmem:[#allocation2 + $0x68] sm:$0xff] %vm459_vm1, %v4915_v4  ;;  %s5054_s9 = scalar_select %p398_p4, %s4905_s24, 1 }
   0xf   : > { %475 = vst.msk [vmem:[#allocation2 + $0x70] sm:$0x3] %vm462_vm2, %v4915_v4  ;;  %478 = vst.msk [vmem:[#allocation2 + $0x88] sm:$0x3] %vm462_vm2, %v4915_v4  ;;  %v802_v18 = vld [vmem:[#allocation2 + $0x1] sm:$0xff]  ;;  %s5794_s10 = smov (!%p444_p5, %s3833_s10), 63 }
  0x10   : > { %476 = vst.msk [vmem:[#allocation2 + $0x78] sm:$0xff] %vm459_vm1, %v4915_v4  ;;  %477 = vst.msk [vmem:[#allocation2 + $0x80] sm:$0xff] %vm459_vm1, %v4915_v4  ;;  %s4024_s12 = sshll.u32 %s5054_s9, 7  ;;  %v803_v19 = vld [vmem:[#allocation2 + $0x9] sm:$0xff]  ;;  %s3834_s11 = sshll.u32 %s5794_s10, 2 }
  0x11   : > { %479 = vst.msk [vmem:[#allocation2 + $0x90] sm:$0xff] %vm459_vm1, %v4915_v4  ;;  %480 = vst.msk [vmem:[#allocation2 + $0x98] sm:$0xff] %vm459_vm1, %v4915_v4  ;;  %s5065_s15 = scalar_lea.vmem %s5781_s0, %s4024_s12  ;;  %v834_v25 = vpack.c.bf16 %v803_v19, %v802_v18  ;;  %s5628_s14 = scalar_lea.vmem %s5787_s6, %s3834_s11 }
  0x12   : > { %481 = vst.msk [vmem:[#allocation2 + $0xa0] sm:$0x3] %vm462_vm2, %v4915_v4  ;;  %484 = vst.msk [vmem:[#allocation2 + $0xb8] sm:$0x3] %vm462_vm2, %v4915_v4  ;;  %v4061_v8 = vld [vmem:[%s5065_s15] sm:$0xff]   ;;  %v4124_v10 = vld [vmem:[%s5065_s15 + $0x8] sm:$0xff]  }
  0x13   : > { %482 = vst.msk [vmem:[#allocation2 + $0xa8] sm:$0xff] %vm459_vm1, %v4915_v4  ;;  %483 = vst.msk [vmem:[#allocation2 + $0xb0] sm:$0xff] %vm459_vm1, %v4915_v4  ;;  %v4125_v12 = vld [vmem:[%s5065_s15 + $0x10] sm:$0xff]   ;;  %v4062_v13 = vunpack.c.l.bf16 %v4061_v8  ;;  %v4063_v14 = vunpack.c.h.bf16 %v4061_v8  ;;  %v4066_v15 = vunpack.c.l.bf16 %v4124_v10  ;;  %v4067_v16 = vunpack.c.h.bf16 %v4124_v10  ;;  %v4126_v17 = vld [vmem:[%s5065_s15 + $0x18] sm:$0xff]   ;;  %4294 = vmatprep.mubr.msk.bf16.mxu1 %vm459_vm1, %v834_v25  ;;  %s3835_s24 = sshll.u32 %s5054_s9, 1 }
  0x14   : > { %485 = vst.msk [vmem:[#allocation2 + $0xc0] sm:$0xff] %vm459_vm1, %v4915_v4  ;;  %486 = vst.msk [vmem:[#allocation2 + $0xc8] sm:$0xff] %vm459_vm1, %v4915_v4  ;;  %v4070_v21 = vunpack.c.l.bf16 %v4125_v12  ;;  %v4071_v22 = vunpack.c.h.bf16 %v4125_v12  ;;  %v4074_v23 = vunpack.c.l.bf16 %v4126_v17  ;;  %v4075_v24 = vunpack.c.h.bf16 %v4126_v17  ;;  %v4127_v41 = vld [vmem:[%s5065_s15 + $0x20] sm:$0xff]   ;;  %v4128_v42 = vld [vmem:[%s5065_s15 + $0x28] sm:$0xff]   ;;  %s454_s17 = scalar_lea.vmem %s5788_s7, %s3835_s24 }
  0x15   : > { %487 = vst.msk [vmem:[#allocation2 + $0xd0] sm:$0x3] %vm462_vm2, %v4915_v4  ;;  %490 = vst.msk [vmem:[#allocation2 + $0xe8] sm:$0x3] %vm462_vm2, %v4915_v4  ;;  %v585_v26 = vmul.f32 %v4062_v13, %v5070_v7  ;;  %v586_v27 = vmul.f32 %v4063_v14, %v5070_v7  ;;  %v587_v28 = vmul.f32 %v4066_v15, %v5070_v7  ;;  %v4129_v47 = vld [vmem:[%s5065_s15 + $0x30] sm:$0xff]   ;;  %v4130_v48 = vld [vmem:[%s5065_s15 + $0x38] sm:$0xff]   ;;  %v4078_v54 = vunpack.c.l.bf16 %v4127_v41 }
  0x16   : > { %488 = vst.msk [vmem:[#allocation2 + $0xd8] sm:$0xff] %vm459_vm1, %v4915_v4  ;;  %489 = vst.msk [vmem:[#allocation2 + $0xe0] sm:$0xff] %vm459_vm1, %v4915_v4  ;;  %v588_v29 = vmul.f32 %v4067_v16, %v5070_v7  ;;  %v589_v30 = vmul.f32 %v4070_v21, %v5070_v7  ;;  %v590_v31 = vmul.f32 %v4071_v22, %v5070_v7  ;;  %v4079_v55 = vunpack.c.h.bf16 %v4127_v41  ;;  %v4131_v14 = vld [vmem:[%s5065_s15 + $0x40] sm:$0xff]   ;;  %v4133_v25 = vld [vmem:[%s5065_s15 + $0x50] sm:$0xff]  }
  0x17   : > { %491 = vst.msk [vmem:[#allocation2 + $0xf0] sm:$0xff] %vm459_vm1, %v4915_v4  ;;  %492 = vst.msk [vmem:[#allocation2 + $0xf8] sm:$0xff] %vm459_vm1, %v4915_v4  ;;  %v591_v32 = vmul.f32 %v4074_v23, %v5070_v7  ;;  %v623_v33 = vadd.f32 %v5085_v20, %v585_v26  ;;  %v624_v34 = vadd.f32 %v5085_v20, %v586_v27  ;;  %v4082_v56 = vunpack.c.l.bf16 %v4128_v42 }
  0x18   : > { %493 = vst.msk [vmem:[#allocation2 + $0x100] sm:$0x3] %vm462_vm2, %v4915_v4  ;;  %496 = vst.msk [vmem:[#allocation2 + $0x118] sm:$0x3] %vm462_vm2, %v4915_v4  ;;  %v625_v35 = vadd.f32 %v5085_v20, %v587_v28  ;;  %v592_v36 = vmul.f32 %v4075_v24, %v5070_v7  ;;  %v626_v37 = vadd.f32 %v5085_v20, %v588_v29  ;;  %v4083_v57 = vunpack.c.h.bf16 %v4128_v42  ;;  %v4132_v24 = vld [vmem:[%s5065_s15 + $0x48] sm:$0xff]  }
  0x19   : > { %494 = vst.msk [vmem:[#allocation2 + $0x108] sm:$0xff] %vm459_vm1, %v4915_v4  ;;  %495 = vst.msk [vmem:[#allocation2 + $0x110] sm:$0xff] %vm459_vm1, %v4915_v4  ;;  %v627_v38 = vadd.f32 %v5085_v20, %v589_v30  ;;  %v628_v39 = vadd.f32 %v5085_v20, %v590_v31  ;;  %v629_v40 = vadd.f32 %v5085_v20, %v591_v32  ;;  %v655_v43 = vmax.f32 %v623_v33, 0.0 }
  0x1a   : > { %497 = vst.msk [vmem:[#allocation2 + $0x120] sm:$0xff] %vm459_vm1, %v4915_v4  ;;  %498 = vst.msk [vmem:[#allocation2 + $0x128] sm:$0xff] %vm459_vm1, %v4915_v4  ;;  %v656_v44 = vmax.f32 %v624_v34, 0.0  ;;  %v657_v45 = vmax.f32 %v625_v35, 0.0  ;;  %v630_v46 = vadd.f32 %v5085_v20, %v592_v36  ;;  %v658_v49 = vmax.f32 %v626_v37, 0.0 }
  0x1b   : > { %499 = vst.msk [vmem:[#allocation2 + $0x130] sm:$0x3] %vm462_vm2, %v4915_v4  ;;  %502 = vst.msk [vmem:[#allocation2 + $0x148] sm:$0x3] %vm462_vm2, %v4915_v4  ;;  %v659_v50 = vmax.f32 %v627_v38, 0.0  ;;  %v660_v51 = vmax.f32 %v628_v39, 0.0  ;;  %v4086_v58 = vunpack.c.l.bf16 %v4129_v47  ;;  %v4087_v59 = vunpack.c.h.bf16 %v4129_v47 }
  0x1c   : > { %500 = vst.msk [vmem:[#allocation2 + $0x138] sm:$0xff] %vm459_vm1, %v4915_v4  ;;  %501 = vst.msk [vmem:[#allocation2 + $0x140] sm:$0xff] %vm459_vm1, %v4915_v4  ;;  %v661_v52 = vmax.f32 %v629_v40, 0.0  ;;  %v662_v53 = vmax.f32 %v630_v46, 0.0  ;;  %v4090_v60 = vunpack.c.l.bf16 %v4130_v48  ;;  %v593_v61 = vmul.f32 %v4078_v54, %v5070_v7  ;;  %v5155_v46 = vld [vmem:[%s5784_s3 + $0x6] sm:$0x1] }
  0x1d   : > { %503 = vst.msk [vmem:[#allocation2 + $0x150] sm:$0xff] %vm459_vm1, %v4915_v4  ;;  %504 = vst.msk [vmem:[#allocation2 + $0x158] sm:$0xff] %vm459_vm1, %v4915_v4  ;;  %v594_v62 = vmul.f32 %v4079_v55, %v5070_v7  ;;  %v595_v63 = vmul.f32 %v4082_v56, %v5070_v7  ;;  %v4091_v0 = vunpack.c.h.bf16 %v4130_v48  ;;  %v596_v2 = vmul.f32 %v4083_v57, %v5070_v7 }
  0x1e   : > { %505 = vst.msk [vmem:[#allocation2 + $0x160] sm:$0x3] %vm462_vm2, %v4915_v4  ;;  %508 = vst.msk [vmem:[#allocation2 + $0x178] sm:$0x3] %vm462_vm2, %v4915_v4  ;;  %v598_v5 = vmul.f32 %v4087_v59, %v5070_v7  ;;  %v599_v6 = vmul.f32 %v4090_v60, %v5070_v7  ;;  %v631_v8 = vadd.f32 %v5085_v20, %v593_v61  ;;  %v4094_v32 = vunpack.c.l.bf16 %v4131_v14  ;;  %v4135_v59 = vld [vmem:[%s5065_s15 + $0x60] sm:$0xff]  }
  0x1f   : > { %506 = vst.msk [vmem:[#allocation2 + $0x168] sm:$0xff] %vm459_vm1, %v4915_v4  ;;  %507 = vst.msk [vmem:[#allocation2 + $0x170] sm:$0xff] %vm459_vm1, %v4915_v4  ;;  %v632_v10 = vadd.f32 %v5085_v20, %v594_v62  ;;  %v633_v12 = vadd.f32 %v5085_v20, %v595_v63  ;;  %v600_v13 = vmul.f32 %v4091_v0, %v5070_v7  ;;  %v4095_v39 = vunpack.c.h.bf16 %v4131_v14 }
  0x20   : > { %509 = vst.msk [vmem:[#allocation2 + $0x180] sm:$0xff] %vm459_vm1, %v4915_v4  ;;  %510 = vst.msk [vmem:[#allocation2 + $0x188] sm:$0xff] %vm459_vm1, %v4915_v4  ;;  %v634_v15 = vadd.f32 %v5085_v20, %v596_v2  ;;  %v636_v17 = vadd.f32 %v5085_v20, %v598_v5  ;;  %v637_v18 = vadd.f32 %v5085_v20, %v599_v6  ;;  %v663_v19 = vmax.f32 %v631_v8, 0.0 }
  0x21   : > { %511 = vst.msk [vmem:[#allocation2 + $0x190] sm:$0x3] %vm462_vm2, %v4915_v4  ;;  %514 = vst.msk [vmem:[#allocation2 + $0x1a8] sm:$0x3] %vm462_vm2, %v4915_v4  ;;  %v664_v21 = vmax.f32 %v632_v10, 0.0  ;;  %v665_v22 = vmax.f32 %v633_v12, 0.0  ;;  %v638_v23 = vadd.f32 %v5085_v20, %v600_v13  ;;  %v601_v42 = vmul.f32 %v4094_v32, %v5070_v7 }
  0x22   : > { %512 = vst.msk [vmem:[#allocation2 + $0x198] sm:$0xff] %vm459_vm1, %v4915_v4  ;;  %513 = vst.msk [vmem:[#allocation2 + $0x1a0] sm:$0xff] %vm459_vm1, %v4915_v4  ;;  %v597_v4 = vmul.f32 %v4086_v58, %v5070_v7  ;;  %v666_v29 = vmax.f32 %v634_v15, 0.0  ;;  %v668_v31 = vmax.f32 %v636_v17, 0.0  ;;  %v669_v37 = vmax.f32 %v637_v18, 0.0  ;;  %v4136_v15 = vld [vmem:[%s5065_s15 + $0x68] sm:$0xff]  }
  0x23   : > { %688 = vst.msk [vmem:[#allocation2 + $0x19] sm:$0xff] %vm459_vm1, %v655_v43  ;;  %689 = vst.msk [vmem:[#allocation2 + $0x21] sm:$0xff] %vm459_vm1, %v656_v44  ;;  %v670_v38 = vmax.f32 %v638_v23, 0.0  ;;  %v4098_v43 = vunpack.c.l.bf16 %v4132_v24  ;;  %v4134_v44 = vld [vmem:[%s5065_s15 + $0x58] sm:$0xff]   ;;  %v4099_v47 = vunpack.c.h.bf16 %v4132_v24  ;;  %v4102_v48 = vunpack.c.l.bf16 %v4133_v25 }
  0x24   : > { %690 = vst.msk [vmem:[#allocation2 + $0x31] sm:$0xff] %vm459_vm1, %v657_v45  ;;  %691 = vst.msk [vmem:[#allocation2 + $0x39] sm:$0xff] %vm459_vm1, %v658_v49  ;;  %v635_v16 = vadd.f32 %v5085_v20, %v597_v4  ;;  %v602_v45 = vmul.f32 %v4095_v39, %v5070_v7  ;;  %v4106_v56 = vunpack.c.l.bf16 %v4134_v44  ;;  %v4107_v6 = vunpack.c.h.bf16 %v4134_v44 }
  0x25   : > { %692 = vst.msk [vmem:[#allocation2 + $0x49] sm:$0xff] %vm459_vm1, %v659_v50  ;;  %693 = vst.msk [vmem:[#allocation2 + $0x51] sm:$0xff] %vm459_vm1, %v660_v51  ;;  %v639_v51 = vadd.f32 %v5085_v20, %v601_v42  ;;  %v603_v54 = vmul.f32 %v4098_v43, %v5070_v7  ;;  %v604_v55 = vmul.f32 %v4099_v47, %v5070_v7  ;;  %v4110_v14 = vunpack.c.l.bf16 %v4135_v59 }
  0x26   : > { %694 = vst.msk [vmem:[#allocation2 + $0x61] sm:$0xff] %vm459_vm1, %v661_v52  ;;  %695 = vst.msk [vmem:[#allocation2 + $0x69] sm:$0xff] %vm459_vm1, %v662_v53  ;;  %v667_v30 = vmax.f32 %v635_v16, 0.0  ;;  %v4103_v52 = vunpack.c.h.bf16 %v4133_v25  ;;  %v5164_v53 = vld [vmem:[%s5784_s3 + $0x2] sm:$0x1]  ;;  %v605_v58 = vmul.f32 %v4102_v48, %v5070_v7  ;;  %v607_v8 = vmul.f32 %v4106_v56, %v5070_v7 }
  0x27   : > { %696 = vst.msk [vmem:[#allocation2 + $0x79] sm:$0xff] %vm459_vm1, %v663_v19  ;;  %697 = vst.msk [vmem:[#allocation2 + $0x81] sm:$0xff] %vm459_vm1, %v664_v21  ;;  %v671_v57 = vmax.f32 %v639_v51, 0.0  ;;  %v641_v62 = vadd.f32 %v5085_v20, %v603_v54  ;;  %v642_v63 = vadd.f32 %v5085_v20, %v604_v55  ;;  %v608_v18 = vmul.f32 %v4107_v6, %v5070_v7  ;;  %v4138_v55 = vld [vmem:[%s5065_s15 + $0x78] sm:$0xff]  }
  0x28   : > { %698 = vst.msk [vmem:[#allocation2 + $0x91] sm:$0xff] %vm459_vm1, %v665_v22  ;;  %699 = vst.msk [vmem:[#allocation2 + $0x99] sm:$0xff] %vm459_vm1, %v666_v29  ;;  %v643_v4 = vadd.f32 %v5085_v20, %v605_v58  ;;  %v645_v19 = vadd.f32 %v5085_v20, %v607_v8  ;;  %v4111_v21 = vunpack.c.h.bf16 %v4135_v59  ;;  %v4137_v22 = vld [vmem:[%s5065_s15 + $0x70] sm:$0xff]   ;;  %v609_v25 = vmul.f32 %v4110_v14, %v5070_v7 }
  0x29   : > { %700 = vst.msk [vmem:[#allocation2 + $0xa9] sm:$0xff] %vm459_vm1, %v667_v30  ;;  %701 = vst.msk [vmem:[#allocation2 + $0xb1] sm:$0xff] %vm459_vm1, %v668_v31  ;;  %v673_v12 = vmax.f32 %v641_v62, 0.0  ;;  %v674_v13 = vmax.f32 %v642_v63, 0.0  ;;  %v4115_v30 = vunpack.c.h.bf16 %v4136_v15  ;;  %v4122_v62 = vunpack.c.l.bf16 %v4138_v55 }
  0x2a   : > { %v804_v26 = vld [vmem:[#allocation2 + $0x19] sm:$0xff]  ;;  %v805_v27 = vld [vmem:[#allocation2 + $0x21] sm:$0xff]  ;;  %702 = vst.msk [vmem:[#allocation2 + $0xc1] sm:$0xff] %vm459_vm1, %v669_v37  ;;  %703 = vst.msk [vmem:[#allocation2 + $0xc9] sm:$0xff] %vm459_vm1, %v670_v38  ;;  %v675_v16 = vmax.f32 %v643_v4, 0.0  ;;  %v610_v29 = vmul.f32 %v4111_v21, %v5070_v7  ;;  %v4123_v63 = vunpack.c.h.bf16 %v4138_v55 }
  0x2b   : > { %v1867_v28 = vld [vmem:[#allocation2 + $0x31] sm:$0xff]  ;;  %v835_v33 = vpack.c.bf16 %v805_v27, %v804_v26  ;;  %v1868_v34 = vld [vmem:[#allocation2 + $0x39] sm:$0xff]  ;;  %704 = vst.msk [vmem:[#allocation2 + $0xd9] sm:$0xff] %vm459_vm1, %v671_v57  ;;  %706 = vst.msk [vmem:[#allocation2 + $0xf1] sm:$0xff] %vm459_vm1, %v673_v12  ;;  %v4114_v26 = vunpack.c.l.bf16 %v4136_v15  ;;  %v646_v27 = vadd.f32 %v5085_v20, %v608_v18  ;;  %v612_v42 = vmul.f32 %v4115_v30, %v5070_v7 }
  0x2c   : > { %v808_v35 = vld [vmem:[#allocation2 + $0x49] sm:$0xff]  ;;  %v809_v36 = vld [vmem:[#allocation2 + $0x51] sm:$0xff]  ;;  %v5138_v40 = vpack.c.bf16 %v1868_v34, %v1867_v28  ;;  %707 = vst.msk [vmem:[#allocation2 + $0xf9] sm:$0xff] %vm459_vm1, %v674_v13  ;;  %708 = vst.msk [vmem:[#allocation2 + $0x109] sm:$0xff] %vm459_vm1, %v675_v16  ;;  %v677_v28 = vmax.f32 %v645_v19, 0.0  ;;  %v648_v39 = vadd.f32 %v5085_v20, %v610_v29 }
  0x2d   : > { %v5140_v41 = vpack.c.bf16 %v809_v36, %v808_v35  ;;  %4295 = vmatmul.mubr.msk.bf16.vlgmr.msra.gmra.mrb[0].mxu1 %vm459_vm1, %v835_v33  ;;  %4430 = vmatprep.mubr.msk.bf16.mxu0 %vm459_vm1, %v835_v33  ;;  %v1871_v49 = vld [vmem:[#allocation2 + $0x61] sm:$0xff]  ;;  %v1872_v50 = vld [vmem:[#allocation2 + $0x69] sm:$0xff]  ;;  %v647_v33 = vadd.f32 %v5085_v20, %v609_v25  ;;  %v611_v34 = vmul.f32 %v4114_v26, %v5070_v7  ;;  %v4118_v35 = vunpack.c.l.bf16 %v4137_v22  ;;  %v2161_v14 = vld [vmem:[#allocation2 + $0x32] sm:$0xff] }
  0x2e   : > { %4327 = vmatpush3.bf16.msra.mxu1 %v5074_v9  ;;  %4431 = vmatmul.mubr.msk.bf16.vlgmr.msra.gmra.mrb[0].mxu0 %vm459_vm1, %v5138_v40  ;;  %v640_v9 = vadd.f32 %v5085_v20, %v602_v45  ;;  %v5179_v60 = vpack.c.bf16 %v1872_v50, %v1871_v49  ;;  %v812_v0 = vld [vmem:[#allocation2 + $0x79] sm:$0xff]  ;;  %v813_v2 = vld [vmem:[#allocation2 + $0x81] sm:$0xff]  ;;  %v4119_v36 = vunpack.c.h.bf16 %v4137_v22  ;;  %v678_v38 = vmax.f32 %v646_v27, 0.0  ;;  %710 = vst.msk [vmem:[#allocation2 + $0x121] sm:$0xff] %vm459_vm1, %v677_v28  ;;  %v2163_v19 = vld [vmem:[#allocation2 + $0x4a] sm:$0xff] }
  0x2f   : > { %4463 = vmatpush3.bf16.msra.mxu0 %v5078_v11  ;;  %4298 = vmatprep.mubr.msk.bf16.mxu1 %vm459_vm1, %v5138_v40  ;;  %v606_v11 = vmul.f32 %v4103_v52, %v5070_v7  ;;  %v5189_v10 = vpack.c.bf16 %v813_v2, %v812_v0  ;;  %v1875_v23 = vld [vmem:[#allocation2 + $0x91] sm:$0xff]  ;;  %v1876_v24 = vld [vmem:[#allocation2 + $0x99] sm:$0xff]  ;;  %v679_v43 = vmax.f32 %v647_v33, 0.0  ;;  %v649_v44 = vadd.f32 %v5085_v20, %v611_v34  ;;  %v5275_v26 = vld [vmem:[%s5784_s3 + $0x7] sm:$0x1] }
  0x30   : > { %4434 = vmatprep.mubr.msk.bf16.mxu0 %vm459_vm1, %v5140_v41  ;;  %4863 = vmatprep.subr.msk.bf16.mxu0 %vm900_vm0, %v5155_v46  ;;  %v672_v61 = vmax.f32 %v640_v9, 0.0  ;;  %v816_v31 = vld [vmem:[#allocation2 + $0xa9] sm:$0xff]  ;;  %v817_v32 = vld [vmem:[#allocation2 + $0xb1] sm:$0xff]  ;;  %v5213_v37 = vpack.c.bf16 %v1876_v24, %v1875_v23  ;;  %v613_v45 = vmul.f32 %v4118_v35, %v5070_v7  ;;  %v614_v47 = vmul.f32 %v4119_v36, %v5070_v7  ;;  %v2159_v59 = vld [vmem:[#allocation2 + $0x1a] sm:$0xff] }
  0x31   : > { %4858 = vmatprep.subr.msk.bf16.mxu1 %vm900_vm0, %v5164_v53  ;;  %v644_v5 = vadd.f32 %v5085_v20, %v606_v11  ;;  %v5221_v48 = vpack.c.bf16 %v817_v32, %v816_v31  ;;  %711 = vst.msk [vmem:[#allocation2 + $0x129] sm:$0xff] %vm459_vm1, %v678_v38  ;;  %v680_v49 = vmax.f32 %v648_v39, 0.0  ;;  %v650_v50 = vadd.f32 %v5085_v20, %v612_v42  ;;  %v1879_v58 = vld [vmem:[#allocation2 + $0xc1] sm:$0xff]  ;;  %v1880_v11 = vld [vmem:[#allocation2 + $0xc9] sm:$0xff]  ;;  %v2164_v21 = vld [vmem:[#allocation2 + $0x52] sm:$0xff] }
  0x32   : > { %705 = vst.msk [vmem:[#allocation2 + $0xe1] sm:$0xff] %vm459_vm1, %v672_v61  ;;  %712 = vst.msk [vmem:[#allocation2 + $0x139] sm:$0xff] %vm459_vm1, %v679_v43  ;;  %v681_v51 = vmax.f32 %v649_v44, 0.0  ;;  %v651_v52 = vadd.f32 %v5085_v20, %v613_v45  ;;  %v652_v9 = vadd.f32 %v5085_v20, %v614_v47  ;;  %v2160_v61 = vld [vmem:[#allocation2 + $0x22] sm:$0xff]  ;;  %v5242_v0 = vpack.c.bf16 %v1880_v11, %v1879_v58  ;;  %v820_v12 = vld [vmem:[#allocation2 + $0xd9] sm:$0xff] }
  0x33   : > { %v676_v17 = vmax.f32 %v644_v5, 0.0  ;;  %713 = vst.msk [vmem:[#allocation2 + $0x141] sm:$0xff] %vm459_vm1, %v680_v49  ;;  %v682_v54 = vmax.f32 %v650_v50, 0.0  ;;  %v615_v2 = vmul.f32 %v4122_v62, %v5070_v7  ;;  %v5245_v4 = vpack.c.bf16 %v2160_v61, %v2159_v59  ;;  %v822_v16 = vld [vmem:[#allocation2 + $0xf1] sm:$0xff]  ;;  %v824_v27 = vld [vmem:[#allocation2 + $0x109] sm:$0xff]  ;;  %v2167_v32 = vld [vmem:[#allocation2 + $0x7a] sm:$0xff] }
  0x34   : > { %714 = vst.msk [vmem:[#allocation2 + $0x151] sm:$0xff] %vm459_vm1, %v681_v51  ;;  %v683_v56 = vmax.f32 %v651_v52, 0.0  ;;  %v684_v57 = vmax.f32 %v652_v9, 0.0  ;;  %v616_v5 = vmul.f32 %v4123_v63, %v5070_v7  ;;  %v2162_v7 = vld [vmem:[#allocation2 + $0x3a] sm:$0xff]  ;;  %v5266_v24 = vpack.c.bf16 %v2164_v21, %v2163_v19  ;;  %v2165_v29 = vld [vmem:[#allocation2 + $0x62] sm:$0xff]  ;;  %v2169_v43 = vld [vmem:[#allocation2 + $0x92] sm:$0xff] }
  0x35   : > { %4299 = vmatmul.mubr.msk.bf16.gmra.mrb[4].mxu1 %vm459_vm1, %v5140_v41  ;;  %709 = vst.msk [vmem:[#allocation2 + $0x111] sm:$0xff] %vm459_vm1, %v676_v17  ;;  %715 = vst.msk [vmem:[#allocation2 + $0x159] sm:$0xff] %vm459_vm1, %v682_v54  ;;  %v653_v6 = vadd.f32 %v5085_v20, %v615_v2  ;;  %v823_v17 = vld [vmem:[#allocation2 + $0xf9] sm:$0xff]  ;;  %v5262_v22 = vpack.c.bf16 %v2162_v7, %v2161_v14  ;;  %v2553_v25 = vsel %vm900_vm0, %v5155_v46, 0  ;;  %v2166_v46 = vld [vmem:[#allocation2 + $0x6a] sm:$0xff]  ;;  %v1376_v21 = vsel %vm900_vm0, %v5164_v53, 0 }
  0x36   : > { %4435 = vmatmul.mubr.msk.bf16.gmra.mrb[4].mxu0 %vm459_vm1, %v5179_v60  ;;  %4302 = vmatprep.mubr.msk.bf16.mxu1 %vm459_vm1, %v5179_v60  ;;  %716 = vst.msk [vmem:[#allocation2 + $0x169] sm:$0xff] %vm459_vm1, %v683_v56  ;;  %717 = vst.msk [vmem:[#allocation2 + $0x171] sm:$0xff] %vm459_vm1, %v684_v57  ;;  %v654_v8 = vadd.f32 %v5085_v20, %v616_v5  ;;  %v5264_v23 = vpack.c.bf16 %v823_v17, %v822_v16  ;;  %v826_v30 = vld [vmem:[#allocation2 + $0x121] sm:$0xff]  ;;  %v2171_v49 = vld [vmem:[#allocation2 + $0xaa] sm:$0xff] }
  0x37   : > { %4438 = vmatprep.mubr.msk.bf16.mxu0 %vm459_vm1, %v5189_v10  ;;  %v685_v15 = vmax.f32 %v653_v6, 0.0  ;;  %v2168_v33 = vld [vmem:[#allocation2 + $0x82] sm:$0xff]  ;;  %v5287_v35 = vpack.c.bf16 %v2166_v46, %v2165_v29  ;;  %v2170_v44 = vld [vmem:[#allocation2 + $0x9a] sm:$0xff]  ;;  %v2172_v50 = vld [vmem:[#allocation2 + $0xb2] sm:$0xff] }
  0x38   : > { %v686_v18 = vmax.f32 %v654_v8, 0.0  ;;  %v827_v31 = vld [vmem:[#allocation2 + $0x129] sm:$0xff]  ;;  %v5291_v38 = vpack.c.bf16 %v2168_v33, %v2167_v32  ;;  %v5303_v52 = vpack.c.bf16 %v2170_v44, %v2169_v43  ;;  %v5307_v54 = vpack.c.bf16 %v2172_v50, %v2171_v49  ;;  %v753_v57 = vld [vmem:[#allocation2] sm:$0xff]  ;;  %v755_v8 = vld [vmem:[#allocation2 + $0x18] sm:$0xff] }
  0x39   : > { %v821_v13 = vld [vmem:[#allocation2 + $0xe1] sm:$0xff]  ;;  %718 = vst.msk [vmem:[#allocation2 + $0x181] sm:$0xff] %vm459_vm1, %v685_v15  ;;  %v5289_v36 = vpack.c.bf16 %v827_v31, %v826_v30  ;;  %v828_v39 = vld [vmem:[#allocation2 + $0x139] sm:$0xff]  ;;  %v2174_v11 = vld [vmem:[#allocation2 + $0xca] sm:$0xff] }
  0x3a   : > { %v5259_v20 = vpack.c.bf16 %v821_v13, %v820_v12  ;;  %719 = vst.msk [vmem:[#allocation2 + $0x189] sm:$0xff] %vm459_vm1, %v686_v18  ;;  %v829_v42 = vld [vmem:[#allocation2 + $0x141] sm:$0xff]  ;;  %v2177_v13 = vld [vmem:[#allocation2 + $0xf2] sm:$0xff]  ;;  %v2182_v31 = vld [vmem:[#allocation2 + $0x12a] sm:$0xff] }
  0x3b   : > { %v830_v45 = vld [vmem:[#allocation2 + $0x151] sm:$0xff]  ;;  %v5301_v51 = vpack.c.bf16 %v829_v42, %v828_v39  ;;  %v2173_v58 = vld [vmem:[#allocation2 + $0xc2] sm:$0xff]  ;;  %v2175_v61 = vld [vmem:[#allocation2 + $0xda] sm:$0xff] }
  0x3c   : > { %v825_v28 = vld [vmem:[#allocation2 + $0x111] sm:$0xff]  ;;  %v831_v47 = vld [vmem:[#allocation2 + $0x159] sm:$0xff]  ;;  %v754_v59 = vld [vmem:[#allocation2 + $0x8] sm:$0xff]  ;;  %v5319_v2 = vpack.c.bf16 %v2174_v11, %v2173_v58 }
  0x3d   : > { %4303 = vmatmul.mubr.msk.bf16.gmra.mrb[8].mxu1 %vm459_vm1, %v5189_v10  ;;  %v5285_v34 = vpack.c.bf16 %v825_v28, %v824_v27  ;;  %v5305_v9 = vpack.c.bf16 %v831_v47, %v830_v45  ;;  %v832_v55 = vld [vmem:[#allocation2 + $0x169] sm:$0xff]  ;;  %v833_v56 = vld [vmem:[#allocation2 + $0x171] sm:$0xff]  ;;  %v785_v5 = vpack.c.bf16 %v754_v59, %v753_v57  ;;  %v756_v12 = vld [vmem:[#allocation2 + $0x20] sm:$0xff] }
  0x3e   : > { %4439 = vmatmul.mubr.msk.bf16.gmra.mrb[8].mxu0 %vm459_vm1, %v5213_v37  ;;  %4306 = vmatprep.mubr.msk.bf16.mxu1 %vm459_vm1, %v5213_v37  ;;  %v2176_v62 = vld [vmem:[#allocation2 + $0xe2] sm:$0xff]  ;;  %v5317_v63 = vpack.c.bf16 %v833_v56, %v832_v55  ;;  %v2178_v14 = vld [vmem:[#allocation2 + $0xfa] sm:$0xff]  ;;  %v757_v15 = vld [vmem:[#allocation2 + $0x30] sm:$0xff]  ;;  %v5330_v18 = vpack.c.bf16 %v756_v12, %v755_v8 }
  0x3f   : > { %4442 = vmatprep.mubr.msk.bf16.mxu0 %vm459_vm1, %v5221_v48  ;;  %v5321_v6 = vpack.c.bf16 %v2176_v62, %v2175_v61  ;;  %v758_v7 = vld [vmem:[#allocation2 + $0x38] sm:$0xff]  ;;  %v2179_v16 = vld [vmem:[#allocation2 + $0x10a] sm:$0xff]  ;;  %v5332_v19 = vpack.c.bf16 %v2178_v14, %v2177_v13  ;;  %v5345_v28 = vld [vmem:[%s5784_s3 + $0x3] sm:$0x1] }
  0x40   : > { %v2180_v17 = vld [vmem:[#allocation2 + $0x112] sm:$0xff]  ;;  %v759_v29 = vld [vmem:[#allocation2 + $0x48] sm:$0xff]  ;;  %v761_v30 = vld [vmem:[#allocation2 + $0x60] sm:$0xff] }
  0x41   : > { %v5338_v27 = vpack.c.bf16 %v2180_v17, %v2179_v16  ;;  %v760_v46 = vld [vmem:[#allocation2 + $0x50] sm:$0xff]  ;;  %v2181_v53 = vld [vmem:[#allocation2 + $0x122] sm:$0xff]  ;;  %v2183_v33 = vld [vmem:[#allocation2 + $0x13a] sm:$0xff] }
  0x42   : > { %v762_v32 = vld [vmem:[#allocation2 + $0x68] sm:$0xff]  ;;  %v5355_v42 = vpack.c.bf16 %v760_v46, %v759_v29  ;;  %v5357_v43 = vpack.c.bf16 %v2182_v31, %v2181_v53  ;;  %v763_v47 = vld [vmem:[#allocation2 + $0x78] sm:$0xff]  ;;  %v764_v49 = vld [vmem:[#allocation2 + $0x80] sm:$0xff] }
  0x43   : > { %v2184_v39 = vld [vmem:[#allocation2 + $0x142] sm:$0xff]  ;;  %v5359_v44 = vpack.c.bf16 %v762_v32, %v761_v30  ;;  %v765_v50 = vld [vmem:[#allocation2 + $0x90] sm:$0xff]  ;;  %v2186_v56 = vld [vmem:[#allocation2 + $0x15a] sm:$0xff]  ;;  %v5371_v59 = vpack.c.bf16 %v764_v49, %v763_v47 }
  0x44   : > { %v5361_v45 = vpack.c.bf16 %v2184_v39, %v2183_v33  ;;  %v2185_v55 = vld [vmem:[#allocation2 + $0x152] sm:$0xff]  ;;  %v2187_v58 = vld [vmem:[#allocation2 + $0x16a] sm:$0xff]  ;;  %v769_v13 = vld [vmem:[#allocation2 + $0xc0] sm:$0xff]  ;;  %v2847_v33 = vsel %vm900_vm0, %v5275_v26, 0 }
  0x45   : > { %4307 = vmatmul.mubr.msk.bf16.gmra.mrb[12].mxu1 %vm459_vm1, %v5221_v48  ;;  %v766_v57 = vld [vmem:[#allocation2 + $0x98] sm:$0xff]  ;;  %v5373_v61 = vpack.c.bf16 %v2186_v56, %v2185_v55  ;;  %v767_v8 = vld [vmem:[#allocation2 + $0xa8] sm:$0xff]  ;;  %v768_v12 = vld [vmem:[#allocation2 + $0xb0] sm:$0xff] }
  0x46   : > { %4443 = vmatmul.mubr.msk.bf16.gmra.mrb[12].mxu0 %vm459_vm1, %v5242_v0  ;;  %4310 = vmatprep.mubr.msk.bf16.mxu1 %vm459_vm1, %v5242_v0  ;;  %v2188_v11 = vld [vmem:[#allocation2 + $0x172] sm:$0xff]  ;;  %v5375_v62 = vpack.c.bf16 %v766_v57, %v765_v50  ;;  %v2189_v14 = vld [vmem:[#allocation2 + $0x182] sm:$0xff]  ;;  %v5387_v16 = vpack.c.bf16 %v768_v12, %v767_v8 }
  0x47   : > { %4464 = vmatprep.mubr.msk.bf16.mxu0 %vm459_vm1, %v5245_v4  ;;  %v771_v29 = vld [vmem:[#allocation2 + $0xd8] sm:$0xff]  ;;  %v772_v46 = vld [vmem:[#allocation2 + $0xe0] sm:$0xff]  ;;  %v773_v30 = vld [vmem:[#allocation2 + $0xf0] sm:$0xff] }
  0x48   : > { %v774_v53 = vld [vmem:[#allocation2 + $0xf8] sm:$0xff]  ;;  %v5401_v31 = vpack.c.bf16 %v772_v46, %v771_v29  ;;  %v3973_v39 = vld [vmem:[%s5784_s3 + $0x8] sm:$0x1]  ;;  %v776_v49 = vld [vmem:[#allocation2 + $0x110] sm:$0xff] }
  0x49   : > { %v5403_v32 = vpack.c.bf16 %v774_v53, %v773_v30  ;;  %v775_v47 = vld [vmem:[#allocation2 + $0x108] sm:$0xff]  ;;  %v779_v57 = vld [vmem:[#allocation2 + $0x138] sm:$0xff]  ;;  %v1670_v53 = vsel %vm900_vm0, %v5345_v28, 0 }
  0x4a   : > { %v778_v50 = vld [vmem:[#allocation2 + $0x128] sm:$0xff]  ;;  %v5419_v55 = vpack.c.bf16 %v776_v49, %v775_v47  ;;  %v782_v8 = vld [vmem:[#allocation2 + $0x158] sm:$0xff]  ;;  %v2485_v47 = vld [vmem:[#allocation2 + $0x1a0] sm:$0xff] }
  0x4b   : > { %v1278_v29 = vld [vmem:[#allocation2 + $0xa] sm:$0xff] }
  0x4d   : > { %4311 = vmatmul.mubr.msk.bf16.gmra.mrb[16].mxu1 %vm459_vm1, %v5259_v20 }
  0x4e   : > { %4465 = vmatmul.mubr.msk.bf16.vlgmr.msra.gmra.mrb[0].mxu0 %vm459_vm1, %v5262_v22  ;;  %4314 = vmatprep.mubr.msk.bf16.mxu1 %vm459_vm1, %v5264_v23 }
  0x4f   : > { %4497 = vmatpush3.bf16.msra.mxu0 %v2553_v25  ;;  %4468 = vmatprep.mubr.msk.bf16.mxu0 %vm459_vm1, %v5266_v24  ;;  %v5336_v25 = vpack.c.bf16 %v758_v7, %v757_v15  ;;  %v2190_v15 = vld [vmem:[#allocation2 + $0x18a] sm:$0xff] }
  0x50   : > { %4864 = vmatprep.subr.msk.bf16.mxu0 %vm900_vm0, %v5275_v26  ;;  %v770_v7 = vld [vmem:[#allocation2 + $0xc8] sm:$0xff]  ;;  %v5389_v17 = vpack.c.bf16 %v2190_v15, %v2189_v14  ;;  %v777_v26 = vld [vmem:[#allocation2 + $0x120] sm:$0xff]  ;;  %v784_v15 = vld [vmem:[#allocation2 + $0x170] sm:$0xff] }
  0x51   : > { %v5421_v56 = vpack.c.bf16 %v778_v50, %v777_v26  ;;  %v783_v14 = vld [vmem:[#allocation2 + $0x168] sm:$0xff]  ;;  %v3141_v26 = vsel %vm900_vm0, %v3973_v39, 0 }
  0x52   : > { %v5443_v46 = vpack.c.bf16 %v784_v15, %v783_v14 }
  0x55   : > { %4315 = vmatmul.mubr.msk.bf16.gmra.mrb[20].mxu1 %vm459_vm1, %v5285_v34 }
  0x56   : > { %4469 = vmatmul.mubr.msk.bf16.gmra.mrb[4].mxu0 %vm459_vm1, %v5287_v35  ;;  %4318 = vmatprep.mubr.msk.bf16.mxu1 %vm459_vm1, %v5289_v36 }
  0x57   : > { %4472 = vmatprep.mubr.msk.bf16.mxu0 %vm459_vm1, %v5291_v38 }
  0x5d   : > { %4319 = vmatmul.mubr.msk.bf16.gmra.mrb[24].mxu1 %vm459_vm1, %v5301_v51 }
  0x5e   : > { %4473 = vmatmul.mubr.msk.bf16.gmra.mrb[8].mxu0 %vm459_vm1, %v5303_v52  ;;  %4322 = vmatprep.mubr.msk.bf16.mxu1 %vm459_vm1, %v5305_v9 }
  0x5f   : > { %4476 = vmatprep.mubr.msk.bf16.mxu0 %vm459_vm1, %v5307_v54 }
  0x65   : > { %4323 = vmatmul.mubr.msk.bf16.gmra.mrb[28].mxu1 %vm459_vm1, %v5317_v63 }
  0x66   : > { %4477 = vmatmul.mubr.msk.bf16.gmra.mrb[12].mxu0 %vm459_vm1, %v5319_v2  ;;  %4328 = vmatprep.mubr.msk.bf16.mxu1 %vm459_vm1, %v785_v5  ;;  %v5377_v5 = vpack.c.bf16 %v2188_v11, %v2187_v58  ;;  %v780_v58 = vld [vmem:[#allocation2 + $0x140] sm:$0xff]  ;;  %v781_v11 = vld [vmem:[#allocation2 + $0x150] sm:$0xff] }
  0x67   : > { %4480 = vmatprep.mubr.msk.bf16.mxu0 %vm459_vm1, %v5321_v6  ;;  %v5431_v12 = vpack.c.bf16 %v780_v58, %v779_v57 }
  0x6d   : > { %4329 = vmatmul.mubr.msk.bf16.vlgmr.msra.gmra.mrb[0].mxu1 %vm459_vm1, %v5330_v18 }
  0x6e   : > { %4361 = vmatpush3.bf16.msra.mxu1 %v1376_v21  ;;  %4481 = vmatmul.mubr.msk.bf16.gmra.mrb[16].mxu0 %vm459_vm1, %v5332_v19  ;;  %v5391_v21 = vpack.c.bf16 %v770_v7, %v769_v13  ;;  %v5433_v13 = vpack.c.bf16 %v782_v8, %v781_v11  ;;  %v1277_v7 = vld [vmem:[#allocation2 + $0x2] sm:$0xff] }
  0x6f   : > { %4332 = vmatprep.mubr.msk.bf16.mxu1 %vm459_vm1, %v5336_v25  ;;  %4484 = vmatprep.mubr.msk.bf16.mxu0 %vm459_vm1, %v5338_v27  ;;  %v1309_v30 = vpack.c.bf16 %v1278_v29, %v1277_v7 }
  0x70   : > { %4859 = vmatprep.subr.msk.bf16.mxu1 %vm900_vm0, %v5345_v28  ;;  %v2483_v28 = vld [vmem:[#allocation2 + $0x188] sm:$0xff] }
  0x75   : > { %4333 = vmatmul.mubr.msk.bf16.gmra.mrb[4].mxu1 %vm459_vm1, %v5355_v42 }
  0x76   : > { %4485 = vmatmul.mubr.msk.bf16.gmra.mrb[20].mxu0 %vm459_vm1, %v5357_v43  ;;  %4336 = vmatprep.mubr.msk.bf16.mxu1 %vm459_vm1, %v5359_v44 }
  0x77   : > { %4488 = vmatprep.mubr.msk.bf16.mxu0 %vm459_vm1, %v5361_v45 }
  0x7d   : > { %4337 = vmatmul.mubr.msk.bf16.gmra.mrb[8].mxu1 %vm459_vm1, %v5371_v59 }
  0x7e   : > { %4489 = vmatmul.mubr.msk.bf16.gmra.mrb[24].mxu0 %vm459_vm1, %v5373_v61  ;;  %4340 = vmatprep.mubr.msk.bf16.mxu1 %vm459_vm1, %v5375_v62 }
  0x7f   : > { %4492 = vmatprep.mubr.msk.bf16.mxu0 %vm459_vm1, %v5377_v5 }
  0x85   : > { %4341 = vmatmul.mubr.msk.bf16.gmra.mrb[12].mxu1 %vm459_vm1, %v5387_v16 }
  0x86   : > { %4493 = vmatmul.mubr.msk.bf16.gmra.mrb[28].mxu0 %vm459_vm1, %v5389_v17  ;;  %4344 = vmatprep.mubr.msk.bf16.mxu1 %vm459_vm1, %v5391_v21 }
  0x87   : > { %4498 = vmatprep.mubr.msk.bf16.mxu0 %vm459_vm1, %v5336_v25 }
  0x8d   : > { %4345 = vmatmul.mubr.msk.bf16.gmra.mrb[16].mxu1 %vm459_vm1, %v5401_v31 }
  0x8e   : > { %4499 = vmatmul.mubr.msk.bf16.vlgmr.msra.gmra.mrb[0].mxu0 %vm459_vm1, %v5355_v42  ;;  %4348 = vmatprep.mubr.msk.bf16.mxu1 %vm459_vm1, %v5403_v32 }
  0x8f   : > { %4531 = vmatpush3.bf16.msra.mxu0 %v2847_v33  ;;  %4502 = vmatprep.mubr.msk.bf16.mxu0 %vm459_vm1, %v5359_v44 }
  0x90   : > { %4865 = vmatprep.subr.msk.bf16.mxu0 %vm900_vm0, %v3973_v39 }
  0x95   : > { %4349 = vmatmul.mubr.msk.bf16.gmra.mrb[20].mxu1 %vm459_vm1, %v5419_v55 }
  0x96   : > { %4503 = vmatmul.mubr.msk.bf16.gmra.mrb[4].mxu0 %vm459_vm1, %v5371_v59  ;;  %4352 = vmatprep.mubr.msk.bf16.mxu1 %vm459_vm1, %v5421_v56 }
  0x97   : > { %4506 = vmatprep.mubr.msk.bf16.mxu0 %vm459_vm1, %v5375_v62 }
  0x9d   : > { %4353 = vmatmul.mubr.msk.bf16.gmra.mrb[24].mxu1 %vm459_vm1, %v5431_v12 }
  0x9e   : > { %4507 = vmatmul.mubr.msk.bf16.gmra.mrb[8].mxu0 %vm459_vm1, %v5387_v16  ;;  %4356 = vmatprep.mubr.msk.bf16.mxu1 %vm459_vm1, %v5433_v13 }
  0x9f   : > { %4510 = vmatprep.mubr.msk.bf16.mxu0 %vm459_vm1, %v5391_v21 }
  0xa5   : > { %4357 = vmatmul.mubr.msk.bf16.gmra.mrb[28].mxu1 %vm459_vm1, %v5443_v46 }
  0xa6   : > { %4511 = vmatmul.mubr.msk.bf16.gmra.mrb[12].mxu0 %vm459_vm1, %v5401_v31  ;;  %4362 = vmatprep.mubr.msk.bf16.mxu1 %vm459_vm1, %v1309_v30 }
  0xa7   : > { %4514 = vmatprep.mubr.msk.bf16.mxu0 %vm459_vm1, %v5403_v32 }
  0xad   : > { %4363 = vmatmul.mubr.msk.bf16.vlgmr.msra.gmra.mrb[0].mxu1 %vm459_vm1, %v5245_v4  ;;  %v2482_v4 = vld [vmem:[#allocation2 + $0x180] sm:$0xff] }
  0xae   : > { %4395 = vmatpush3.bf16.msra.mxu1 %v1670_v53  ;;  %4515 = vmatmul.mubr.msk.bf16.gmra.mrb[16].mxu0 %vm459_vm1, %v5419_v55  ;;  %v5472_v33 = vpack.c.bf16 %v2483_v28, %v2482_v4 }
  0xaf   : > { %4366 = vmatprep.mubr.msk.bf16.mxu1 %vm459_vm1, %v5262_v22  ;;  %4518 = vmatprep.mubr.msk.bf16.mxu0 %vm459_vm1, %v5421_v56 }
  0xb0   : > { %4861 = vmatprep.subr.msk.bf16.mxu1 %vm900_vm0, %v4982_v1  ;;  %v2484_v1 = vld [vmem:[#allocation2 + $0x198] sm:$0xff] }
  0xb1   : > { %v2501_v49 = vpack.c.bf16 %v2485_v47, %v2484_v1 }
  0xb5   : > { %4367 = vmatmul.mubr.msk.bf16.gmra.mrb[4].mxu1 %vm459_vm1, %v5266_v24 }
  0xb6   : > { %4519 = vmatmul.mubr.msk.bf16.gmra.mrb[20].mxu0 %vm459_vm1, %v5431_v12  ;;  %4370 = vmatprep.mubr.msk.bf16.mxu1 %vm459_vm1, %v5287_v35 }
  0xb7   : > { %4522 = vmatprep.mubr.msk.bf16.mxu0 %vm459_vm1, %v5433_v13 }
  0xbd   : > { %4371 = vmatmul.mubr.msk.bf16.gmra.mrb[8].mxu1 %vm459_vm1, %v5291_v38 }
  0xbe   : > { %4523 = vmatmul.mubr.msk.bf16.gmra.mrb[24].mxu0 %vm459_vm1, %v5443_v46  ;;  %4374 = vmatprep.mubr.msk.bf16.mxu1 %vm459_vm1, %v5303_v52 }
  0xbf   : > { %4526 = vmatprep.mubr.msk.bf16.mxu0 %vm459_vm1, %v5472_v33 }
  0xc5   : > { %4375 = vmatmul.mubr.msk.bf16.gmra.mrb[12].mxu1 %vm459_vm1, %v5307_v54 }
  0xc6   : > { %4527 = vmatmul.mubr.msk.bf16.gmra.mrb[28].mxu0 %vm459_vm1, %v2501_v49  ;;  %4378 = vmatprep.mubr.msk.bf16.mxu1 %vm459_vm1, %v5319_v2 }
  0xc7   : > { %4532 = vmatprep.mubr.msk.bf16.mxu0 %vm459_vm1, %v5138_v40  ;;  %v2777_v40 = vld [vmem:[#allocation2 + $0x189] sm:$0xff] }
  0xcd   : > { %4379 = vmatmul.mubr.msk.bf16.gmra.mrb[16].mxu1 %vm459_vm1, %v5321_v6 }
  0xce   : > { %4533 = vmatmul.mubr.msk.bf16.vlgmr.msra.gmra.mrb[0].mxu0 %vm459_vm1, %v5140_v41  ;;  %4382 = vmatprep.mubr.msk.bf16.mxu1 %vm459_vm1, %v5332_v19 }
  0xcf   : > { %4565 = vmatpush3.bf16.msra.mxu0 %v3141_v26  ;;  %4536 = vmatprep.mubr.msk.bf16.mxu0 %vm459_vm1, %v5179_v60  ;;  %v2778_v60 = vld [vmem:[#allocation2 + $0x199] sm:$0xff] }
  0xd5   : > { %4383 = vmatmul.mubr.msk.bf16.gmra.mrb[20].mxu1 %vm459_vm1, %v5338_v27 }
  0xd6   : > { %4537 = vmatmul.mubr.msk.bf16.gmra.mrb[4].mxu0 %vm459_vm1, %v5189_v10  ;;  %4386 = vmatprep.mubr.msk.bf16.mxu1 %vm459_vm1, %v5357_v43  ;;  %v2779_v10 = vld [vmem:[#allocation2 + $0x1a1] sm:$0xff] }
  0xd7   : > { %4540 = vmatprep.mubr.msk.bf16.mxu0 %vm459_vm1, %v5213_v37  ;;  %v2795_v37 = vpack.c.bf16 %v2779_v10, %v2778_v60 }
  0xdd   : > { %4387 = vmatmul.mubr.msk.bf16.gmra.mrb[24].mxu1 %vm459_vm1, %v5361_v45 }
  0xde   : > { %4541 = vmatmul.mubr.msk.bf16.gmra.mrb[8].mxu0 %vm459_vm1, %v5221_v48  ;;  %4390 = vmatprep.mubr.msk.bf16.mxu1 %vm459_vm1, %v5373_v61  ;;  %v1881_v48 = vld [vmem:[#allocation2 + $0xd9] sm:$0xff] }
  0xdf   : > { %4544 = vmatprep.mubr.msk.bf16.mxu0 %vm459_vm1, %v5242_v0  ;;  %v1882_v0 = vld [vmem:[#allocation2 + $0xe1] sm:$0xff] }
  0xe5   : > { %4391 = vmatmul.mubr.msk.bf16.gmra.mrb[28].mxu1 %vm459_vm1, %v5377_v5 }
  0xe6   : > { %4545 = vmatmul.mubr.msk.bf16.gmra.mrb[12].mxu0 %vm459_vm1, %v5259_v20  ;;  %4396 = vmatprep.mubr.msk.bf16.mxu1 %vm459_vm1, %v5330_v18  ;;  %v1905_v20 = vpack.c.bf16 %v1882_v0, %v1881_v48 }
  0xe7   : > { %4548 = vmatprep.mubr.msk.bf16.mxu0 %vm459_vm1, %v5264_v23  ;;  %v1884_v23 = vld [vmem:[#allocation2 + $0xf9] sm:$0xff] }
  0xed   : > { %4397 = vmatmul.mubr.msk.bf16.vlgmr.msra.gmra.mrb[0].mxu1 %vm459_vm1, %v5336_v25 }
  0xee   : > { %4599 = vmatpush3.bf16.msra.mxu1 %v4990_v3  ;;  %4549 = vmatmul.mubr.msk.bf16.gmra.mrb[16].mxu0 %vm459_vm1, %v5285_v34  ;;  %v2776_v3 = vld [vmem:[#allocation2 + $0x181] sm:$0xff]  ;;  %v1886_v34 = vld [vmem:[#allocation2 + $0x111] sm:$0xff] }
  0xef   : > { %4400 = vmatprep.mubr.msk.bf16.mxu1 %vm459_vm1, %v5355_v42  ;;  %4552 = vmatprep.mubr.msk.bf16.mxu0 %vm459_vm1, %v5289_v36  ;;  %v2794_v41 = vpack.c.bf16 %v2777_v40, %v2776_v3 }
  0xf5   : > { %4401 = vmatmul.mubr.msk.bf16.gmra.mrb[4].mxu1 %vm459_vm1, %v5359_v44 }
  0xf6   : > { %4553 = vmatmul.mubr.msk.bf16.gmra.mrb[20].mxu0 %vm459_vm1, %v5301_v51  ;;  %4404 = vmatprep.mubr.msk.bf16.mxu1 %vm459_vm1, %v5371_v59 }
  0xf7   : > { %4556 = vmatprep.mubr.msk.bf16.mxu0 %vm459_vm1, %v5305_v9 }
  0xfd   : > { %4405 = vmatmul.mubr.msk.bf16.gmra.mrb[8].mxu1 %vm459_vm1, %v5375_v62 }
  0xfe   : > { %4557 = vmatmul.mubr.msk.bf16.gmra.mrb[24].mxu0 %vm459_vm1, %v5317_v63  ;;  %4408 = vmatprep.mubr.msk.bf16.mxu1 %vm459_vm1, %v5387_v16 }
  0xff   : > { %4560 = vmatprep.mubr.msk.bf16.mxu0 %vm459_vm1, %v2794_v41 }
 0x105   : > { %4409 = vmatmul.mubr.msk.bf16.gmra.mrb[12].mxu1 %vm459_vm1, %v5391_v21 }
 0x106   : > { %4561 = vmatmul.mubr.msk.bf16.gmra.mrb[28].mxu0 %vm459_vm1, %v2795_v37  ;;  %4412 = vmatprep.mubr.msk.bf16.mxu1 %vm459_vm1, %v5401_v31 }
 0x107   : > { %4566 = vmatprep.mubr.msk.bf16.mxu0 %vm459_vm1, %v5262_v22  ;;  %v1883_v22 = vld [vmem:[#allocation2 + $0xf1] sm:$0xff] }
 0x10d   : > { %4413 = vmatmul.mubr.msk.bf16.gmra.mrb[16].mxu1 %vm459_vm1, %v5403_v32 }
 0x10e   : > { %4567 = vmatmul.mubr.msk.bf16.vlgmr.msra.gmra.mrb[0].mxu0 %vm459_vm1, %v5266_v24  ;;  %4416 = vmatprep.mubr.msk.bf16.mxu1 %vm459_vm1, %v5419_v55  ;;  %v1885_v24 = vld [vmem:[#allocation2 + $0x109] sm:$0xff] }
 0x10f   : > { %4570 = vmatprep.mubr.msk.bf16.mxu0 %vm459_vm1, %v5287_v35  ;;  %v1906_v35 = vpack.c.bf16 %v1884_v23, %v1883_v22 }
 0x115   : > { %4417 = vmatmul.mubr.msk.bf16.gmra.mrb[20].mxu1 %vm459_vm1, %v5421_v56 }
 0x116   : > { %4571 = vmatmul.mubr.msk.bf16.gmra.mrb[4].mxu0 %vm459_vm1, %v5291_v38  ;;  %4420 = vmatprep.mubr.msk.bf16.mxu1 %vm459_vm1, %v5431_v12  ;;  %v1907_v38 = vpack.c.bf16 %v1886_v34, %v1885_v24 }
 0x117   : > { %4574 = vmatprep.mubr.msk.bf16.mxu0 %vm459_vm1, %v5303_v52  ;;  %v3073_v52 = vld [vmem:[#allocation2 + $0x1a2] sm:$0xff] }
 0x11d   : > { %4421 = vmatmul.mubr.msk.bf16.gmra.mrb[24].mxu1 %vm459_vm1, %v5433_v13 }
 0x11e   : > { %4575 = vmatmul.mubr.msk.bf16.gmra.mrb[8].mxu0 %vm459_vm1, %v5307_v54  ;;  %4424 = vmatprep.mubr.msk.bf16.mxu1 %vm459_vm1, %v5443_v46 }
 0x11f   : > { %4578 = vmatprep.mubr.msk.bf16.mxu0 %vm459_vm1, %v5319_v2 }
 0x125   : > { %4425 = vmatmul.mubr.msk.bf16.gmra.mrb[28].mxu1 %vm459_vm1, %v5472_v33 }
 0x126   : > { %4579 = vmatmul.mubr.msk.bf16.gmra.mrb[12].mxu0 %vm459_vm1, %v5321_v6  ;;  %4446 = vmatprep.mubr.msk.bf16.mxu1 %vm459_vm1, %v1905_v20 }
 0x127   : > { %4582 = vmatprep.mubr.msk.bf16.mxu0 %vm459_vm1, %v5332_v19 }
 0x12d   : > { %4447 = vmatmul.mubr.msk.bf16.vlgmr.msra.gmra.mrb[16].mxu1 %vm459_vm1, %v1906_v35 }
 0x12e   : > { %4583 = vmatmul.mubr.msk.bf16.gmra.mrb[16].mxu0 %vm459_vm1, %v5338_v27  ;;  %4450 = vmatprep.mubr.msk.bf16.mxu1 %vm459_vm1, %v1907_v38 }
 0x12f   : > { %4586 = vmatprep.mubr.msk.bf16.mxu0 %vm459_vm1, %v5357_v43 }
 0x135   : > { %4451 = vmatmul.mubr.msk.bf16.gmra.mrb[20].mxu1 %vm459_vm1, %v5289_v36  ;;  %v3072_v36 = vld [vmem:[#allocation2 + $0x19a] sm:$0xff] }
 0x136   : > { %4587 = vmatmul.mubr.msk.bf16.gmra.mrb[20].mxu0 %vm459_vm1, %v5361_v45  ;;  %4454 = vmatprep.mubr.msk.bf16.mxu1 %vm459_vm1, %v5301_v51  ;;  %v3089_v54 = vpack.c.bf16 %v3073_v52, %v3072_v36 }
 0x137   : > { %4590 = vmatprep.mubr.msk.bf16.mxu0 %vm459_vm1, %v5373_v61 }
 0x13d   : > { %4455 = vmatmul.mubr.msk.bf16.gmra.mrb[24].mxu1 %vm459_vm1, %v5305_v9 }
 0x13e   : > { %4591 = vmatmul.mubr.msk.bf16.gmra.mrb[24].mxu0 %vm459_vm1, %v5377_v5  ;;  %4458 = vmatprep.mubr.msk.bf16.mxu1 %vm459_vm1, %v5317_v63 }
 0x13f   : > { %4594 = vmatprep.mubr.msk.bf16.mxu0 %vm459_vm1, %v5389_v17 }
 0x145   : > { %4459 = vmatmul.mubr.msk.bf16.gmra.mrb[28].mxu1 %vm459_vm1, %v2794_v41 }
 0x146   : > { %4595 = vmatmul.mubr.msk.bf16.gmra.mrb[28].mxu0 %vm459_vm1, %v3089_v54 }
 0x1c0   : > { %v4398_v51 = vpop.f32.mrb[0].mxu1 }
 0x1c1   : > { %v1706_v2 = vpop.f32.mrb[1].mxu1 }
 0x1c2   : > { %v4399_v9 = vpop.f32.mrb[2].mxu1 }
 0x1c3   : > { %v1709_v6 = vpop.f32.mrb[3].mxu1 }
 0x1c8   : > { %v4402_v18 = vpop.f32.mrb[4].mxu1 }
 0x1c9   : > { %v1722_v19 = vpop.f32.mrb[5].mxu1 }
 0x1ca   : > { %v4403_v25 = vpop.f32.mrb[6].mxu1 }
 0x1cb   : > { %v1725_v27 = vpop.f32.mrb[7].mxu1 }
 0x1d0   : > { %v5608_v63 = vpop.f32.mrb[8].mxu1 }
 0x1d1   : > { %v5610_v42 = vpop.f32.mrb[9].mxu1 }
 0x1d2   : > { %v5612_v43 = vpop.f32.mrb[10].mxu1 }
 0x1d3   : > { %v5614_v44 = vpop.f32.mrb[11].mxu1 }
 0x1d8   : > { %v5617_v45 = vpop.f32.mrb[12].mxu1 }
 0x1d9   : > { %v5619_v59 = vpop.f32.mrb[13].mxu1 }
 0x1da   : > { %v5621_v61 = vpop.f32.mrb[14].mxu1 }
 0x1db   : > { %v5623_v62 = vpop.f32.mrb[15].mxu1 }
 0x1e1   : > { %v4568_v5 = vpop.f32.mrb[0].mxu0 }
 0x1e2   : > { %v4600_v16 = vadd.f32 %v4568_v5, %v4398_v51  ;;  %v3177_v17 = vpop.f32.mrb[1].mxu0 }
 0x1e3   : > { %v4601_v21 = vadd.f32 %v3177_v17, %v1706_v2  ;;  %v4569_v31 = vpop.f32.mrb[2].mxu0 }
 0x1e4   : > { %v4030_v32 = vpack.c.bf16 %v4600_v16, %v4600_v16  ;;  %v4602_v39 = vadd.f32 %v4569_v31, %v4399_v9  ;;  %v3180_v50 = vpop.f32.mrb[3].mxu0  ;;  %v3568_v58 = vmul.f32 %v4600_v16, %v4600_v16  ;;  %v3500_v29 = vsel %vm459_vm1, %v4600_v16, 0.0 }
 0x1e5   : > { %v4028_v55 = vpack.c.bf16 %v4601_v21, %v4601_v21  ;;  %v3566_v56 = vmul.f32 %v4601_v21, %v4601_v21  ;;  %v4603_v57 = vadd.f32 %v3180_v50, %v1709_v6  ;;  %v3497_v8 = vsel %vm459_vm1, %v4601_v21, 0.0 }
 0x1e6   : > { %3467 = vst.msk [vmem:[%s5628_s14 + $0x8] sm:$0xf] %vm3464_vm3, %v4030_v32  ;;  %v4031_v11 = vpack.c.bf16 %v4602_v39, %v4602_v39  ;;  %v3569_v15 = vmul.f32 %v4602_v39, %v4602_v39  ;;  %v3601_v47 = vsel %vm459_vm1, %v3568_v58, 0.0  ;;  %v3502_v3 = vsel %vm459_vm1, %v4602_v39, 0.0 }
 0x1e7   : > { %3465 = vst.msk [vmem:[%s5628_s14] sm:$0xf] %vm3464_vm3, %v4028_v55  ;;  %v4029_v12 = vpack.c.bf16 %v4603_v57, %v4603_v57  ;;  %v3498_v13 = vsel %vm459_vm1, %v4603_v57, 0.0  ;;  %v3567_v14 = vmul.f32 %v4603_v57, %v4603_v57  ;;  %v3598_v46 = vsel %vm459_vm1, %v3566_v56, 0.0 }
 0x1e8   : > { %3468 = vst.msk [vmem:[%s5628_s14 + $0xc] sm:$0xf] %vm3464_vm3, %v4031_v11  ;;  %v3499_v7 = vadd.f32 %v3498_v13, %v3497_v8  ;;  %v3603_v40 = vsel %vm459_vm1, %v3569_v15, 0.0 }
 0x1e9   : > { %3466 = vst.msk [vmem:[%s5628_s14 + $0x4] sm:$0xf] %vm3464_vm3, %v4029_v12  ;;  %v3599_v30 = vsel %vm459_vm1, %v3567_v14, 0.0  ;;  %v4572_v53 = vpop.f32.mrb[4].mxu0 }
 0x1ea   : > { %v3501_v4 = vadd.f32 %v3500_v29, %v3499_v7  ;;  %v3600_v28 = vadd.f32 %v3599_v30, %v3598_v46  ;;  %v4604_v33 = vadd.f32 %v4572_v53, %v4402_v18  ;;  %v3193_v1 = vpop.f32.mrb[5].mxu0 }
 0x1eb   : > { %v4605_v49 = vadd.f32 %v3193_v1, %v1722_v19  ;;  %v4573_v26 = vpop.f32.mrb[6].mxu0 }
 0x1ec   : > { %v3602_v41 = vadd.f32 %v3601_v47, %v3600_v28  ;;  %v4034_v60 = vpack.c.bf16 %v4604_v33, %v4604_v33  ;;  %v3196_v10 = vpop.f32.mrb[7].mxu0  ;;  %v3503_v48 = vadd.f32 %v3502_v3, %v3501_v4  ;;  %v4606_v23 = vadd.f32 %v4573_v26, %v4403_v25 }
 0x1ed   : > { %v4032_v37 = vpack.c.bf16 %v4605_v49, %v4605_v49  ;;  %v3504_v0 = vsel %vm459_vm1, %v4605_v49, 0.0  ;;  %v3570_v20 = vmul.f32 %v4605_v49, %v4605_v49  ;;  %v4607_v24 = vadd.f32 %v3196_v10, %v1725_v27 }
 0x1ee   : > { %3471 = vst.msk [vmem:[%s5628_s14 + $0x18] sm:$0xf] %vm3464_vm3, %v4034_v60  ;;  %v3604_v22 = vadd.f32 %v3603_v40, %v3602_v41  ;;  %v3505_v34 = vadd.f32 %v3504_v0, %v3503_v48  ;;  %v3572_v38 = vmul.f32 %v4604_v33, %v4604_v33  ;;  %v4035_v52 = vpack.c.bf16 %v4606_v23, %v4606_v23 }
 0x1ef   : > { %3469 = vst.msk [vmem:[%s5628_s14 + $0x10] sm:$0xf] %vm3464_vm3, %v4032_v37  ;;  %v3605_v35 = vsel %vm459_vm1, %v3570_v20, 0.0  ;;  %v4033_v54 = vpack.c.bf16 %v4607_v24, %v4607_v24  ;;  %v3506_v51 = vsel %vm459_vm1, %v4607_v24, 0.0  ;;  %v3571_v2 = vmul.f32 %v4607_v24, %v4607_v24 }
 0x1f0   : > { %v3606_v36 = vadd.f32 %v3605_v35, %v3604_v22  ;;  %3472 = vst.msk [vmem:[%s5628_s14 + $0x1c] sm:$0xf] %vm3464_vm3, %v4035_v52  ;;  %v3507_v6 = vadd.f32 %v3506_v51, %v3505_v34  ;;  %v3508_v25 = vsel %vm459_vm1, %v4604_v33, 0.0  ;;  %v3573_v27 = vmul.f32 %v4606_v23, %v4606_v23 }
 0x1f1   : > { %v4576_v9 = vpop.f32.mrb[8].mxu0  ;;  %3470 = vst.msk [vmem:[%s5628_s14 + $0x14] sm:$0xf] %vm3464_vm3, %v4033_v54  ;;  %v3607_v5 = vsel %vm459_vm1, %v3571_v2, 0.0  ;;  %v3609_v21 = vsel %vm459_vm1, %v3572_v38, 0.0 }
 0x1f2   : > { %v4608_v18 = vadd.f32 %v4576_v9, %v5608_v63  ;;  %v3209_v19 = vpop.f32.mrb[9].mxu0  ;;  %v3509_v31 = vadd.f32 %v3508_v25, %v3507_v6  ;;  %v3608_v32 = vadd.f32 %v3607_v5, %v3606_v36  ;;  %v3510_v63 = vsel %vm459_vm1, %v4606_v23, 0.0 }
 0x1f3   : > { %v4609_v16 = vadd.f32 %v3209_v19, %v5610_v42  ;;  %v4577_v17 = vpop.f32.mrb[10].mxu0  ;;  %v3611_v12 = vsel %vm459_vm1, %v3573_v27, 0.0 }
 0x1f4   : > { %v4038_v39 = vpack.c.bf16 %v4608_v18, %v4608_v18  ;;  %v3212_v50 = vpop.f32.mrb[11].mxu0  ;;  %v3610_v58 = vadd.f32 %v3609_v21, %v3608_v32  ;;  %v3511_v11 = vadd.f32 %v3510_v63, %v3509_v31  ;;  %v4610_v42 = vadd.f32 %v4577_v17, %v5612_v43 }
 0x1f5   : > { %v4036_v55 = vpack.c.bf16 %v4609_v16, %v4609_v16  ;;  %v3512_v56 = vsel %vm459_vm1, %v4609_v16, 0.0  ;;  %v3574_v57 = vmul.f32 %v4609_v16, %v4609_v16  ;;  %v4611_v8 = vadd.f32 %v3212_v50, %v5614_v44 }
 0x1f6   : > { %3475 = vst.msk [vmem:[%s5628_s14 + $0x28] sm:$0xf] %vm3464_vm3, %v4038_v39  ;;  %v3576_v14 = vmul.f32 %v4608_v18, %v4608_v18  ;;  %v3513_v15 = vadd.f32 %v3512_v56, %v3511_v11  ;;  %v3612_v7 = vadd.f32 %v3611_v12, %v3610_v58  ;;  %v4039_v29 = vpack.c.bf16 %v4610_v42, %v4610_v42 }
 0x1f7   : > { %3473 = vst.msk [vmem:[%s5628_s14 + $0x20] sm:$0xf] %vm3464_vm3, %v4036_v55  ;;  %v3613_v13 = vsel %vm459_vm1, %v3574_v57, 0.0  ;;  %v4037_v46 = vpack.c.bf16 %v4611_v8, %v4611_v8  ;;  %v3514_v30 = vsel %vm459_vm1, %v4611_v8, 0.0  ;;  %v3575_v53 = vmul.f32 %v4611_v8, %v4611_v8 }
 0x1f8   : > { %v3614_v28 = vadd.f32 %v3613_v13, %v3612_v7  ;;  %3476 = vst.msk [vmem:[%s5628_s14 + $0x2c] sm:$0xf] %vm3464_vm3, %v4039_v29  ;;  %v3515_v43 = vadd.f32 %v3514_v30, %v3513_v15  ;;  %v3516_v1 = vsel %vm459_vm1, %v4608_v18, 0.0  ;;  %v3577_v47 = vmul.f32 %v4610_v42, %v4610_v42 }
 0x1f9   : > { %v4580_v4 = vpop.f32.mrb[12].mxu0  ;;  %3474 = vst.msk [vmem:[%s5628_s14 + $0x24] sm:$0xf] %vm3464_vm3, %v4037_v46  ;;  %v3615_v49 = vsel %vm459_vm1, %v3575_v53, 0.0  ;;  %v3617_v40 = vsel %vm459_vm1, %v3576_v14, 0.0 }
 0x1fa   : > { %v4612_v44 = vadd.f32 %v4580_v4, %v5617_v45  ;;  %v3225_v33 = vpop.f32.mrb[13].mxu0  ;;  %v3517_v41 = vadd.f32 %v3516_v1, %v3515_v43  ;;  %v3616_v60 = vadd.f32 %v3615_v49, %v3614_v28  ;;  %v3518_v45 = vsel %vm459_vm1, %v4610_v42, 0.0 }
 0x1fb   : > { %v4613_v26 = vadd.f32 %v3225_v33, %v5619_v59  ;;  %v4581_v3 = vpop.f32.mrb[14].mxu0  ;;  %v3619_v34 = vsel %vm459_vm1, %v3577_v47, 0.0 }
 0x1fc   : > { %v4042_v10 = vpack.c.bf16 %v4612_v44, %v4612_v44  ;;  %v3228_v37 = vpop.f32.mrb[15].mxu0  ;;  %v3618_v22 = vadd.f32 %v3617_v40, %v3616_v60  ;;  %v3519_v23 = vadd.f32 %v3518_v45, %v3517_v41  ;;  %v4614_v59 = vadd.f32 %v4581_v3, %v5621_v61 }
 0x1fd   : > { %v4040_v48 = vpack.c.bf16 %v4613_v26, %v4613_v26  ;;  %v3520_v0 = vsel %vm459_vm1, %v4613_v26, 0.0  ;;  %v3578_v20 = vmul.f32 %v4613_v26, %v4613_v26  ;;  %v4615_v24 = vadd.f32 %v3228_v37, %v5623_v62 }
 0x1fe   : > { %3479 = vst.msk [vmem:[%s5628_s14 + $0x38] sm:$0xf] %vm3464_vm3, %v4042_v10  ;;  %v3580_v38 = vmul.f32 %v4612_v44, %v4612_v44  ;;  %v3521_v36 = vadd.f32 %v3520_v0, %v3519_v23  ;;  %v3620_v52 = vadd.f32 %v3619_v34, %v3618_v22  ;;  %v4043_v54 = vpack.c.bf16 %v4614_v59, %v4614_v59 }
 0x1ff   : > { %3477 = vst.msk [vmem:[%s5628_s14 + $0x30] sm:$0xf] %vm3464_vm3, %v4040_v48  ;;  %v3621_v35 = vsel %vm459_vm1, %v3578_v20, 0.0  ;;  %v4041_v2 = vpack.c.bf16 %v4615_v24, %v4615_v24  ;;  %v3522_v9 = vsel %vm459_vm1, %v4615_v24, 0.0  ;;  %v3579_v6 = vmul.f32 %v4615_v24, %v4615_v24 }
 0x200   : > { %v4448_v51 = vpop.f32.mrb[16].mxu1  ;;  %v3622_v19 = vadd.f32 %v3621_v35, %v3620_v52  ;;  %3480 = vst.msk [vmem:[%s5628_s14 + $0x3c] sm:$0xf] %vm3464_vm3, %v4043_v54  ;;  %v3523_v62 = vadd.f32 %v3522_v9, %v3521_v36  ;;  %v3524_v16 = vsel %vm459_vm1, %v4612_v44, 0.0  ;;  %v3581_v17 = vmul.f32 %v4614_v59, %v4614_v59 }
 0x201   : > { %v2064_v61 = vpop.f32.mrb[17].mxu1  ;;  %v4584_v18 = vpop.f32.mrb[16].mxu0  ;;  %3478 = vst.msk [vmem:[%s5628_s14 + $0x34] sm:$0xf] %vm3464_vm3, %v4041_v2  ;;  %v3623_v21 = vsel %vm459_vm1, %v3579_v6, 0.0  ;;  %v3625_v50 = vsel %vm459_vm1, %v3580_v38, 0.0 }
 0x202   : > { %v4616_v25 = vadd.f32 %v4584_v18, %v4448_v51  ;;  %v4449_v27 = vpop.f32.mrb[18].mxu1  ;;  %v3241_v5 = vpop.f32.mrb[17].mxu0  ;;  %v3525_v63 = vadd.f32 %v3524_v16, %v3523_v62  ;;  %v3624_v55 = vadd.f32 %v3623_v21, %v3622_v19  ;;  %v3526_v58 = vsel %vm459_vm1, %v4614_v59, 0.0 }
 0x203   : > { %v4617_v31 = vadd.f32 %v3241_v5, %v2064_v61  ;;  %v2067_v32 = vpop.f32.mrb[19].mxu1  ;;  %v4585_v39 = vpop.f32.mrb[18].mxu0  ;;  %v3627_v7 = vsel %vm459_vm1, %v3581_v17, 0.0 }
 0x204   : > { %v4046_v56 = vpack.c.bf16 %v4616_v25, %v4616_v25  ;;  %v3244_v57 = vpop.f32.mrb[19].mxu0  ;;  %v3626_v12 = vadd.f32 %v3625_v50, %v3624_v55  ;;  %v3527_v13 = vadd.f32 %v3526_v58, %v3525_v63  ;;  %v4618_v14 = vadd.f32 %v4585_v39, %v4449_v27 }
 0x205   : > { %v4044_v11 = vpack.c.bf16 %v4617_v31, %v4617_v31  ;;  %v3528_v42 = vsel %vm459_vm1, %v4617_v31, 0.0  ;;  %v3582_v8 = vmul.f32 %v4617_v31, %v4617_v31  ;;  %v4619_v15 = vadd.f32 %v3244_v57, %v2067_v32 }
 0x206   : > { %3483 = vst.msk [vmem:[%s5628_s14 + $0x48] sm:$0xf] %vm3464_vm3, %v4046_v56  ;;  %v3584_v46 = vmul.f32 %v4616_v25, %v4616_v25  ;;  %v3529_v30 = vadd.f32 %v3528_v42, %v3527_v13  ;;  %v3628_v53 = vadd.f32 %v3627_v7, %v3626_v12  ;;  %v4047_v4 = vpack.c.bf16 %v4618_v14, %v4618_v14 }
 0x207   : > { %3481 = vst.msk [vmem:[%s5628_s14 + $0x40] sm:$0xf] %vm3464_vm3, %v4044_v11  ;;  %v3629_v29 = vsel %vm459_vm1, %v3582_v8, 0.0  ;;  %v4045_v43 = vpack.c.bf16 %v4619_v15, %v4619_v15  ;;  %v3530_v44 = vsel %vm459_vm1, %v4619_v15, 0.0  ;;  %v3583_v33 = vmul.f32 %v4619_v15, %v4619_v15 }
 0x208   : > { %v4452_v28 = vpop.f32.mrb[20].mxu1  ;;  %v3630_v49 = vadd.f32 %v3629_v29, %v3628_v53  ;;  %3484 = vst.msk [vmem:[%s5628_s14 + $0x4c] sm:$0xf] %vm3464_vm3, %v4047_v4  ;;  %v3531_v26 = vadd.f32 %v3530_v44, %v3529_v30  ;;  %v3532_v60 = vsel %vm459_vm1, %v4616_v25, 0.0  ;;  %v3585_v10 = vmul.f32 %v4618_v14, %v4618_v14 }
 0x209   : > { %v2080_v1 = vpop.f32.mrb[21].mxu1  ;;  %v4588_v47 = vpop.f32.mrb[20].mxu0  ;;  %3482 = vst.msk [vmem:[%s5628_s14 + $0x44] sm:$0xf] %vm3464_vm3, %v4045_v43  ;;  %v3631_v37 = vsel %vm459_vm1, %v3583_v33, 0.0  ;;  %v3633_v20 = vsel %vm459_vm1, %v3584_v46, 0.0 }
 0x20a   : > { %v4620_v3 = vadd.f32 %v4588_v47, %v4452_v28  ;;  %v4453_v40 = vpop.f32.mrb[22].mxu1  ;;  %v3257_v41 = vpop.f32.mrb[21].mxu0  ;;  %v3533_v22 = vadd.f32 %v3532_v60, %v3531_v26  ;;  %v3632_v23 = vadd.f32 %v3631_v37, %v3630_v49  ;;  %v3534_v34 = vsel %vm459_vm1, %v4618_v14, 0.0 }
 0x20b   : > { %v4621_v45 = vadd.f32 %v3257_v41, %v2080_v1  ;;  %v2083_v48 = vpop.f32.mrb[23].mxu1  ;;  %v4589_v0 = vpop.f32.mrb[22].mxu0  ;;  %v3635_v9 = vsel %vm459_vm1, %v3585_v10, 0.0 }
 0x20c   : > { %v4050_v59 = vpack.c.bf16 %v4620_v3, %v4620_v3  ;;  %v3260_v24 = vpop.f32.mrb[23].mxu0  ;;  %v3634_v52 = vadd.f32 %v3633_v20, %v3632_v23  ;;  %v3535_v54 = vadd.f32 %v3534_v34, %v3533_v22  ;;  %v4622_v51 = vadd.f32 %v4589_v0, %v4453_v40 }
 0x20d   : > { %v4048_v35 = vpack.c.bf16 %v4621_v45, %v4621_v45  ;;  %v3536_v38 = vsel %vm459_vm1, %v4621_v45, 0.0  ;;  %v3586_v36 = vmul.f32 %v4621_v45, %v4621_v45  ;;  %v4623_v2 = vadd.f32 %v3260_v24, %v2083_v48 }
 0x20e   : > { %3487 = vst.msk [vmem:[%s5628_s14 + $0x58] sm:$0xf] %vm3464_vm3, %v4050_v59  ;;  %v3588_v61 = vmul.f32 %v4620_v3, %v4620_v3  ;;  %v3537_v18 = vadd.f32 %v3536_v38, %v3535_v54  ;;  %v3636_v19 = vadd.f32 %v3635_v9, %v3634_v52  ;;  %v4051_v62 = vpack.c.bf16 %v4622_v51, %v4622_v51 }
 0x20f   : > { %3485 = vst.msk [vmem:[%s5628_s14 + $0x50] sm:$0xf] %vm3464_vm3, %v4048_v35  ;;  %v3637_v6 = vsel %vm459_vm1, %v3586_v36, 0.0  ;;  %v4049_v27 = vpack.c.bf16 %v4623_v2, %v4623_v2  ;;  %v3538_v5 = vsel %vm459_vm1, %v4623_v2, 0.0  ;;  %v3587_v16 = vmul.f32 %v4623_v2, %v4623_v2 }
 0x210   : > { %v4456_v25 = vpop.f32.mrb[24].mxu1  ;;  %v3638_v31 = vadd.f32 %v3637_v6, %v3636_v19  ;;  %3488 = vst.msk [vmem:[%s5628_s14 + $0x5c] sm:$0xf] %vm3464_vm3, %v4051_v62  ;;  %v3539_v32 = vadd.f32 %v3538_v5, %v3537_v18  ;;  %v3540_v55 = vsel %vm459_vm1, %v4620_v3, 0.0  ;;  %v3589_v56 = vmul.f32 %v4622_v51, %v4622_v51 }
 0x211   : > { %v2096_v17 = vpop.f32.mrb[25].mxu1  ;;  %v4592_v21 = vpop.f32.mrb[24].mxu0  ;;  %3486 = vst.msk [vmem:[%s5628_s14 + $0x54] sm:$0xf] %vm3464_vm3, %v4049_v27  ;;  %v3639_v57 = vsel %vm459_vm1, %v3587_v16, 0.0  ;;  %v3641_v8 = vsel %vm459_vm1, %v3588_v61, 0.0 }
 0x212   : > { %v4624_v39 = vadd.f32 %v4592_v21, %v4456_v25  ;;  %v4457_v50 = vpop.f32.mrb[26].mxu1  ;;  %v3273_v63 = vpop.f32.mrb[25].mxu0  ;;  %v3541_v12 = vadd.f32 %v3540_v55, %v3539_v32  ;;  %v3640_v13 = vadd.f32 %v3639_v57, %v3638_v31  ;;  %v3542_v7 = vsel %vm459_vm1, %v4622_v51, 0.0 }
 0x213   : > { %v4625_v58 = vadd.f32 %v3273_v63, %v2096_v17  ;;  %v2099_v11 = vpop.f32.mrb[27].mxu1  ;;  %v4593_v42 = vpop.f32.mrb[26].mxu0  ;;  %v3643_v44 = vsel %vm459_vm1, %v3589_v56, 0.0 }
 0x214   : > { %v4054_v14 = vpack.c.bf16 %v4624_v39, %v4624_v39  ;;  %v3276_v15 = vpop.f32.mrb[27].mxu0  ;;  %v3642_v53 = vadd.f32 %v3641_v8, %v3640_v13  ;;  %v3543_v4 = vadd.f32 %v3542_v7, %v3541_v12  ;;  %v4626_v28 = vadd.f32 %v4593_v42, %v4457_v50 }
 0x215   : > { %v4052_v29 = vpack.c.bf16 %v4625_v58, %v4625_v58  ;;  %v3544_v46 = vsel %vm459_vm1, %v4625_v58, 0.0  ;;  %v3590_v30 = vmul.f32 %v4625_v58, %v4625_v58  ;;  %v4627_v43 = vadd.f32 %v3276_v15, %v2099_v11 }
 0x216   : > { %3491 = vst.msk [vmem:[%s5628_s14 + $0x68] sm:$0xf] %vm3464_vm3, %v4054_v14  ;;  %v3592_v1 = vmul.f32 %v4624_v39, %v4624_v39  ;;  %v3545_v47 = vadd.f32 %v3544_v46, %v3543_v4  ;;  %v3644_v49 = vadd.f32 %v3643_v44, %v3642_v53  ;;  %v4055_v26 = vpack.c.bf16 %v4626_v28, %v4626_v28 }
 0x217   : > { %3489 = vst.msk [vmem:[%s5628_s14 + $0x60] sm:$0xf] %vm3464_vm3, %v4052_v29  ;;  %v3645_v33 = vsel %vm459_vm1, %v3590_v30, 0.0  ;;  %v4053_v40 = vpack.c.bf16 %v4627_v43, %v4627_v43  ;;  %v3546_v41 = vsel %vm459_vm1, %v4627_v43, 0.0  ;;  %v3591_v60 = vmul.f32 %v4627_v43, %v4627_v43 }
 0x218   : > { %v4460_v3 = vpop.f32.mrb[28].mxu1  ;;  %v3646_v45 = vadd.f32 %v3645_v33, %v3644_v49  ;;  %3492 = vst.msk [vmem:[%s5628_s14 + $0x6c] sm:$0xf] %vm3464_vm3, %v4055_v26  ;;  %v3547_v48 = vadd.f32 %v3546_v41, %v3545_v47  ;;  %v3548_v23 = vsel %vm459_vm1, %v4624_v39, 0.0  ;;  %v3593_v59 = vmul.f32 %v4626_v28, %v4626_v28 }
 0x219   : > { %v2112_v10 = vpop.f32.mrb[29].mxu1  ;;  %v4596_v37 = vpop.f32.mrb[28].mxu0  ;;  %3490 = vst.msk [vmem:[%s5628_s14 + $0x64] sm:$0xf] %vm3464_vm3, %v4053_v40  ;;  %v3647_v24 = vsel %vm459_vm1, %v3591_v60, 0.0  ;;  %v3649_v36 = vsel %vm459_vm1, %v3592_v1, 0.0 }
 0x21a   : > { %v4628_v0 = vadd.f32 %v4596_v37, %v4460_v3  ;;  %v4461_v20 = vpop.f32.mrb[30].mxu1  ;;  %v3289_v22 = vpop.f32.mrb[29].mxu0  ;;  %v3549_v52 = vadd.f32 %v3548_v23, %v3547_v48  ;;  %v3648_v54 = vadd.f32 %v3647_v24, %v3646_v45  ;;  %v3550_v9 = vsel %vm459_vm1, %v4626_v28, 0.0 }
 0x21b   : > { %v4629_v34 = vadd.f32 %v3289_v22, %v2112_v10  ;;  %v2115_v35 = vpop.f32.mrb[31].mxu1  ;;  %v4597_v38 = vpop.f32.mrb[30].mxu0  ;;  %v3651_v5 = vsel %vm459_vm1, %v3593_v59, 0.0 }
 0x21c   : > { %v4058_v51 = vpack.c.bf16 %v4628_v0, %v4628_v0  ;;  %v3292_v2 = vpop.f32.mrb[31].mxu0  ;;  %v3650_v19 = vadd.f32 %v3649_v36, %v3648_v54  ;;  %v3551_v62 = vadd.f32 %v3550_v9, %v3549_v52  ;;  %v4630_v25 = vadd.f32 %v4597_v38, %v4461_v20 }
 0x21d   : > { %v4056_v6 = vpack.c.bf16 %v4629_v34, %v4629_v34  ;;  %v3552_v61 = vsel %vm459_vm1, %v4629_v34, 0.0  ;;  %v3594_v18 = vmul.f32 %v4629_v34, %v4629_v34  ;;  %v4631_v27 = vadd.f32 %v3292_v2, %v2115_v35 }
 0x21e   : > { %3495 = vst.msk [vmem:[%s5628_s14 + $0x78] sm:$0xf] %vm3464_vm3, %v4058_v51  ;;  %v3553_v17 = vadd.f32 %v3552_v61, %v3551_v62  ;;  %v3652_v21 = vadd.f32 %v3651_v5, %v3650_v19  ;;  %v4059_v31 = vpack.c.bf16 %v4630_v25, %v4630_v25  ;;  %v3596_v32 = vmul.f32 %v4628_v0, %v4628_v0 }
 0x21f   : > { %3493 = vst.msk [vmem:[%s5628_s14 + $0x70] sm:$0xf] %vm3464_vm3, %v4056_v6  ;;  %v3653_v16 = vsel %vm459_vm1, %v3594_v18, 0.0  ;;  %v4057_v39 = vpack.c.bf16 %v4631_v27, %v4631_v27  ;;  %v3554_v50 = vsel %vm459_vm1, %v4631_v27, 0.0  ;;  %v3595_v63 = vmul.f32 %v4631_v27, %v4631_v27 }
 0x220   : > { %v3654_v55 = vadd.f32 %v3653_v16, %v3652_v21  ;;  %3496 = vst.msk [vmem:[%s5628_s14 + $0x7c] sm:$0xf] %vm3464_vm3, %v4059_v31  ;;  %v3555_v56 = vadd.f32 %v3554_v50, %v3553_v17  ;;  %v3556_v57 = vsel %vm459_vm1, %v4628_v0, 0.0  ;;  %v3597_v58 = vmul.f32 %v4630_v25, %v4630_v25 }
 0x221   : > { %3494 = vst.msk [vmem:[%s5628_s14 + $0x74] sm:$0xf] %vm3464_vm3, %v4057_v39  ;;  %v3655_v11 = vsel %vm459_vm1, %v3595_v63, 0.0  ;;  %v3657_v12 = vsel %vm459_vm1, %v3596_v32, 0.0  ;;  %v3558_v13 = vsel %vm459_vm1, %v4630_v25, 0.0 }
 0x222   : > { %v3557_v42 = vadd.f32 %v3556_v57, %v3555_v56  ;;  %v3656_v8 = vadd.f32 %v3655_v11, %v3654_v55  ;;  %v3659_v7 = vsel %vm459_vm1, %v3597_v58, 0.0 }
 0x224   : > { %v3559_v14 = vadd.f32 %v3558_v13, %v3557_v42  ;;  %v3658_v15 = vadd.f32 %v3657_v12, %v3656_v8 }
 0x226   : > { %v3560_v29 = vrot.slane %v3559_v14, 4  ;;  %v3660_v46 = vadd.f32 %v3659_v7, %v3658_v15 }
 0x228   : > { %v3561_v30 = vadd.f32 %v3560_v29, %v3559_v14  ;;  %v3661_v53 = vrot.slane %v3660_v46, 4 }
 0x22a   : > { %v3562_v4 = vrot.slane %v3561_v30, 2  ;;  %v3662_v28 = vadd.f32 %v3661_v53, %v3660_v46 }
 0x22c   : > { %v3563_v43 = vadd.f32 %v3562_v4, %v3561_v30  ;;  %v3663_v44 = vrot.slane %v3662_v28, 2 }
 0x22e   : > { %v3564_v33 = vrot.slane %v3563_v43, 1  ;;  %v3664_v1 = vadd.f32 %v3663_v44, %v3662_v28 }
 0x230   : > { %v3665_v47 = vrot.slane %v3664_v1, 1  ;;  %v3565_v49 = vadd.f32 %v3564_v33, %v3563_v43 }
 0x232   : > { %v3666_v26 = vadd.f32 %v3665_v47, %v3664_v1 }
 0x234   : > { %v3667_v3 = vsel %vm900_vm0, %v3565_v49, %v3666_v26 }
 0x235   : > { %3668 = vst.msk [vmem:[%s454_s17] sm:$0x3] %vm462_vm2, %v3667_v3 }
 0x236 PF: > { %s18_s2 = sadd.s32 1, %s4913_s2   ;;  %s5789_s24 = smov %s4909_s1 }
 0x237   : > { %p15_p6 = scmp.ge.s32.totalorder %s18_s2, 4   ;;  %s5790_s1 = smov %s5792_s25 }
 0x239   :  { %17 = sbr.rel (!%p15_p6) target bundleno = 2 (0x2), region = 111 }

// kernel: up_forward.5
= control target key start
LH: loop header
LB: loop body
LE: loop exit
PB: predicated region body
PF: predicated region fallthrough
CT: control target
= control target key end

     0   :  { %s8932_s28 = smov 0   ;;  %s8934_s29 = smov 0   ;;  %s10248_s0 = inlined_call_operand.vmem [shape: bf16[2,16,16,2], index: 0, kind: input, shape index: {}, may-alias: {0,1,2}]   ;;  %s10249_s1 = inlined_call_operand.vmem [shape: bf16[2,16,16,2], index: 1, kind: input, shape index: {}, may-alias: {0,1,2}]   ;;  %s10250_s2 = inlined_call_operand.vmem [shape: bf16[2,16,16,2], index: 2, kind: input, shape index: {}, may-alias: {0,1,2}]   ;;  %s10251_s3 = inlined_call_operand.vmem [shape: bf16[9,2,2], index: 3, kind: input, shape index: {}]   ;;  %s10252_s4 = inlined_call_operand.vmem [shape: bf16[2,16,16,2], index: 4, kind: input, shape index: {}, may-alias: {4,5,6}]   ;;  %s10253_s5 = inlined_call_operand.vmem [shape: bf16[2,16,16,2], index: 5, kind: input, shape index: {}, may-alias: {4,5,6}]   ;;  %s10254_s6 = inlined_call_operand.vmem [shape: bf16[2,16,16,2], index: 6, kind: input, shape index: {}, may-alias: {4,5,6}]   ;;  %s10255_s7 = inlined_call_operand.vmem [shape: bf16[9,2,2], index: 7, kind: input, shape index: {}]   ;;  %s10256_s8 = inlined_call_operand.vmem [shape: bf16[512,2], index: 8, kind: output, shape index: {0}]   ;;  %s10257_s9 = inlined_call_operand.vmem [shape: f32[2,2,2], index: 9, kind: output, shape index: {1}]  }
   0x1   :  { %s8936_s30 = smov 0  }
   0x2 LB: > { %s32_s5 = sadd.s32 1, %s8875_s29  ;;  %p6800_p0 = scmp.ge.s32.totalorder %s8879_s30, 1  ;;  %s8879_s30 = sphi %s8936_s30, %s20_s30   ;;  %s8875_s29 = sphi %s8934_s29, %s10322_s29   ;;  %s8871_s28 = sphi %s8932_s28, %s10321_s28  }
   0x3   : > { %p34_p1 = scmp.ge.s32.totalorder %s32_s5, 2  ;;  %p460_p2 = scmp.lt.s32.totalorder %s8879_s30, 3 }
   0x5   : > { %s10324_s5 = smov (%p34_p1, %s32_s5), 0  ;;  %p461_p3 = pnand %p6800_p0, %p460_p2 }
   0x7   : > { %464 = sbr.rel (%p461_p3) target bundleno = 889 (0x379), region = 52 }
   0xe   : > { %v6816_v0 = vld [vmem:[%s10251_s3 + $0x1] sm:$0x1]  ;;  %vm995_vm0 = vcmask 1040384   ;;  %v3649_v1 = vld [vmem:[%s10255_s7] sm:$0x1]  ;;  %vm674_vm1 = vcmask 15360  }
   0xf   : > { %8814 = vmatprep.subr.msk.bf16.mxu1 %vm995_vm0, %v6816_v0  ;;  %8823 = vmatprep.subr.msk.bf16.mxu0 %vm995_vm0, %v3649_v1  ;;  %v997_v2 = vsel %vm995_vm0, %v6816_v0, 0  ;;  %v3699_v3 = vsel %vm995_vm0, %v3649_v1, 0  ;;  %vm677_vm2 = vcmask 9216   ;;  %v8965_v4 = vld [vmem:[%s10251_s3] sm:$0x1]  ;;  %v8881_v5 = vmov 0.0  }
  0x10   : > { %7659 = vmatpush3.bf16.msra.mxu1 %v997_v2  ;;  %7965 = vmatpush3.bf16.msra.mxu0 %v3699_v3  ;;  %675 = vst.msk [vmem:[#allocation2] sm:$0xff] %vm674_vm1, %v8881_v5  ;;  %676 = vst.msk [vmem:[#allocation2 + $0x8] sm:$0xff] %vm674_vm1, %v8881_v5  ;;  %v6984_v6 = vld [vmem:[%s10255_s7 + $0x1] sm:$0x1]  ;;  %p570_p4 = scmp.lt.s32.totalorder %s8871_s28, 1  ;;  %v9207_v8 = vsel %vm995_vm0, %v8965_v4, 0 }
  0x11   : > { %678 = vst.msk [vmem:[#allocation2 + $0x10] sm:$0x3] %vm677_vm2, %v8881_v5  ;;  %681 = vst.msk [vmem:[#allocation2 + $0x28] sm:$0x3] %vm677_vm2, %v8881_v5  ;;  %8815 = vmatprep.subr.msk.bf16.mxu1 %vm995_vm0, %v8965_v4  ;;  %8824 = vmatprep.subr.msk.bf16.mxu0 %vm995_vm0, %v6984_v6  ;;  %v9212_v20 = vsel %vm995_vm0, %v6984_v6, 0  ;;  %s6813_s12 = sshll.u32 %s8871_s28, 5 }
  0x12   : > { %679 = vst.msk [vmem:[#allocation2 + $0x18] sm:$0xff] %vm674_vm1, %v8881_v5  ;;  %680 = vst.msk [vmem:[#allocation2 + $0x20] sm:$0xff] %vm674_vm1, %v8881_v5  ;;  %s9191_s17 = scalar_select %p570_p4, %s8871_s28, 1  ;;  %vm6375_vm3 = vcmask 11264  }
  0x13   : > { %682 = vst.msk [vmem:[#allocation2 + $0x30] sm:$0xff] %vm674_vm1, %v8881_v5  ;;  %683 = vst.msk [vmem:[#allocation2 + $0x38] sm:$0xff] %vm674_vm1, %v8881_v5  ;;  %p661_p5 = scmp.lt.s32.totalorder %s6813_s12, 63 }
  0x14   : > { %684 = vst.msk [vmem:[#allocation2 + $0x40] sm:$0x3] %vm677_vm2, %v8881_v5  ;;  %687 = vst.msk [vmem:[#allocation2 + $0x58] sm:$0x3] %vm677_vm2, %v8881_v5  ;;  %s7154_s18 = sshll.u32 %s9191_s17, 7  ;;  %s6815_s28 = sshll.u32 %s9191_s17, 1 }
  0x15   : > { %685 = vst.msk [vmem:[#allocation2 + $0x48] sm:$0xff] %vm674_vm1, %v8881_v5  ;;  %686 = vst.msk [vmem:[#allocation2 + $0x50] sm:$0xff] %vm674_vm1, %v8881_v5  ;;  %s9197_s21 = scalar_lea.vmem %s10248_s0, %s7154_s18  ;;  %s9202_s24 = scalar_lea.vmem %s10252_s4, %s7154_s18 }
  0x16   : > { %688 = vst.msk [vmem:[#allocation2 + $0x60] sm:$0xff] %vm674_vm1, %v8881_v5  ;;  %689 = vst.msk [vmem:[#allocation2 + $0x68] sm:$0xff] %vm674_vm1, %v8881_v5  ;;  %v7195_v7 = vld [vmem:[%s9197_s21] sm:$0xff]   ;;  %v7322_v10 = vld [vmem:[%s9197_s21 + $0x8] sm:$0xff]   ;;  %s10326_s12 = smov (!%p661_p5, %s6813_s12), 63  ;;  %s671_s20 = scalar_lea.vmem %s10257_s9, %s6815_s28 }
  0x17   : > { %690 = vst.msk [vmem:[#allocation2 + $0x70] sm:$0x3] %vm677_vm2, %v8881_v5  ;;  %693 = vst.msk [vmem:[#allocation2 + $0x88] sm:$0x3] %vm677_vm2, %v8881_v5  ;;  %v7259_v9 = vld [vmem:[%s9202_s24] sm:$0xff]   ;;  %v7196_v14 = vunpack.c.l.bf16 %v7195_v7  ;;  %v7197_v15 = vunpack.c.h.bf16 %v7195_v7  ;;  %v7200_v21 = vunpack.c.l.bf16 %v7322_v10  ;;  %v7201_v22 = vunpack.c.h.bf16 %v7322_v10  ;;  %v7337_v23 = vld [vmem:[%s9202_s24 + $0x8] sm:$0xff]  }
  0x18   : > { %691 = vst.msk [vmem:[#allocation2 + $0x78] sm:$0xff] %vm674_vm1, %v8881_v5  ;;  %692 = vst.msk [vmem:[#allocation2 + $0x80] sm:$0xff] %vm674_vm1, %v8881_v5  ;;  %v897_v11 = vld [vmem:[#allocation2 + $0x1] sm:$0xff]  ;;  %v898_v12 = vld [vmem:[#allocation2 + $0x9] sm:$0xff]  ;;  %v7260_v16 = vunpack.c.l.bf16 %v7259_v9  ;;  %v7261_v17 = vunpack.c.h.bf16 %v7259_v9  ;;  %v7264_v26 = vunpack.c.l.bf16 %v7337_v23  ;;  %v7265_v27 = vunpack.c.h.bf16 %v7337_v23  ;;  %s6814_s13 = sshll.u32 %s10326_s12, 2 }
  0x19   : > { %694 = vst.msk [vmem:[#allocation2 + $0x90] sm:$0xff] %vm674_vm1, %v8881_v5  ;;  %695 = vst.msk [vmem:[#allocation2 + $0x98] sm:$0xff] %vm674_vm1, %v8881_v5  ;;  %v929_v18 = vpack.c.bf16 %v898_v12, %v897_v11  ;;  %v7323_v24 = vld [vmem:[%s9197_s21 + $0x10] sm:$0xff]   ;;  %v7324_v30 = vld [vmem:[%s9197_s21 + $0x18] sm:$0xff]   ;;  %s10103_s16 = scalar_lea.vmem %s10256_s8, %s6814_s13 }
  0x1a   : > { %696 = vst.msk [vmem:[#allocation2 + $0xa0] sm:$0x3] %vm677_vm2, %v8881_v5  ;;  %699 = vst.msk [vmem:[#allocation2 + $0xb8] sm:$0x3] %vm677_vm2, %v8881_v5  ;;  %v7204_v28 = vunpack.c.l.bf16 %v7323_v24  ;;  %v7338_v29 = vld [vmem:[%s9202_s24 + $0x10] sm:$0xff]   ;;  %v7339_v31 = vld [vmem:[%s9202_s24 + $0x18] sm:$0xff]   ;;  %v7205_v32 = vunpack.c.h.bf16 %v7323_v24  ;;  %v7208_v35 = vunpack.c.l.bf16 %v7324_v30  ;;  %v7209_v39 = vunpack.c.h.bf16 %v7324_v30 }
  0x1b   : > { %697 = vst.msk [vmem:[#allocation2 + $0xa8] sm:$0xff] %vm674_vm1, %v8881_v5  ;;  %698 = vst.msk [vmem:[#allocation2 + $0xb0] sm:$0xff] %vm674_vm1, %v8881_v5  ;;  %7660 = vmatprep.mubr.msk.bf16.mxu1 %vm674_vm1, %v929_v18  ;;  %v7268_v33 = vunpack.c.l.bf16 %v7338_v29  ;;  %v7269_v34 = vunpack.c.h.bf16 %v7338_v29  ;;  %v7325_v36 = vld [vmem:[%s9197_s21 + $0x20] sm:$0xff]   ;;  %v7326_v38 = vld [vmem:[%s9197_s21 + $0x28] sm:$0xff]   ;;  %v7272_v40 = vunpack.c.l.bf16 %v7339_v31  ;;  %v7273_v41 = vunpack.c.h.bf16 %v7339_v31 }
  0x1c   : > { %700 = vst.msk [vmem:[#allocation2 + $0xc0] sm:$0xff] %vm674_vm1, %v8881_v5  ;;  %701 = vst.msk [vmem:[#allocation2 + $0xc8] sm:$0xff] %vm674_vm1, %v8881_v5  ;;  %v7340_v37 = vld [vmem:[%s9202_s24 + $0x20] sm:$0xff]   ;;  %v7212_v42 = vunpack.c.l.bf16 %v7325_v36  ;;  %v7341_v43 = vld [vmem:[%s9202_s24 + $0x28] sm:$0xff]   ;;  %v7213_v46 = vunpack.c.h.bf16 %v7325_v36  ;;  %v7216_v49 = vunpack.c.l.bf16 %v7326_v38  ;;  %v7217_v53 = vunpack.c.h.bf16 %v7326_v38 }
  0x1d   : > { %702 = vst.msk [vmem:[#allocation2 + $0xd0] sm:$0x3] %vm677_vm2, %v8881_v5  ;;  %705 = vst.msk [vmem:[#allocation2 + $0xe8] sm:$0x3] %vm677_vm2, %v8881_v5  ;;  %v7327_v44 = vld [vmem:[%s9197_s21 + $0x30] sm:$0xff]   ;;  %v7276_v47 = vunpack.c.l.bf16 %v7340_v37  ;;  %v7277_v48 = vunpack.c.h.bf16 %v7340_v37  ;;  %v7328_v50 = vld [vmem:[%s9197_s21 + $0x38] sm:$0xff]   ;;  %v7280_v54 = vunpack.c.l.bf16 %v7341_v43  ;;  %v7281_v55 = vunpack.c.h.bf16 %v7341_v43 }
  0x1e   : > { %703 = vst.msk [vmem:[#allocation2 + $0xd8] sm:$0xff] %vm674_vm1, %v8881_v5  ;;  %704 = vst.msk [vmem:[#allocation2 + $0xe0] sm:$0xff] %vm674_vm1, %v8881_v5  ;;  %v7342_v45 = vld [vmem:[%s9202_s24 + $0x30] sm:$0xff]   ;;  %v7343_v51 = vld [vmem:[%s9202_s24 + $0x38] sm:$0xff]   ;;  %v7220_v56 = vunpack.c.l.bf16 %v7327_v44  ;;  %v7221_v59 = vunpack.c.h.bf16 %v7327_v44  ;;  %v7224_v62 = vunpack.c.l.bf16 %v7328_v50  ;;  %v7225_v1 = vunpack.c.h.bf16 %v7328_v50 }
  0x1f   : > { %706 = vst.msk [vmem:[#allocation2 + $0xf0] sm:$0xff] %vm674_vm1, %v8881_v5  ;;  %707 = vst.msk [vmem:[#allocation2 + $0xf8] sm:$0xff] %vm674_vm1, %v8881_v5  ;;  %v7329_v52 = vld [vmem:[%s9197_s21 + $0x40] sm:$0xff]   ;;  %v7330_v58 = vld [vmem:[%s9197_s21 + $0x48] sm:$0xff]   ;;  %v7284_v60 = vunpack.c.l.bf16 %v7342_v45  ;;  %v7285_v61 = vunpack.c.h.bf16 %v7342_v45  ;;  %v7288_v2 = vunpack.c.l.bf16 %v7343_v51  ;;  %v7289_v3 = vunpack.c.h.bf16 %v7343_v51 }
  0x20   : > { %708 = vst.msk [vmem:[#allocation2 + $0x100] sm:$0x3] %vm677_vm2, %v8881_v5  ;;  %711 = vst.msk [vmem:[#allocation2 + $0x118] sm:$0x3] %vm677_vm2, %v8881_v5  ;;  %v7344_v57 = vld [vmem:[%s9202_s24 + $0x40] sm:$0xff]   ;;  %v7345_v63 = vld [vmem:[%s9202_s24 + $0x48] sm:$0xff]   ;;  %v7228_v4 = vunpack.c.l.bf16 %v7329_v52  ;;  %v7229_v12 = vunpack.c.h.bf16 %v7329_v52 }
  0x21   : > { %709 = vst.msk [vmem:[#allocation2 + $0x108] sm:$0xff] %vm674_vm1, %v8881_v5  ;;  %710 = vst.msk [vmem:[#allocation2 + $0x110] sm:$0xff] %vm674_vm1, %v8881_v5  ;;  %v9255_v0 = vld [vmem:[%s9197_s21 + $0x50] sm:$0xff]   ;;  %v9265_v6 = vld [vmem:[%s9197_s21 + $0x58] sm:$0xff]   ;;  %v7297_v23 = vunpack.c.h.bf16 %v7345_v63 }
  0x22   : > { %712 = vst.msk [vmem:[#allocation2 + $0x120] sm:$0xff] %vm674_vm1, %v8881_v5  ;;  %713 = vst.msk [vmem:[#allocation2 + $0x128] sm:$0xff] %vm674_vm1, %v8881_v5  ;;  %v9268_v7 = vld [vmem:[%s9202_s24 + $0x58] sm:$0xff]   ;;  %v7237_v29 = vunpack.c.h.bf16 %v9255_v0  ;;  %v7333_v30 = vld [vmem:[%s9197_s21 + $0x60] sm:$0xff]  }
  0x23   : > { %714 = vst.msk [vmem:[#allocation2 + $0x130] sm:$0x3] %vm677_vm2, %v8881_v5  ;;  %717 = vst.msk [vmem:[#allocation2 + $0x148] sm:$0x3] %vm677_vm2, %v8881_v5  ;;  %v9296_v36 = vld [vmem:[%s10251_s3 + $0x2] sm:$0x1]  ;;  %v7305_v45 = vunpack.c.h.bf16 %v9268_v7 }
  0x24   : > { %715 = vst.msk [vmem:[#allocation2 + $0x138] sm:$0xff] %vm674_vm1, %v8881_v5  ;;  %716 = vst.msk [vmem:[#allocation2 + $0x140] sm:$0xff] %vm674_vm1, %v8881_v5  ;;  %v9301_v37 = vld [vmem:[%s10255_s7 + $0x2] sm:$0x1] }
  0x25   : > { %718 = vst.msk [vmem:[#allocation2 + $0x150] sm:$0xff] %vm674_vm1, %v8881_v5  ;;  %719 = vst.msk [vmem:[#allocation2 + $0x158] sm:$0xff] %vm674_vm1, %v8881_v5 }
  0x26   : > { %720 = vst.msk [vmem:[#allocation2 + $0x160] sm:$0x3] %vm677_vm2, %v8881_v5  ;;  %723 = vst.msk [vmem:[#allocation2 + $0x178] sm:$0x3] %vm677_vm2, %v8881_v5 }
  0x27   : > { %721 = vst.msk [vmem:[#allocation2 + $0x168] sm:$0xff] %vm674_vm1, %v8881_v5  ;;  %722 = vst.msk [vmem:[#allocation2 + $0x170] sm:$0xff] %vm674_vm1, %v8881_v5 }
  0x28   : > { %724 = vst.msk [vmem:[#allocation2 + $0x180] sm:$0xff] %vm674_vm1, %v8881_v5  ;;  %725 = vst.msk [vmem:[#allocation2 + $0x188] sm:$0xff] %vm674_vm1, %v8881_v5 }
  0x29   : > { %726 = vst.msk [vmem:[#allocation2 + $0x190] sm:$0x3] %vm677_vm2, %v8881_v5  ;;  %729 = vst.msk [vmem:[#allocation2 + $0x1a8] sm:$0x3] %vm677_vm2, %v8881_v5 }
  0x2a   : > { %727 = vst.msk [vmem:[#allocation2 + $0x198] sm:$0xff] %vm674_vm1, %v8881_v5  ;;  %728 = vst.msk [vmem:[#allocation2 + $0x1a0] sm:$0xff] %vm674_vm1, %v8881_v5 }
  0x2b   : > { %3431 = vst.msk [vmem:[#allocation3] sm:$0xff] %vm674_vm1, %v8881_v5  ;;  %3432 = vst.msk [vmem:[#allocation3 + $0x8] sm:$0xff] %vm674_vm1, %v8881_v5 }
  0x2c   : > { %3433 = vst.msk [vmem:[#allocation3 + $0x10] sm:$0x3] %vm677_vm2, %v8881_v5  ;;  %3436 = vst.msk [vmem:[#allocation3 + $0x28] sm:$0x3] %vm677_vm2, %v8881_v5 }
  0x2d   : > { %3434 = vst.msk [vmem:[#allocation3 + $0x18] sm:$0xff] %vm674_vm1, %v8881_v5  ;;  %3435 = vst.msk [vmem:[#allocation3 + $0x20] sm:$0xff] %vm674_vm1, %v8881_v5 }
  0x2e   : > { %3437 = vst.msk [vmem:[#allocation3 + $0x30] sm:$0xff] %vm674_vm1, %v8881_v5  ;;  %3438 = vst.msk [vmem:[#allocation3 + $0x38] sm:$0xff] %vm674_vm1, %v8881_v5 }
  0x2f   : > { %3439 = vst.msk [vmem:[#allocation3 + $0x40] sm:$0x3] %vm677_vm2, %v8881_v5  ;;  %3442 = vst.msk [vmem:[#allocation3 + $0x58] sm:$0x3] %vm677_vm2, %v8881_v5 }
  0x30   : > { %3440 = vst.msk [vmem:[#allocation3 + $0x48] sm:$0xff] %vm674_vm1, %v8881_v5  ;;  %3441 = vst.msk [vmem:[#allocation3 + $0x50] sm:$0xff] %vm674_vm1, %v8881_v5 }
  0x31   : > { %3443 = vst.msk [vmem:[#allocation3 + $0x60] sm:$0xff] %vm674_vm1, %v8881_v5  ;;  %3444 = vst.msk [vmem:[#allocation3 + $0x68] sm:$0xff] %vm674_vm1, %v8881_v5 }
  0x32   : > { %3445 = vst.msk [vmem:[#allocation3 + $0x70] sm:$0x3] %vm677_vm2, %v8881_v5  ;;  %3448 = vst.msk [vmem:[#allocation3 + $0x88] sm:$0x3] %vm677_vm2, %v8881_v5  ;;  %v3601_v13 = vld [vmem:[#allocation3] sm:$0xff]  ;;  %v3602_v19 = vld [vmem:[#allocation3 + $0x8] sm:$0xff] }
  0x33   : > { %3446 = vst.msk [vmem:[#allocation3 + $0x78] sm:$0xff] %vm674_vm1, %v8881_v5  ;;  %3447 = vst.msk [vmem:[#allocation3 + $0x80] sm:$0xff] %vm674_vm1, %v8881_v5  ;;  %v3633_v25 = vpack.c.bf16 %v3602_v19, %v3601_v13  ;;  %v7292_v13 = vunpack.c.l.bf16 %v7344_v57 }
  0x34   : > { %3449 = vst.msk [vmem:[#allocation3 + $0x90] sm:$0xff] %vm674_vm1, %v8881_v5  ;;  %3450 = vst.msk [vmem:[#allocation3 + $0x98] sm:$0xff] %vm674_vm1, %v8881_v5 }
  0x35   : > { %3451 = vst.msk [vmem:[#allocation3 + $0xa0] sm:$0x3] %vm677_vm2, %v8881_v5  ;;  %3454 = vst.msk [vmem:[#allocation3 + $0xb8] sm:$0x3] %vm677_vm2, %v8881_v5  ;;  %7966 = vmatprep.mubr.msk.bf16.mxu0 %vm674_vm1, %v3633_v25 }
  0x36   : > { %3452 = vst.msk [vmem:[#allocation3 + $0xa8] sm:$0xff] %vm674_vm1, %v8881_v5  ;;  %3453 = vst.msk [vmem:[#allocation3 + $0xb0] sm:$0xff] %vm674_vm1, %v8881_v5 }
  0x37   : > { %3455 = vst.msk [vmem:[#allocation3 + $0xc0] sm:$0xff] %vm674_vm1, %v8881_v5  ;;  %3456 = vst.msk [vmem:[#allocation3 + $0xc8] sm:$0xff] %vm674_vm1, %v8881_v5 }
  0x38   : > { %3457 = vst.msk [vmem:[#allocation3 + $0xd0] sm:$0x3] %vm677_vm2, %v8881_v5  ;;  %3460 = vst.msk [vmem:[#allocation3 + $0xe8] sm:$0x3] %vm677_vm2, %v8881_v5 }
  0x39   : > { %3458 = vst.msk [vmem:[#allocation3 + $0xd8] sm:$0xff] %vm674_vm1, %v8881_v5  ;;  %3459 = vst.msk [vmem:[#allocation3 + $0xe0] sm:$0xff] %vm674_vm1, %v8881_v5 }
  0x3a   : > { %3461 = vst.msk [vmem:[#allocation3 + $0xf0] sm:$0xff] %vm674_vm1, %v8881_v5  ;;  %3462 = vst.msk [vmem:[#allocation3 + $0xf8] sm:$0xff] %vm674_vm1, %v8881_v5 }
  0x3b   : > { %3463 = vst.msk [vmem:[#allocation3 + $0x100] sm:$0x3] %vm677_vm2, %v8881_v5  ;;  %3466 = vst.msk [vmem:[#allocation3 + $0x118] sm:$0x3] %vm677_vm2, %v8881_v5 }
  0x3c   : > { %3464 = vst.msk [vmem:[#allocation3 + $0x108] sm:$0xff] %vm674_vm1, %v8881_v5  ;;  %3465 = vst.msk [vmem:[#allocation3 + $0x110] sm:$0xff] %vm674_vm1, %v8881_v5 }
  0x3d   : > { %3467 = vst.msk [vmem:[#allocation3 + $0x120] sm:$0xff] %vm674_vm1, %v8881_v5  ;;  %3468 = vst.msk [vmem:[#allocation3 + $0x128] sm:$0xff] %vm674_vm1, %v8881_v5 }
  0x3e   : > { %3469 = vst.msk [vmem:[#allocation3 + $0x130] sm:$0x3] %vm677_vm2, %v8881_v5  ;;  %3472 = vst.msk [vmem:[#allocation3 + $0x148] sm:$0x3] %vm677_vm2, %v8881_v5 }
  0x3f   : > { %3470 = vst.msk [vmem:[#allocation3 + $0x138] sm:$0xff] %vm674_vm1, %v8881_v5  ;;  %3471 = vst.msk [vmem:[#allocation3 + $0x140] sm:$0xff] %vm674_vm1, %v8881_v5 }
  0x40   : > { %3473 = vst.msk [vmem:[#allocation3 + $0x150] sm:$0xff] %vm674_vm1, %v8881_v5  ;;  %3474 = vst.msk [vmem:[#allocation3 + $0x158] sm:$0xff] %vm674_vm1, %v8881_v5 }
  0x41   : > { %3475 = vst.msk [vmem:[#allocation3 + $0x160] sm:$0x3] %vm677_vm2, %v8881_v5  ;;  %3478 = vst.msk [vmem:[#allocation3 + $0x178] sm:$0x3] %vm677_vm2, %v8881_v5 }
  0x42   : > { %3476 = vst.msk [vmem:[#allocation3 + $0x168] sm:$0xff] %vm674_vm1, %v8881_v5  ;;  %3477 = vst.msk [vmem:[#allocation3 + $0x170] sm:$0xff] %vm674_vm1, %v8881_v5 }
  0x43   : > { %3479 = vst.msk [vmem:[#allocation3 + $0x180] sm:$0xff] %vm674_vm1, %v8881_v5  ;;  %3480 = vst.msk [vmem:[#allocation3 + $0x188] sm:$0xff] %vm674_vm1, %v8881_v5 }
  0x44   : > { %3481 = vst.msk [vmem:[#allocation3 + $0x190] sm:$0x3] %vm677_vm2, %v8881_v5  ;;  %3484 = vst.msk [vmem:[#allocation3 + $0x1a8] sm:$0x3] %vm677_vm2, %v8881_v5 }
  0x45   : > { %3482 = vst.msk [vmem:[#allocation3 + $0x198] sm:$0xff] %vm674_vm1, %v8881_v5  ;;  %3483 = vst.msk [vmem:[#allocation3 + $0x1a0] sm:$0xff] %vm674_vm1, %v8881_v5  ;;  %v9262_v5 = vld [vmem:[%s9202_s24 + $0x50] sm:$0xff]  }
  0x46   : > { %795 = vst.msk [vmem:[#allocation2 + $0x19] sm:$0xff] %vm674_vm1, %v7196_v14  ;;  %796 = vst.msk [vmem:[#allocation2 + $0x21] sm:$0xff] %vm674_vm1, %v7197_v15  ;;  %v7293_v14 = vunpack.c.h.bf16 %v7344_v57  ;;  %v7232_v15 = vunpack.c.l.bf16 %v7330_v58 }
  0x47   : > { %3550 = vst.msk [vmem:[#allocation3 + $0x19] sm:$0xff] %vm674_vm1, %v7260_v16  ;;  %3551 = vst.msk [vmem:[#allocation3 + $0x21] sm:$0xff] %vm674_vm1, %v7261_v17 }
  0x48   : > { %797 = vst.msk [vmem:[#allocation2 + $0x31] sm:$0xff] %vm674_vm1, %v7200_v21  ;;  %798 = vst.msk [vmem:[#allocation2 + $0x39] sm:$0xff] %vm674_vm1, %v7201_v22  ;;  %v7233_v21 = vunpack.c.h.bf16 %v7330_v58  ;;  %v7296_v22 = vunpack.c.l.bf16 %v7345_v63 }
  0x49   : > { %3552 = vst.msk [vmem:[#allocation3 + $0x31] sm:$0xff] %vm674_vm1, %v7264_v26  ;;  %3553 = vst.msk [vmem:[#allocation3 + $0x39] sm:$0xff] %vm674_vm1, %v7265_v27 }
  0x4a   : > { %799 = vst.msk [vmem:[#allocation2 + $0x49] sm:$0xff] %vm674_vm1, %v7204_v28  ;;  %800 = vst.msk [vmem:[#allocation2 + $0x51] sm:$0xff] %vm674_vm1, %v7205_v32  ;;  %v7236_v28 = vunpack.c.l.bf16 %v9255_v0  ;;  %v7300_v32 = vunpack.c.l.bf16 %v9262_v5 }
  0x4b   : > { %3554 = vst.msk [vmem:[#allocation3 + $0x49] sm:$0xff] %vm674_vm1, %v7268_v33  ;;  %3555 = vst.msk [vmem:[#allocation3 + $0x51] sm:$0xff] %vm674_vm1, %v7269_v34  ;;  %v7301_v33 = vunpack.c.h.bf16 %v9262_v5  ;;  %v7240_v34 = vunpack.c.l.bf16 %v9265_v6 }
  0x4c   : > { %801 = vst.msk [vmem:[#allocation2 + $0x61] sm:$0xff] %vm674_vm1, %v7208_v35  ;;  %802 = vst.msk [vmem:[#allocation2 + $0x69] sm:$0xff] %vm674_vm1, %v7209_v39  ;;  %v7348_v35 = vld [vmem:[%s9202_s24 + $0x60] sm:$0xff]  }
  0x4d   : > { %3556 = vst.msk [vmem:[#allocation3 + $0x61] sm:$0xff] %vm674_vm1, %v7272_v40  ;;  %3557 = vst.msk [vmem:[#allocation3 + $0x69] sm:$0xff] %vm674_vm1, %v7273_v41  ;;  %v899_v9 = vld [vmem:[#allocation2 + $0x19] sm:$0xff]  ;;  %v900_v10 = vld [vmem:[#allocation2 + $0x21] sm:$0xff]  ;;  %v7241_v41 = vunpack.c.h.bf16 %v9265_v6  ;;  %v7309_v50 = vunpack.c.h.bf16 %v7348_v35 }
  0x4e   : > { %803 = vst.msk [vmem:[#allocation2 + $0x79] sm:$0xff] %vm674_vm1, %v7212_v42  ;;  %804 = vst.msk [vmem:[#allocation2 + $0x81] sm:$0xff] %vm674_vm1, %v7213_v46  ;;  %v3603_v11 = vld [vmem:[#allocation3 + $0x18] sm:$0xff]  ;;  %v930_v16 = vpack.c.bf16 %v900_v10, %v899_v9  ;;  %v3604_v17 = vld [vmem:[#allocation3 + $0x20] sm:$0xff]  ;;  %v7304_v42 = vunpack.c.l.bf16 %v9268_v7  ;;  %v7244_v46 = vunpack.c.l.bf16 %v7333_v30 }
  0x4f   : > { %3558 = vst.msk [vmem:[#allocation3 + $0x79] sm:$0xff] %vm674_vm1, %v7276_v47  ;;  %3559 = vst.msk [vmem:[#allocation3 + $0x81] sm:$0xff] %vm674_vm1, %v7277_v48  ;;  %v901_v18 = vld [vmem:[#allocation2 + $0x31] sm:$0xff]  ;;  %v902_v19 = vld [vmem:[#allocation2 + $0x39] sm:$0xff]  ;;  %v3634_v24 = vpack.c.bf16 %v3604_v17, %v3603_v11  ;;  %v7245_v47 = vunpack.c.h.bf16 %v7333_v30 }
  0x50   : > { %805 = vst.msk [vmem:[#allocation2 + $0x91] sm:$0xff] %vm674_vm1, %v7216_v49  ;;  %806 = vst.msk [vmem:[#allocation2 + $0x99] sm:$0xff] %vm674_vm1, %v7217_v53  ;;  %v931_v25 = vpack.c.bf16 %v902_v19, %v901_v18  ;;  %v3605_v26 = vld [vmem:[#allocation3 + $0x30] sm:$0xff]  ;;  %v3606_v27 = vld [vmem:[#allocation3 + $0x38] sm:$0xff]  ;;  %7661 = vmatmul.mubr.msk.bf16.vlgmr.msra.gmra.mrb[0].mxu1 %vm674_vm1, %v930_v16 }
  0x51   : > { %3560 = vst.msk [vmem:[#allocation3 + $0x91] sm:$0xff] %vm674_vm1, %v7280_v54  ;;  %3561 = vst.msk [vmem:[#allocation3 + $0x99] sm:$0xff] %vm674_vm1, %v7281_v55  ;;  %v3635_v31 = vpack.c.bf16 %v3606_v27, %v3605_v26  ;;  %7693 = vmatpush3.bf16.msra.mxu1 %v9207_v8  ;;  %7967 = vmatmul.mubr.msk.bf16.vlgmr.msra.gmra.mrb[0].mxu0 %vm674_vm1, %v3634_v24  ;;  %v903_v38 = vld [vmem:[#allocation2 + $0x49] sm:$0xff]  ;;  %v904_v39 = vld [vmem:[#allocation2 + $0x51] sm:$0xff] }
  0x52   : > { %807 = vst.msk [vmem:[#allocation2 + $0xa9] sm:$0xff] %vm674_vm1, %v7220_v56  ;;  %808 = vst.msk [vmem:[#allocation2 + $0xb1] sm:$0xff] %vm674_vm1, %v7221_v59  ;;  %v3607_v40 = vld [vmem:[#allocation3 + $0x48] sm:$0xff]  ;;  %7999 = vmatpush3.bf16.msra.mxu0 %v9212_v20  ;;  %7664 = vmatprep.mubr.msk.bf16.mxu1 %vm674_vm1, %v931_v25  ;;  %v3608_v43 = vld [vmem:[#allocation3 + $0x50] sm:$0xff]  ;;  %v7308_v20 = vunpack.c.l.bf16 %v7348_v35  ;;  %v932_v51 = vpack.c.bf16 %v904_v39, %v903_v38 }
  0x53   : > { %3562 = vst.msk [vmem:[#allocation3 + $0xa9] sm:$0xff] %vm674_vm1, %v7284_v60  ;;  %3563 = vst.msk [vmem:[#allocation3 + $0xb1] sm:$0xff] %vm674_vm1, %v7285_v61  ;;  %v905_v44 = vld [vmem:[#allocation2 + $0x61] sm:$0xff]  ;;  %v906_v8 = vld [vmem:[#allocation2 + $0x69] sm:$0xff]  ;;  %7970 = vmatprep.mubr.msk.bf16.mxu0 %vm674_vm1, %v3635_v31  ;;  %8816 = vmatprep.subr.msk.bf16.mxu1 %vm995_vm0, %v9296_v36  ;;  %v3636_v52 = vpack.c.bf16 %v3608_v43, %v3607_v40 }
  0x54   : > { %809 = vst.msk [vmem:[#allocation2 + $0xc1] sm:$0xff] %vm674_vm1, %v7224_v62  ;;  %810 = vst.msk [vmem:[#allocation2 + $0xc9] sm:$0xff] %vm674_vm1, %v7225_v1  ;;  %v3609_v48 = vld [vmem:[#allocation3 + $0x60] sm:$0xff]  ;;  %v3610_v49 = vld [vmem:[#allocation3 + $0x68] sm:$0xff]  ;;  %8825 = vmatprep.subr.msk.bf16.mxu0 %vm995_vm0, %v9301_v37  ;;  %v933_v53 = vpack.c.bf16 %v906_v8, %v905_v44 }
  0x55   : > { %3564 = vst.msk [vmem:[#allocation3 + $0xc1] sm:$0xff] %vm674_vm1, %v7288_v2  ;;  %3565 = vst.msk [vmem:[#allocation3 + $0xc9] sm:$0xff] %vm674_vm1, %v7289_v3  ;;  %v9327_v54 = vpack.c.bf16 %v3610_v49, %v3609_v48  ;;  %v907_v55 = vld [vmem:[#allocation2 + $0x79] sm:$0xff]  ;;  %v908_v56 = vld [vmem:[#allocation2 + $0x81] sm:$0xff] }
  0x56   : > { %811 = vst.msk [vmem:[#allocation2 + $0xd9] sm:$0xff] %vm674_vm1, %v7228_v4  ;;  %812 = vst.msk [vmem:[#allocation2 + $0xe1] sm:$0xff] %vm674_vm1, %v7229_v12  ;;  %v3611_v57 = vld [vmem:[#allocation3 + $0x78] sm:$0xff]  ;;  %v3612_v58 = vld [vmem:[#allocation3 + $0x80] sm:$0xff]  ;;  %v934_v63 = vpack.c.bf16 %v908_v56, %v907_v55 }
  0x57   : > { %3566 = vst.msk [vmem:[#allocation3 + $0xd9] sm:$0xff] %vm674_vm1, %v7292_v13  ;;  %3567 = vst.msk [vmem:[#allocation3 + $0xe1] sm:$0xff] %vm674_vm1, %v7293_v14  ;;  %v909_v59 = vld [vmem:[#allocation2 + $0x91] sm:$0xff]  ;;  %v910_v60 = vld [vmem:[#allocation2 + $0x99] sm:$0xff]  ;;  %v9334_v0 = vpack.c.bf16 %v3612_v58, %v3611_v57 }
  0x58   : > { %813 = vst.msk [vmem:[#allocation2 + $0xf1] sm:$0xff] %vm674_vm1, %v7232_v15  ;;  %814 = vst.msk [vmem:[#allocation2 + $0xf9] sm:$0xff] %vm674_vm1, %v7233_v21  ;;  %7665 = vmatmul.mubr.msk.bf16.gmra.mrb[4].mxu1 %vm674_vm1, %v932_v51  ;;  %v3613_v61 = vld [vmem:[#allocation3 + $0x90] sm:$0xff]  ;;  %v3614_v62 = vld [vmem:[#allocation3 + $0x98] sm:$0xff]  ;;  %v935_v1 = vpack.c.bf16 %v910_v60, %v909_v59 }
  0x59   : > { %3568 = vst.msk [vmem:[#allocation3 + $0xf1] sm:$0xff] %vm674_vm1, %v7296_v22  ;;  %3569 = vst.msk [vmem:[#allocation3 + $0xf9] sm:$0xff] %vm674_vm1, %v7297_v23  ;;  %7971 = vmatmul.mubr.msk.bf16.gmra.mrb[4].mxu0 %vm674_vm1, %v3636_v52  ;;  %7668 = vmatprep.mubr.msk.bf16.mxu1 %vm674_vm1, %v933_v53  ;;  %v9336_v2 = vpack.c.bf16 %v3614_v62, %v3613_v61  ;;  %v7334_v3 = vld [vmem:[%s9197_s21 + $0x68] sm:$0xff]   ;;  %v7335_v9 = vld [vmem:[%s9197_s21 + $0x70] sm:$0xff]  }
  0x5a   : > { %815 = vst.msk [vmem:[#allocation2 + $0x109] sm:$0xff] %vm674_vm1, %v7236_v28  ;;  %816 = vst.msk [vmem:[#allocation2 + $0x111] sm:$0xff] %vm674_vm1, %v7237_v29  ;;  %7974 = vmatprep.mubr.msk.bf16.mxu0 %vm674_vm1, %v9327_v54  ;;  %v7349_v4 = vld [vmem:[%s9202_s24 + $0x68] sm:$0xff]   ;;  %v7248_v5 = vunpack.c.l.bf16 %v7334_v3  ;;  %v7249_v6 = vunpack.c.h.bf16 %v7334_v3  ;;  %v7350_v10 = vld [vmem:[%s9202_s24 + $0x70] sm:$0xff]   ;;  %v7252_v12 = vunpack.c.l.bf16 %v7335_v9  ;;  %v7253_v13 = vunpack.c.h.bf16 %v7335_v9 }
  0x5b   : > { %3570 = vst.msk [vmem:[#allocation3 + $0x109] sm:$0xff] %vm674_vm1, %v7300_v32  ;;  %3571 = vst.msk [vmem:[#allocation3 + $0x111] sm:$0xff] %vm674_vm1, %v7301_v33  ;;  %v7312_v7 = vunpack.c.l.bf16 %v7349_v4  ;;  %v7313_v11 = vunpack.c.h.bf16 %v7349_v4  ;;  %v7316_v14 = vunpack.c.l.bf16 %v7350_v10  ;;  %v911_v15 = vld [vmem:[#allocation2 + $0xa9] sm:$0xff]  ;;  %v912_v16 = vld [vmem:[#allocation2 + $0xb1] sm:$0xff]  ;;  %v7317_v18 = vunpack.c.h.bf16 %v7350_v10 }
  0x5c   : > { %817 = vst.msk [vmem:[#allocation2 + $0x121] sm:$0xff] %vm674_vm1, %v7240_v34  ;;  %818 = vst.msk [vmem:[#allocation2 + $0x129] sm:$0xff] %vm674_vm1, %v7241_v41  ;;  %v3615_v17 = vld [vmem:[#allocation3 + $0xa8] sm:$0xff]  ;;  %v3616_v19 = vld [vmem:[#allocation3 + $0xb0] sm:$0xff]  ;;  %v936_v25 = vpack.c.bf16 %v912_v16, %v911_v15 }
  0x5d   : > { %3572 = vst.msk [vmem:[#allocation3 + $0x121] sm:$0xff] %vm674_vm1, %v7304_v42  ;;  %3573 = vst.msk [vmem:[#allocation3 + $0x129] sm:$0xff] %vm674_vm1, %v7305_v45  ;;  %v913_v21 = vld [vmem:[#allocation2 + $0xc1] sm:$0xff]  ;;  %v914_v22 = vld [vmem:[#allocation2 + $0xc9] sm:$0xff]  ;;  %v9356_v26 = vpack.c.bf16 %v3616_v19, %v3615_v17 }
  0x5e   : > { %819 = vst.msk [vmem:[#allocation2 + $0x139] sm:$0xff] %vm674_vm1, %v7244_v46  ;;  %820 = vst.msk [vmem:[#allocation2 + $0x141] sm:$0xff] %vm674_vm1, %v7245_v47  ;;  %v3617_v23 = vld [vmem:[#allocation3 + $0xc0] sm:$0xff]  ;;  %v3618_v24 = vld [vmem:[#allocation3 + $0xc8] sm:$0xff]  ;;  %v937_v27 = vpack.c.bf16 %v914_v22, %v913_v21 }
  0x5f   : > { %3574 = vst.msk [vmem:[#allocation3 + $0x139] sm:$0xff] %vm674_vm1, %v7308_v20  ;;  %3575 = vst.msk [vmem:[#allocation3 + $0x141] sm:$0xff] %vm674_vm1, %v7309_v50  ;;  %v9358_v28 = vpack.c.bf16 %v3618_v24, %v3617_v23  ;;  %v915_v29 = vld [vmem:[#allocation2 + $0xd9] sm:$0xff]  ;;  %v916_v30 = vld [vmem:[#allocation2 + $0xe1] sm:$0xff] }
  0x60   : > { %7669 = vmatmul.mubr.msk.bf16.gmra.mrb[8].mxu1 %vm674_vm1, %v934_v63  ;;  %821 = vst.msk [vmem:[#allocation2 + $0x151] sm:$0xff] %vm674_vm1, %v7248_v5  ;;  %822 = vst.msk [vmem:[#allocation2 + $0x159] sm:$0xff] %vm674_vm1, %v7249_v6  ;;  %v3619_v31 = vld [vmem:[#allocation3 + $0xd8] sm:$0xff]  ;;  %v3620_v32 = vld [vmem:[#allocation3 + $0xe0] sm:$0xff]  ;;  %v938_v39 = vpack.c.bf16 %v916_v30, %v915_v29  ;;  %v1471_v30 = vsel %vm995_vm0, %v9296_v36, 0 }
  0x61   : > { %7975 = vmatmul.mubr.msk.bf16.gmra.mrb[8].mxu0 %vm674_vm1, %v9334_v0  ;;  %7672 = vmatprep.mubr.msk.bf16.mxu1 %vm674_vm1, %v935_v1  ;;  %3576 = vst.msk [vmem:[#allocation3 + $0x151] sm:$0xff] %vm674_vm1, %v7312_v7  ;;  %3577 = vst.msk [vmem:[#allocation3 + $0x159] sm:$0xff] %vm674_vm1, %v7313_v11  ;;  %v917_v33 = vld [vmem:[#allocation2 + $0xf1] sm:$0xff]  ;;  %v918_v34 = vld [vmem:[#allocation2 + $0xf9] sm:$0xff]  ;;  %v9366_v40 = vpack.c.bf16 %v3620_v32, %v3619_v31  ;;  %v4287_v32 = vsel %vm995_vm0, %v9301_v37, 0 }
  0x62   : > { %7978 = vmatprep.mubr.msk.bf16.mxu0 %vm674_vm1, %v9336_v2  ;;  %823 = vst.msk [vmem:[#allocation2 + $0x169] sm:$0xff] %vm674_vm1, %v7252_v12  ;;  %824 = vst.msk [vmem:[#allocation2 + $0x171] sm:$0xff] %vm674_vm1, %v7253_v13  ;;  %v3621_v35 = vld [vmem:[#allocation3 + $0xf0] sm:$0xff]  ;;  %v3622_v38 = vld [vmem:[#allocation3 + $0xf8] sm:$0xff]  ;;  %v939_v41 = vpack.c.bf16 %v918_v34, %v917_v33 }
  0x63   : > { %3578 = vst.msk [vmem:[#allocation3 + $0x169] sm:$0xff] %vm674_vm1, %v7316_v14  ;;  %3579 = vst.msk [vmem:[#allocation3 + $0x171] sm:$0xff] %vm674_vm1, %v7317_v18  ;;  %v9368_v42 = vpack.c.bf16 %v3622_v38, %v3621_v35  ;;  %v919_v43 = vld [vmem:[#allocation2 + $0x109] sm:$0xff]  ;;  %v920_v44 = vld [vmem:[#allocation2 + $0x111] sm:$0xff] }
  0x64   : > { %v3623_v8 = vld [vmem:[#allocation3 + $0x108] sm:$0xff]  ;;  %v3624_v45 = vld [vmem:[#allocation3 + $0x110] sm:$0xff]  ;;  %v922_v47 = vld [vmem:[#allocation2 + $0x129] sm:$0xff]  ;;  %v940_v20 = vpack.c.bf16 %v920_v44, %v919_v43 }
  0x65   : > { %v921_v46 = vld [vmem:[#allocation2 + $0x121] sm:$0xff]  ;;  %v3625_v48 = vld [vmem:[#allocation3 + $0x120] sm:$0xff]  ;;  %v3626_v49 = vld [vmem:[#allocation3 + $0x128] sm:$0xff]  ;;  %v9376_v50 = vpack.c.bf16 %v3624_v45, %v3623_v8 }
  0x66   : > { %v941_v51 = vpack.c.bf16 %v922_v47, %v921_v46  ;;  %v9378_v52 = vpack.c.bf16 %v3626_v49, %v3625_v48  ;;  %v923_v53 = vld [vmem:[#allocation2 + $0x139] sm:$0xff]  ;;  %v924_v55 = vld [vmem:[#allocation2 + $0x141] sm:$0xff]  ;;  %v3628_v57 = vld [vmem:[#allocation3 + $0x140] sm:$0xff] }
  0x67   : > { %v3627_v56 = vld [vmem:[#allocation3 + $0x138] sm:$0xff]  ;;  %v925_v58 = vld [vmem:[#allocation2 + $0x151] sm:$0xff]  ;;  %v926_v59 = vld [vmem:[#allocation2 + $0x159] sm:$0xff]  ;;  %v942_v62 = vpack.c.bf16 %v924_v55, %v923_v53 }
  0x68   : > { %7673 = vmatmul.mubr.msk.bf16.gmra.mrb[12].mxu1 %vm674_vm1, %v936_v25  ;;  %v3629_v60 = vld [vmem:[#allocation3 + $0x150] sm:$0xff]  ;;  %v3630_v61 = vld [vmem:[#allocation3 + $0x158] sm:$0xff]  ;;  %v9386_v63 = vpack.c.bf16 %v3628_v57, %v3627_v56  ;;  %v943_v1 = vpack.c.bf16 %v926_v59, %v925_v58  ;;  %v3894_v11 = vld [vmem:[#allocation3 + $0x1] sm:$0xff] }
  0x69   : > { %7979 = vmatmul.mubr.msk.bf16.gmra.mrb[12].mxu0 %vm674_vm1, %v9356_v26  ;;  %7676 = vmatprep.mubr.msk.bf16.mxu1 %vm674_vm1, %v937_v27  ;;  %v9388_v3 = vpack.c.bf16 %v3630_v61, %v3629_v60  ;;  %v927_v4 = vld [vmem:[#allocation2 + $0x169] sm:$0xff]  ;;  %v928_v5 = vld [vmem:[#allocation2 + $0x171] sm:$0xff]  ;;  %v848_v6 = vld [vmem:[#allocation2] sm:$0xff] }
  0x6a   : > { %7982 = vmatprep.mubr.msk.bf16.mxu0 %vm674_vm1, %v9358_v28  ;;  %v3631_v7 = vld [vmem:[#allocation3 + $0x168] sm:$0xff]  ;;  %v3632_v9 = vld [vmem:[#allocation3 + $0x170] sm:$0xff]  ;;  %v849_v10 = vld [vmem:[#allocation2 + $0x8] sm:$0xff]  ;;  %v944_v13 = vpack.c.bf16 %v928_v5, %v927_v4 }
  0x6b   : > { %v3895_v12 = vld [vmem:[#allocation3 + $0x9] sm:$0xff]  ;;  %v9396_v14 = vpack.c.bf16 %v3632_v9, %v3631_v7  ;;  %v880_v15 = vpack.c.bf16 %v849_v10, %v848_v6  ;;  %v3896_v19 = vld [vmem:[#allocation3 + $0x19] sm:$0xff]  ;;  %v3897_v21 = vld [vmem:[#allocation3 + $0x21] sm:$0xff] }
  0x6c   : > { %v3926_v16 = vpack.c.bf16 %v3895_v12, %v3894_v11  ;;  %v850_v17 = vld [vmem:[#allocation2 + $0x18] sm:$0xff]  ;;  %v851_v18 = vld [vmem:[#allocation2 + $0x20] sm:$0xff]  ;;  %v852_v22 = vld [vmem:[#allocation2 + $0x30] sm:$0xff]  ;;  %v9405_v29 = vpack.c.bf16 %v3897_v21, %v3896_v19 }
  0x6d   : > { %v853_v23 = vld [vmem:[#allocation2 + $0x38] sm:$0xff]  ;;  %v9403_v24 = vpack.c.bf16 %v851_v18, %v850_v17  ;;  %v3898_v25 = vld [vmem:[#allocation3 + $0x31] sm:$0xff]  ;;  %v3899_v27 = vld [vmem:[#allocation3 + $0x39] sm:$0xff] }
  0x6e   : > { %v9409_v31 = vpack.c.bf16 %v853_v23, %v852_v22  ;;  %v9413_v33 = vpack.c.bf16 %v3899_v27, %v3898_v25  ;;  %v854_v34 = vld [vmem:[#allocation2 + $0x48] sm:$0xff]  ;;  %v9420_v35 = vld [vmem:[%s10251_s3 + $0x3] sm:$0x1]  ;;  %v855_v36 = vld [vmem:[#allocation2 + $0x50] sm:$0xff] }
  0x6f   : > { %v3900_v38 = vld [vmem:[#allocation3 + $0x49] sm:$0xff]  ;;  %v9427_v37 = vld [vmem:[%s10255_s7 + $0x3] sm:$0x1]  ;;  %v857_v43 = vld [vmem:[#allocation2 + $0x68] sm:$0xff]  ;;  %v9435_v45 = vpack.c.bf16 %v855_v36, %v854_v34 }
  0x70   : > { %7677 = vmatmul.mubr.msk.bf16.gmra.mrb[16].mxu1 %vm674_vm1, %v938_v39  ;;  %v3901_v39 = vld [vmem:[#allocation3 + $0x51] sm:$0xff]  ;;  %v3902_v44 = vld [vmem:[#allocation3 + $0x61] sm:$0xff]  ;;  %v3903_v8 = vld [vmem:[#allocation3 + $0x69] sm:$0xff] }
  0x71   : > { %7983 = vmatmul.mubr.msk.bf16.gmra.mrb[16].mxu0 %vm674_vm1, %v9366_v40  ;;  %7680 = vmatprep.mubr.msk.bf16.mxu1 %vm674_vm1, %v939_v41  ;;  %v856_v41 = vld [vmem:[#allocation2 + $0x60] sm:$0xff]  ;;  %v9439_v46 = vpack.c.bf16 %v3901_v39, %v3900_v38  ;;  %v9443_v48 = vpack.c.bf16 %v3903_v8, %v3902_v44  ;;  %v858_v49 = vld [vmem:[#allocation2 + $0x78] sm:$0xff]  ;;  %v860_v55 = vld [vmem:[#allocation2 + $0x90] sm:$0xff] }
  0x72   : > { %7986 = vmatprep.mubr.msk.bf16.mxu0 %vm674_vm1, %v9368_v42  ;;  %v9441_v47 = vpack.c.bf16 %v857_v43, %v856_v41  ;;  %v3905_v53 = vld [vmem:[#allocation3 + $0x81] sm:$0xff]  ;;  %v3906_v57 = vld [vmem:[#allocation3 + $0x91] sm:$0xff]  ;;  %v3907_v58 = vld [vmem:[#allocation3 + $0x99] sm:$0xff] }
  0x73   : > { %v861_v56 = vld [vmem:[#allocation2 + $0x98] sm:$0xff]  ;;  %v863_v4 = vld [vmem:[#allocation2 + $0xb0] sm:$0xff]  ;;  %v3909_v6 = vld [vmem:[#allocation3 + $0xb1] sm:$0xff] }
  0x74   : > { %v9457_v61 = vpack.c.bf16 %v861_v56, %v860_v55  ;;  %v3908_v5 = vld [vmem:[#allocation3 + $0xa9] sm:$0xff]  ;;  %v865_v9 = vld [vmem:[#allocation2 + $0xc8] sm:$0xff]  ;;  %v3910_v10 = vld [vmem:[#allocation3 + $0xc1] sm:$0xff] }
  0x75   : > { %v864_v7 = vld [vmem:[#allocation2 + $0xc0] sm:$0xff]  ;;  %v866_v17 = vld [vmem:[#allocation2 + $0xd8] sm:$0xff]  ;;  %v3912_v19 = vld [vmem:[#allocation3 + $0xd9] sm:$0xff] }
  0x76   : > { %v3911_v11 = vld [vmem:[#allocation3 + $0xc9] sm:$0xff]  ;;  %v3913_v21 = vld [vmem:[#allocation3 + $0xe1] sm:$0xff]  ;;  %v3914_v25 = vld [vmem:[#allocation3 + $0xf1] sm:$0xff] }
  0x77   : > { %v867_v18 = vld [vmem:[#allocation2 + $0xe0] sm:$0xff]  ;;  %v868_v22 = vld [vmem:[#allocation2 + $0xf0] sm:$0xff]  ;;  %v869_v23 = vld [vmem:[#allocation2 + $0xf8] sm:$0xff] }
  0x78   : > { %7681 = vmatmul.mubr.msk.bf16.gmra.mrb[20].mxu1 %vm674_vm1, %v940_v20  ;;  %v859_v20 = vld [vmem:[#allocation2 + $0x80] sm:$0xff]  ;;  %v3915_v27 = vld [vmem:[#allocation3 + $0xf9] sm:$0xff]  ;;  %v9489_v34 = vpack.c.bf16 %v869_v23, %v868_v22 }
  0x79   : > { %7987 = vmatmul.mubr.msk.bf16.gmra.mrb[20].mxu0 %vm674_vm1, %v9376_v50  ;;  %7684 = vmatprep.mubr.msk.bf16.mxu1 %vm674_vm1, %v941_v51  ;;  %v3904_v51 = vld [vmem:[#allocation3 + $0x79] sm:$0xff]  ;;  %v9453_v59 = vpack.c.bf16 %v859_v20, %v858_v49  ;;  %v9491_v36 = vpack.c.bf16 %v3915_v27, %v3914_v25  ;;  %v3916_v41 = vld [vmem:[#allocation3 + $0x109] sm:$0xff]  ;;  %v3917_v43 = vld [vmem:[#allocation3 + $0x111] sm:$0xff] }
  0x7a   : > { %7990 = vmatprep.mubr.msk.bf16.mxu0 %vm674_vm1, %v9378_v52  ;;  %v9455_v60 = vpack.c.bf16 %v3905_v53, %v3904_v51  ;;  %v870_v38 = vld [vmem:[#allocation2 + $0x108] sm:$0xff]  ;;  %v871_v39 = vld [vmem:[#allocation2 + $0x110] sm:$0xff]  ;;  %v872_v44 = vld [vmem:[#allocation2 + $0x120] sm:$0xff]  ;;  %v9503_v53 = vpack.c.bf16 %v3917_v43, %v3916_v41 }
  0x7b   : > { %v873_v8 = vld [vmem:[#allocation2 + $0x128] sm:$0xff]  ;;  %v3918_v49 = vld [vmem:[#allocation3 + $0x121] sm:$0xff]  ;;  %v3919_v20 = vld [vmem:[#allocation3 + $0x129] sm:$0xff]  ;;  %v9501_v51 = vpack.c.bf16 %v871_v39, %v870_v38 }
  0x7c   : > { %v9505_v55 = vpack.c.bf16 %v873_v8, %v872_v44  ;;  %v9507_v56 = vpack.c.bf16 %v3919_v20, %v3918_v49  ;;  %v878_v38 = vld [vmem:[#allocation2 + $0x168] sm:$0xff]  ;;  %v879_v39 = vld [vmem:[#allocation2 + $0x170] sm:$0xff]  ;;  %v3924_v41 = vld [vmem:[#allocation3 + $0x169] sm:$0xff] }
  0x7d   : > { %v3925_v43 = vld [vmem:[#allocation3 + $0x171] sm:$0xff]  ;;  %v1373_v8 = vld [vmem:[#allocation2 + $0xa] sm:$0xff]  ;;  %v4188_v49 = vld [vmem:[#allocation3 + $0x2] sm:$0xff] }
  0x7e   : > { %v1372_v44 = vld [vmem:[#allocation2 + $0x2] sm:$0xff]  ;;  %v4189_v20 = vld [vmem:[#allocation3 + $0xa] sm:$0xff] }
  0x80   : > { %7685 = vmatmul.mubr.msk.bf16.gmra.mrb[24].mxu1 %vm674_vm1, %v942_v62  ;;  %v9459_v62 = vpack.c.bf16 %v3907_v58, %v3906_v57  ;;  %v874_v57 = vld [vmem:[#allocation2 + $0x138] sm:$0xff]  ;;  %v875_v58 = vld [vmem:[#allocation2 + $0x140] sm:$0xff] }
  0x81   : > { %7991 = vmatmul.mubr.msk.bf16.gmra.mrb[24].mxu0 %vm674_vm1, %v9386_v63  ;;  %7688 = vmatprep.mubr.msk.bf16.mxu1 %vm674_vm1, %v943_v1  ;;  %v862_v1 = vld [vmem:[#allocation2 + $0xa8] sm:$0xff] }
  0x82   : > { %7994 = vmatprep.mubr.msk.bf16.mxu0 %vm674_vm1, %v9388_v3  ;;  %v9469_v12 = vpack.c.bf16 %v863_v4, %v862_v1  ;;  %v3920_v1 = vld [vmem:[#allocation3 + $0x139] sm:$0xff]  ;;  %v3921_v4 = vld [vmem:[#allocation3 + $0x141] sm:$0xff] }
  0x88   : > { %7689 = vmatmul.mubr.msk.bf16.gmra.mrb[28].mxu1 %vm674_vm1, %v944_v13  ;;  %v9471_v13 = vpack.c.bf16 %v3909_v6, %v3908_v5  ;;  %v876_v5 = vld [vmem:[#allocation2 + $0x150] sm:$0xff]  ;;  %v877_v6 = vld [vmem:[#allocation2 + $0x158] sm:$0xff] }
  0x89   : > { %7995 = vmatmul.mubr.msk.bf16.gmra.mrb[28].mxu0 %vm674_vm1, %v9396_v14  ;;  %7694 = vmatprep.mubr.msk.bf16.mxu1 %vm674_vm1, %v880_v15  ;;  %v9473_v15 = vpack.c.bf16 %v865_v9, %v864_v7  ;;  %v3922_v7 = vld [vmem:[#allocation3 + $0x151] sm:$0xff]  ;;  %v3923_v9 = vld [vmem:[#allocation3 + $0x159] sm:$0xff] }
  0x8a   : > { %8000 = vmatprep.mubr.msk.bf16.mxu0 %vm674_vm1, %v3926_v16  ;;  %v9475_v16 = vpack.c.bf16 %v3911_v11, %v3910_v10  ;;  %v9517_v10 = vpack.c.bf16 %v875_v58, %v874_v57  ;;  %v9519_v11 = vpack.c.bf16 %v3921_v4, %v3920_v1  ;;  %v9525_v27 = vpack.c.bf16 %v3923_v9, %v3922_v7  ;;  %v4190_v7 = vld [vmem:[#allocation3 + $0x1a] sm:$0xff]  ;;  %v4191_v9 = vld [vmem:[#allocation3 + $0x22] sm:$0xff] }
  0x8b   : > { %v9539_v57 = vpack.c.bf16 %v879_v39, %v878_v38  ;;  %v9541_v58 = vpack.c.bf16 %v3925_v43, %v3924_v41  ;;  %v1404_v1 = vpack.c.bf16 %v1373_v8, %v1372_v44  ;;  %v4220_v4 = vpack.c.bf16 %v4189_v20, %v4188_v49  ;;  %v1378_v44 = vld [vmem:[#allocation2 + $0x4a] sm:$0xff]  ;;  %v9566_v8 = vld [vmem:[%s10251_s3 + $0x4] sm:$0x1]  ;;  %v4194_v49 = vld [vmem:[#allocation3 + $0x4a] sm:$0xff] }
  0x8c   : > { %v1765_v38 = vsel %vm995_vm0, %v9420_v35, 0  ;;  %v4581_v41 = vsel %vm995_vm0, %v9427_v37, 0  ;;  %v4195_v20 = vld [vmem:[#allocation3 + $0x52] sm:$0xff] }
  0x90   : > { %7695 = vmatmul.mubr.msk.bf16.vlgmr.msra.gmra.mrb[0].mxu1 %vm674_vm1, %v9403_v24 }
  0x91   : > { %7727 = vmatpush3.bf16.msra.mxu1 %v1471_v30  ;;  %8001 = vmatmul.mubr.msk.bf16.vlgmr.msra.gmra.mrb[0].mxu0 %vm674_vm1, %v9405_v29  ;;  %v9485_v30 = vpack.c.bf16 %v867_v18, %v866_v17  ;;  %v9521_v17 = vpack.c.bf16 %v877_v6, %v876_v5  ;;  %v7336_v18 = vld [vmem:[%s9197_s21 + $0x78] sm:$0xff]   ;;  %v1375_v6 = vld [vmem:[#allocation2 + $0x22] sm:$0xff] }
  0x92   : > { %8033 = vmatpush3.bf16.msra.mxu0 %v4287_v32  ;;  %7698 = vmatprep.mubr.msk.bf16.mxu1 %vm674_vm1, %v9409_v31  ;;  %v9487_v32 = vpack.c.bf16 %v3913_v21, %v3912_v19  ;;  %v7351_v19 = vld [vmem:[%s9202_s24 + $0x78] sm:$0xff]   ;;  %v7256_v21 = vunpack.c.l.bf16 %v7336_v18  ;;  %v7257_v22 = vunpack.c.h.bf16 %v7336_v18 }
  0x93   : > { %8004 = vmatprep.mubr.msk.bf16.mxu0 %vm674_vm1, %v9413_v33  ;;  %8817 = vmatprep.subr.msk.bf16.mxu1 %vm995_vm0, %v9420_v35  ;;  %v7320_v23 = vunpack.c.l.bf16 %v7351_v19  ;;  %v7321_v25 = vunpack.c.h.bf16 %v7351_v19  ;;  %v1374_v5 = vld [vmem:[#allocation2 + $0x1a] sm:$0xff]  ;;  %v1376_v18 = vld [vmem:[#allocation2 + $0x32] sm:$0xff] }
  0x94   : > { %8826 = vmatprep.subr.msk.bf16.mxu0 %vm995_vm0, %v9427_v37  ;;  %825 = vst.msk [vmem:[#allocation2 + $0x181] sm:$0xff] %vm674_vm1, %v7256_v21  ;;  %826 = vst.msk [vmem:[#allocation2 + $0x189] sm:$0xff] %vm674_vm1, %v7257_v22  ;;  %v1377_v19 = vld [vmem:[#allocation2 + $0x3a] sm:$0xff]  ;;  %v9549_v21 = vpack.c.bf16 %v1375_v6, %v1374_v5  ;;  %v4192_v22 = vld [vmem:[#allocation3 + $0x32] sm:$0xff] }
  0x95   : > { %3580 = vst.msk [vmem:[#allocation3 + $0x181] sm:$0xff] %vm674_vm1, %v7320_v23  ;;  %3581 = vst.msk [vmem:[#allocation3 + $0x189] sm:$0xff] %vm674_vm1, %v7321_v25  ;;  %v4193_v23 = vld [vmem:[#allocation3 + $0x3a] sm:$0xff]  ;;  %v9551_v25 = vpack.c.bf16 %v4191_v9, %v4190_v7  ;;  %v9555_v39 = vpack.c.bf16 %v1377_v19, %v1376_v18  ;;  %v1379_v35 = vld [vmem:[#allocation2 + $0x52] sm:$0xff]  ;;  %v9585_v9 = vpack.c.bf16 %v4195_v20, %v4194_v49 }
  0x96   : > { %v9559_v43 = vpack.c.bf16 %v4193_v23, %v4192_v22  ;;  %v9573_v37 = vld [vmem:[%s10255_s7 + $0x4] sm:$0x1]  ;;  %v4196_v5 = vld [vmem:[#allocation3 + $0x62] sm:$0xff]  ;;  %v4197_v6 = vld [vmem:[#allocation3 + $0x6a] sm:$0xff]  ;;  %v9581_v7 = vpack.c.bf16 %v1379_v35, %v1378_v44 }
  0x97   : > { %10279 = vst [vmem:[#allocation4_spill] sm:$0xff] %v9585_v9  ;;  %v9589_v19 = vpack.c.bf16 %v4197_v6, %v4196_v5  ;;  %v1382_v22 = vld [vmem:[#allocation2 + $0x7a] sm:$0xff]  ;;  %v1383_v23 = vld [vmem:[#allocation2 + $0x82] sm:$0xff]  ;;  %v1384_v44 = vld [vmem:[#allocation2 + $0x92] sm:$0xff] }
  0x98   : > { %7699 = vmatmul.mubr.msk.bf16.gmra.mrb[4].mxu1 %vm674_vm1, %v9435_v45  ;;  %v1385_v35 = vld [vmem:[#allocation2 + $0x9a] sm:$0xff]  ;;  %v4200_v49 = vld [vmem:[#allocation3 + $0x92] sm:$0xff]  ;;  %v4201_v20 = vld [vmem:[#allocation3 + $0x9a] sm:$0xff] }
  0x99   : > { %8005 = vmatmul.mubr.msk.bf16.gmra.mrb[4].mxu0 %vm674_vm1, %v9439_v46  ;;  %7702 = vmatprep.mubr.msk.bf16.mxu1 %vm674_vm1, %v9441_v47  ;;  %10281 = vst [vmem:[#allocation6_spill] sm:$0xff] %v9589_v19  ;;  %v9603_v5 = vpack.c.bf16 %v1385_v35, %v1384_v44  ;;  %v9605_v6 = vpack.c.bf16 %v4201_v20, %v4200_v49  ;;  %v4205_v44 = vld [vmem:[#allocation3 + $0xca] sm:$0xff] }
  0x9a   : > { %8008 = vmatprep.mubr.msk.bf16.mxu0 %vm674_vm1, %v9443_v48 }
  0x9b   : > { %10284 = vst [vmem:[#allocation9_spill] sm:$0xff] %v9603_v5  ;;  %10285 = vst [vmem:[#allocation10_spill] sm:$0xff] %v9605_v6 }
  0xa0   : > { %7703 = vmatmul.mubr.msk.bf16.gmra.mrb[8].mxu1 %vm674_vm1, %v9453_v59 }
  0xa1   : > { %8009 = vmatmul.mubr.msk.bf16.gmra.mrb[8].mxu0 %vm674_vm1, %v9455_v60  ;;  %7706 = vmatprep.mubr.msk.bf16.mxu1 %vm674_vm1, %v9457_v61 }
  0xa2   : > { %8012 = vmatprep.mubr.msk.bf16.mxu0 %vm674_vm1, %v9459_v62 }
  0xa8   : > { %7707 = vmatmul.mubr.msk.bf16.gmra.mrb[12].mxu1 %vm674_vm1, %v9469_v12 }
  0xa9   : > { %8013 = vmatmul.mubr.msk.bf16.gmra.mrb[12].mxu0 %vm674_vm1, %v9471_v13  ;;  %7710 = vmatprep.mubr.msk.bf16.mxu1 %vm674_vm1, %v9473_v15 }
  0xaa   : > { %8016 = vmatprep.mubr.msk.bf16.mxu0 %vm674_vm1, %v9475_v16 }
  0xb0   : > { %7711 = vmatmul.mubr.msk.bf16.gmra.mrb[16].mxu1 %vm674_vm1, %v9485_v30 }
  0xb1   : > { %8017 = vmatmul.mubr.msk.bf16.gmra.mrb[16].mxu0 %vm674_vm1, %v9487_v32  ;;  %7714 = vmatprep.mubr.msk.bf16.mxu1 %vm674_vm1, %v9489_v34 }
  0xb2   : > { %8020 = vmatprep.mubr.msk.bf16.mxu0 %vm674_vm1, %v9491_v36 }
  0xb8   : > { %7715 = vmatmul.mubr.msk.bf16.gmra.mrb[20].mxu1 %vm674_vm1, %v9501_v51 }
  0xb9   : > { %8021 = vmatmul.mubr.msk.bf16.gmra.mrb[20].mxu0 %vm674_vm1, %v9503_v53  ;;  %7718 = vmatprep.mubr.msk.bf16.mxu1 %vm674_vm1, %v9505_v55 }
  0xba   : > { %8024 = vmatprep.mubr.msk.bf16.mxu0 %vm674_vm1, %v9507_v56 }
  0xc0   : > { %7719 = vmatmul.mubr.msk.bf16.gmra.mrb[24].mxu1 %vm674_vm1, %v9517_v10 }
  0xc1   : > { %8025 = vmatmul.mubr.msk.bf16.gmra.mrb[24].mxu0 %vm674_vm1, %v9519_v11  ;;  %7722 = vmatprep.mubr.msk.bf16.mxu1 %vm674_vm1, %v9521_v17 }
  0xc2   : > { %8028 = vmatprep.mubr.msk.bf16.mxu0 %vm674_vm1, %v9525_v27 }
  0xc8   : > { %7723 = vmatmul.mubr.msk.bf16.gmra.mrb[28].mxu1 %vm674_vm1, %v9539_v57 }
  0xc9   : > { %8029 = vmatmul.mubr.msk.bf16.gmra.mrb[28].mxu0 %vm674_vm1, %v9541_v58  ;;  %7728 = vmatprep.mubr.msk.bf16.mxu1 %vm674_vm1, %v1404_v1  ;;  %v1380_v1 = vld [vmem:[#allocation2 + $0x62] sm:$0xff] }
  0xca   : > { %8034 = vmatprep.mubr.msk.bf16.mxu0 %vm674_vm1, %v4220_v4  ;;  %v1381_v4 = vld [vmem:[#allocation2 + $0x6a] sm:$0xff] }
  0xcb   : > { %v9587_v18 = vpack.c.bf16 %v1381_v4, %v1380_v1  ;;  %v9599_v1 = vpack.c.bf16 %v1383_v23, %v1382_v22  ;;  %v4203_v22 = vld [vmem:[#allocation3 + $0xb2] sm:$0xff] }
  0xcc   : > { %v1388_v23 = vld [vmem:[#allocation2 + $0xc2] sm:$0xff] }
  0xcd   : > { %10280 = vst [vmem:[#allocation5_spill] sm:$0xff] %v9587_v18  ;;  %10282 = vst [vmem:[#allocation7_spill] sm:$0xff] %v9599_v1 }
  0xd0   : > { %7729 = vmatmul.mubr.msk.bf16.vlgmr.msra.gmra.mrb[0].mxu1 %vm674_vm1, %v9549_v21 }
  0xd1   : > { %7761 = vmatpush3.bf16.msra.mxu1 %v1765_v38  ;;  %8035 = vmatmul.mubr.msk.bf16.vlgmr.msra.gmra.mrb[0].mxu0 %vm674_vm1, %v9551_v25  ;;  %v4198_v38 = vld [vmem:[#allocation3 + $0x7a] sm:$0xff] }
  0xd2   : > { %8067 = vmatpush3.bf16.msra.mxu0 %v4581_v41  ;;  %7732 = vmatprep.mubr.msk.bf16.mxu1 %vm674_vm1, %v9555_v39  ;;  %v4199_v41 = vld [vmem:[#allocation3 + $0x82] sm:$0xff] }
  0xd3   : > { %8038 = vmatprep.mubr.msk.bf16.mxu0 %vm674_vm1, %v9559_v43  ;;  %8818 = vmatprep.subr.msk.bf16.mxu1 %vm995_vm0, %v9566_v8  ;;  %v9601_v4 = vpack.c.bf16 %v4199_v41, %v4198_v38  ;;  %v1389_v38 = vld [vmem:[#allocation2 + $0xca] sm:$0xff]  ;;  %v4204_v41 = vld [vmem:[#allocation3 + $0xc2] sm:$0xff] }
  0xd4   : > { %8827 = vmatprep.subr.msk.bf16.mxu0 %vm995_vm0, %v9573_v37  ;;  %v9619_v20 = vpack.c.bf16 %v1389_v38, %v1388_v23  ;;  %v4209_v23 = vld [vmem:[#allocation3 + $0xfa] sm:$0xff] }
  0xd5   : > { %10283 = vst [vmem:[#allocation8_spill] sm:$0xff] %v9601_v4 }
  0xd6   : > { %10288 = vst [vmem:[#allocation13_spill] sm:$0xff] %v9619_v20 }
  0xd8   : > { %7733 = vmatmul.mubr.msk.bf16.gmra.mrb[4].mxu1 %vm674_vm1, %v9581_v7 }
  0xd9   : > { %8039 = vmatmul.mubr.msk.bf16.gmra.mrb[4].mxu0 %vm674_vm1, %v9585_v9  ;;  %7736 = vmatprep.mubr.msk.bf16.mxu1 %vm674_vm1, %v9587_v18  ;;  %v1387_v18 = vld [vmem:[#allocation2 + $0xb2] sm:$0xff]  ;;  %v4202_v9 = vld [vmem:[#allocation3 + $0xaa] sm:$0xff] }
  0xda   : > { %8042 = vmatprep.mubr.msk.bf16.mxu0 %vm674_vm1, %v9589_v19  ;;  %v1386_v19 = vld [vmem:[#allocation2 + $0xaa] sm:$0xff]  ;;  %v9617_v49 = vpack.c.bf16 %v4203_v22, %v4202_v9  ;;  %v4207_v9 = vld [vmem:[#allocation3 + $0xe2] sm:$0xff]  ;;  %v4208_v22 = vld [vmem:[#allocation3 + $0xf2] sm:$0xff] }
  0xdb   : > { %v9615_v35 = vpack.c.bf16 %v1387_v18, %v1386_v19  ;;  %v1392_v18 = vld [vmem:[#allocation2 + $0xf2] sm:$0xff]  ;;  %v1393_v19 = vld [vmem:[#allocation2 + $0xfa] sm:$0xff] }
  0xdc   : > { %10287 = vst [vmem:[#allocation12_spill] sm:$0xff] %v9617_v49 }
  0xdd   : > { %10286 = vst [vmem:[#allocation11_spill] sm:$0xff] %v9615_v35 }
  0xe0   : > { %7737 = vmatmul.mubr.msk.bf16.gmra.mrb[8].mxu1 %vm674_vm1, %v9599_v1  ;;  %v4206_v1 = vld [vmem:[#allocation3 + $0xda] sm:$0xff] }
  0xe1   : > { %8043 = vmatmul.mubr.msk.bf16.gmra.mrb[8].mxu0 %vm674_vm1, %v9601_v4  ;;  %7740 = vmatprep.mubr.msk.bf16.mxu1 %vm674_vm1, %v9603_v5  ;;  %v9621_v4 = vpack.c.bf16 %v4205_v44, %v4204_v41  ;;  %v1391_v5 = vld [vmem:[#allocation2 + $0xe2] sm:$0xff]  ;;  %v9633_v41 = vpack.c.bf16 %v4207_v9, %v4206_v1  ;;  %v9635_v44 = vpack.c.bf16 %v1393_v19, %v1392_v18  ;;  %v4212_v9 = vld [vmem:[#allocation3 + $0x122] sm:$0xff]  ;;  %v4213_v18 = vld [vmem:[#allocation3 + $0x12a] sm:$0xff] }
  0xe2   : > { %8046 = vmatprep.mubr.msk.bf16.mxu0 %vm674_vm1, %v9605_v6  ;;  %v1390_v6 = vld [vmem:[#allocation2 + $0xda] sm:$0xff]  ;;  %v4211_v1 = vld [vmem:[#allocation3 + $0x112] sm:$0xff] }
  0xe3   : > { %10289 = vst [vmem:[#allocation14_spill] sm:$0xff] %v9621_v4  ;;  %v9631_v38 = vpack.c.bf16 %v1391_v5, %v1390_v6  ;;  %10291 = vst [vmem:[#allocation16_spill] sm:$0xff] %v9633_v41  ;;  %v1396_v5 = vld [vmem:[#allocation2 + $0x122] sm:$0xff]  ;;  %v1397_v6 = vld [vmem:[#allocation2 + $0x12a] sm:$0xff] }
  0xe4   : > { %10292 = vst [vmem:[#allocation17_spill] sm:$0xff] %v9635_v44 }
  0xe5   : > { %10290 = vst [vmem:[#allocation15_spill] sm:$0xff] %v9631_v38 }
  0xe8   : > { %7741 = vmatmul.mubr.msk.bf16.gmra.mrb[12].mxu1 %vm674_vm1, %v9615_v35  ;;  %v4210_v35 = vld [vmem:[#allocation3 + $0x10a] sm:$0xff] }
  0xe9   : > { %8047 = vmatmul.mubr.msk.bf16.gmra.mrb[12].mxu0 %vm674_vm1, %v9617_v49  ;;  %7744 = vmatprep.mubr.msk.bf16.mxu1 %vm674_vm1, %v9619_v20  ;;  %v9637_v49 = vpack.c.bf16 %v4209_v23, %v4208_v22  ;;  %v1395_v20 = vld [vmem:[#allocation2 + $0x112] sm:$0xff]  ;;  %v9649_v22 = vpack.c.bf16 %v4211_v1, %v4210_v35  ;;  %v9651_v23 = vpack.c.bf16 %v1397_v6, %v1396_v5  ;;  %v4216_v1 = vld [vmem:[#allocation3 + $0x152] sm:$0xff]  ;;  %v4217_v5 = vld [vmem:[#allocation3 + $0x15a] sm:$0xff] }
  0xea   : > { %8050 = vmatprep.mubr.msk.bf16.mxu0 %vm674_vm1, %v9621_v4  ;;  %v1394_v4 = vld [vmem:[#allocation2 + $0x10a] sm:$0xff]  ;;  %v1400_v35 = vld [vmem:[#allocation2 + $0x152] sm:$0xff] }
  0xeb   : > { %10293 = vst [vmem:[#allocation18_spill] sm:$0xff] %v9637_v49  ;;  %v9647_v19 = vpack.c.bf16 %v1395_v20, %v1394_v4  ;;  %10294 = vst [vmem:[#allocation19_spill] sm:$0xff] %v9649_v22  ;;  %v4215_v4 = vld [vmem:[#allocation3 + $0x142] sm:$0xff]  ;;  %v1401_v20 = vld [vmem:[#allocation2 + $0x15a] sm:$0xff] }
  0xec   : > { %10295 = vst [vmem:[#allocation20_spill] sm:$0xff] %v9651_v23 }
  0xf0   : > { %7745 = vmatmul.mubr.msk.bf16.gmra.mrb[16].mxu1 %vm674_vm1, %v9631_v38  ;;  %v4214_v38 = vld [vmem:[#allocation3 + $0x13a] sm:$0xff] }
  0xf1   : > { %8051 = vmatmul.mubr.msk.bf16.gmra.mrb[16].mxu0 %vm674_vm1, %v9633_v41  ;;  %7748 = vmatprep.mubr.msk.bf16.mxu1 %vm674_vm1, %v9635_v44  ;;  %v9653_v41 = vpack.c.bf16 %v4213_v18, %v4212_v9  ;;  %v1399_v44 = vld [vmem:[#allocation2 + $0x142] sm:$0xff]  ;;  %v9665_v9 = vpack.c.bf16 %v4215_v4, %v4214_v38  ;;  %v9667_v18 = vpack.c.bf16 %v1401_v20, %v1400_v35  ;;  %v4483_v4 = vld [vmem:[#allocation3 + $0x20] sm:$0xff] }
  0xf2   : > { %8054 = vmatprep.mubr.msk.bf16.mxu0 %vm674_vm1, %v9637_v49  ;;  %v1398_v49 = vld [vmem:[#allocation2 + $0x13a] sm:$0xff]  ;;  %v4219_v38 = vld [vmem:[#allocation3 + $0x172] sm:$0xff] }
  0xf3   : > { %10296 = vst [vmem:[#allocation21_spill] sm:$0xff] %v9653_v41  ;;  %v9663_v6 = vpack.c.bf16 %v1399_v44, %v1398_v49  ;;  %10297 = vst [vmem:[#allocation22_spill] sm:$0xff] %v9665_v9  ;;  %v4218_v49 = vld [vmem:[#allocation3 + $0x16a] sm:$0xff]  ;;  %v4482_v44 = vld [vmem:[#allocation3 + $0x18] sm:$0xff] }
  0xf4   : > { %10298 = vst [vmem:[#allocation23_spill] sm:$0xff] %v9667_v18  ;;  %v9681_v20 = vpack.c.bf16 %v4219_v38, %v4218_v49  ;;  %v4875_v49 = vsel %vm995_vm0, %v9573_v37, 0 }
  0xf8   : > { %7749 = vmatmul.mubr.msk.bf16.gmra.mrb[20].mxu1 %vm674_vm1, %v9647_v19 }
  0xf9   : > { %8055 = vmatmul.mubr.msk.bf16.gmra.mrb[20].mxu0 %vm674_vm1, %v9649_v22  ;;  %7752 = vmatprep.mubr.msk.bf16.mxu1 %vm674_vm1, %v9651_v23  ;;  %v9669_v22 = vpack.c.bf16 %v4217_v5, %v4216_v1  ;;  %v1403_v23 = vld [vmem:[#allocation2 + $0x172] sm:$0xff]  ;;  %v4514_v1 = vpack.c.bf16 %v4483_v4, %v4482_v44  ;;  %v4484_v5 = vld [vmem:[#allocation3 + $0x30] sm:$0xff] }
  0xfa   : > { %8058 = vmatprep.mubr.msk.bf16.mxu0 %vm674_vm1, %v9653_v41  ;;  %v1402_v41 = vld [vmem:[#allocation2 + $0x16a] sm:$0xff] }
  0xfb   : > { %10299 = vst [vmem:[#allocation24_spill] sm:$0xff] %v9669_v22  ;;  %v9679_v35 = vpack.c.bf16 %v1403_v23, %v1402_v41  ;;  %v2059_v23 = vsel %vm995_vm0, %v9566_v8, 0  ;;  %v7052_v8 = vld [vmem:[%s10255_s7 + $0x5] sm:$0x1] }
 0x100   : > { %7753 = vmatmul.mubr.msk.bf16.gmra.mrb[24].mxu1 %vm674_vm1, %v9663_v6 }
 0x101   : > { %8059 = vmatmul.mubr.msk.bf16.gmra.mrb[24].mxu0 %vm674_vm1, %v9665_v9  ;;  %7756 = vmatprep.mubr.msk.bf16.mxu1 %vm674_vm1, %v9667_v18  ;;  %v4486_v18 = vld [vmem:[#allocation3 + $0x48] sm:$0xff]  ;;  %v4487_v9 = vld [vmem:[#allocation3 + $0x50] sm:$0xff] }
 0x102   : > { %8062 = vmatprep.mubr.msk.bf16.mxu0 %vm674_vm1, %v9669_v22  ;;  %v4485_v22 = vld [vmem:[#allocation3 + $0x38] sm:$0xff]  ;;  %v9696_v38 = vpack.c.bf16 %v4487_v9, %v4486_v18 }
 0x103   : > { %v9690_v41 = vpack.c.bf16 %v4485_v22, %v4484_v5  ;;  %v1975_v9 = vld [vmem:[#allocation2 + $0xc9] sm:$0xff]  ;;  %v1977_v18 = vld [vmem:[#allocation2 + $0xe1] sm:$0xff]  ;;  %v1981_v5 = vld [vmem:[#allocation2 + $0x111] sm:$0xff] }
 0x108   : > { %7757 = vmatmul.mubr.msk.bf16.gmra.mrb[28].mxu1 %vm674_vm1, %v9679_v35 }
 0x109   : > { %8063 = vmatmul.mubr.msk.bf16.gmra.mrb[28].mxu0 %vm674_vm1, %v9681_v20  ;;  %7762 = vmatprep.mubr.msk.bf16.mxu1 %vm674_vm1, %v9403_v24  ;;  %v6900_v24 = vld [vmem:[%s10251_s3 + $0x5] sm:$0x1] }
 0x10a   : > { %8068 = vmatprep.mubr.msk.bf16.mxu0 %vm674_vm1, %v4514_v1  ;;  %v1979_v1 = vld [vmem:[#allocation2 + $0xf9] sm:$0xff] }
 0x110   : > { %7763 = vmatmul.mubr.msk.bf16.vlgmr.msra.gmra.mrb[0].mxu1 %vm674_vm1, %v9409_v31  ;;  %v1965_v31 = vld [vmem:[#allocation2 + $0x51] sm:$0xff] }
 0x111   : > { %7795 = vmatpush3.bf16.msra.mxu1 %v2059_v23  ;;  %8069 = vmatmul.mubr.msk.bf16.vlgmr.msra.gmra.mrb[0].mxu0 %vm674_vm1, %v9690_v41 }
 0x112   : > { %8101 = vmatpush3.bf16.msra.mxu0 %v4875_v49  ;;  %7766 = vmatprep.mubr.msk.bf16.mxu1 %vm674_vm1, %v9435_v45 }
 0x113   : > { %8072 = vmatprep.mubr.msk.bf16.mxu0 %vm674_vm1, %v9696_v38  ;;  %8819 = vmatprep.subr.msk.bf16.mxu1 %vm995_vm0, %v6900_v24 }
 0x114   : > { %8828 = vmatprep.subr.msk.bf16.mxu0 %vm995_vm0, %v7052_v8 }
 0x118   : > { %7767 = vmatmul.mubr.msk.bf16.gmra.mrb[4].mxu1 %vm674_vm1, %v9441_v47  ;;  %v2353_v47 = vsel %vm995_vm0, %v6900_v24, 0  ;;  %v1983_v24 = vld [vmem:[#allocation2 + $0x129] sm:$0xff] }
 0x119   : > { %8073 = vmatmul.mubr.msk.bf16.gmra.mrb[4].mxu0 %vm674_vm1, %v9327_v54  ;;  %7770 = vmatprep.mubr.msk.bf16.mxu1 %vm674_vm1, %v9453_v59  ;;  %v1696_v54 = vld [vmem:[#allocation2 + $0x180] sm:$0xff] }
 0x11a   : > { %8076 = vmatprep.mubr.msk.bf16.mxu0 %vm674_vm1, %v9334_v0  ;;  %v1697_v0 = vld [vmem:[#allocation2 + $0x188] sm:$0xff] }
 0x120   : > { %7771 = vmatmul.mubr.msk.bf16.gmra.mrb[8].mxu1 %vm674_vm1, %v9457_v61  ;;  %v5169_v61 = vsel %vm995_vm0, %v7052_v8, 0  ;;  %v1985_v8 = vld [vmem:[#allocation2 + $0x141] sm:$0xff] }
 0x121   : > { %8077 = vmatmul.mubr.msk.bf16.gmra.mrb[8].mxu0 %vm674_vm1, %v9336_v2  ;;  %7774 = vmatprep.mubr.msk.bf16.mxu1 %vm674_vm1, %v9469_v12  ;;  %v4512_v2 = vld [vmem:[#allocation3 + $0x180] sm:$0xff]  ;;  %v9784_v12 = vld [vmem:[%s10251_s3 + $0x6] sm:$0x1] }
 0x122   : > { %8080 = vmatprep.mubr.msk.bf16.mxu0 %vm674_vm1, %v9356_v26  ;;  %v4513_v26 = vld [vmem:[#allocation3 + $0x188] sm:$0xff] }
 0x128   : > { %7775 = vmatmul.mubr.msk.bf16.gmra.mrb[12].mxu1 %vm674_vm1, %v9473_v15  ;;  %v1967_v15 = vld [vmem:[#allocation2 + $0x69] sm:$0xff] }
 0x129   : > { %8081 = vmatmul.mubr.msk.bf16.gmra.mrb[12].mxu0 %vm674_vm1, %v9358_v28  ;;  %7778 = vmatprep.mubr.msk.bf16.mxu1 %vm674_vm1, %v9485_v30  ;;  %v1960_v28 = vld [vmem:[#allocation2 + $0x19] sm:$0xff]  ;;  %v9791_v30 = vld [vmem:[%s10255_s7 + $0x6] sm:$0x1] }
 0x12a   : > { %8084 = vmatprep.mubr.msk.bf16.mxu0 %vm674_vm1, %v9366_v40  ;;  %v1961_v40 = vld [vmem:[#allocation2 + $0x21] sm:$0xff] }
 0x130   : > { %7779 = vmatmul.mubr.msk.bf16.gmra.mrb[16].mxu1 %vm674_vm1, %v9489_v34  ;;  %v1968_v34 = vld [vmem:[#allocation2 + $0x79] sm:$0xff] }
 0x131   : > { %8085 = vmatmul.mubr.msk.bf16.gmra.mrb[16].mxu0 %vm674_vm1, %v9368_v42  ;;  %7782 = vmatprep.mubr.msk.bf16.mxu1 %vm674_vm1, %v9501_v51  ;;  %v9762_v42 = vpack.c.bf16 %v1697_v0, %v1696_v54  ;;  %v1969_v51 = vld [vmem:[#allocation2 + $0x81] sm:$0xff] }
 0x132   : > { %8088 = vmatprep.mubr.msk.bf16.mxu0 %vm674_vm1, %v9376_v50  ;;  %v9764_v50 = vpack.c.bf16 %v4513_v26, %v4512_v2  ;;  %v1987_v2 = vld [vmem:[#allocation2 + $0x159] sm:$0xff]  ;;  %v1989_v26 = vld [vmem:[#allocation2 + $0x171] sm:$0xff] }
 0x138   : > { %7783 = vmatmul.mubr.msk.bf16.gmra.mrb[20].mxu1 %vm674_vm1, %v9505_v55  ;;  %v9803_v55 = vpack.c.bf16 %v1969_v51, %v1968_v34  ;;  %v10310_v34 = vld [vmem:[#allocation14_spill] sm:$0xff]  ;;  %v10311_v51 = vld [vmem:[#allocation15_spill] sm:$0xff] }
 0x139   : > { %8089 = vmatmul.mubr.msk.bf16.gmra.mrb[20].mxu0 %vm674_vm1, %v9378_v52  ;;  %7786 = vmatprep.mubr.msk.bf16.mxu1 %vm674_vm1, %v9517_v10  ;;  %v1992_v52 = vpack.c.bf16 %v1961_v40, %v1960_v28  ;;  %v1971_v10 = vld [vmem:[#allocation2 + $0x99] sm:$0xff] }
 0x13a   : > { %8092 = vmatprep.mubr.msk.bf16.mxu0 %vm674_vm1, %v9386_v63  ;;  %v1962_v63 = vld [vmem:[#allocation2 + $0x31] sm:$0xff] }
 0x140   : > { %7787 = vmatmul.mubr.msk.bf16.gmra.mrb[24].mxu1 %vm674_vm1, %v9521_v17  ;;  %v1972_v17 = vld [vmem:[#allocation2 + $0xa9] sm:$0xff] }
 0x141   : > { %8093 = vmatmul.mubr.msk.bf16.gmra.mrb[24].mxu0 %vm674_vm1, %v9388_v3  ;;  %7790 = vmatprep.mubr.msk.bf16.mxu1 %vm674_vm1, %v9539_v57  ;;  %v1963_v3 = vld [vmem:[#allocation2 + $0x39] sm:$0xff]  ;;  %v1973_v57 = vld [vmem:[#allocation2 + $0xb1] sm:$0xff] }
 0x142   : > { %8096 = vmatprep.mubr.msk.bf16.mxu0 %vm674_vm1, %v9396_v14  ;;  %v1964_v14 = vld [vmem:[#allocation2 + $0x49] sm:$0xff]  ;;  %v9773_v45 = vpack.c.bf16 %v1963_v3, %v1962_v63  ;;  %v9815_v22 = vpack.c.bf16 %v1973_v57, %v1972_v17  ;;  %v4807_v63 = vld [vmem:[#allocation3 + $0x189] sm:$0xff] }
 0x143   : > { %v9776_v59 = vpack.c.bf16 %v1965_v31, %v1964_v14  ;;  %v6934_v31 = vld [vmem:[%s10251_s3 + $0x7] sm:$0x1]  ;;  %v10314_v17 = vld [vmem:[#allocation18_spill] sm:$0xff]  ;;  %v10315_v57 = vld [vmem:[#allocation19_spill] sm:$0xff] }
 0x148   : > { %7791 = vmatmul.mubr.msk.bf16.gmra.mrb[28].mxu1 %vm674_vm1, %v9762_v42 }
 0x149   : > { %8097 = vmatmul.mubr.msk.bf16.gmra.mrb[28].mxu0 %vm674_vm1, %v9764_v50  ;;  %7796 = vmatprep.mubr.msk.bf16.mxu1 %vm674_vm1, %v1992_v52  ;;  %v1991_v52 = vld [vmem:[#allocation2 + $0x189] sm:$0xff] }
 0x14a   : > { %8102 = vmatprep.mubr.msk.bf16.mxu0 %vm674_vm1, %v9405_v29  ;;  %v1966_v29 = vld [vmem:[#allocation2 + $0x61] sm:$0xff] }
 0x150   : > { %7797 = vmatmul.mubr.msk.bf16.vlgmr.msra.gmra.mrb[0].mxu1 %vm674_vm1, %v9773_v45 }
 0x151   : > { %7829 = vmatpush3.bf16.msra.mxu1 %v2353_v47  ;;  %8103 = vmatmul.mubr.msk.bf16.vlgmr.msra.gmra.mrb[0].mxu0 %vm674_vm1, %v9413_v33  ;;  %v9799_v33 = vpack.c.bf16 %v1967_v15, %v1966_v29  ;;  %v10302_v47 = vld [vmem:[#allocation6_spill] sm:$0xff]  ;;  %v10307_v29 = vld [vmem:[#allocation11_spill] sm:$0xff]  ;;  %v10308_v15 = vld [vmem:[#allocation12_spill] sm:$0xff] }
 0x152   : > { %8135 = vmatpush3.bf16.msra.mxu0 %v5169_v61  ;;  %7800 = vmatprep.mubr.msk.bf16.mxu1 %vm674_vm1, %v9776_v59  ;;  %v10304_v61 = vld [vmem:[#allocation8_spill] sm:$0xff] }
 0x153   : > { %8106 = vmatprep.mubr.msk.bf16.mxu0 %vm674_vm1, %v9439_v46  ;;  %8820 = vmatprep.subr.msk.bf16.mxu1 %vm995_vm0, %v9784_v12  ;;  %v1970_v46 = vld [vmem:[#allocation2 + $0x91] sm:$0xff] }
 0x154   : > { %8829 = vmatprep.subr.msk.bf16.mxu0 %vm995_vm0, %v9791_v30  ;;  %v9813_v37 = vpack.c.bf16 %v1971_v10, %v1970_v46  ;;  %v10312_v46 = vld [vmem:[#allocation16_spill] sm:$0xff]  ;;  %v10313_v10 = vld [vmem:[#allocation17_spill] sm:$0xff] }
 0x158   : > { %7801 = vmatmul.mubr.msk.bf16.gmra.mrb[4].mxu1 %vm674_vm1, %v9799_v33 }
 0x159   : > { %8107 = vmatmul.mubr.msk.bf16.gmra.mrb[4].mxu0 %vm674_vm1, %v9443_v48  ;;  %7804 = vmatprep.mubr.msk.bf16.mxu1 %vm674_vm1, %v9803_v55  ;;  %v1974_v48 = vld [vmem:[#allocation2 + $0xc1] sm:$0xff] }
 0x15a   : > { %8110 = vmatprep.mubr.msk.bf16.mxu0 %vm674_vm1, %v9455_v60  ;;  %v1976_v60 = vld [vmem:[#allocation2 + $0xd9] sm:$0xff]  ;;  %v9825_v44 = vpack.c.bf16 %v1975_v9, %v1974_v48  ;;  %v10317_v9 = vld [vmem:[#allocation21_spill] sm:$0xff] }
 0x15b   : > { %v9827_v4 = vpack.c.bf16 %v1977_v18, %v1976_v60  ;;  %v10316_v48 = vld [vmem:[#allocation20_spill] sm:$0xff]  ;;  %v10318_v60 = vld [vmem:[#allocation22_spill] sm:$0xff]  ;;  %v10319_v18 = vld [vmem:[#allocation23_spill] sm:$0xff] }
 0x160   : > { %7805 = vmatmul.mubr.msk.bf16.gmra.mrb[8].mxu1 %vm674_vm1, %v9813_v37 }
 0x161   : > { %8111 = vmatmul.mubr.msk.bf16.gmra.mrb[8].mxu0 %vm674_vm1, %v9459_v62  ;;  %7808 = vmatprep.mubr.msk.bf16.mxu1 %vm674_vm1, %v9815_v22  ;;  %v1978_v62 = vld [vmem:[#allocation2 + $0xf1] sm:$0xff] }
 0x162   : > { %8114 = vmatprep.mubr.msk.bf16.mxu0 %vm674_vm1, %v9471_v13  ;;  %v1980_v13 = vld [vmem:[#allocation2 + $0x109] sm:$0xff]  ;;  %v9837_v23 = vpack.c.bf16 %v1979_v1, %v1978_v62  ;;  %v10320_v62 = vld [vmem:[#allocation24_spill] sm:$0xff] }
 0x163   : > { %v9839_v49 = vpack.c.bf16 %v1981_v5, %v1980_v13  ;;  %v2285_v1 = vld [vmem:[#allocation2 + $0x18a] sm:$0xff]  ;;  %v5100_v13 = vld [vmem:[#allocation3 + $0x182] sm:$0xff]  ;;  %v5101_v5 = vld [vmem:[#allocation3 + $0x18a] sm:$0xff] }
 0x168   : > { %7809 = vmatmul.mubr.msk.bf16.gmra.mrb[12].mxu1 %vm674_vm1, %v9825_v44 }
 0x169   : > { %8115 = vmatmul.mubr.msk.bf16.gmra.mrb[12].mxu0 %vm674_vm1, %v9475_v16  ;;  %7812 = vmatprep.mubr.msk.bf16.mxu1 %vm674_vm1, %v9827_v4  ;;  %v1982_v16 = vld [vmem:[#allocation2 + $0x121] sm:$0xff] }
 0x16a   : > { %8118 = vmatprep.mubr.msk.bf16.mxu0 %vm674_vm1, %v9487_v32  ;;  %v1984_v32 = vld [vmem:[#allocation2 + $0x139] sm:$0xff]  ;;  %v9849_v54 = vpack.c.bf16 %v1983_v24, %v1982_v16 }
 0x16b   : > { %v9851_v0 = vpack.c.bf16 %v1985_v8, %v1984_v32  ;;  %v2550_v16 = vld [vmem:[#allocation2 + $0x38] sm:$0xff]  ;;  %v9955_v32 = vpack.c.bf16 %v5101_v5, %v5100_v13  ;;  %v5379_v13 = vld [vmem:[#allocation3 + $0xd8] sm:$0xff]  ;;  %v5380_v5 = vld [vmem:[#allocation3 + $0xe0] sm:$0xff] }
 0x170   : > { %7813 = vmatmul.mubr.msk.bf16.gmra.mrb[16].mxu1 %vm674_vm1, %v9837_v23 }
 0x171   : > { %8119 = vmatmul.mubr.msk.bf16.gmra.mrb[16].mxu0 %vm674_vm1, %v9491_v36  ;;  %7816 = vmatprep.mubr.msk.bf16.mxu1 %vm674_vm1, %v9839_v49  ;;  %v1986_v36 = vld [vmem:[#allocation2 + $0x151] sm:$0xff] }
 0x172   : > { %8122 = vmatprep.mubr.msk.bf16.mxu0 %vm674_vm1, %v9503_v53  ;;  %v1988_v53 = vld [vmem:[#allocation2 + $0x169] sm:$0xff]  ;;  %v9861_v28 = vpack.c.bf16 %v1987_v2, %v1986_v36 }
 0x173   : > { %v9863_v40 = vpack.c.bf16 %v1989_v26, %v1988_v53  ;;  %v2552_v36 = vld [vmem:[#allocation2 + $0x50] sm:$0xff]  ;;  %v2554_v2 = vld [vmem:[#allocation2 + $0x68] sm:$0xff] }
 0x174   : > { %v5369_v26 = vld [vmem:[#allocation3 + $0x60] sm:$0xff] }
 0x178   : > { %7817 = vmatmul.mubr.msk.bf16.gmra.mrb[20].mxu1 %vm674_vm1, %v9849_v54 }
 0x179   : > { %8123 = vmatmul.mubr.msk.bf16.gmra.mrb[20].mxu0 %vm674_vm1, %v9507_v56  ;;  %7820 = vmatprep.mubr.msk.bf16.mxu1 %vm674_vm1, %v9851_v0  ;;  %v1990_v56 = vld [vmem:[#allocation2 + $0x181] sm:$0xff] }
 0x17a   : > { %8126 = vmatprep.mubr.msk.bf16.mxu0 %vm674_vm1, %v9519_v11  ;;  %v4806_v11 = vld [vmem:[#allocation3 + $0x181] sm:$0xff]  ;;  %v9873_v3 = vpack.c.bf16 %v1991_v52, %v1990_v56  ;;  %v2942_v52 = vsel %vm995_vm0, %v6934_v31, 0 }
 0x17b   : > { %v9875_v14 = vpack.c.bf16 %v4807_v63, %v4806_v11  ;;  %v5370_v56 = vld [vmem:[#allocation3 + $0x68] sm:$0xff] }
 0x180   : > { %7821 = vmatmul.mubr.msk.bf16.gmra.mrb[24].mxu1 %vm674_vm1, %v9861_v28 }
 0x181   : > { %8127 = vmatmul.mubr.msk.bf16.gmra.mrb[24].mxu0 %vm674_vm1, %v9525_v27  ;;  %7824 = vmatprep.mubr.msk.bf16.mxu1 %vm674_vm1, %v9863_v40  ;;  %v2648_v27 = vsel %vm995_vm0, %v9784_v12, 0  ;;  %v10306_v12 = vld [vmem:[#allocation10_spill] sm:$0xff] }
 0x182   : > { %8130 = vmatprep.mubr.msk.bf16.mxu0 %vm674_vm1, %v9541_v58  ;;  %v5464_v58 = vsel %vm995_vm0, %v9791_v30, 0  ;;  %v10309_v30 = vld [vmem:[#allocation13_spill] sm:$0xff] }
 0x188   : > { %7825 = vmatmul.mubr.msk.bf16.gmra.mrb[28].mxu1 %vm674_vm1, %v9873_v3 }
 0x189   : > { %8131 = vmatmul.mubr.msk.bf16.gmra.mrb[28].mxu0 %vm674_vm1, %v9875_v14  ;;  %7830 = vmatprep.mubr.msk.bf16.mxu1 %vm674_vm1, %v9549_v21  ;;  %v7086_v21 = vld [vmem:[%s10255_s7 + $0x7] sm:$0x1] }
 0x18a   : > { %8136 = vmatprep.mubr.msk.bf16.mxu0 %vm674_vm1, %v9551_v25  ;;  %v10300_v25 = vld [vmem:[#allocation4_spill] sm:$0xff]  ;;  %v5758_v63 = vsel %vm995_vm0, %v7086_v21, 0 }
 0x190   : > { %7831 = vmatmul.mubr.msk.bf16.vlgmr.msra.gmra.mrb[0].mxu1 %vm674_vm1, %v9555_v39  ;;  %v10301_v39 = vld [vmem:[#allocation5_spill] sm:$0xff] }
 0x191   : > { %7863 = vmatpush3.bf16.msra.mxu1 %v2648_v27  ;;  %8137 = vmatmul.mubr.msk.bf16.vlgmr.msra.gmra.mrb[0].mxu0 %vm674_vm1, %v9559_v43  ;;  %v10303_v43 = vld [vmem:[#allocation7_spill] sm:$0xff]  ;;  %v5399_v27 = vpack.c.bf16 %v5370_v56, %v5369_v26  ;;  %v2567_v26 = vld [vmem:[#allocation2 + $0x108] sm:$0xff]  ;;  %v2568_v56 = vld [vmem:[#allocation2 + $0x110] sm:$0xff] }
 0x192   : > { %8169 = vmatpush3.bf16.msra.mxu0 %v5464_v58  ;;  %7834 = vmatprep.mubr.msk.bf16.mxu1 %vm674_vm1, %v9581_v7  ;;  %v10305_v7 = vld [vmem:[#allocation9_spill] sm:$0xff]  ;;  %v2555_v58 = vld [vmem:[#allocation2 + $0x78] sm:$0xff] }
 0x193   : > { %8140 = vmatprep.mubr.msk.bf16.mxu0 %vm674_vm1, %v10300_v25  ;;  %8821 = vmatprep.subr.msk.bf16.mxu1 %vm995_vm0, %v6934_v31  ;;  %v9970_v25 = vld [vmem:[%s10251_s3 + $0x8] sm:$0x1] }
 0x194   : > { %8830 = vmatprep.subr.msk.bf16.mxu0 %vm995_vm0, %v7086_v21  ;;  %v9977_v31 = vld [vmem:[%s10255_s7 + $0x8] sm:$0x1]  ;;  %v5372_v21 = vld [vmem:[#allocation3 + $0x80] sm:$0xff] }
 0x198   : > { %7835 = vmatmul.mubr.msk.bf16.gmra.mrb[4].mxu1 %vm674_vm1, %v10301_v39  ;;  %v5371_v39 = vld [vmem:[#allocation3 + $0x78] sm:$0xff] }
 0x199   : > { %8141 = vmatmul.mubr.msk.bf16.gmra.mrb[4].mxu0 %vm674_vm1, %v10302_v47  ;;  %7838 = vmatprep.mubr.msk.bf16.mxu1 %vm674_vm1, %v10303_v43  ;;  %v2557_v47 = vld [vmem:[#allocation2 + $0x90] sm:$0xff]  ;;  %v2558_v43 = vld [vmem:[#allocation2 + $0x98] sm:$0xff] }
 0x19a   : > { %8144 = vmatprep.mubr.msk.bf16.mxu0 %vm674_vm1, %v10304_v61  ;;  %v5373_v61 = vld [vmem:[#allocation3 + $0x90] sm:$0xff] }
 0x1a0   : > { %7839 = vmatmul.mubr.msk.bf16.gmra.mrb[8].mxu1 %vm674_vm1, %v10305_v7  ;;  %v5374_v7 = vld [vmem:[#allocation3 + $0x98] sm:$0xff] }
 0x1a1   : > { %8145 = vmatmul.mubr.msk.bf16.gmra.mrb[8].mxu0 %vm674_vm1, %v10306_v12  ;;  %7842 = vmatprep.mubr.msk.bf16.mxu1 %vm674_vm1, %v10307_v29  ;;  %v5400_v12 = vpack.c.bf16 %v5372_v21, %v5371_v39  ;;  %v2585_v29 = vpack.c.bf16 %v2558_v43, %v2557_v47  ;;  %v2590_v39 = vpack.c.bf16 %v2568_v56, %v2567_v26  ;;  %v3236_v26 = vsel %vm995_vm0, %v9970_v25, 0 }
 0x1a2   : > { %8148 = vmatprep.mubr.msk.bf16.mxu0 %vm674_vm1, %v10308_v15  ;;  %v5401_v15 = vpack.c.bf16 %v5374_v7, %v5373_v61  ;;  %v2571_v61 = vld [vmem:[#allocation2 + $0x138] sm:$0xff]  ;;  %v2572_v7 = vld [vmem:[#allocation2 + $0x140] sm:$0xff]  ;;  %v6052_v56 = vsel %vm995_vm0, %v9977_v31, 0 }
 0x1a8   : > { %7843 = vmatmul.mubr.msk.bf16.gmra.mrb[12].mxu1 %vm674_vm1, %v10309_v30  ;;  %v2559_v30 = vld [vmem:[#allocation2 + $0xa8] sm:$0xff] }
 0x1a9   : > { %8149 = vmatmul.mubr.msk.bf16.gmra.mrb[12].mxu0 %vm674_vm1, %v10310_v34  ;;  %7846 = vmatprep.mubr.msk.bf16.mxu1 %vm674_vm1, %v10311_v51  ;;  %v2560_v34 = vld [vmem:[#allocation2 + $0xb0] sm:$0xff]  ;;  %v5375_v51 = vld [vmem:[#allocation3 + $0xa8] sm:$0xff] }
 0x1aa   : > { %8152 = vmatprep.mubr.msk.bf16.mxu0 %vm674_vm1, %v10312_v46  ;;  %v5376_v46 = vld [vmem:[#allocation3 + $0xb0] sm:$0xff] }
 0x1b0   : > { %7847 = vmatmul.mubr.msk.bf16.gmra.mrb[16].mxu1 %vm674_vm1, %v10313_v10  ;;  %v2561_v10 = vld [vmem:[#allocation2 + $0xc0] sm:$0xff] }
 0x1b1   : > { %8153 = vmatmul.mubr.msk.bf16.gmra.mrb[16].mxu0 %vm674_vm1, %v10314_v17  ;;  %7850 = vmatprep.mubr.msk.bf16.mxu1 %vm674_vm1, %v9647_v19  ;;  %v2284_v19 = vld [vmem:[#allocation2 + $0x182] sm:$0xff] }
 0x1b2   : > { %8156 = vmatprep.mubr.msk.bf16.mxu0 %vm674_vm1, %v10315_v57  ;;  %v9953_v24 = vpack.c.bf16 %v2285_v1, %v2284_v19  ;;  %v2562_v17 = vld [vmem:[#allocation2 + $0xc8] sm:$0xff]  ;;  %v5377_v57 = vld [vmem:[#allocation3 + $0xc0] sm:$0xff]  ;;  %v2563_v19 = vld [vmem:[#allocation2 + $0xd8] sm:$0xff] }
 0x1b3   : > { %v2564_v1 = vld [vmem:[#allocation2 + $0xe0] sm:$0xff] }
 0x1b8   : > { %7851 = vmatmul.mubr.msk.bf16.gmra.mrb[20].mxu1 %vm674_vm1, %v10316_v48  ;;  %v5378_v48 = vld [vmem:[#allocation3 + $0xc8] sm:$0xff] }
 0x1b9   : > { %8157 = vmatmul.mubr.msk.bf16.gmra.mrb[20].mxu0 %vm674_vm1, %v10317_v9  ;;  %7854 = vmatprep.mubr.msk.bf16.mxu1 %vm674_vm1, %v9663_v6  ;;  %v2549_v6 = vld [vmem:[#allocation2 + $0x30] sm:$0xff]  ;;  %v2586_v9 = vpack.c.bf16 %v2560_v34, %v2559_v30  ;;  %v5389_v30 = vld [vmem:[#allocation3 + $0x150] sm:$0xff]  ;;  %v5390_v34 = vld [vmem:[#allocation3 + $0x158] sm:$0xff] }
 0x1ba   : > { %8160 = vmatprep.mubr.msk.bf16.mxu0 %vm674_vm1, %v10318_v60  ;;  %v2581_v8 = vpack.c.bf16 %v2550_v16, %v2549_v6  ;;  %v5402_v60 = vpack.c.bf16 %v5376_v46, %v5375_v51  ;;  %v2565_v6 = vld [vmem:[#allocation2 + $0xf0] sm:$0xff]  ;;  %v2566_v16 = vld [vmem:[#allocation2 + $0xf8] sm:$0xff]  ;;  %v2592_v51 = vpack.c.bf16 %v2572_v7, %v2571_v61 }
 0x1c0   : > { %7855 = vmatmul.mubr.msk.bf16.gmra.mrb[24].mxu1 %vm674_vm1, %v10319_v18  ;;  %v2587_v18 = vpack.c.bf16 %v2562_v17, %v2561_v10  ;;  %v5409_v17 = vpack.c.bf16 %v5390_v34, %v5389_v30  ;;  %v5683_v30 = vld [vmem:[#allocation3 + $0x151] sm:$0xff]  ;;  %v5684_v34 = vld [vmem:[#allocation3 + $0x159] sm:$0xff] }
 0x1c1   : > { %8161 = vmatmul.mubr.msk.bf16.gmra.mrb[24].mxu0 %vm674_vm1, %v10320_v62  ;;  %7858 = vmatprep.mubr.msk.bf16.mxu1 %vm674_vm1, %v9679_v35  ;;  %v2551_v35 = vld [vmem:[#allocation2 + $0x48] sm:$0xff]  ;;  %v5403_v62 = vpack.c.bf16 %v5378_v48, %v5377_v57  ;;  %v2576_v48 = vld [vmem:[#allocation2 + $0x170] sm:$0xff] }
 0x1c2   : > { %8164 = vmatprep.mubr.msk.bf16.mxu0 %vm674_vm1, %v9681_v20  ;;  %v2553_v20 = vld [vmem:[#allocation2 + $0x60] sm:$0xff]  ;;  %v2582_v53 = vpack.c.bf16 %v2552_v36, %v2551_v35  ;;  %v5382_v35 = vld [vmem:[#allocation3 + $0xf8] sm:$0xff]  ;;  %v2588_v36 = vpack.c.bf16 %v2564_v1, %v2563_v19  ;;  %v2579_v19 = vld [vmem:[#allocation2 + $0x198] sm:$0xff] }
 0x1c3   : > { %v2583_v11 = vpack.c.bf16 %v2554_v2, %v2553_v20  ;;  %v5404_v20 = vpack.c.bf16 %v5380_v5, %v5379_v13  ;;  %v2589_v2 = vpack.c.bf16 %v2566_v16, %v2565_v6  ;;  %v2575_v57 = vld [vmem:[#allocation2 + $0x168] sm:$0xff]  ;;  %v2580_v1 = vld [vmem:[#allocation2 + $0x1a0] sm:$0xff]  ;;  %v5396_v5 = vld [vmem:[#allocation3 + $0x1a0] sm:$0xff] }
 0x1c4   : > { %v5395_v13 = vld [vmem:[#allocation3 + $0x198] sm:$0xff] }
 0x1c5   : > { %v5659_v6 = vld [vmem:[#allocation3 + $0x31] sm:$0xff]  ;;  %v5660_v16 = vld [vmem:[#allocation3 + $0x39] sm:$0xff] }
 0x1c8   : > { %7859 = vmatmul.mubr.msk.bf16.gmra.mrb[28].mxu1 %vm674_vm1, %v9953_v24 }
 0x1c9   : > { %8165 = vmatmul.mubr.msk.bf16.gmra.mrb[28].mxu0 %vm674_vm1, %v9955_v32  ;;  %7864 = vmatprep.mubr.msk.bf16.mxu1 %vm674_vm1, %v2581_v8  ;;  %v5381_v8 = vld [vmem:[#allocation3 + $0xf0] sm:$0xff] }
 0x1ca   : > { %8170 = vmatprep.mubr.msk.bf16.mxu0 %vm674_vm1, %v9690_v41  ;;  %v2556_v41 = vld [vmem:[#allocation2 + $0x80] sm:$0xff] }
 0x1d0   : > { %7865 = vmatmul.mubr.msk.bf16.vlgmr.msra.gmra.mrb[0].mxu1 %vm674_vm1, %v2582_v53  ;;  %v5405_v53 = vpack.c.bf16 %v5382_v35, %v5381_v8  ;;  %v2596_v8 = vpack.c.bf16 %v2580_v1, %v2579_v19  ;;  %v5412_v35 = vpack.c.bf16 %v5396_v5, %v5395_v13  ;;  %v3140_v13 = vld [vmem:[#allocation2 + $0x52] sm:$0xff]  ;;  %v5955_v5 = vld [vmem:[#allocation3 + $0x4a] sm:$0xff] }
 0x1d1   : > { %7897 = vmatpush3.bf16.msra.mxu1 %v2942_v52  ;;  %8171 = vmatmul.mubr.msk.bf16.vlgmr.msra.gmra.mrb[0].mxu0 %vm674_vm1, %v9696_v38  ;;  %v2584_v38 = vpack.c.bf16 %v2556_v41, %v2555_v58  ;;  %v5383_v52 = vld [vmem:[#allocation3 + $0x108] sm:$0xff]  ;;  %v5385_v58 = vld [vmem:[#allocation3 + $0x120] sm:$0xff] }
 0x1d2   : > { %8203 = vmatpush3.bf16.msra.mxu0 %v5758_v63  ;;  %7868 = vmatprep.mubr.msk.bf16.mxu1 %vm674_vm1, %v2583_v11  ;;  %v5384_v11 = vld [vmem:[#allocation3 + $0x110] sm:$0xff]  ;;  %v5386_v41 = vld [vmem:[#allocation3 + $0x128] sm:$0xff] }
 0x1d3   : > { %8174 = vmatprep.mubr.msk.bf16.mxu0 %vm674_vm1, %v5399_v27  ;;  %8822 = vmatprep.subr.msk.bf16.mxu1 %vm995_vm0, %v9970_v25  ;;  %v2569_v63 = vld [vmem:[#allocation2 + $0x120] sm:$0xff]  ;;  %v2570_v27 = vld [vmem:[#allocation2 + $0x128] sm:$0xff]  ;;  %v5406_v21 = vpack.c.bf16 %v5384_v11, %v5383_v52  ;;  %v5407_v43 = vpack.c.bf16 %v5386_v41, %v5385_v58  ;;  %v5666_v11 = vld [vmem:[#allocation3 + $0x81] sm:$0xff] }
 0x1d4   : > { %8831 = vmatprep.subr.msk.bf16.mxu0 %vm995_vm0, %v9977_v31  ;;  %v2591_v47 = vpack.c.bf16 %v2570_v27, %v2569_v63  ;;  %v5667_v63 = vld [vmem:[#allocation3 + $0x91] sm:$0xff]  ;;  %v5668_v25 = vld [vmem:[#allocation3 + $0x99] sm:$0xff]  ;;  %v5671_v31 = vld [vmem:[#allocation3 + $0xc1] sm:$0xff] }
 0x1d5   : > { %v5695_v58 = vpack.c.bf16 %v5668_v25, %v5667_v63  ;;  %v5672_v41 = vld [vmem:[#allocation3 + $0xc9] sm:$0xff]  ;;  %v5962_v63 = vld [vmem:[#allocation3 + $0x9a] sm:$0xff] }
 0x1d8   : > { %7869 = vmatmul.mubr.msk.bf16.gmra.mrb[4].mxu1 %vm674_vm1, %v2584_v38  ;;  %v5387_v38 = vld [vmem:[#allocation3 + $0x138] sm:$0xff] }
 0x1d9   : > { %8175 = vmatmul.mubr.msk.bf16.gmra.mrb[4].mxu0 %vm674_vm1, %v5400_v12  ;;  %7872 = vmatprep.mubr.msk.bf16.mxu1 %vm674_vm1, %v2585_v29  ;;  %v5388_v12 = vld [vmem:[#allocation3 + $0x140] sm:$0xff] }
 0x1da   : > { %8178 = vmatprep.mubr.msk.bf16.mxu0 %vm674_vm1, %v5401_v15  ;;  %v2573_v29 = vld [vmem:[#allocation2 + $0x150] sm:$0xff]  ;;  %v2574_v15 = vld [vmem:[#allocation2 + $0x158] sm:$0xff]  ;;  %v5408_v46 = vpack.c.bf16 %v5388_v12, %v5387_v38 }
 0x1db   : > { %v2593_v10 = vpack.c.bf16 %v2574_v15, %v2573_v29  ;;  %v5679_v38 = vld [vmem:[#allocation3 + $0x121] sm:$0xff]  ;;  %v5680_v12 = vld [vmem:[#allocation3 + $0x129] sm:$0xff] }
 0x1dc   : > { %v5701_v15 = vpack.c.bf16 %v5680_v12, %v5679_v38  ;;  %v3152_v38 = vld [vmem:[#allocation2 + $0xe2] sm:$0xff]  ;;  %v5967_v12 = vld [vmem:[#allocation3 + $0xda] sm:$0xff] }
 0x1e0   : > { %7873 = vmatmul.mubr.msk.bf16.gmra.mrb[8].mxu1 %vm674_vm1, %v2586_v9  ;;  %v5391_v9 = vld [vmem:[#allocation3 + $0x168] sm:$0xff] }
 0x1e1   : > { %8179 = vmatmul.mubr.msk.bf16.gmra.mrb[8].mxu0 %vm674_vm1, %v5402_v60  ;;  %7876 = vmatprep.mubr.msk.bf16.mxu1 %vm674_vm1, %v2587_v18  ;;  %v5392_v60 = vld [vmem:[#allocation3 + $0x170] sm:$0xff]  ;;  %v2594_v18 = vpack.c.bf16 %v2576_v48, %v2575_v57  ;;  %v5689_v57 = vld [vmem:[#allocation3 + $0x199] sm:$0xff]  ;;  %v3137_v48 = vld [vmem:[#allocation2 + $0x32] sm:$0xff] }
 0x1e2   : > { %8182 = vmatprep.mubr.msk.bf16.mxu0 %vm674_vm1, %v5403_v62  ;;  %v5410_v62 = vpack.c.bf16 %v5392_v60, %v5391_v9  ;;  %v3138_v9 = vld [vmem:[#allocation2 + $0x3a] sm:$0xff]  ;;  %v5953_v60 = vld [vmem:[#allocation3 + $0x32] sm:$0xff] }
 0x1e3   : > { %v3169_v1 = vpack.c.bf16 %v3138_v9, %v3137_v48  ;;  %v5973_v48 = vld [vmem:[#allocation3 + $0x122] sm:$0xff]  ;;  %v5974_v9 = vld [vmem:[#allocation3 + $0x12a] sm:$0xff] }
 0x1e8   : > { %7877 = vmatmul.mubr.msk.bf16.gmra.mrb[12].mxu1 %vm674_vm1, %v2588_v36  ;;  %v5691_v36 = vpack.c.bf16 %v5660_v16, %v5659_v6  ;;  %v3141_v6 = vld [vmem:[#allocation2 + $0x62] sm:$0xff]  ;;  %v3142_v16 = vld [vmem:[#allocation2 + $0x6a] sm:$0xff] }
 0x1e9   : > { %8183 = vmatmul.mubr.msk.bf16.gmra.mrb[12].mxu0 %vm674_vm1, %v5404_v20  ;;  %7880 = vmatprep.mubr.msk.bf16.mxu1 %vm674_vm1, %v2589_v2  ;;  %v5662_v20 = vld [vmem:[#allocation3 + $0x51] sm:$0xff]  ;;  %v5663_v2 = vld [vmem:[#allocation3 + $0x61] sm:$0xff] }
 0x1ea   : > { %8186 = vmatprep.mubr.msk.bf16.mxu0 %vm674_vm1, %v5405_v53 }
 0x1f0   : > { %7881 = vmatmul.mubr.msk.bf16.gmra.mrb[16].mxu1 %vm674_vm1, %v2590_v39 }
 0x1f1   : > { %8187 = vmatmul.mubr.msk.bf16.gmra.mrb[16].mxu0 %vm674_vm1, %v5406_v21  ;;  %7884 = vmatprep.mubr.msk.bf16.mxu1 %vm674_vm1, %v2591_v47  ;;  %v5697_v21 = vpack.c.bf16 %v5672_v41, %v5671_v31  ;;  %v5675_v47 = vld [vmem:[#allocation3 + $0xf1] sm:$0xff]  ;;  %v3148_v31 = vld [vmem:[#allocation2 + $0xb2] sm:$0xff] }
 0x1f2   : > { %8190 = vmatprep.mubr.msk.bf16.mxu0 %vm674_vm1, %v5407_v43  ;;  %v5676_v43 = vld [vmem:[#allocation3 + $0xf9] sm:$0xff]  ;;  %v5963_v41 = vld [vmem:[#allocation3 + $0xaa] sm:$0xff] }
 0x1f3   : > { %v5699_v7 = vpack.c.bf16 %v5676_v43, %v5675_v47  ;;  %v5966_v47 = vld [vmem:[#allocation3 + $0xca] sm:$0xff] }
 0x1f8   : > { %7885 = vmatmul.mubr.msk.bf16.gmra.mrb[20].mxu1 %vm674_vm1, %v2592_v51 }
 0x1f9   : > { %8191 = vmatmul.mubr.msk.bf16.gmra.mrb[20].mxu0 %vm674_vm1, %v5408_v46  ;;  %7888 = vmatprep.mubr.msk.bf16.mxu1 %vm674_vm1, %v2593_v10  ;;  %v5703_v46 = vpack.c.bf16 %v5684_v34, %v5683_v30  ;;  %v5970_v30 = vld [vmem:[#allocation3 + $0xfa] sm:$0xff] }
 0x1fa   : > { %8194 = vmatprep.mubr.msk.bf16.mxu0 %vm674_vm1, %v5409_v17  ;;  %v2873_v17 = vld [vmem:[#allocation2 + $0x199] sm:$0xff] }
 0x200   : > { %7889 = vmatmul.mubr.msk.bf16.gmra.mrb[24].mxu1 %vm674_vm1, %v2594_v18  ;;  %v5954_v18 = vld [vmem:[#allocation3 + $0x3a] sm:$0xff] }
 0x201   : > { %8195 = vmatmul.mubr.msk.bf16.gmra.mrb[24].mxu0 %vm674_vm1, %v5410_v62  ;;  %7892 = vmatprep.mubr.msk.bf16.mxu1 %vm674_vm1, %v9762_v42  ;;  %v5661_v42 = vld [vmem:[#allocation3 + $0x49] sm:$0xff] }
 0x202   : > { %8198 = vmatprep.mubr.msk.bf16.mxu0 %vm674_vm1, %v9764_v50  ;;  %v5664_v50 = vld [vmem:[#allocation3 + $0x69] sm:$0xff]  ;;  %v5692_v53 = vpack.c.bf16 %v5662_v20, %v5661_v42  ;;  %v3171_v20 = vpack.c.bf16 %v3142_v16, %v3141_v6  ;;  %v5977_v6 = vld [vmem:[#allocation3 + $0x152] sm:$0xff]  ;;  %v5978_v16 = vld [vmem:[#allocation3 + $0x15a] sm:$0xff] }
 0x203   : > { %v5693_v52 = vpack.c.bf16 %v5664_v50, %v5663_v2  ;;  %v3143_v50 = vld [vmem:[#allocation2 + $0x7a] sm:$0xff] }
 0x208   : > { %7893 = vmatmul.mubr.msk.bf16.gmra.mrb[28].mxu1 %vm674_vm1, %v2596_v8  ;;  %v5957_v8 = vld [vmem:[#allocation3 + $0x62] sm:$0xff] }
 0x209   : > { %8199 = vmatmul.mubr.msk.bf16.gmra.mrb[28].mxu0 %vm674_vm1, %v5412_v35  ;;  %7898 = vmatprep.mubr.msk.bf16.mxu1 %vm674_vm1, %v9773_v45  ;;  %v5665_v45 = vld [vmem:[#allocation3 + $0x79] sm:$0xff]  ;;  %v5958_v35 = vld [vmem:[#allocation3 + $0x6a] sm:$0xff] }
 0x20a   : > { %8204 = vmatprep.mubr.msk.bf16.mxu0 %vm674_vm1, %v5691_v36  ;;  %v5694_v27 = vpack.c.bf16 %v5666_v11, %v5665_v45  ;;  %v5987_v2 = vpack.c.bf16 %v5958_v35, %v5957_v8  ;;  %v3146_v45 = vld [vmem:[#allocation2 + $0x9a] sm:$0xff]  ;;  %v5961_v11 = vld [vmem:[#allocation3 + $0x92] sm:$0xff] }
 0x210   : > { %7899 = vmatmul.mubr.msk.bf16.vlgmr.msra.gmra.mrb[0].mxu1 %vm674_vm1, %v9776_v59  ;;  %v5669_v59 = vld [vmem:[#allocation3 + $0xa9] sm:$0xff] }
 0x211   : > { %7931 = vmatpush3.bf16.msra.mxu1 %v3236_v26  ;;  %8205 = vmatmul.mubr.msk.bf16.vlgmr.msra.gmra.mrb[0].mxu0 %vm674_vm1, %v5692_v53  ;;  %v3144_v53 = vld [vmem:[#allocation2 + $0x82] sm:$0xff]  ;;  %v5959_v26 = vld [vmem:[#allocation3 + $0x7a] sm:$0xff] }
 0x212   : > { %8237 = vmatpush3.bf16.msra.mxu0 %v6052_v56  ;;  %7902 = vmatprep.mubr.msk.bf16.mxu1 %vm674_vm1, %v9799_v33  ;;  %v5670_v33 = vld [vmem:[#allocation3 + $0xb1] sm:$0xff]  ;;  %v5960_v56 = vld [vmem:[#allocation3 + $0x82] sm:$0xff]  ;;  %v3172_v25 = vpack.c.bf16 %v3144_v53, %v3143_v50 }
 0x213   : > { %8208 = vmatprep.mubr.msk.bf16.mxu0 %vm674_vm1, %v5693_v52  ;;  %v5696_v39 = vpack.c.bf16 %v5670_v33, %v5669_v59  ;;  %v3145_v52 = vld [vmem:[#allocation2 + $0x92] sm:$0xff]  ;;  %v5989_v59 = vpack.c.bf16 %v5962_v63, %v5961_v11  ;;  %v3147_v33 = vld [vmem:[#allocation2 + $0xaa] sm:$0xff]  ;;  %v5979_v50 = vld [vmem:[#allocation3 + $0x16a] sm:$0xff] }
 0x214   : > { %v3174_v43 = vpack.c.bf16 %v3148_v31, %v3147_v33  ;;  %v5980_v53 = vld [vmem:[#allocation3 + $0x172] sm:$0xff]  ;;  %v5983_v11 = vld [vmem:[#allocation3 + $0x19a] sm:$0xff]  ;;  %v5984_v63 = vld [vmem:[#allocation3 + $0x1a2] sm:$0xff] }
 0x218   : > { %7903 = vmatmul.mubr.msk.bf16.gmra.mrb[4].mxu1 %vm674_vm1, %v9803_v55  ;;  %v5673_v55 = vld [vmem:[#allocation3 + $0xd9] sm:$0xff] }
 0x219   : > { %8209 = vmatmul.mubr.msk.bf16.gmra.mrb[4].mxu0 %vm674_vm1, %v5694_v27  ;;  %7906 = vmatprep.mubr.msk.bf16.mxu1 %vm674_vm1, %v9813_v37  ;;  %v5674_v37 = vld [vmem:[#allocation3 + $0xe1] sm:$0xff]  ;;  %v5988_v27 = vpack.c.bf16 %v5960_v56, %v5959_v26  ;;  %v5998_v56 = vpack.c.bf16 %v5980_v53, %v5979_v50 }
 0x21a   : > { %8212 = vmatprep.mubr.msk.bf16.mxu0 %vm674_vm1, %v5695_v58  ;;  %v5698_v61 = vpack.c.bf16 %v5674_v37, %v5673_v55  ;;  %v3173_v58 = vpack.c.bf16 %v3146_v45, %v3145_v52  ;;  %v3150_v55 = vld [vmem:[#allocation2 + $0xca] sm:$0xff]  ;;  %v5965_v37 = vld [vmem:[#allocation3 + $0xc2] sm:$0xff]  ;;  %v3167_v52 = vld [vmem:[#allocation2 + $0x19a] sm:$0xff] }
 0x21b   : > { %v3168_v45 = vld [vmem:[#allocation2 + $0x1a2] sm:$0xff] }
 0x220   : > { %7907 = vmatmul.mubr.msk.bf16.gmra.mrb[8].mxu1 %vm674_vm1, %v9815_v22  ;;  %v5677_v22 = vld [vmem:[#allocation3 + $0x109] sm:$0xff] }
 0x221   : > { %8213 = vmatmul.mubr.msk.bf16.gmra.mrb[8].mxu0 %vm674_vm1, %v5696_v39  ;;  %7910 = vmatprep.mubr.msk.bf16.mxu1 %vm674_vm1, %v9825_v44  ;;  %v5678_v44 = vld [vmem:[#allocation3 + $0x111] sm:$0xff] }
 0x222   : > { %8216 = vmatprep.mubr.msk.bf16.mxu0 %vm674_vm1, %v5697_v21  ;;  %v5700_v29 = vpack.c.bf16 %v5678_v44, %v5677_v22  ;;  %v5964_v39 = vld [vmem:[#allocation3 + $0xb2] sm:$0xff]  ;;  %v5991_v22 = vpack.c.bf16 %v5966_v47, %v5965_v37  ;;  %v3151_v44 = vld [vmem:[#allocation2 + $0xda] sm:$0xff] }
 0x223   : > { %v3149_v21 = vld [vmem:[#allocation2 + $0xc2] sm:$0xff]  ;;  %v3176_v34 = vpack.c.bf16 %v3152_v38, %v3151_v44 }
 0x228   : > { %7911 = vmatmul.mubr.msk.bf16.gmra.mrb[12].mxu1 %vm674_vm1, %v9827_v4  ;;  %v5681_v4 = vld [vmem:[#allocation3 + $0x139] sm:$0xff] }
 0x229   : > { %8217 = vmatmul.mubr.msk.bf16.gmra.mrb[12].mxu0 %vm674_vm1, %v5698_v61  ;;  %7914 = vmatprep.mubr.msk.bf16.mxu1 %vm674_vm1, %v9837_v23  ;;  %v5682_v23 = vld [vmem:[#allocation3 + $0x141] sm:$0xff]  ;;  %v5990_v61 = vpack.c.bf16 %v5964_v39, %v5963_v41 }
 0x22a   : > { %8220 = vmatprep.mubr.msk.bf16.mxu0 %vm674_vm1, %v5699_v7  ;;  %v5702_v51 = vpack.c.bf16 %v5682_v23, %v5681_v4  ;;  %v3175_v7 = vpack.c.bf16 %v3150_v55, %v3149_v21  ;;  %v3154_v4 = vld [vmem:[#allocation2 + $0xfa] sm:$0xff]  ;;  %v5969_v23 = vld [vmem:[#allocation3 + $0xf2] sm:$0xff] }
 0x230   : > { %7915 = vmatmul.mubr.msk.bf16.gmra.mrb[16].mxu1 %vm674_vm1, %v9839_v49  ;;  %v5685_v49 = vld [vmem:[#allocation3 + $0x169] sm:$0xff] }
 0x231   : > { %8221 = vmatmul.mubr.msk.bf16.gmra.mrb[16].mxu0 %vm674_vm1, %v5700_v29  ;;  %7918 = vmatprep.mubr.msk.bf16.mxu1 %vm674_vm1, %v9849_v54  ;;  %v5686_v54 = vld [vmem:[#allocation3 + $0x171] sm:$0xff]  ;;  %v5968_v29 = vld [vmem:[#allocation3 + $0xe2] sm:$0xff] }
 0x232   : > { %8224 = vmatprep.mubr.msk.bf16.mxu0 %vm674_vm1, %v5701_v15  ;;  %v5704_v10 = vpack.c.bf16 %v5686_v54, %v5685_v49  ;;  %v3153_v15 = vld [vmem:[#allocation2 + $0xf2] sm:$0xff]  ;;  %v5993_v49 = vpack.c.bf16 %v5970_v30, %v5969_v23  ;;  %v3155_v54 = vld [vmem:[#allocation2 + $0x10a] sm:$0xff] }
 0x238   : > { %7919 = vmatmul.mubr.msk.bf16.gmra.mrb[20].mxu1 %vm674_vm1, %v9851_v0  ;;  %v2874_v0 = vld [vmem:[#allocation2 + $0x1a1] sm:$0xff] }
 0x239   : > { %8225 = vmatmul.mubr.msk.bf16.gmra.mrb[20].mxu0 %vm674_vm1, %v5702_v51  ;;  %7922 = vmatprep.mubr.msk.bf16.mxu1 %vm674_vm1, %v9861_v28  ;;  %v5690_v28 = vld [vmem:[#allocation3 + $0x1a1] sm:$0xff]  ;;  %v2890_v62 = vpack.c.bf16 %v2874_v0, %v2873_v17  ;;  %v5992_v51 = vpack.c.bf16 %v5968_v29, %v5967_v12  ;;  %v5971_v17 = vld [vmem:[#allocation3 + $0x10a] sm:$0xff]  ;;  %v5972_v0 = vld [vmem:[#allocation3 + $0x112] sm:$0xff] }
 0x23a   : > { %8228 = vmatprep.mubr.msk.bf16.mxu0 %vm674_vm1, %v5703_v46  ;;  %v5706_v19 = vpack.c.bf16 %v5690_v28, %v5689_v57  ;;  %v3177_v46 = vpack.c.bf16 %v3154_v4, %v3153_v15  ;;  %v3157_v57 = vld [vmem:[#allocation2 + $0x122] sm:$0xff]  ;;  %v3158_v28 = vld [vmem:[#allocation2 + $0x12a] sm:$0xff] }
 0x240   : > { %7923 = vmatmul.mubr.msk.bf16.gmra.mrb[24].mxu1 %vm674_vm1, %v9863_v40  ;;  %v5985_v40 = vpack.c.bf16 %v5954_v18, %v5953_v60  ;;  %v5994_v18 = vpack.c.bf16 %v5972_v0, %v5971_v17 }
 0x241   : > { %8229 = vmatmul.mubr.msk.bf16.gmra.mrb[24].mxu0 %vm674_vm1, %v5704_v10  ;;  %7926 = vmatprep.mubr.msk.bf16.mxu1 %vm674_vm1, %v9873_v3  ;;  %v3139_v3 = vld [vmem:[#allocation2 + $0x4a] sm:$0xff]  ;;  %v3156_v10 = vld [vmem:[#allocation2 + $0x112] sm:$0xff] }
 0x242   : > { %8232 = vmatprep.mubr.msk.bf16.mxu0 %vm674_vm1, %v9875_v14  ;;  %v5956_v14 = vld [vmem:[#allocation3 + $0x52] sm:$0xff]  ;;  %v3170_v36 = vpack.c.bf16 %v3140_v13, %v3139_v3  ;;  %v3178_v60 = vpack.c.bf16 %v3156_v10, %v3155_v54  ;;  %v5975_v3 = vld [vmem:[#allocation3 + $0x13a] sm:$0xff]  ;;  %v5976_v13 = vld [vmem:[#allocation3 + $0x142] sm:$0xff] }
 0x243   : > { %v5986_v42 = vpack.c.bf16 %v5956_v14, %v5955_v5  ;;  %v3161_v5 = vld [vmem:[#allocation2 + $0x152] sm:$0xff]  ;;  %v3162_v14 = vld [vmem:[#allocation2 + $0x15a] sm:$0xff]  ;;  %v5996_v35 = vpack.c.bf16 %v5976_v13, %v5975_v3 }
 0x248   : > { %7927 = vmatmul.mubr.msk.bf16.gmra.mrb[28].mxu1 %vm674_vm1, %v2890_v62  ;;  %v3179_v62 = vpack.c.bf16 %v3158_v28, %v3157_v57 }
 0x249   : > { %8233 = vmatmul.mubr.msk.bf16.gmra.mrb[28].mxu0 %vm674_vm1, %v5706_v19  ;;  %7932 = vmatprep.mubr.msk.bf16.mxu1 %vm674_vm1, %v3169_v1  ;;  %v5995_v19 = vpack.c.bf16 %v5974_v9, %v5973_v48  ;;  %v3159_v1 = vld [vmem:[#allocation2 + $0x13a] sm:$0xff] }
 0x24a   : > { %8238 = vmatprep.mubr.msk.bf16.mxu0 %vm674_vm1, %v5985_v40  ;;  %v3160_v40 = vld [vmem:[#allocation2 + $0x142] sm:$0xff] }
 0x24b   : > { %v3180_v8 = vpack.c.bf16 %v3160_v40, %v3159_v1 }
 0x250   : > { %7933 = vmatmul.mubr.msk.bf16.vlgmr.msra.gmra.mrb[0].mxu1 %vm674_vm1, %v3170_v36  ;;  %v3181_v36 = vpack.c.bf16 %v3162_v14, %v3161_v5 }
 0x251   : > { %8239 = vmatmul.mubr.msk.bf16.vlgmr.msra.gmra.mrb[0].mxu0 %vm674_vm1, %v5986_v42  ;;  %7936 = vmatprep.mubr.msk.bf16.mxu1 %vm674_vm1, %v3171_v20  ;;  %v5997_v42 = vpack.c.bf16 %v5978_v16, %v5977_v6  ;;  %v3163_v20 = vld [vmem:[#allocation2 + $0x16a] sm:$0xff] }
 0x252   : > { %8242 = vmatprep.mubr.msk.bf16.mxu0 %vm674_vm1, %v5987_v2  ;;  %v3164_v2 = vld [vmem:[#allocation2 + $0x172] sm:$0xff] }
 0x253   : > { %v3182_v26 = vpack.c.bf16 %v3164_v2, %v3163_v20 }
 0x258   : > { %7937 = vmatmul.mubr.msk.bf16.gmra.mrb[4].mxu1 %vm674_vm1, %v3172_v25  ;;  %v3184_v25 = vpack.c.bf16 %v3168_v45, %v3167_v52 }
 0x259   : > { %8243 = vmatmul.mubr.msk.bf16.gmra.mrb[4].mxu0 %vm674_vm1, %v5988_v27  ;;  %7940 = vmatprep.mubr.msk.bf16.mxu1 %vm674_vm1, %v3173_v58  ;;  %v6000_v27 = vpack.c.bf16 %v5984_v63, %v5983_v11 }
 0x25a   : > { %8246 = vmatprep.mubr.msk.bf16.mxu0 %vm674_vm1, %v5989_v59 }
 0x260   : > { %7941 = vmatmul.mubr.msk.bf16.gmra.mrb[8].mxu1 %vm674_vm1, %v3174_v43 }
 0x261   : > { %8247 = vmatmul.mubr.msk.bf16.gmra.mrb[8].mxu0 %vm674_vm1, %v5990_v61  ;;  %7944 = vmatprep.mubr.msk.bf16.mxu1 %vm674_vm1, %v3175_v7 }
 0x262   : > { %8250 = vmatprep.mubr.msk.bf16.mxu0 %vm674_vm1, %v5991_v22 }
 0x268   : > { %7945 = vmatmul.mubr.msk.bf16.gmra.mrb[12].mxu1 %vm674_vm1, %v3176_v34 }
 0x269   : > { %8251 = vmatmul.mubr.msk.bf16.gmra.mrb[12].mxu0 %vm674_vm1, %v5992_v51  ;;  %7948 = vmatprep.mubr.msk.bf16.mxu1 %vm674_vm1, %v3177_v46 }
 0x26a   : > { %8254 = vmatprep.mubr.msk.bf16.mxu0 %vm674_vm1, %v5993_v49 }
 0x270   : > { %7949 = vmatmul.mubr.msk.bf16.gmra.mrb[16].mxu1 %vm674_vm1, %v3178_v60 }
 0x271   : > { %8255 = vmatmul.mubr.msk.bf16.gmra.mrb[16].mxu0 %vm674_vm1, %v5994_v18  ;;  %7952 = vmatprep.mubr.msk.bf16.mxu1 %vm674_vm1, %v3179_v62 }
 0x272   : > { %8258 = vmatprep.mubr.msk.bf16.mxu0 %vm674_vm1, %v5995_v19 }
 0x278   : > { %7953 = vmatmul.mubr.msk.bf16.gmra.mrb[20].mxu1 %vm674_vm1, %v3180_v8 }
 0x279   : > { %8259 = vmatmul.mubr.msk.bf16.gmra.mrb[20].mxu0 %vm674_vm1, %v5996_v35  ;;  %7956 = vmatprep.mubr.msk.bf16.mxu1 %vm674_vm1, %v3181_v36 }
 0x27a   : > { %8262 = vmatprep.mubr.msk.bf16.mxu0 %vm674_vm1, %v5997_v42 }
 0x280   : > { %7957 = vmatmul.mubr.msk.bf16.gmra.mrb[24].mxu1 %vm674_vm1, %v3182_v26 }
 0x281   : > { %8263 = vmatmul.mubr.msk.bf16.gmra.mrb[24].mxu0 %vm674_vm1, %v5998_v56  ;;  %7960 = vmatprep.mubr.msk.bf16.mxu1 %vm674_vm1, %v9953_v24 }
 0x282   : > { %8266 = vmatprep.mubr.msk.bf16.mxu0 %vm674_vm1, %v9955_v32 }
 0x288   : > { %7961 = vmatmul.mubr.msk.bf16.gmra.mrb[28].mxu1 %vm674_vm1, %v3184_v25 }
 0x289   : > { %8267 = vmatmul.mubr.msk.bf16.gmra.mrb[28].mxu0 %vm674_vm1, %v6000_v27 }
 0x323   : > { %v7934_v58 = vpop.f32.mrb[0].mxu1 }
 0x324   : > { %v8240_v59 = vpop.f32.mrb[0].mxu0  ;;  %v3272_v24 = vpop.f32.mrb[1].mxu1 }
 0x325   : > { %v8270_v33 = vadd.f32 %v8240_v59, %v7934_v58  ;;  %v6088_v31 = vpop.f32.mrb[1].mxu0  ;;  %v7935_v41 = vpop.f32.mrb[2].mxu1 }
 0x326   : > { %v8271_v32 = vadd.f32 %v6088_v31, %v3272_v24  ;;  %v8241_v39 = vpop.f32.mrb[2].mxu0  ;;  %v3275_v21 = vpop.f32.mrb[3].mxu1 }
 0x327   : > { %v7164_v55 = vpack.c.bf16 %v8270_v33, %v8270_v33  ;;  %v8272_v37 = vadd.f32 %v8241_v39, %v7935_v41  ;;  %v6091_v47 = vpop.f32.mrb[3].mxu0  ;;  %v6479_v22 = vmul.f32 %v8270_v33, %v8270_v33  ;;  %v6411_v34 = vsel %vm674_vm1, %v8270_v33, 0.0 }
 0x328   : > { %v7162_v43 = vpack.c.bf16 %v8271_v32, %v8271_v32  ;;  %v6477_v61 = vmul.f32 %v8271_v32, %v8271_v32  ;;  %v8273_v7 = vadd.f32 %v6091_v47, %v3275_v21  ;;  %v6408_v38 = vsel %vm674_vm1, %v8271_v32, 0.0 }
 0x329   : > { %6378 = vst.msk [vmem:[%s10103_s16 + $0x8] sm:$0xf] %vm6375_vm3, %v7164_v55  ;;  %v7165_v44 = vpack.c.bf16 %v8272_v37, %v8272_v37  ;;  %v6480_v4 = vmul.f32 %v8272_v37, %v8272_v37  ;;  %v6512_v48 = vsel %vm674_vm1, %v6479_v22, 0.0  ;;  %v6413_v62 = vsel %vm674_vm1, %v8272_v37, 0.0 }
 0x32a   : > { %6376 = vst.msk [vmem:[%s10103_s16] sm:$0xf] %vm6375_vm3, %v7162_v43  ;;  %v7163_v12 = vpack.c.bf16 %v8273_v7, %v8273_v7  ;;  %v6409_v29 = vsel %vm674_vm1, %v8273_v7, 0.0  ;;  %v6478_v15 = vmul.f32 %v8273_v7, %v8273_v7  ;;  %v6509_v51 = vsel %vm674_vm1, %v6477_v61, 0.0 }
 0x32b   : > { %6379 = vst.msk [vmem:[%s10103_s16 + $0xc] sm:$0xf] %vm6375_vm3, %v7165_v44  ;;  %v6410_v23 = vadd.f32 %v6409_v29, %v6408_v38  ;;  %v7938_v30 = vpop.f32.mrb[4].mxu1  ;;  %v6514_v19 = vsel %vm674_vm1, %v6480_v4, 0.0 }
 0x32c   : > { %6377 = vst.msk [vmem:[%s10103_s16 + $0x4] sm:$0xf] %vm6375_vm3, %v7163_v12  ;;  %v6510_v46 = vsel %vm674_vm1, %v6478_v15, 0.0  ;;  %v8244_v49 = vpop.f32.mrb[4].mxu0  ;;  %v3288_v54 = vpop.f32.mrb[5].mxu1 }
 0x32d   : > { %v6412_v10 = vadd.f32 %v6411_v34, %v6410_v23  ;;  %v6511_v17 = vadd.f32 %v6510_v46, %v6509_v51  ;;  %v8274_v0 = vadd.f32 %v8244_v49, %v7938_v30  ;;  %v6104_v57 = vpop.f32.mrb[5].mxu0  ;;  %v7939_v28 = vpop.f32.mrb[6].mxu1 }
 0x32e   : > { %v8275_v9 = vadd.f32 %v6104_v57, %v3288_v54  ;;  %v8245_v60 = vpop.f32.mrb[6].mxu0  ;;  %v3291_v18 = vpop.f32.mrb[7].mxu1 }
 0x32f   : > { %v6513_v1 = vadd.f32 %v6512_v48, %v6511_v17  ;;  %v7168_v40 = vpack.c.bf16 %v8274_v0, %v8274_v0  ;;  %v6107_v3 = vpop.f32.mrb[7].mxu0  ;;  %v6414_v5 = vadd.f32 %v6413_v62, %v6412_v10  ;;  %v8276_v8 = vadd.f32 %v8245_v60, %v7939_v28 }
 0x330   : > { %v7166_v13 = vpack.c.bf16 %v8275_v9, %v8275_v9  ;;  %v6415_v14 = vsel %vm674_vm1, %v8275_v9, 0.0  ;;  %v6481_v6 = vmul.f32 %v8275_v9, %v8275_v9  ;;  %v8277_v35 = vadd.f32 %v6107_v3, %v3291_v18 }
 0x331   : > { %6382 = vst.msk [vmem:[%s10103_s16 + $0x18] sm:$0xf] %vm6375_vm3, %v7168_v40  ;;  %v6515_v16 = vadd.f32 %v6514_v19, %v6513_v1  ;;  %v6416_v36 = vadd.f32 %v6415_v14, %v6414_v5  ;;  %v6483_v20 = vmul.f32 %v8274_v0, %v8274_v0  ;;  %v7169_v50 = vpack.c.bf16 %v8276_v8, %v8276_v8 }
 0x332   : > { %6380 = vst.msk [vmem:[%s10103_s16 + $0x10] sm:$0xf] %vm6375_vm3, %v7166_v13  ;;  %v6516_v42 = vsel %vm674_vm1, %v6481_v6, 0.0  ;;  %v7167_v26 = vpack.c.bf16 %v8277_v35, %v8277_v35  ;;  %v6417_v56 = vsel %vm674_vm1, %v8277_v35, 0.0  ;;  %v6482_v52 = vmul.f32 %v8277_v35, %v8277_v35 }
 0x333   : > { %v6517_v2 = vadd.f32 %v6516_v42, %v6515_v16  ;;  %v7942_v53 = vpop.f32.mrb[8].mxu1  ;;  %6383 = vst.msk [vmem:[%s10103_s16 + $0x1c] sm:$0xf] %vm6375_vm3, %v7169_v50  ;;  %v6418_v63 = vadd.f32 %v6417_v56, %v6416_v36  ;;  %v6419_v59 = vsel %vm674_vm1, %v8274_v0, 0.0  ;;  %v6484_v24 = vmul.f32 %v8276_v8, %v8276_v8 }
 0x334   : > { %v8248_v45 = vpop.f32.mrb[8].mxu0  ;;  %v3304_v11 = vpop.f32.mrb[9].mxu1  ;;  %6381 = vst.msk [vmem:[%s10103_s16 + $0x14] sm:$0xf] %vm6375_vm3, %v7167_v26  ;;  %v6518_v33 = vsel %vm674_vm1, %v6482_v52, 0.0  ;;  %v6520_v39 = vsel %vm674_vm1, %v6483_v20, 0.0 }
 0x335   : > { %v8278_v25 = vadd.f32 %v8248_v45, %v7942_v53  ;;  %v6120_v27 = vpop.f32.mrb[9].mxu0  ;;  %v7943_v58 = vpop.f32.mrb[10].mxu1  ;;  %v6420_v21 = vadd.f32 %v6419_v59, %v6418_v63  ;;  %v6519_v55 = vadd.f32 %v6518_v33, %v6517_v2  ;;  %v6421_v43 = vsel %vm674_vm1, %v8276_v8, 0.0 }
 0x336   : > { %v8279_v31 = vadd.f32 %v6120_v27, %v3304_v11  ;;  %v8249_v41 = vpop.f32.mrb[10].mxu0  ;;  %v3307_v32 = vpop.f32.mrb[11].mxu1  ;;  %v6522_v15 = vsel %vm674_vm1, %v6484_v24, 0.0 }
 0x337   : > { %v7172_v37 = vpack.c.bf16 %v8278_v25, %v8278_v25  ;;  %v6123_v47 = vpop.f32.mrb[11].mxu0  ;;  %v6521_v44 = vadd.f32 %v6520_v39, %v6519_v55  ;;  %v6422_v38 = vadd.f32 %v6421_v43, %v6420_v21  ;;  %v8280_v12 = vadd.f32 %v8249_v41, %v7943_v58 }
 0x338   : > { %v7170_v61 = vpack.c.bf16 %v8279_v31, %v8279_v31  ;;  %v6423_v7 = vsel %vm674_vm1, %v8279_v31, 0.0  ;;  %v6485_v22 = vmul.f32 %v8279_v31, %v8279_v31  ;;  %v8281_v29 = vadd.f32 %v6123_v47, %v3307_v32 }
 0x339   : > { %6386 = vst.msk [vmem:[%s10103_s16 + $0x28] sm:$0xf] %vm6375_vm3, %v7172_v37  ;;  %v6487_v23 = vmul.f32 %v8278_v25, %v8278_v25  ;;  %v6424_v30 = vadd.f32 %v6423_v7, %v6422_v38  ;;  %v6523_v34 = vadd.f32 %v6522_v15, %v6521_v44  ;;  %v7173_v51 = vpack.c.bf16 %v8280_v12, %v8280_v12 }
 0x33a   : > { %6384 = vst.msk [vmem:[%s10103_s16 + $0x20] sm:$0xf] %vm6375_vm3, %v7170_v61  ;;  %v6524_v4 = vsel %vm674_vm1, %v6485_v22, 0.0  ;;  %v7171_v49 = vpack.c.bf16 %v8281_v29, %v8281_v29  ;;  %v6425_v54 = vsel %vm674_vm1, %v8281_v29, 0.0  ;;  %v6486_v10 = vmul.f32 %v8281_v29, %v8281_v29 }
 0x33b   : > { %v7946_v46 = vpop.f32.mrb[12].mxu1  ;;  %v6525_v57 = vadd.f32 %v6524_v4, %v6523_v34  ;;  %6387 = vst.msk [vmem:[%s10103_s16 + $0x2c] sm:$0xf] %vm6375_vm3, %v7173_v51  ;;  %v6426_v28 = vadd.f32 %v6425_v54, %v6424_v30  ;;  %v6427_v18 = vsel %vm674_vm1, %v8278_v25, 0.0  ;;  %v6488_v62 = vmul.f32 %v8280_v12, %v8280_v12 }
 0x33c   : > { %v8252_v17 = vpop.f32.mrb[12].mxu0  ;;  %v3320_v0 = vpop.f32.mrb[13].mxu1  ;;  %6385 = vst.msk [vmem:[%s10103_s16 + $0x24] sm:$0xf] %vm6375_vm3, %v7171_v49  ;;  %v6526_v19 = vsel %vm674_vm1, %v6486_v10, 0.0  ;;  %v6528_v13 = vsel %vm674_vm1, %v6487_v23, 0.0 }
 0x33d   : > { %v8282_v48 = vadd.f32 %v8252_v17, %v7946_v46  ;;  %v6136_v9 = vpop.f32.mrb[13].mxu0  ;;  %v7947_v60 = vpop.f32.mrb[14].mxu1  ;;  %v6428_v5 = vadd.f32 %v6427_v18, %v6426_v28  ;;  %v6527_v14 = vadd.f32 %v6526_v19, %v6525_v57  ;;  %v6429_v8 = vsel %vm674_vm1, %v8280_v12, 0.0 }
 0x33e   : > { %v8283_v1 = vadd.f32 %v6136_v9, %v3320_v0  ;;  %v8253_v40 = vpop.f32.mrb[14].mxu0  ;;  %v3323_v3 = vpop.f32.mrb[15].mxu1  ;;  %v6530_v26 = vsel %vm674_vm1, %v6488_v62, 0.0 }
 0x33f   : > { %v7176_v6 = vpack.c.bf16 %v8282_v48, %v8282_v48  ;;  %v6139_v16 = vpop.f32.mrb[15].mxu0  ;;  %v6529_v20 = vadd.f32 %v6528_v13, %v6527_v14  ;;  %v6430_v2 = vadd.f32 %v6429_v8, %v6428_v5  ;;  %v8284_v50 = vadd.f32 %v8253_v40, %v7947_v60 }
 0x340   : > { %v7174_v35 = vpack.c.bf16 %v8283_v1, %v8283_v1  ;;  %v6431_v36 = vsel %vm674_vm1, %v8283_v1, 0.0  ;;  %v6489_v42 = vmul.f32 %v8283_v1, %v8283_v1  ;;  %v8285_v53 = vadd.f32 %v6139_v16, %v3323_v3 }
 0x341   : > { %6390 = vst.msk [vmem:[%s10103_s16 + $0x38] sm:$0xf] %vm6375_vm3, %v7176_v6  ;;  %v6491_v52 = vmul.f32 %v8282_v48, %v8282_v48  ;;  %v6432_v45 = vadd.f32 %v6431_v36, %v6430_v2  ;;  %v6531_v11 = vadd.f32 %v6530_v26, %v6529_v20  ;;  %v7177_v63 = vpack.c.bf16 %v8284_v50, %v8284_v50 }
 0x342   : > { %6388 = vst.msk [vmem:[%s10103_s16 + $0x30] sm:$0xf] %vm6375_vm3, %v7174_v35  ;;  %v6532_v56 = vsel %vm674_vm1, %v6489_v42, 0.0  ;;  %v7175_v27 = vpack.c.bf16 %v8285_v53, %v8285_v53  ;;  %v6433_v58 = vsel %vm674_vm1, %v8285_v53, 0.0  ;;  %v6490_v59 = vmul.f32 %v8285_v53, %v8285_v53 }
 0x343   : > { %v7950_v25 = vpop.f32.mrb[16].mxu1  ;;  %v6533_v31 = vadd.f32 %v6532_v56, %v6531_v11  ;;  %6391 = vst.msk [vmem:[%s10103_s16 + $0x3c] sm:$0xf] %vm6375_vm3, %v7177_v63  ;;  %v6434_v41 = vadd.f32 %v6433_v58, %v6432_v45  ;;  %v6435_v55 = vsel %vm674_vm1, %v8282_v48, 0.0  ;;  %v6492_v37 = vmul.f32 %v8284_v50, %v8284_v50 }
 0x344   : > { %v8256_v24 = vpop.f32.mrb[16].mxu0  ;;  %v3336_v33 = vpop.f32.mrb[17].mxu1  ;;  %6389 = vst.msk [vmem:[%s10103_s16 + $0x34] sm:$0xf] %vm6375_vm3, %v7175_v27  ;;  %v6534_v47 = vsel %vm674_vm1, %v6490_v59, 0.0  ;;  %v6536_v22 = vsel %vm674_vm1, %v6491_v52, 0.0 }
 0x345   : > { %v8286_v32 = vadd.f32 %v8256_v24, %v7950_v25  ;;  %v6152_v39 = vpop.f32.mrb[17].mxu0  ;;  %v7951_v21 = vpop.f32.mrb[18].mxu1  ;;  %v6436_v44 = vadd.f32 %v6435_v55, %v6434_v41  ;;  %v6535_v38 = vadd.f32 %v6534_v47, %v6533_v31  ;;  %v6437_v15 = vsel %vm674_vm1, %v8284_v50, 0.0 }
 0x346   : > { %v8287_v43 = vadd.f32 %v6152_v39, %v3336_v33  ;;  %v8257_v61 = vpop.f32.mrb[18].mxu0  ;;  %v3339_v7 = vpop.f32.mrb[19].mxu1  ;;  %v6538_v54 = vsel %vm674_vm1, %v6492_v37, 0.0 }
 0x347   : > { %v7180_v12 = vpack.c.bf16 %v8286_v32, %v8286_v32  ;;  %v6155_v29 = vpop.f32.mrb[19].mxu0  ;;  %v6537_v34 = vadd.f32 %v6536_v22, %v6535_v38  ;;  %v6438_v51 = vadd.f32 %v6437_v15, %v6436_v44  ;;  %v8288_v46 = vadd.f32 %v8257_v61, %v7951_v21 }
 0x348   : > { %v7178_v4 = vpack.c.bf16 %v8287_v43, %v8287_v43  ;;  %v6439_v23 = vsel %vm674_vm1, %v8287_v43, 0.0  ;;  %v6493_v30 = vmul.f32 %v8287_v43, %v8287_v43  ;;  %v8289_v49 = vadd.f32 %v6155_v29, %v3339_v7 }
 0x349   : > { %6394 = vst.msk [vmem:[%s10103_s16 + $0x48] sm:$0xf] %vm6375_vm3, %v7180_v12  ;;  %v6495_v17 = vmul.f32 %v8286_v32, %v8286_v32  ;;  %v6440_v0 = vadd.f32 %v6439_v23, %v6438_v51  ;;  %v6539_v57 = vadd.f32 %v6538_v54, %v6537_v34  ;;  %v7181_v28 = vpack.c.bf16 %v8288_v46, %v8288_v46 }
 0x34a   : > { %6392 = vst.msk [vmem:[%s10103_s16 + $0x40] sm:$0xf] %vm6375_vm3, %v7178_v4  ;;  %v6540_v10 = vsel %vm674_vm1, %v6493_v30, 0.0  ;;  %v7179_v9 = vpack.c.bf16 %v8289_v49, %v8289_v49  ;;  %v6441_v60 = vsel %vm674_vm1, %v8289_v49, 0.0  ;;  %v6494_v18 = vmul.f32 %v8289_v49, %v8289_v49 }
 0x34b   : > { %v7954_v48 = vpop.f32.mrb[20].mxu1  ;;  %v6541_v1 = vadd.f32 %v6540_v10, %v6539_v57  ;;  %6395 = vst.msk [vmem:[%s10103_s16 + $0x4c] sm:$0xf] %vm6375_vm3, %v7181_v28  ;;  %v6442_v40 = vadd.f32 %v6441_v60, %v6440_v0  ;;  %v6443_v14 = vsel %vm674_vm1, %v8286_v32, 0.0  ;;  %v6496_v6 = vmul.f32 %v8288_v46, %v8288_v46 }
 0x34c   : > { %v8260_v62 = vpop.f32.mrb[20].mxu0  ;;  %v3352_v19 = vpop.f32.mrb[21].mxu1  ;;  %6393 = vst.msk [vmem:[%s10103_s16 + $0x44] sm:$0xf] %vm6375_vm3, %v7179_v9  ;;  %v6542_v16 = vsel %vm674_vm1, %v6494_v18, 0.0  ;;  %v6544_v42 = vsel %vm674_vm1, %v6495_v17, 0.0 }
 0x34d   : > { %v8290_v3 = vadd.f32 %v8260_v62, %v7954_v48  ;;  %v6168_v13 = vpop.f32.mrb[21].mxu0  ;;  %v7955_v5 = vpop.f32.mrb[22].mxu1  ;;  %v6444_v20 = vadd.f32 %v6443_v14, %v6442_v40  ;;  %v6543_v2 = vadd.f32 %v6542_v16, %v6541_v1  ;;  %v6445_v26 = vsel %vm674_vm1, %v8288_v46, 0.0 }
 0x34e   : > { %v8291_v8 = vadd.f32 %v6168_v13, %v3352_v19  ;;  %v8261_v35 = vpop.f32.mrb[22].mxu0  ;;  %v3355_v36 = vpop.f32.mrb[23].mxu1  ;;  %v6546_v58 = vsel %vm674_vm1, %v6496_v6, 0.0 }
 0x34f   : > { %v7184_v50 = vpack.c.bf16 %v8290_v3, %v8290_v3  ;;  %v6171_v53 = vpop.f32.mrb[23].mxu0  ;;  %v6545_v11 = vadd.f32 %v6544_v42, %v6543_v2  ;;  %v6446_v63 = vadd.f32 %v6445_v26, %v6444_v20  ;;  %v8292_v25 = vadd.f32 %v8261_v35, %v7955_v5 }
 0x350   : > { %v7182_v56 = vpack.c.bf16 %v8291_v8, %v8291_v8  ;;  %v6447_v52 = vsel %vm674_vm1, %v8291_v8, 0.0  ;;  %v6497_v45 = vmul.f32 %v8291_v8, %v8291_v8  ;;  %v8293_v27 = vadd.f32 %v6171_v53, %v3355_v36 }
 0x351   : > { %6398 = vst.msk [vmem:[%s10103_s16 + $0x58] sm:$0xf] %vm6375_vm3, %v7184_v50  ;;  %v6499_v24 = vmul.f32 %v8290_v3, %v8290_v3  ;;  %v6448_v33 = vadd.f32 %v6447_v52, %v6446_v63  ;;  %v6547_v31 = vadd.f32 %v6546_v58, %v6545_v11  ;;  %v7185_v41 = vpack.c.bf16 %v8292_v25, %v8292_v25 }
 0x352   : > { %6396 = vst.msk [vmem:[%s10103_s16 + $0x50] sm:$0xf] %vm6375_vm3, %v7182_v56  ;;  %v6548_v59 = vsel %vm674_vm1, %v6497_v45, 0.0  ;;  %v7183_v39 = vpack.c.bf16 %v8293_v27, %v8293_v27  ;;  %v6449_v21 = vsel %vm674_vm1, %v8293_v27, 0.0  ;;  %v6498_v55 = vmul.f32 %v8293_v27, %v8293_v27 }
 0x353   : > { %v7958_v32 = vpop.f32.mrb[24].mxu1  ;;  %v6549_v43 = vadd.f32 %v6548_v59, %v6547_v31  ;;  %6399 = vst.msk [vmem:[%s10103_s16 + $0x5c] sm:$0xf] %vm6375_vm3, %v7185_v41  ;;  %v6450_v61 = vadd.f32 %v6449_v21, %v6448_v33  ;;  %v6451_v38 = vsel %vm674_vm1, %v8290_v3, 0.0  ;;  %v6500_v12 = vmul.f32 %v8292_v25, %v8292_v25 }
 0x354   : > { %v8264_v37 = vpop.f32.mrb[24].mxu0  ;;  %v3368_v47 = vpop.f32.mrb[25].mxu1  ;;  %6397 = vst.msk [vmem:[%s10103_s16 + $0x54] sm:$0xf] %vm6375_vm3, %v7183_v39  ;;  %v6550_v29 = vsel %vm674_vm1, %v6498_v55, 0.0  ;;  %v6552_v30 = vsel %vm674_vm1, %v6499_v24, 0.0 }
 0x355   : > { %v8294_v7 = vadd.f32 %v8264_v37, %v7958_v32  ;;  %v6184_v22 = vpop.f32.mrb[25].mxu0  ;;  %v7959_v44 = vpop.f32.mrb[26].mxu1  ;;  %v6452_v34 = vadd.f32 %v6451_v38, %v6450_v61  ;;  %v6551_v51 = vadd.f32 %v6550_v29, %v6549_v43  ;;  %v6453_v54 = vsel %vm674_vm1, %v8292_v25, 0.0 }
 0x356   : > { %v8295_v15 = vadd.f32 %v6184_v22, %v3368_v47  ;;  %v8265_v4 = vpop.f32.mrb[26].mxu0  ;;  %v3371_v23 = vpop.f32.mrb[27].mxu1  ;;  %v6554_v60 = vsel %vm674_vm1, %v6500_v12, 0.0 }
 0x357   : > { %v7188_v46 = vpack.c.bf16 %v8294_v7, %v8294_v7  ;;  %v6187_v49 = vpop.f32.mrb[27].mxu0  ;;  %v6553_v57 = vadd.f32 %v6552_v30, %v6551_v51  ;;  %v6454_v28 = vadd.f32 %v6453_v54, %v6452_v34  ;;  %v8296_v48 = vadd.f32 %v8265_v4, %v7959_v44 }
 0x358   : > { %v7186_v10 = vpack.c.bf16 %v8295_v15, %v8295_v15  ;;  %v6455_v17 = vsel %vm674_vm1, %v8295_v15, 0.0  ;;  %v6501_v0 = vmul.f32 %v8295_v15, %v8295_v15  ;;  %v8297_v9 = vadd.f32 %v6187_v49, %v3371_v23 }
 0x359   : > { %6402 = vst.msk [vmem:[%s10103_s16 + $0x68] sm:$0xf] %vm6375_vm3, %v7188_v46  ;;  %v6503_v62 = vmul.f32 %v8294_v7, %v8294_v7  ;;  %v6456_v19 = vadd.f32 %v6455_v17, %v6454_v28  ;;  %v6555_v1 = vadd.f32 %v6554_v60, %v6553_v57  ;;  %v7189_v40 = vpack.c.bf16 %v8296_v48, %v8296_v48 }
 0x35a   : > { %6400 = vst.msk [vmem:[%s10103_s16 + $0x60] sm:$0xf] %vm6375_vm3, %v7186_v10  ;;  %v6556_v18 = vsel %vm674_vm1, %v6501_v0, 0.0  ;;  %v7187_v13 = vpack.c.bf16 %v8297_v9, %v8297_v9  ;;  %v6457_v5 = vsel %vm674_vm1, %v8297_v9, 0.0  ;;  %v6502_v14 = vmul.f32 %v8297_v9, %v8297_v9 }
 0x35b   : > { %v7962_v3 = vpop.f32.mrb[28].mxu1  ;;  %v6557_v8 = vadd.f32 %v6556_v18, %v6555_v1  ;;  %6403 = vst.msk [vmem:[%s10103_s16 + $0x6c] sm:$0xf] %vm6375_vm3, %v7189_v40  ;;  %v6458_v35 = vadd.f32 %v6457_v5, %v6456_v19  ;;  %v6459_v2 = vsel %vm674_vm1, %v8294_v7, 0.0  ;;  %v6504_v50 = vmul.f32 %v8296_v48, %v8296_v48 }
 0x35c   : > { %v8268_v6 = vpop.f32.mrb[28].mxu0  ;;  %v3384_v16 = vpop.f32.mrb[29].mxu1  ;;  %6401 = vst.msk [vmem:[%s10103_s16 + $0x64] sm:$0xf] %vm6375_vm3, %v7187_v13  ;;  %v6558_v53 = vsel %vm674_vm1, %v6502_v14, 0.0  ;;  %v6560_v45 = vsel %vm674_vm1, %v6503_v62, 0.0 }
 0x35d   : > { %v8298_v36 = vadd.f32 %v8268_v6, %v7962_v3  ;;  %v6200_v42 = vpop.f32.mrb[29].mxu0  ;;  %v7963_v20 = vpop.f32.mrb[30].mxu1  ;;  %v6460_v11 = vadd.f32 %v6459_v2, %v6458_v35  ;;  %v6559_v63 = vadd.f32 %v6558_v53, %v6557_v8  ;;  %v6461_v58 = vsel %vm674_vm1, %v8296_v48, 0.0 }
 0x35e   : > { %v8299_v26 = vadd.f32 %v6200_v42, %v3384_v16  ;;  %v8269_v56 = vpop.f32.mrb[30].mxu0  ;;  %v3387_v52 = vpop.f32.mrb[31].mxu1  ;;  %v6562_v21 = vsel %vm674_vm1, %v6504_v50, 0.0 }
 0x35f   : > { %v7192_v25 = vpack.c.bf16 %v8298_v36, %v8298_v36  ;;  %v6203_v27 = vpop.f32.mrb[31].mxu0  ;;  %v6561_v31 = vadd.f32 %v6560_v45, %v6559_v63  ;;  %v6462_v41 = vadd.f32 %v6461_v58, %v6460_v11  ;;  %v8300_v32 = vadd.f32 %v8269_v56, %v7963_v20 }
 0x360   : > { %v7190_v59 = vpack.c.bf16 %v8299_v26, %v8299_v26  ;;  %v6463_v24 = vsel %vm674_vm1, %v8299_v26, 0.0  ;;  %v6505_v33 = vmul.f32 %v8299_v26, %v8299_v26  ;;  %v8301_v39 = vadd.f32 %v6203_v27, %v3387_v52 }
 0x361   : > { %6406 = vst.msk [vmem:[%s10103_s16 + $0x78] sm:$0xf] %vm6375_vm3, %v7192_v25  ;;  %v6464_v37 = vadd.f32 %v6463_v24, %v6462_v41  ;;  %v6563_v47 = vadd.f32 %v6562_v21, %v6561_v31  ;;  %v7193_v43 = vpack.c.bf16 %v8300_v32, %v8300_v32  ;;  %v6507_v61 = vmul.f32 %v8298_v36, %v8298_v36 }
 0x362   : > { %6404 = vst.msk [vmem:[%s10103_s16 + $0x70] sm:$0xf] %vm6375_vm3, %v7190_v59  ;;  %v6564_v55 = vsel %vm674_vm1, %v6505_v33, 0.0  ;;  %v7191_v7 = vpack.c.bf16 %v8301_v39, %v8301_v39  ;;  %v6465_v22 = vsel %vm674_vm1, %v8301_v39, 0.0  ;;  %v6506_v44 = vmul.f32 %v8301_v39, %v8301_v39 }
 0x363   : > { %v6565_v38 = vadd.f32 %v6564_v55, %v6563_v47  ;;  %6407 = vst.msk [vmem:[%s10103_s16 + $0x7c] sm:$0xf] %vm6375_vm3, %v7193_v43  ;;  %v6466_v12 = vadd.f32 %v6465_v22, %v6464_v37  ;;  %v6467_v29 = vsel %vm674_vm1, %v8298_v36, 0.0  ;;  %v6508_v15 = vmul.f32 %v8300_v32, %v8300_v32 }
 0x364   : > { %6405 = vst.msk [vmem:[%s10103_s16 + $0x74] sm:$0xf] %vm6375_vm3, %v7191_v7  ;;  %v6566_v4 = vsel %vm674_vm1, %v6506_v44, 0.0  ;;  %v6568_v34 = vsel %vm674_vm1, %v6507_v61, 0.0  ;;  %v6469_v51 = vsel %vm674_vm1, %v8300_v32, 0.0 }
 0x365   : > { %v6468_v23 = vadd.f32 %v6467_v29, %v6466_v12  ;;  %v6567_v30 = vadd.f32 %v6566_v4, %v6565_v38  ;;  %v6570_v54 = vsel %vm674_vm1, %v6508_v15, 0.0 }
 0x367   : > { %v6470_v46 = vadd.f32 %v6469_v51, %v6468_v23  ;;  %v6569_v49 = vadd.f32 %v6568_v34, %v6567_v30 }
 0x369   : > { %v6471_v10 = vrot.slane %v6470_v46, 4  ;;  %v6571_v17 = vadd.f32 %v6570_v54, %v6569_v49 }
 0x36b   : > { %v6472_v0 = vadd.f32 %v6471_v10, %v6470_v46  ;;  %v6572_v57 = vrot.slane %v6571_v17, 4 }
 0x36d   : > { %v6473_v28 = vrot.slane %v6472_v0, 2  ;;  %v6573_v48 = vadd.f32 %v6572_v57, %v6571_v17 }
 0x36f   : > { %v6474_v9 = vadd.f32 %v6473_v28, %v6472_v0  ;;  %v6574_v60 = vrot.slane %v6573_v48, 2 }
 0x371   : > { %v6475_v18 = vrot.slane %v6474_v9, 1  ;;  %v6575_v62 = vadd.f32 %v6574_v60, %v6573_v48 }
 0x373   : > { %v6576_v19 = vrot.slane %v6575_v62, 1  ;;  %v6476_v1 = vadd.f32 %v6475_v18, %v6474_v9 }
 0x375   : > { %v6577_v40 = vadd.f32 %v6576_v19, %v6575_v62 }
 0x377   : > { %v6578_v3 = vsel %vm995_vm0, %v6476_v1, %v6577_v40 }
 0x378   : > { %6579 = vst.msk [vmem:[%s671_s20] sm:$0x3] %vm677_vm2, %v6578_v3 }
 0x379 PF: > { %s20_s30 = sadd.s32 1, %s8879_s30   ;;  %s10321_s28 = smov %s8875_s29 }
 0x37a   : > { %p17_p6 = scmp.ge.s32.totalorder %s20_s30, 4   ;;  %s10322_s29 = smov %s10324_s5 }
 0x37c   :  { %19 = sbr.rel (!%p17_p6) target bundleno = 2 (0x2), region = 147 }

</bundles_post_ra>
